<compile_context>
chip_gen: v5e
topology: v5e:2x2
jax: 0.10.0
libtpu: 0.0.40
codegen_flags: <defaults>
</compile_context>

<pallas_src>
import functools

import jax
import jax.numpy as jnp
from jax.experimental import pallas as pl
from jax.experimental.pallas import tpu as pltpu

_VMEM_LIMIT = 32 * 1024 * 1024


def _act(z, leaky):
    if leaky == 0.0:
        return jnp.maximum(z, 0.0)
    return jnp.where(z >= 0.0, z, leaky * z)


def _conv3x3_stats_kernel(scale_ref, shift_ref, w_ref, xc_ref, xt_ref, xb_ref,
                          y_ref, stats_ref, *, TH, W, C_in, C_out, leaky,
                          apply_in_bn, compute_dtype):
    """One (batch, row-tile) grid step.

    Optionally applies the previous layer's BN affine + activation to the input
    (fused BN), then computes the 3x3 conv as a single
    (TH*W, 9*C_in) @ (9*C_in, C_out) matmul (implicit im2col), stores the raw
    conv output tile and its per-channel partial (sum, sum_sq) for the global
    BatchNorm reduction.
    """
    rb = pl.program_id(1)
    nrb = pl.num_programs(1)
    TP = TH * W

    def prep(v):
        v = v.astype(jnp.float32)
        if apply_in_bn:
            v = _act(v * scale_ref[...] + shift_ref[...], leaky)
        return v

    # Row halos: real neighbour rows inside the image; zeros at image top/bottom.
    # (The halo BlockSpecs clamp their index, so boundary fetches return valid-
    # but-unused data which is masked to zero here, AFTER the fused BN/act.)
    top = prep(xt_ref[...]) * (rb > 0).astype(jnp.float32)           # (W, C_in)
    bot = prep(xb_ref[...]) * (rb < nrb - 1).astype(jnp.float32)     # (W, C_in)
    center = prep(xc_ref[...])                                       # (TP, C_in)

    # Extended pixel column: [zero px | row above | tile | row below | zero px].
    zpix = jnp.zeros((1, C_in), jnp.float32)
    xw = jnp.concatenate([zpix, top, center, bot, zpix], axis=0)     # (TP+2W+2, C_in)

    # Left/right edge masks = conv zero-padding along W (static pattern).
    pix = jax.lax.broadcasted_iota(jnp.int32, (TP, 1), 0)
    keep_left = (pix % W != 0).astype(jnp.float32)        # kills dx==0 at w==0
    keep_right = (pix % W != W - 1).astype(jnp.float32)   # kills dx==2 at w==W-1

    # Implicit im2col: output pixel p needs input pixel p + dy*W + (dx-1); with
    # the 1-pixel zero guards above, the tap slice simply starts at dy*W + dx.
    taps = []
    for dy in range(3):
        for dx in range(3):
            sl = xw[dy * W + dx: dy * W + dx + TP, :]
            if dx == 0:
                sl = sl * keep_left
            elif dx == 2:
                sl = sl * keep_right
            taps.append(sl)
    patches = jnp.concatenate(taps, axis=1)                          # (TP, 9*C_in)

    # Single fused contraction on the MXU (K = 9*C_in), f32 accumulation.
    acc = jnp.dot(patches.astype(compute_dtype), w_ref[...],
                  preferred_element_type=jnp.float32)                # (TP, C_out)

    y_ref[...] = acc
    # BN statistics epilogue: per-tile partial sum / sum-of-squares.
    ssum = jnp.sum(acc, axis=0, keepdims=True)                       # (1, C_out)
    ssq = jnp.sum(acc * acc, axis=0, keepdims=True)                  # (1, C_out)
    stats_ref[...] = jnp.concatenate([ssum, ssq], axis=0).reshape(1, 2, C_out)


def _bn_act_kernel(scale_ref, shift_ref, y_ref, o_ref, *, leaky):
    o_ref[...] = _act(y_ref[...] * scale_ref[...] + shift_ref[...], leaky)


def _conv_stage(x_flat, w_fused, scale, shift, *, N, H, W, TH, C_in, C_out,
                leaky, apply_in_bn, compute_dtype):
    """Tiled conv3x3 (+ optional fused input BN/act) + partial BN stats."""
    RB = H // TH
    TP = TH * W
    P = N * H * W
    kernel = functools.partial(
        _conv3x3_stats_kernel, TH=TH, W=W, C_in=C_in, C_out=C_out, leaky=leaky,
        apply_in_bn=apply_in_bn, compute_dtype=compute_dtype)

    center_spec = pl.BlockSpec((TP, C_in), lambda n, rb: (n * RB + rb, 0))
    # Halo rows: block index is an image-row index (block height == W pixels);
    # clamp at image boundaries (the clamped fetch is masked inside the kernel).
    top_spec = pl.BlockSpec(
        (W, C_in), lambda n, rb: (jnp.maximum(n * H + rb * TH - 1, 0), 0))
    bot_spec = pl.BlockSpec(
        (W, C_in), lambda n, rb: (jnp.minimum(n * H + (rb + 1) * TH, N * H - 1), 0))

    y, stats = pl.pallas_call(
        kernel,
        grid=(N, RB),
        in_specs=[
            pl.BlockSpec((1, C_in), lambda n, rb: (0, 0)),           # scale
            pl.BlockSpec((1, C_in), lambda n, rb: (0, 0)),           # shift
            pl.BlockSpec((9 * C_in, C_out), lambda n, rb: (0, 0)),   # fused weight
            center_spec, top_spec, bot_spec,                         # same array x3
        ],
        out_specs=[
            pl.BlockSpec((TP, C_out), lambda n, rb: (n * RB + rb, 0)),
            pl.BlockSpec((1, 2, C_out), lambda n, rb: (n * RB + rb, 0, 0)),
        ],
        out_shape=[
            jax.ShapeDtypeStruct((P, C_out), jnp.float32),
            jax.ShapeDtypeStruct((N * RB, 2, C_out), jnp.float32),
        ],
        compiler_params=pltpu.CompilerParams(
            dimension_semantics=("parallel", "parallel"),
            vmem_limit_bytes=_VMEM_LIMIT),
    )(scale, shift, w_fused, x_flat, x_flat, x_flat)
    return y, stats


def _bn_scale_shift(stats, gamma, beta, count, eps):
    """Global (training-mode, biased-variance) BN -> per-channel affine."""
    s = jnp.sum(stats, axis=0)                               # (2, C)
    mean = s[0] / count
    var = jnp.maximum(s[1] / count - mean * mean, 0.0)       # guard cancellation
    scale = gamma * jax.lax.rsqrt(var + eps)
    shift = beta - mean * scale
    return (scale.reshape(1, -1).astype(jnp.float32),
            shift.reshape(1, -1).astype(jnp.float32))


def _pick_tile_rows(H, W, max_pixels=1024):
    """Largest TH | H with 8 | TH*W and TH*W <= max_pixels (else smallest valid)."""
    best = None
    smallest_valid = None
    for th in range(1, H + 1):
        if H % th == 0 and (th * W) % 8 == 0:
            if smallest_valid is None:
                smallest_valid = th
            if th * W <= max_pixels:
                best = th
    if best is not None:
        return best
    if smallest_valid is not None:
        return smallest_valid
    raise ValueError(f"No valid row tile for H={H}, W={W} (need TH|H, 8|TH*W)")


def decoder_block(x_nchw, params, activation='relu', eps=1e-5,
                  compute_dtype=jnp.float32):
    """Forward pass matching the PyTorch DecoderBlock (training-mode BatchNorm)."""
    w1, g1, b1, w2, g2, b2 = params
    N, Cin, H, W = x_nchw.shape
    Cout = w1.shape[0]
    if activation == 'relu':
        leaky = 0.0
    elif activation == 'leaky_relu':
        leaky = 0.01
    else:
        raise ValueError(f'Unsupported activation function: {activation}')
    if W % 8 != 0:
        raise ValueError("W must be a multiple of 8 for the tiled TPU layout")

    TH = _pick_tile_rows(H, W)
    RB = H // TH
    TP = TH * W
    P = N * H * W
    count = jnp.float32(P)

    # Layout glue (plain JAX): NCHW -> channels-last, pixels flattened onto the
    # sublane axis.  Only full-tensor copy outside the kernels; no spatially
    # padded activation copy is ever materialized.
    x_flat = jnp.transpose(x_nchw, (0, 2, 3, 1)).reshape(P, Cin).astype(jnp.float32)

    # Conv weights (Cout, Cin, 3, 3) -> fused (9*Cin, Cout); rows ordered
    # (dy, dx, cin) to match the kernel's patch concatenation order.  Pre-cast to
    # the MXU compute dtype once here (not per grid step).
    w1k = jnp.transpose(w1, (2, 3, 1, 0)).reshape(9 * Cin, Cout).astype(compute_dtype)
    w2k = jnp.transpose(w2, (2, 3, 1, 0)).reshape(9 * Cout, Cout).astype(compute_dtype)

    one_c = jnp.ones((1, Cin), jnp.float32)      # dummy affine for sweep 1
    zero_c = jnp.zeros((1, Cin), jnp.float32)

    # Sweep 1: conv1 + partial BN1 statistics.
    y1, stats1 = _conv_stage(x_flat, w1k, one_c, zero_c, N=N, H=H, W=W, TH=TH,
                             C_in=Cin, C_out=Cout, leaky=leaky,
                             apply_in_bn=False, compute_dtype=compute_dtype)
    scale1, shift1 = _bn_scale_shift(stats1, g1, b1, count, eps)

    # Sweep 2: BN1+act fused into conv2's input path, conv2 + partial BN2 stats.
    y2, stats2 = _conv_stage(y1, w2k, scale1, shift1, N=N, H=H, W=W, TH=TH,
                             C_in=Cout, C_out=Cout, leaky=leaky,
                             apply_in_bn=True, compute_dtype=compute_dtype)
    scale2, shift2 = _bn_scale_shift(stats2, g2, b2, count, eps)

    # Final BN2 + activation (tiled elementwise).
    out_flat = pl.pallas_call(
        functools.partial(_bn_act_kernel, leaky=leaky),
        grid=(N * RB,),
        in_specs=[pl.BlockSpec((1, Cout), lambda i: (0, 0)),
                  pl.BlockSpec((1, Cout), lambda i: (0, 0)),
                  pl.BlockSpec((TP, Cout), lambda i: (i, 0))],
        out_specs=pl.BlockSpec((TP, Cout), lambda i: (i, 0)),
        out_shape=jax.ShapeDtypeStruct((P, Cout), jnp.float32),
        compiler_params=pltpu.CompilerParams(
            dimension_semantics=("parallel",),
            vmem_limit_bytes=_VMEM_LIMIT),
    )(scale2, shift2, y2)

    return jnp.transpose(out_flat.reshape(N, H, W, Cout), (0, 3, 1, 2))  # NCHW


def decoder_block_ref(x_nchw, params, activation='relu', eps=1e-5):
    """Pure-JAX reference (mirrors the PyTorch forward) for correctness check."""
    w1, g1, b1, w2, g2, b2 = params
    slope = 0.0 if activation == 'relu' else 0.01

    def conv(x, w):
        return jax.lax.conv_general_dilated(
            x, w, window_strides=(1, 1), padding=((1, 1), (1, 1)),
            dimension_numbers=('NCHW', 'OIHW', 'NCHW'))

    def bn_act(y, g, b):
        mean = jnp.mean(y, axis=(0, 2, 3), keepdims=True)
        var = jnp.mean((y - mean) ** 2, axis=(0, 2, 3), keepdims=True)
        z = (y - mean) * jax.lax.rsqrt(var + eps) * g[None, :, None, None] \
            + b[None, :, None, None]
        return jnp.maximum(z, 0.0) if slope == 0.0 else jnp.where(z >= 0, z, slope * z)

    h = bn_act(conv(x_nchw.astype(jnp.float32), w1), g1, b1)
    return bn_act(conv(h, w2), g2, b2)


def init_params(key, in_channels, out_channels):
    """Deterministic init matching the PyTorch module's parameter shapes."""
    k1, k2 = jax.random.split(key)
    bound1 = 1.0 / (in_channels * 9) ** 0.5
    bound2 = 1.0 / (out_channels * 9) ** 0.5
    w1 = jax.random.uniform(k1, (out_channels, in_channels, 3, 3),
                            minval=-bound1, maxval=bound1, dtype=jnp.float32)
    w2 = jax.random.uniform(k2, (out_channels, out_channels, 3, 3),
                            minval=-bound2, maxval=bound2, dtype=jnp.float32)
    g1 = jnp.ones((out_channels,), jnp.float32)   # BatchNorm2d default weight
    b1 = jnp.zeros((out_channels,), jnp.float32)  # BatchNorm2d default bias
    g2 = jnp.ones((out_channels,), jnp.float32)
    b2 = jnp.zeros((out_channels,), jnp.float32)
    # TODO(synk): BatchNorm running_mean/var buffer updates (training-side state)
    # are not modeled; the forward output does not depend on them.
    return (w1, g1, b1, w2, g2, b2)


if __name__ == "__main__":
    key = jax.random.PRNGKey(0)
    kx, kp = jax.random.split(key)

    N, Cin, Cout, H, W = 2, 4, 8, 16, 16
    x = jax.random.normal(kx, (N, Cin, H, W), dtype=jnp.float32)
    params = init_params(kp, Cin, Cout)

    fwd = jax.jit(functools.partial(decoder_block, activation='relu'))
    out = jax.block_until_ready(fwd(x, params))

    ref = jax.block_until_ready(decoder_block_ref(x, params, activation='relu'))
    assert out.shape == (N, Cout, H, W)
    assert jnp.allclose(out, ref, rtol=1e-4, atol=1e-4), "mismatch vs JAX reference"

    print("KERNEL_OK")
</pallas_src>

<mosaic_0001>
module attributes {stable_mosaic.version = 11 : i64} {
  func.func @_conv3x3_stats_kernel(%arg0: i32, %arg1: i32, %arg2: memref<1x4xf32, #tpu.memory_space<vmem>>, %arg3: memref<1x4xf32, #tpu.memory_space<vmem>>, %arg4: memref<36x8xf32, #tpu.memory_space<vmem>>, %arg5: memref<256x4xf32, #tpu.memory_space<vmem>>, %arg6: memref<16x4xf32, #tpu.memory_space<vmem>>, %arg7: memref<16x4xf32, #tpu.memory_space<vmem>>, %arg8: memref<256x8xf32, #tpu.memory_space<vmem>>, %arg9: memref<1x2x8xf32, #tpu.memory_space<vmem>>) attributes {dimension_semantics = [#tpu.dimension_semantics<parallel>, #tpu.dimension_semantics<parallel>], iteration_bounds = array<i64: 2, 1>, scalar_prefetch = 0 : i64, scratch_operands = 0 : i64, tpu.core_type = #tpu.core_type<tc>, window_params = [{pipeline_mode = #tpu.pipeline_mode<synchronous>, transform_indices = @transform_0, window_bounds = array<i64: 1, 4>}, {pipeline_mode = #tpu.pipeline_mode<synchronous>, transform_indices = @transform_1, window_bounds = array<i64: 1, 4>}, {pipeline_mode = #tpu.pipeline_mode<synchronous>, transform_indices = @transform_2, window_bounds = array<i64: 36, 8>}, {transform_indices = @transform_3, window_bounds = array<i64: 256, 4>}, {transform_indices = @transform_4, window_bounds = array<i64: 16, 4>}, {transform_indices = @transform_5, window_bounds = array<i64: 16, 4>}, {transform_indices = @transform_6, window_bounds = array<i64: 256, 8>}, {transform_indices = @transform_7, window_bounds = array<i64: 1, 2, 8>}]} {
    %c0 = arith.constant 0 : index
    %c0_0 = arith.constant 0 : index
    %0 = vector.load %arg6[%c0, %c0_0] : memref<16x4xf32, #tpu.memory_space<vmem>>, vector<16x4xf32>
    %c0_i32 = arith.constant 0 : i32
    %1 = arith.cmpi sgt, %arg1, %c0_i32 : i32
    %2 = arith.extui %1 : i1 to i32
    %3 = arith.sitofp %2 : i32 to f32
    %4 = vector.broadcast %3 : f32 to vector<16x4xf32>
    %5 = arith.mulf %0, %4 : vector<16x4xf32>
    %c0_1 = arith.constant 0 : index
    %c0_2 = arith.constant 0 : index
    %6 = vector.load %arg7[%c0_1, %c0_2] : memref<16x4xf32, #tpu.memory_space<vmem>>, vector<16x4xf32>
    %c0_i32_3 = arith.constant 0 : i32
    %7 = arith.cmpi slt, %arg1, %c0_i32_3 : i32
    %8 = arith.extui %7 : i1 to i32
    %9 = arith.sitofp %8 : i32 to f32
    %10 = vector.broadcast %9 : f32 to vector<16x4xf32>
    %11 = arith.mulf %6, %10 : vector<16x4xf32>
    %c0_4 = arith.constant 0 : index
    %c0_5 = arith.constant 0 : index
    %12 = vector.load %arg5[%c0_4, %c0_5] : memref<256x4xf32, #tpu.memory_space<vmem>>, vector<256x4xf32>
    %cst = arith.constant 0.000000e+00 : f32
    %13 = vector.broadcast %cst : f32 to vector<1x4xf32>
    %14 = tpu.concatenate %13, %5, %12, %11, %13 in 0 : vector<1x4xf32>, vector<16x4xf32>, vector<256x4xf32>, vector<16x4xf32>, vector<1x4xf32> -> vector<290x4xf32>
    %15 = tpu.iota {dimensions = array<i32: 0>} : vector<256x1xi32>
    %c16_i32 = arith.constant 16 : i32
    %c0_i32_6 = arith.constant 0 : i32
    %16 = arith.cmpi eq, %c16_i32, %c0_i32_6 : i32
    %c1_i32 = arith.constant 1 : i32
    %17 = arith.select %16, %c1_i32, %c16_i32 : i32
    %18 = vector.broadcast %17 : i32 to vector<256x1xi32>
    %19 = arith.remsi %15, %18 : vector<256x1xi32>
    %c0_i32_7 = arith.constant 0 : i32
    %20 = vector.broadcast %c0_i32_7 : i32 to vector<256x1xi32>
    %21 = arith.cmpi ne, %19, %20 : vector<256x1xi32>
    %c0_i32_8 = arith.constant 0 : i32
    %22 = vector.broadcast %c0_i32_8 : i32 to vector<256x1xi32>
    %23 = arith.cmpi slt, %19, %22 : vector<256x1xi32>
    %c0_i32_9 = arith.constant 0 : i32
    %24 = arith.cmpi slt, %17, %c0_i32_9 : i32
    %25 = vector.broadcast %24 : i1 to vector<256x1xi1>
    %26 = vector.broadcast %25 : vector<256x1xi1> to vector<256x1xi1>
    %27 = arith.xori %23, %26 : vector<256x1xi1>
    %28 = arith.andi %27, %21 : vector<256x1xi1>
    %29 = vector.broadcast %17 : i32 to vector<256x1xi32>
    %30 = arith.addi %19, %29 : vector<256x1xi32>
    %31 = arith.select %28, %30, %19 : vector<256x1xi1>, vector<256x1xi32>
    %c0_i32_10 = arith.constant 0 : i32
    %32 = vector.broadcast %c0_i32_10 : i32 to vector<256x1xi32>
    %33 = arith.cmpi ne, %31, %32 : vector<256x1xi32>
    %34 = arith.extui %33 : vector<256x1xi1> to vector<256x1xi32>
    %35 = arith.sitofp %34 : vector<256x1xi32> to vector<256x1xf32>
    %c16_i32_11 = arith.constant 16 : i32
    %c0_i32_12 = arith.constant 0 : i32
    %36 = arith.cmpi eq, %c16_i32_11, %c0_i32_12 : i32
    %c1_i32_13 = arith.constant 1 : i32
    %37 = arith.select %36, %c1_i32_13, %c16_i32_11 : i32
    %38 = vector.broadcast %37 : i32 to vector<256x1xi32>
    %39 = arith.remsi %15, %38 : vector<256x1xi32>
    %c0_i32_14 = arith.constant 0 : i32
    %40 = vector.broadcast %c0_i32_14 : i32 to vector<256x1xi32>
    %41 = arith.cmpi ne, %39, %40 : vector<256x1xi32>
    %c0_i32_15 = arith.constant 0 : i32
    %42 = vector.broadcast %c0_i32_15 : i32 to vector<256x1xi32>
    %43 = arith.cmpi slt, %39, %42 : vector<256x1xi32>
    %c0_i32_16 = arith.constant 0 : i32
    %44 = arith.cmpi slt, %37, %c0_i32_16 : i32
    %45 = vector.broadcast %44 : i1 to vector<256x1xi1>
    %46 = vector.broadcast %45 : vector<256x1xi1> to vector<256x1xi1>
    %47 = arith.xori %43, %46 : vector<256x1xi1>
    %48 = arith.andi %47, %41 : vector<256x1xi1>
    %49 = vector.broadcast %37 : i32 to vector<256x1xi32>
    %50 = arith.addi %39, %49 : vector<256x1xi32>
    %51 = arith.select %48, %50, %39 : vector<256x1xi1>, vector<256x1xi32>
    %c15_i32 = arith.constant 15 : i32
    %52 = vector.broadcast %c15_i32 : i32 to vector<256x1xi32>
    %53 = arith.cmpi ne, %51, %52 : vector<256x1xi32>
    %54 = arith.extui %53 : vector<256x1xi1> to vector<256x1xi32>
    %55 = arith.sitofp %54 : vector<256x1xi32> to vector<256x1xf32>
    %56 = vector.extract_strided_slice %14 {offsets = [0, 0], sizes = [256, 4], strides = [1, 1]} : vector<290x4xf32> to vector<256x4xf32>
    %57 = vector.broadcast %35 : vector<256x1xf32> to vector<256x4xf32>
    %58 = arith.mulf %56, %57 : vector<256x4xf32>
    %59 = vector.extract_strided_slice %14 {offsets = [1, 0], sizes = [256, 4], strides = [1, 1]} : vector<290x4xf32> to vector<256x4xf32>
    %60 = vector.extract_strided_slice %14 {offsets = [2, 0], sizes = [256, 4], strides = [1, 1]} : vector<290x4xf32> to vector<256x4xf32>
    %61 = vector.broadcast %55 : vector<256x1xf32> to vector<256x4xf32>
    %62 = arith.mulf %60, %61 : vector<256x4xf32>
    %63 = vector.extract_strided_slice %14 {offsets = [16, 0], sizes = [256, 4], strides = [1, 1]} : vector<290x4xf32> to vector<256x4xf32>
    %64 = vector.broadcast %35 : vector<256x1xf32> to vector<256x4xf32>
    %65 = arith.mulf %63, %64 : vector<256x4xf32>
    %66 = vector.extract_strided_slice %14 {offsets = [17, 0], sizes = [256, 4], strides = [1, 1]} : vector<290x4xf32> to vector<256x4xf32>
    %67 = vector.extract_strided_slice %14 {offsets = [18, 0], sizes = [256, 4], strides = [1, 1]} : vector<290x4xf32> to vector<256x4xf32>
    %68 = vector.broadcast %55 : vector<256x1xf32> to vector<256x4xf32>
    %69 = arith.mulf %67, %68 : vector<256x4xf32>
    %70 = vector.extract_strided_slice %14 {offsets = [32, 0], sizes = [256, 4], strides = [1, 1]} : vector<290x4xf32> to vector<256x4xf32>
    %71 = vector.broadcast %35 : vector<256x1xf32> to vector<256x4xf32>
    %72 = arith.mulf %70, %71 : vector<256x4xf32>
    %73 = vector.extract_strided_slice %14 {offsets = [33, 0], sizes = [256, 4], strides = [1, 1]} : vector<290x4xf32> to vector<256x4xf32>
    %74 = vector.extract_strided_slice %14 {offsets = [34, 0], sizes = [256, 4], strides = [1, 1]} : vector<290x4xf32> to vector<256x4xf32>
    %75 = vector.broadcast %55 : vector<256x1xf32> to vector<256x4xf32>
    %76 = arith.mulf %74, %75 : vector<256x4xf32>
    %77 = tpu.concatenate %58, %59, %62, %65, %66, %69, %72, %73, %76 in 1 : vector<256x4xf32>, vector<256x4xf32>, vector<256x4xf32>, vector<256x4xf32>, vector<256x4xf32>, vector<256x4xf32>, vector<256x4xf32>, vector<256x4xf32>, vector<256x4xf32> -> vector<256x36xf32>
    %c0_17 = arith.constant 0 : index
    %c0_18 = arith.constant 0 : index
    %78 = vector.load %arg4[%c0_17, %c0_18] : memref<36x8xf32, #tpu.memory_space<vmem>>, vector<36x8xf32>
    %cst_19 = arith.constant dense<0.000000e+00> : vector<256x8xf32>
    %79 = tpu.matmul %77, %78, %cst_19 {dimension_numbers = #tpu.dot_dimension_numbers<[1], [0], [0], [1], [0, 0, 1, 1], [], []>} : vector<256x36xf32>, vector<36x8xf32>, vector<256x8xf32> -> vector<256x8xf32>
    %c0_20 = arith.constant 0 : index
    %c0_21 = arith.constant 0 : index
    %80 = vector.load %arg8[%c0_20, %c0_21] : memref<256x8xf32, #tpu.memory_space<vmem>>, vector<256x8xf32>
    tpu.vector_store %arg8[%c0_20, %c0_21], %79 {strides = array<i32>} : memref<256x8xf32, #tpu.memory_space<vmem>>, vector<256x8xf32>,
    %cst_22 = arith.constant dense<0.000000e+00> : vector<8xf32>
    %81 = vector.multi_reduction <add>, %79, %cst_22 [0] : vector<256x8xf32> to vector<8xf32>
    %82 = vector.shape_cast %81 : vector<8xf32> to vector<1x8xf32>
    %83 = arith.mulf %79, %79 : vector<256x8xf32>
    %cst_23 = arith.constant dense<0.000000e+00> : vector<8xf32>
    %84 = vector.multi_reduction <add>, %83, %cst_23 [0] : vector<256x8xf32> to vector<8xf32>
    %85 = vector.shape_cast %84 : vector<8xf32> to vector<1x8xf32>
    %86 = tpu.concatenate %82, %85 in 0 : vector<1x8xf32>, vector<1x8xf32> -> vector<2x8xf32>
    %87 = vector.shape_cast %86 : vector<2x8xf32> to vector<1x2x8xf32>
    %c0_24 = arith.constant 0 : index
    %c0_25 = arith.constant 0 : index
    %c0_26 = arith.constant 0 : index
    %88 = vector.load %arg9[%c0_24, %c0_25, %c0_26] : memref<1x2x8xf32, #tpu.memory_space<vmem>>, vector<1x2x8xf32>
    tpu.vector_store %arg9[%c0_24, %c0_25, %c0_26], %87 {strides = array<i32>} : memref<1x2x8xf32, #tpu.memory_space<vmem>>, vector<1x2x8xf32>,
    return
  }
  func.func @transform_0(%arg0: i32, %arg1: i32) -> (i32, i32) {
    %c0_i32 = arith.constant 0 : i32
    %c0_i32_0 = arith.constant 0 : i32
    %c0_i32_1 = arith.constant 0 : i32
    return %c0_i32, %c0_i32_0 : i32, i32
  }
  func.func @transform_1(%arg0: i32, %arg1: i32) -> (i32, i32) {
    %c0_i32 = arith.constant 0 : i32
    %c0_i32_0 = arith.constant 0 : i32
    %c0_i32_1 = arith.constant 0 : i32
    return %c0_i32, %c0_i32_0 : i32, i32
  }
  func.func @transform_2(%arg0: i32, %arg1: i32) -> (i32, i32) {
    %c0_i32 = arith.constant 0 : i32
    %c0_i32_0 = arith.constant 0 : i32
    %c0_i32_1 = arith.constant 0 : i32
    return %c0_i32, %c0_i32_0 : i32, i32
  }
  func.func @transform_3(%arg0: i32, %arg1: i32) -> (i32, i32) {
    %c1_i32 = arith.constant 1 : i32
    %0 = arith.muli %arg0, %c1_i32 : i32
    %1 = arith.addi %0, %arg1 : i32
    %c0_i32 = arith.constant 0 : i32
    %c0_i32_0 = arith.constant 0 : i32
    return %1, %c0_i32 : i32, i32
  }
  func.func @transform_4(%arg0: i32, %arg1: i32) -> (i32, i32) {
    %c16_i32 = arith.constant 16 : i32
    %0 = arith.muli %arg0, %c16_i32 : i32
    %c16_i32_0 = arith.constant 16 : i32
    %1 = arith.muli %arg1, %c16_i32_0 : i32
    %2 = arith.addi %0, %1 : i32
    %c1_i32 = arith.constant 1 : i32
    %3 = arith.subi %2, %c1_i32 : i32
    %c0_i32 = arith.constant 0 : i32
    %4 = arith.maxsi %3, %c0_i32 : i32
    %c0_i32_1 = arith.constant 0 : i32
    %c0_i32_2 = arith.constant 0 : i32
    return %4, %c0_i32_1 : i32, i32
  }
  func.func @transform_5(%arg0: i32, %arg1: i32) -> (i32, i32) {
    %c16_i32 = arith.constant 16 : i32
    %0 = arith.muli %arg0, %c16_i32 : i32
    %c1_i32 = arith.constant 1 : i32
    %1 = arith.addi %arg1, %c1_i32 : i32
    %c16_i32_0 = arith.constant 16 : i32
    %2 = arith.muli %1, %c16_i32_0 : i32
    %3 = arith.addi %0, %2 : i32
    %c31_i32 = arith.constant 31 : i32
    %4 = arith.minsi %3, %c31_i32 : i32
    %c0_i32 = arith.constant 0 : i32
    %c0_i32_1 = arith.constant 0 : i32
    return %4, %c0_i32 : i32, i32
  }
  func.func @transform_6(%arg0: i32, %arg1: i32) -> (i32, i32) {
    %c1_i32 = arith.constant 1 : i32
    %0 = arith.muli %arg0, %c1_i32 : i32
    %1 = arith.addi %0, %arg1 : i32
    %c0_i32 = arith.constant 0 : i32
    %c0_i32_0 = arith.constant 0 : i32
    return %1, %c0_i32 : i32, i32
  }
  func.func @transform_7(%arg0: i32, %arg1: i32) -> (i32, i32, i32) {
    %c1_i32 = arith.constant 1 : i32
    %0 = arith.muli %arg0, %c1_i32 : i32
    %1 = arith.addi %0, %arg1 : i32
    %c0_i32 = arith.constant 0 : i32
    %c0_i32_0 = arith.constant 0 : i32
    %c0_i32_1 = arith.constant 0 : i32
    return %1, %c0_i32, %c0_i32_0 : i32, i32, i32
  }
}

module attributes {stable_mosaic.version = 11 : i64} {
  func.func @_conv3x3_stats_kernel(%arg0: i32, %arg1: i32, %arg2: memref<1x8xf32, #tpu.memory_space<vmem>>, %arg3: memref<1x8xf32, #tpu.memory_space<vmem>>, %arg4: memref<72x8xf32, #tpu.memory_space<vmem>>, %arg5: memref<256x8xf32, #tpu.memory_space<vmem>>, %arg6: memref<16x8xf32, #tpu.memory_space<vmem>>, %arg7: memref<16x8xf32, #tpu.memory_space<vmem>>, %arg8: memref<256x8xf32, #tpu.memory_space<vmem>>, %arg9: memref<1x2x8xf32, #tpu.memory_space<vmem>>) attributes {dimension_semantics = [#tpu.dimension_semantics<parallel>, #tpu.dimension_semantics<parallel>], iteration_bounds = array<i64: 2, 1>, scalar_prefetch = 0 : i64, scratch_operands = 0 : i64, tpu.core_type = #tpu.core_type<tc>, window_params = [{pipeline_mode = #tpu.pipeline_mode<synchronous>, transform_indices = @transform_0, window_bounds = array<i64: 1, 8>}, {pipeline_mode = #tpu.pipeline_mode<synchronous>, transform_indices = @transform_1, window_bounds = array<i64: 1, 8>}, {pipeline_mode = #tpu.pipeline_mode<synchronous>, transform_indices = @transform_2, window_bounds = array<i64: 72, 8>}, {transform_indices = @transform_3, window_bounds = array<i64: 256, 8>}, {transform_indices = @transform_4, window_bounds = array<i64: 16, 8>}, {transform_indices = @transform_5, window_bounds = array<i64: 16, 8>}, {transform_indices = @transform_6, window_bounds = array<i64: 256, 8>}, {transform_indices = @transform_7, window_bounds = array<i64: 1, 2, 8>}]} {
    %c0 = arith.constant 0 : index
    %c0_0 = arith.constant 0 : index
    %0 = vector.load %arg6[%c0, %c0_0] : memref<16x8xf32, #tpu.memory_space<vmem>>, vector<16x8xf32>
    %c0_1 = arith.constant 0 : index
    %c0_2 = arith.constant 0 : index
    %1 = vector.load %arg2[%c0_1, %c0_2] : memref<1x8xf32, #tpu.memory_space<vmem>>, vector<1x8xf32>
    %2 = vector.broadcast %1 : vector<1x8xf32> to vector<16x8xf32>
    %3 = arith.mulf %0, %2 : vector<16x8xf32>
    %c0_3 = arith.constant 0 : index
    %c0_4 = arith.constant 0 : index
    %4 = vector.load %arg3[%c0_3, %c0_4] : memref<1x8xf32, #tpu.memory_space<vmem>>, vector<1x8xf32>
    %5 = vector.broadcast %4 : vector<1x8xf32> to vector<16x8xf32>
    %6 = arith.addf %3, %5 : vector<16x8xf32>
    %cst = arith.constant 0.000000e+00 : f32
    %7 = vector.broadcast %cst : f32 to vector<16x8xf32>
    %8 = arith.maximumf %6, %7 : vector<16x8xf32>
    %c0_i32 = arith.constant 0 : i32
    %9 = arith.cmpi sgt, %arg1, %c0_i32 : i32
    %10 = arith.extui %9 : i1 to i32
    %11 = arith.sitofp %10 : i32 to f32
    %12 = vector.broadcast %11 : f32 to vector<16x8xf32>
    %13 = arith.mulf %8, %12 : vector<16x8xf32>
    %c0_5 = arith.constant 0 : index
    %c0_6 = arith.constant 0 : index
    %14 = vector.load %arg7[%c0_5, %c0_6] : memref<16x8xf32, #tpu.memory_space<vmem>>, vector<16x8xf32>
    %c0_7 = arith.constant 0 : index
    %c0_8 = arith.constant 0 : index
    %15 = vector.load %arg2[%c0_7, %c0_8] : memref<1x8xf32, #tpu.memory_space<vmem>>, vector<1x8xf32>
    %16 = vector.broadcast %15 : vector<1x8xf32> to vector<16x8xf32>
    %17 = arith.mulf %14, %16 : vector<16x8xf32>
    %c0_9 = arith.constant 0 : index
    %c0_10 = arith.constant 0 : index
    %18 = vector.load %arg3[%c0_9, %c0_10] : memref<1x8xf32, #tpu.memory_space<vmem>>, vector<1x8xf32>
    %19 = vector.broadcast %18 : vector<1x8xf32> to vector<16x8xf32>
    %20 = arith.addf %17, %19 : vector<16x8xf32>
    %cst_11 = arith.constant 0.000000e+00 : f32
    %21 = vector.broadcast %cst_11 : f32 to vector<16x8xf32>
    %22 = arith.maximumf %20, %21 : vector<16x8xf32>
    %c0_i32_12 = arith.constant 0 : i32
    %23 = arith.cmpi slt, %arg1, %c0_i32_12 : i32
    %24 = arith.extui %23 : i1 to i32
    %25 = arith.sitofp %24 : i32 to f32
    %26 = vector.broadcast %25 : f32 to vector<16x8xf32>
    %27 = arith.mulf %22, %26 : vector<16x8xf32>
    %c0_13 = arith.constant 0 : index
    %c0_14 = arith.constant 0 : index
    %28 = vector.load %arg5[%c0_13, %c0_14] : memref<256x8xf32, #tpu.memory_space<vmem>>, vector<256x8xf32>
    %c0_15 = arith.constant 0 : index
    %c0_16 = arith.constant 0 : index
    %29 = vector.load %arg2[%c0_15, %c0_16] : memref<1x8xf32, #tpu.memory_space<vmem>>, vector<1x8xf32>
    %30 = vector.broadcast %29 : vector<1x8xf32> to vector<256x8xf32>
    %31 = arith.mulf %28, %30 : vector<256x8xf32>
    %c0_17 = arith.constant 0 : index
    %c0_18 = arith.constant 0 : index
    %32 = vector.load %arg3[%c0_17, %c0_18] : memref<1x8xf32, #tpu.memory_space<vmem>>, vector<1x8xf32>
    %33 = vector.broadcast %32 : vector<1x8xf32> to vector<256x8xf32>
    %34 = arith.addf %31, %33 : vector<256x8xf32>
    %cst_19 = arith.constant 0.000000e+00 : f32
    %35 = vector.broadcast %cst_19 : f32 to vector<256x8xf32>
    %36 = arith.maximumf %34, %35 : vector<256x8xf32>
    %cst_20 = arith.constant 0.000000e+00 : f32
    %37 = vector.broadcast %cst_20 : f32 to vector<1x8xf32>
    %38 = tpu.concatenate %37, %13, %36, %27, %37 in 0 : vector<1x8xf32>, vector<16x8xf32>, vector<256x8xf32>, vector<16x8xf32>, vector<1x8xf32> -> vector<290x8xf32>
    %39 = tpu.iota {dimensions = array<i32: 0>} : vector<256x1xi32>
    %c16_i32 = arith.constant 16 : i32
    %c0_i32_21 = arith.constant 0 : i32
    %40 = arith.cmpi eq, %c16_i32, %c0_i32_21 : i32
    %c1_i32 = arith.constant 1 : i32
    %41 = arith.select %40, %c1_i32, %c16_i32 : i32
    %42 = vector.broadcast %41 : i32 to vector<256x1xi32>
    %43 = arith.remsi %39, %42 : vector<256x1xi32>
    %c0_i32_22 = arith.constant 0 : i32
    %44 = vector.broadcast %c0_i32_22 : i32 to vector<256x1xi32>
    %45 = arith.cmpi ne, %43, %44 : vector<256x1xi32>
    %c0_i32_23 = arith.constant 0 : i32
    %46 = vector.broadcast %c0_i32_23 : i32 to vector<256x1xi32>
    %47 = arith.cmpi slt, %43, %46 : vector<256x1xi32>
    %c0_i32_24 = arith.constant 0 : i32
    %48 = arith.cmpi slt, %41, %c0_i32_24 : i32
    %49 = vector.broadcast %48 : i1 to vector<256x1xi1>
    %50 = vector.broadcast %49 : vector<256x1xi1> to vector<256x1xi1>
    %51 = arith.xori %47, %50 : vector<256x1xi1>
    %52 = arith.andi %51, %45 : vector<256x1xi1>
    %53 = vector.broadcast %41 : i32 to vector<256x1xi32>
    %54 = arith.addi %43, %53 : vector<256x1xi32>
    %55 = arith.select %52, %54, %43 : vector<256x1xi1>, vector<256x1xi32>
    %c0_i32_25 = arith.constant 0 : i32
    %56 = vector.broadcast %c0_i32_25 : i32 to vector<256x1xi32>
    %57 = arith.cmpi ne, %55, %56 : vector<256x1xi32>
    %58 = arith.extui %57 : vector<256x1xi1> to vector<256x1xi32>
    %59 = arith.sitofp %58 : vector<256x1xi32> to vector<256x1xf32>
    %c16_i32_26 = arith.constant 16 : i32
    %c0_i32_27 = arith.constant 0 : i32
    %60 = arith.cmpi eq, %c16_i32_26, %c0_i32_27 : i32
    %c1_i32_28 = arith.constant 1 : i32
    %61 = arith.select %60, %c1_i32_28, %c16_i32_26 : i32
    %62 = vector.broadcast %61 : i32 to vector<256x1xi32>
    %63 = arith.remsi %39, %62 : vector<256x1xi32>
    %c0_i32_29 = arith.constant 0 : i32
    %64 = vector.broadcast %c0_i32_29 : i32 to vector<256x1xi32>
    %65 = arith.cmpi ne, %63, %64 : vector<256x1xi32>
    %c0_i32_30 = arith.constant 0 : i32
    %66 = vector.broadcast %c0_i32_30 : i32 to vector<256x1xi32>
    %67 = arith.cmpi slt, %63, %66 : vector<256x1xi32>
    %c0_i32_31 = arith.constant 0 : i32
    %68 = arith.cmpi slt, %61, %c0_i32_31 : i32
    %69 = vector.broadcast %68 : i1 to vector<256x1xi1>
    %70 = vector.broadcast %69 : vector<256x1xi1> to vector<256x1xi1>
    %71 = arith.xori %67, %70 : vector<256x1xi1>
    %72 = arith.andi %71, %65 : vector<256x1xi1>
    %73 = vector.broadcast %61 : i32 to vector<256x1xi32>
    %74 = arith.addi %63, %73 : vector<256x1xi32>
    %75 = arith.select %72, %74, %63 : vector<256x1xi1>, vector<256x1xi32>
    %c15_i32 = arith.constant 15 : i32
    %76 = vector.broadcast %c15_i32 : i32 to vector<256x1xi32>
    %77 = arith.cmpi ne, %75, %76 : vector<256x1xi32>
    %78 = arith.extui %77 : vector<256x1xi1> to vector<256x1xi32>
    %79 = arith.sitofp %78 : vector<256x1xi32> to vector<256x1xf32>
    %80 = vector.extract_strided_slice %38 {offsets = [0, 0], sizes = [256, 8], strides = [1, 1]} : vector<290x8xf32> to vector<256x8xf32>
    %81 = vector.broadcast %59 : vector<256x1xf32> to vector<256x8xf32>
    %82 = arith.mulf %80, %81 : vector<256x8xf32>
    %83 = vector.extract_strided_slice %38 {offsets = [1, 0], sizes = [256, 8], strides = [1, 1]} : vector<290x8xf32> to vector<256x8xf32>
    %84 = vector.extract_strided_slice %38 {offsets = [2, 0], sizes = [256, 8], strides = [1, 1]} : vector<290x8xf32> to vector<256x8xf32>
    %85 = vector.broadcast %79 : vector<256x1xf32> to vector<256x8xf32>
    %86 = arith.mulf %84, %85 : vector<256x8xf32>
    %87 = vector.extract_strided_slice %38 {offsets = [16, 0], sizes = [256, 8], strides = [1, 1]} : vector<290x8xf32> to vector<256x8xf32>
    %88 = vector.broadcast %59 : vector<256x1xf32> to vector<256x8xf32>
    %89 = arith.mulf %87, %88 : vector<256x8xf32>
    %90 = vector.extract_strided_slice %38 {offsets = [17, 0], sizes = [256, 8], strides = [1, 1]} : vector<290x8xf32> to vector<256x8xf32>
    %91 = vector.extract_strided_slice %38 {offsets = [18, 0], sizes = [256, 8], strides = [1, 1]} : vector<290x8xf32> to vector<256x8xf32>
    %92 = vector.broadcast %79 : vector<256x1xf32> to vector<256x8xf32>
    %93 = arith.mulf %91, %92 : vector<256x8xf32>
    %94 = vector.extract_strided_slice %38 {offsets = [32, 0], sizes = [256, 8], strides = [1, 1]} : vector<290x8xf32> to vector<256x8xf32>
    %95 = vector.broadcast %59 : vector<256x1xf32> to vector<256x8xf32>
    %96 = arith.mulf %94, %95 : vector<256x8xf32>
    %97 = vector.extract_strided_slice %38 {offsets = [33, 0], sizes = [256, 8], strides = [1, 1]} : vector<290x8xf32> to vector<256x8xf32>
    %98 = vector.extract_strided_slice %38 {offsets = [34, 0], sizes = [256, 8], strides = [1, 1]} : vector<290x8xf32> to vector<256x8xf32>
    %99 = vector.broadcast %79 : vector<256x1xf32> to vector<256x8xf32>
    %100 = arith.mulf %98, %99 : vector<256x8xf32>
    %101 = tpu.concatenate %82, %83, %86, %89, %90, %93, %96, %97, %100 in 1 : vector<256x8xf32>, vector<256x8xf32>, vector<256x8xf32>, vector<256x8xf32>, vector<256x8xf32>, vector<256x8xf32>, vector<256x8xf32>, vector<256x8xf32>, vector<256x8xf32> -> vector<256x72xf32>
    %c0_32 = arith.constant 0 : index
    %c0_33 = arith.constant 0 : index
    %102 = vector.load %arg4[%c0_32, %c0_33] : memref<72x8xf32, #tpu.memory_space<vmem>>, vector<72x8xf32>
    %cst_34 = arith.constant dense<0.000000e+00> : vector<256x8xf32>
    %103 = tpu.matmul %101, %102, %cst_34 {dimension_numbers = #tpu.dot_dimension_numbers<[1], [0], [0], [1], [0, 0, 1, 1], [], []>} : vector<256x72xf32>, vector<72x8xf32>, vector<256x8xf32> -> vector<256x8xf32>
    %c0_35 = arith.constant 0 : index
    %c0_36 = arith.constant 0 : index
    %104 = vector.load %arg8[%c0_35, %c0_36] : memref<256x8xf32, #tpu.memory_space<vmem>>, vector<256x8xf32>
    tpu.vector_store %arg8[%c0_35, %c0_36], %103 {strides = array<i32>} : memref<256x8xf32, #tpu.memory_space<vmem>>, vector<256x8xf32>,
    %cst_37 = arith.constant dense<0.000000e+00> : vector<8xf32>
    %105 = vector.multi_reduction <add>, %103, %cst_37 [0] : vector<256x8xf32> to vector<8xf32>
    %106 = vector.shape_cast %105 : vector<8xf32> to vector<1x8xf32>
    %107 = arith.mulf %103, %103 : vector<256x8xf32>
    %cst_38 = arith.constant dense<0.000000e+00> : vector<8xf32>
    %108 = vector.multi_reduction <add>, %107, %cst_38 [0] : vector<256x8xf32> to vector<8xf32>
    %109 = vector.shape_cast %108 : vector<8xf32> to vector<1x8xf32>
    %110 = tpu.concatenate %106, %109 in 0 : vector<1x8xf32>, vector<1x8xf32> -> vector<2x8xf32>
    %111 = vector.shape_cast %110 : vector<2x8xf32> to vector<1x2x8xf32>
    %c0_39 = arith.constant 0 : index
    %c0_40 = arith.constant 0 : index
    %c0_41 = arith.constant 0 : index
    %112 = vector.load %arg9[%c0_39, %c0_40, %c0_41] : memref<1x2x8xf32, #tpu.memory_space<vmem>>, vector<1x2x8xf32>
    tpu.vector_store %arg9[%c0_39, %c0_40, %c0_41], %111 {strides = array<i32>} : memref<1x2x8xf32, #tpu.memory_space<vmem>>, vector<1x2x8xf32>,
    return
  }
  func.func @transform_0(%arg0: i32, %arg1: i32) -> (i32, i32) {
    %c0_i32 = arith.constant 0 : i32
    %c0_i32_0 = arith.constant 0 : i32
    %c0_i32_1 = arith.constant 0 : i32
    return %c0_i32, %c0_i32_0 : i32, i32
  }
  func.func @transform_1(%arg0: i32, %arg1: i32) -> (i32, i32) {
    %c0_i32 = arith.constant 0 : i32
    %c0_i32_0 = arith.constant 0 : i32
    %c0_i32_1 = arith.constant 0 : i32
    return %c0_i32, %c0_i32_0 : i32, i32
  }
  func.func @transform_2(%arg0: i32, %arg1: i32) -> (i32, i32) {
    %c0_i32 = arith.constant 0 : i32
    %c0_i32_0 = arith.constant 0 : i32
    %c0_i32_1 = arith.constant 0 : i32
    return %c0_i32, %c0_i32_0 : i32, i32
  }
  func.func @transform_3(%arg0: i32, %arg1: i32) -> (i32, i32) {
    %c1_i32 = arith.constant 1 : i32
    %0 = arith.muli %arg0, %c1_i32 : i32
    %1 = arith.addi %0, %arg1 : i32
    %c0_i32 = arith.constant 0 : i32
    %c0_i32_0 = arith.constant 0 : i32
    return %1, %c0_i32 : i32, i32
  }
  func.func @transform_4(%arg0: i32, %arg1: i32) -> (i32, i32) {
    %c16_i32 = arith.constant 16 : i32
    %0 = arith.muli %arg0, %c16_i32 : i32
    %c16_i32_0 = arith.constant 16 : i32
    %1 = arith.muli %arg1, %c16_i32_0 : i32
    %2 = arith.addi %0, %1 : i32
    %c1_i32 = arith.constant 1 : i32
    %3 = arith.subi %2, %c1_i32 : i32
    %c0_i32 = arith.constant 0 : i32
    %4 = arith.maxsi %3, %c0_i32 : i32
    %c0_i32_1 = arith.constant 0 : i32
    %c0_i32_2 = arith.constant 0 : i32
    return %4, %c0_i32_1 : i32, i32
  }
  func.func @transform_5(%arg0: i32, %arg1: i32) -> (i32, i32) {
    %c16_i32 = arith.constant 16 : i32
    %0 = arith.muli %arg0, %c16_i32 : i32
    %c1_i32 = arith.constant 1 : i32
    %1 = arith.addi %arg1, %c1_i32 : i32
    %c16_i32_0 = arith.constant 16 : i32
    %2 = arith.muli %1, %c16_i32_0 : i32
    %3 = arith.addi %0, %2 : i32
    %c31_i32 = arith.constant 31 : i32
    %4 = arith.minsi %3, %c31_i32 : i32
    %c0_i32 = arith.constant 0 : i32
    %c0_i32_1 = arith.constant 0 : i32
    return %4, %c0_i32 : i32, i32
  }
  func.func @transform_6(%arg0: i32, %arg1: i32) -> (i32, i32) {
    %c1_i32 = arith.constant 1 : i32
    %0 = arith.muli %arg0, %c1_i32 : i32
    %1 = arith.addi %0, %arg1 : i32
    %c0_i32 = arith.constant 0 : i32
    %c0_i32_0 = arith.constant 0 : i32
    return %1, %c0_i32 : i32, i32
  }
  func.func @transform_7(%arg0: i32, %arg1: i32) -> (i32, i32, i32) {
    %c1_i32 = arith.constant 1 : i32
    %0 = arith.muli %arg0, %c1_i32 : i32
    %1 = arith.addi %0, %arg1 : i32
    %c0_i32 = arith.constant 0 : i32
    %c0_i32_0 = arith.constant 0 : i32
    %c0_i32_1 = arith.constant 0 : i32
    return %1, %c0_i32, %c0_i32_0 : i32, i32, i32
  }
}

module attributes {stable_mosaic.version = 11 : i64} {
  func.func @_bn_act_kernel(%arg0: i32, %arg1: memref<1x8xf32, #tpu.memory_space<vmem>>, %arg2: memref<1x8xf32, #tpu.memory_space<vmem>>, %arg3: memref<256x8xf32, #tpu.memory_space<vmem>>, %arg4: memref<256x8xf32, #tpu.memory_space<vmem>>) attributes {dimension_semantics = [#tpu.dimension_semantics<parallel>], iteration_bounds = array<i64: 2>, scalar_prefetch = 0 : i64, scratch_operands = 0 : i64, tpu.core_type = #tpu.core_type<tc>, window_params = [{pipeline_mode = #tpu.pipeline_mode<synchronous>, transform_indices = @transform_0, window_bounds = array<i64: 1, 8>}, {pipeline_mode = #tpu.pipeline_mode<synchronous>, transform_indices = @transform_1, window_bounds = array<i64: 1, 8>}, {transform_indices = @transform_2, window_bounds = array<i64: 256, 8>}, {transform_indices = @transform_3, window_bounds = array<i64: 256, 8>}]} {
    %c0 = arith.constant 0 : index
    %c0_0 = arith.constant 0 : index
    %0 = vector.load %arg3[%c0, %c0_0] : memref<256x8xf32, #tpu.memory_space<vmem>>, vector<256x8xf32>
    %c0_1 = arith.constant 0 : index
    %c0_2 = arith.constant 0 : index
    %1 = vector.load %arg1[%c0_1, %c0_2] : memref<1x8xf32, #tpu.memory_space<vmem>>, vector<1x8xf32>
    %2 = vector.broadcast %1 : vector<1x8xf32> to vector<256x8xf32>
    %3 = arith.mulf %0, %2 : vector<256x8xf32>
    %c0_3 = arith.constant 0 : index
    %c0_4 = arith.constant 0 : index
    %4 = vector.load %arg2[%c0_3, %c0_4] : memref<1x8xf32, #tpu.memory_space<vmem>>, vector<1x8xf32>
    %5 = vector.broadcast %4 : vector<1x8xf32> to vector<256x8xf32>
    %6 = arith.addf %3, %5 : vector<256x8xf32>
    %cst = arith.constant 0.000000e+00 : f32
    %7 = vector.broadcast %cst : f32 to vector<256x8xf32>
    %8 = arith.maximumf %6, %7 : vector<256x8xf32>
    %c0_5 = arith.constant 0 : index
    %c0_6 = arith.constant 0 : index
    %9 = vector.load %arg4[%c0_5, %c0_6] : memref<256x8xf32, #tpu.memory_space<vmem>>, vector<256x8xf32>
    tpu.vector_store %arg4[%c0_5, %c0_6], %8 {strides = array<i32>} : memref<256x8xf32, #tpu.memory_space<vmem>>, vector<256x8xf32>,
    return
  }
  func.func @transform_0(%arg0: i32) -> (i32, i32) {
    %c0_i32 = arith.constant 0 : i32
    %c0_i32_0 = arith.constant 0 : i32
    %c0_i32_1 = arith.constant 0 : i32
    return %c0_i32, %c0_i32_0 : i32, i32
  }
  func.func @transform_1(%arg0: i32) -> (i32, i32) {
    %c0_i32 = arith.constant 0 : i32
    %c0_i32_0 = arith.constant 0 : i32
    %c0_i32_1 = arith.constant 0 : i32
    return %c0_i32, %c0_i32_0 : i32, i32
  }
  func.func @transform_2(%arg0: i32) -> (i32, i32) {
    %c0_i32 = arith.constant 0 : i32
    %c0_i32_0 = arith.constant 0 : i32
    return %arg0, %c0_i32 : i32, i32
  }
  func.func @transform_3(%arg0: i32) -> (i32, i32) {
    %c0_i32 = arith.constant 0 : i32
    %c0_i32_0 = arith.constant 0 : i32
    return %arg0, %c0_i32 : i32, i32
  }
}

</mosaic_0001>

<bundles_post_ra>
// kernel: decoder_block.5
= control target key start
LH: loop header
LB: loop body
LE: loop exit
PB: predicated region body
PF: predicated region fallthrough
CT: control target
= control target key end

     0   :  { %s448_s12 = smov 0   ;;  %s639_s0 = inlined_call_operand.vmem [shape: f32[1,8], index: 0, kind: input, shape index: {}]   ;;  %s640_s1 = inlined_call_operand.vmem [shape: f32[1,8], index: 1, kind: input, shape index: {}]   ;;  %s641_s2 = inlined_call_operand.vmem [shape: f32[512,8], index: 2, kind: input, shape index: {}]   ;;  %s642_s3 = inlined_call_operand.vmem [shape: f32[512,8], index: 3, kind: output, shape index: {}]  }
   0x1 LB: > { %s399_s13 = sadd.s32 4294967295, %s426_s12   ;;  %p403_p0 = scmp.ge.s32.totalorder %s426_s12, 1  ;;  %s426_s12 = sphi %s448_s12, %s13_s12  }
   0x2   : > { %p138_p1 = scmp.lt.s32.totalorder %s426_s12, 3 }
   0x4   : > { %p139_p2 = pnand %p403_p0, %p138_p1 }
   0x5   : > { %s404_s14 = sshll.u32 (!%p139_p2), %s399_s13, 5 }
   0x6   : > { %142 = sbr.rel (%p139_p2) target bundleno = 53 (0x35), region = 32  ;;  %p163_p3 = scmp.lt.s32.totalorder (!%p139_p2), %s404_s14, 63 }
   0xb   : > { %s644_s14 = smov (!%p163_p3, %s404_s14), 63  ;;  %v459_v0 = vld [vmem:[%s639_s0] ss:$0 sm:$0xff]  ;;  %vm310_vm0 = vcmask 64512  }
   0xc   : > { %s405_s17 = sshll.u32 %s644_s14, 3  ;;  %v469_v1 = vld [vmem:[%s640_s1] ss:$0 sm:$0xff] }
   0xd   : > { %s464_s20 = scalar_lea.vmem %s641_s2, %s405_s17  ;;  %s492_s25 = scalar_lea.vmem %s642_s3, %s405_s17 }
   0xe   : > { %v174_v2 = vld [vmem:[%s464_s20] sm:$0xff]  ;;  %v175_v3 = vld [vmem:[%s464_s20 + $0x8] sm:$0xff]  ;;  %v176_v4 = vld [vmem:[%s464_s20 + $0x10] sm:$0xff] }
   0xf   : > { %v210_v5 = vmul.f32 %v459_v0, %v174_v2  ;;  %v211_v6 = vmul.f32 %v459_v0, %v175_v3  ;;  %v212_v7 = vmul.f32 %v459_v0, %v176_v4  ;;  %v177_v8 = vld [vmem:[%s464_s20 + $0x18] sm:$0xff]  ;;  %v178_v9 = vld [vmem:[%s464_s20 + $0x20] sm:$0xff]  ;;  %v179_v10 = vld [vmem:[%s464_s20 + $0x28] sm:$0xff] }
  0x10   : > { %v213_v11 = vmul.f32 %v459_v0, %v177_v8  ;;  %v214_v12 = vmul.f32 %v459_v0, %v178_v9  ;;  %v215_v13 = vmul.f32 %v459_v0, %v179_v10  ;;  %v180_v14 = vld [vmem:[%s464_s20 + $0x30] sm:$0xff]  ;;  %v181_v15 = vld [vmem:[%s464_s20 + $0x38] sm:$0xff]  ;;  %v182_v24 = vld [vmem:[%s464_s20 + $0x40] sm:$0xff] }
  0x11   : > { %v246_v16 = vadd.f32 %v469_v1, %v210_v5  ;;  %v247_v17 = vadd.f32 %v469_v1, %v211_v6  ;;  %v248_v18 = vadd.f32 %v469_v1, %v212_v7  ;;  %v216_v19 = vmul.f32 %v459_v0, %v180_v14  ;;  %v183_v25 = vld [vmem:[%s464_s20 + $0x48] sm:$0xff]  ;;  %v184_v26 = vld [vmem:[%s464_s20 + $0x50] sm:$0xff]  ;;  %v185_v31 = vld [vmem:[%s464_s20 + $0x58] sm:$0xff] }
  0x12   : > { %v249_v20 = vadd.f32 %v469_v1, %v213_v11  ;;  %v250_v21 = vadd.f32 %v469_v1, %v214_v12  ;;  %v251_v22 = vadd.f32 %v469_v1, %v215_v13  ;;  %v217_v23 = vmul.f32 %v459_v0, %v181_v15  ;;  %v186_v32 = vld [vmem:[%s464_s20 + $0x60] sm:$0xff]  ;;  %v187_v33 = vld [vmem:[%s464_s20 + $0x68] sm:$0xff]  ;;  %v188_v37 = vld [vmem:[%s464_s20 + $0x70] sm:$0xff] }
  0x13   : > { %v278_v27 = vmax.f32 %v246_v16, 0.0  ;;  %v279_v28 = vmax.f32 %v247_v17, 0.0  ;;  %v280_v29 = vmax.f32 %v248_v18, 0.0  ;;  %v252_v30 = vadd.f32 %v469_v1, %v216_v19  ;;  %v189_v42 = vld [vmem:[%s464_s20 + $0x78] sm:$0xff]  ;;  %v190_v54 = vld [vmem:[%s464_s20 + $0x80] sm:$0xff]  ;;  %v191_v55 = vld [vmem:[%s464_s20 + $0x88] sm:$0xff] }
  0x14   : > { %v281_v34 = vmax.f32 %v249_v20, 0.0  ;;  %v282_v35 = vmax.f32 %v250_v21, 0.0  ;;  %v253_v36 = vadd.f32 %v469_v1, %v217_v23  ;;  %v283_v38 = vmax.f32 %v251_v22, 0.0  ;;  %v192_v56 = vld [vmem:[%s464_s20 + $0x90] sm:$0xff]  ;;  %v193_v59 = vld [vmem:[%s464_s20 + $0x98] sm:$0xff]  ;;  %v194_v63 = vld [vmem:[%s464_s20 + $0xa0] sm:$0xff] }
  0x15   : > { %311 = vst.msk [vmem:[%s492_s25] sm:$0xff] %vm310_vm0, %v278_v27  ;;  %v218_v39 = vmul.f32 %v459_v0, %v182_v24  ;;  %v219_v40 = vmul.f32 %v459_v0, %v183_v25  ;;  %v220_v41 = vmul.f32 %v459_v0, %v184_v26  ;;  %v284_v43 = vmax.f32 %v252_v30, 0.0  ;;  %v195_v6 = vld [vmem:[%s464_s20 + $0xa8] sm:$0xff]  ;;  %v196_v10 = vld [vmem:[%s464_s20 + $0xb0] sm:$0xff]  ;;  %v197_v14 = vld [vmem:[%s464_s20 + $0xb8] sm:$0xff] }
  0x16   : > { %312 = vst.msk [vmem:[%s492_s25 + $0x8] sm:$0xff] %vm310_vm0, %v279_v28  ;;  %v221_v44 = vmul.f32 %v459_v0, %v185_v31  ;;  %v222_v45 = vmul.f32 %v459_v0, %v186_v32  ;;  %v223_v46 = vmul.f32 %v459_v0, %v187_v33  ;;  %v224_v50 = vmul.f32 %v459_v0, %v188_v37  ;;  %v198_v18 = vld [vmem:[%s464_s20 + $0xc0] sm:$0xff]  ;;  %v199_v22 = vld [vmem:[%s464_s20 + $0xc8] sm:$0xff]  ;;  %v200_v26 = vld [vmem:[%s464_s20 + $0xd0] sm:$0xff] }
  0x17   : > { %313 = vst.msk [vmem:[%s492_s25 + $0x10] sm:$0xff] %vm310_vm0, %v280_v29  ;;  %v254_v47 = vadd.f32 %v469_v1, %v218_v39  ;;  %v255_v48 = vadd.f32 %v469_v1, %v219_v40  ;;  %v256_v49 = vadd.f32 %v469_v1, %v220_v41  ;;  %v285_v51 = vmax.f32 %v253_v36, 0.0  ;;  %v201_v30 = vld [vmem:[%s464_s20 + $0xd8] sm:$0xff] }
  0x18   : > { %314 = vst.msk [vmem:[%s492_s25 + $0x18] sm:$0xff] %vm310_vm0, %v281_v34  ;;  %v257_v52 = vadd.f32 %v469_v1, %v221_v44  ;;  %v225_v53 = vmul.f32 %v459_v0, %v189_v42  ;;  %v258_v58 = vadd.f32 %v469_v1, %v222_v45  ;;  %v259_v62 = vadd.f32 %v469_v1, %v223_v46  ;;  %v202_v34 = vld [vmem:[%s464_s20 + $0xe0] sm:$0xff]  ;;  %v204_v42 = vld [vmem:[%s464_s20 + $0xf0] sm:$0xff]  ;;  %v205_v46 = vld [vmem:[%s464_s20 + $0xf8] sm:$0xff] }
  0x19   : > { %315 = vst.msk [vmem:[%s492_s25 + $0x20] sm:$0xff] %vm310_vm0, %v282_v35  ;;  %v286_v57 = vmax.f32 %v254_v47, 0.0  ;;  %v287_v60 = vmax.f32 %v255_v48, 0.0  ;;  %v288_v61 = vmax.f32 %v256_v49, 0.0  ;;  %v260_v2 = vadd.f32 %v469_v1, %v224_v50 }
  0x1a   : > { %316 = vst.msk [vmem:[%s492_s25 + $0x28] sm:$0xff] %vm310_vm0, %v283_v38  ;;  %v226_v3 = vmul.f32 %v459_v0, %v190_v54  ;;  %v227_v4 = vmul.f32 %v459_v0, %v191_v55  ;;  %v228_v5 = vmul.f32 %v459_v0, %v192_v56  ;;  %v289_v7 = vmax.f32 %v257_v52, 0.0  ;;  %v203_v38 = vld [vmem:[%s464_s20 + $0xe8] sm:$0xff] }
  0x1b   : > { %317 = vst.msk [vmem:[%s492_s25 + $0x30] sm:$0xff] %vm310_vm0, %v284_v43  ;;  %v261_v8 = vadd.f32 %v469_v1, %v225_v53  ;;  %v229_v9 = vmul.f32 %v459_v0, %v193_v59  ;;  %v290_v11 = vmax.f32 %v258_v58, 0.0  ;;  %v230_v13 = vmul.f32 %v459_v0, %v194_v63 }
  0x1c   : > { %318 = vst.msk [vmem:[%s492_s25 + $0x38] sm:$0xff] %vm310_vm0, %v285_v51  ;;  %v262_v12 = vadd.f32 %v469_v1, %v226_v3  ;;  %v291_v15 = vmax.f32 %v259_v62, 0.0  ;;  %v263_v16 = vadd.f32 %v469_v1, %v227_v4  ;;  %v231_v17 = vmul.f32 %v459_v0, %v195_v6 }
  0x1d   : > { %319 = vst.msk [vmem:[%s492_s25 + $0x40] sm:$0xff] %vm310_vm0, %v286_v57  ;;  %v292_v19 = vmax.f32 %v260_v2, 0.0  ;;  %v264_v20 = vadd.f32 %v469_v1, %v228_v5  ;;  %v232_v21 = vmul.f32 %v459_v0, %v196_v10  ;;  %v293_v23 = vmax.f32 %v261_v8, 0.0 }
  0x1e   : > { %320 = vst.msk [vmem:[%s492_s25 + $0x48] sm:$0xff] %vm310_vm0, %v287_v60  ;;  %v265_v24 = vadd.f32 %v469_v1, %v229_v9  ;;  %v233_v25 = vmul.f32 %v459_v0, %v197_v14  ;;  %v294_v27 = vmax.f32 %v262_v12, 0.0  ;;  %v266_v28 = vadd.f32 %v469_v1, %v230_v13 }
  0x1f   : > { %321 = vst.msk [vmem:[%s492_s25 + $0x50] sm:$0xff] %vm310_vm0, %v288_v61  ;;  %v234_v29 = vmul.f32 %v459_v0, %v198_v18  ;;  %v295_v31 = vmax.f32 %v263_v16, 0.0  ;;  %v267_v32 = vadd.f32 %v469_v1, %v231_v17  ;;  %v235_v33 = vmul.f32 %v459_v0, %v199_v22 }
  0x20   : > { %322 = vst.msk [vmem:[%s492_s25 + $0x58] sm:$0xff] %vm310_vm0, %v289_v7  ;;  %v296_v35 = vmax.f32 %v264_v20, 0.0  ;;  %v268_v36 = vadd.f32 %v469_v1, %v232_v21  ;;  %v236_v37 = vmul.f32 %v459_v0, %v200_v26  ;;  %v297_v39 = vmax.f32 %v265_v24, 0.0 }
  0x21   : > { %323 = vst.msk [vmem:[%s492_s25 + $0x60] sm:$0xff] %vm310_vm0, %v290_v11  ;;  %v269_v40 = vadd.f32 %v469_v1, %v233_v25  ;;  %v237_v41 = vmul.f32 %v459_v0, %v201_v30  ;;  %v298_v43 = vmax.f32 %v266_v28, 0.0  ;;  %v270_v44 = vadd.f32 %v469_v1, %v234_v29 }
  0x22   : > { %324 = vst.msk [vmem:[%s492_s25 + $0x68] sm:$0xff] %vm310_vm0, %v291_v15  ;;  %v238_v45 = vmul.f32 %v459_v0, %v202_v34  ;;  %v299_v47 = vmax.f32 %v267_v32, 0.0  ;;  %v271_v48 = vadd.f32 %v469_v1, %v235_v33  ;;  %v239_v49 = vmul.f32 %v459_v0, %v203_v38 }
  0x23   : > { %325 = vst.msk [vmem:[%s492_s25 + $0x70] sm:$0xff] %vm310_vm0, %v292_v19  ;;  %v300_v50 = vmax.f32 %v268_v36, 0.0  ;;  %v272_v51 = vadd.f32 %v469_v1, %v236_v37  ;;  %v240_v52 = vmul.f32 %v459_v0, %v204_v42  ;;  %v301_v53 = vmax.f32 %v269_v40, 0.0 }
  0x24   : > { %326 = vst.msk [vmem:[%s492_s25 + $0x78] sm:$0xff] %vm310_vm0, %v293_v23  ;;  %v273_v54 = vadd.f32 %v469_v1, %v237_v41  ;;  %v241_v55 = vmul.f32 %v459_v0, %v205_v46  ;;  %v302_v56 = vmax.f32 %v270_v44, 0.0  ;;  %v274_v57 = vadd.f32 %v469_v1, %v238_v45 }
  0x25   : > { %327 = vst.msk [vmem:[%s492_s25 + $0x80] sm:$0xff] %vm310_vm0, %v294_v27  ;;  %v303_v58 = vmax.f32 %v271_v48, 0.0  ;;  %v275_v59 = vadd.f32 %v469_v1, %v239_v49  ;;  %v304_v60 = vmax.f32 %v272_v51, 0.0  ;;  %v276_v0 = vadd.f32 %v469_v1, %v240_v52 }
  0x26   : > { %328 = vst.msk [vmem:[%s492_s25 + $0x88] sm:$0xff] %vm310_vm0, %v295_v31  ;;  %v305_v61 = vmax.f32 %v273_v54, 0.0  ;;  %v277_v62 = vadd.f32 %v469_v1, %v241_v55  ;;  %v306_v63 = vmax.f32 %v274_v57, 0.0 }
  0x27   : > { %329 = vst.msk [vmem:[%s492_s25 + $0x90] sm:$0xff] %vm310_vm0, %v296_v35  ;;  %v307_v2 = vmax.f32 %v275_v59, 0.0  ;;  %v308_v3 = vmax.f32 %v276_v0, 0.0 }
  0x28   : > { %330 = vst.msk [vmem:[%s492_s25 + $0x98] sm:$0xff] %vm310_vm0, %v297_v39  ;;  %v309_v4 = vmax.f32 %v277_v62, 0.0 }
  0x29   : > { %331 = vst.msk [vmem:[%s492_s25 + $0xa0] sm:$0xff] %vm310_vm0, %v298_v43 }
  0x2a   : > { %332 = vst.msk [vmem:[%s492_s25 + $0xa8] sm:$0xff] %vm310_vm0, %v299_v47 }
  0x2b   : > { %333 = vst.msk [vmem:[%s492_s25 + $0xb0] sm:$0xff] %vm310_vm0, %v300_v50 }
  0x2c   : > { %334 = vst.msk [vmem:[%s492_s25 + $0xb8] sm:$0xff] %vm310_vm0, %v301_v53 }
  0x2d   : > { %335 = vst.msk [vmem:[%s492_s25 + $0xc0] sm:$0xff] %vm310_vm0, %v302_v56 }
  0x2e   : > { %336 = vst.msk [vmem:[%s492_s25 + $0xc8] sm:$0xff] %vm310_vm0, %v303_v58 }
  0x2f   : > { %337 = vst.msk [vmem:[%s492_s25 + $0xd0] sm:$0xff] %vm310_vm0, %v304_v60 }
  0x30   : > { %338 = vst.msk [vmem:[%s492_s25 + $0xd8] sm:$0xff] %vm310_vm0, %v305_v61 }
  0x31   : > { %339 = vst.msk [vmem:[%s492_s25 + $0xe0] sm:$0xff] %vm310_vm0, %v306_v63 }
  0x32   : > { %340 = vst.msk [vmem:[%s492_s25 + $0xe8] sm:$0xff] %vm310_vm0, %v307_v2 }
  0x33   : > { %341 = vst.msk [vmem:[%s492_s25 + $0xf0] sm:$0xff] %vm310_vm0, %v308_v3 }
  0x34   : > { %342 = vst.msk [vmem:[%s492_s25 + $0xf8] sm:$0xff] %vm310_vm0, %v309_v4 }
  0x35 PF: > { %s13_s12 = sadd.s32 1, %s426_s12  }
  0x36   : > { %p10_p4 = scmp.ge.s32.totalorder %s13_s12, 4  }
  0x38   :  { %12 = sbr.rel (!%p10_p4) target bundleno = 1 (0x1), region = 62 }

// kernel: decoder_block.3
= control target key start
LH: loop header
LB: loop body
LE: loop exit
PB: predicated region body
PF: predicated region fallthrough
CT: control target
= control target key end

     0   :  { %s3812_s23 = smov 0   ;;  %s3814_s1 = smov 0   ;;  %s6367_s0 = inlined_call_operand.vmem [shape: f32[1,4], index: 0, kind: input, shape index: {}]   ;;  %s6368_s1 = inlined_call_operand.vmem [shape: f32[1,4], index: 1, kind: input, shape index: {}]   ;;  %s6369_s2 = inlined_call_operand.vmem [shape: f32[36,8], index: 2, kind: input, shape index: {}]   ;;  %s6370_s3 = inlined_call_operand.vmem [shape: f32[512,4], index: 3, kind: input, shape index: {}, may-alias: {3,4,5}]   ;;  %s6371_s4 = inlined_call_operand.vmem [shape: f32[512,4], index: 4, kind: input, shape index: {}, may-alias: {3,4,5}]   ;;  %s6372_s5 = inlined_call_operand.vmem [shape: f32[512,4], index: 5, kind: input, shape index: {}, may-alias: {3,4,5}]   ;;  %s6373_s6 = inlined_call_operand.vmem [shape: f32[512,8], index: 6, kind: output, shape index: {0}]   ;;  %s6374_s7 = inlined_call_operand.vmem [shape: f32[2,2,8], index: 7, kind: output, shape index: {1}]  }
   0x1   :  { %s3816_s24 = smov 0  }
   0x2 LB: > { %s30_s25 = sadd.s32 1, %s3756_s1  ;;  %p3609_p0 = scmp.ge.s32.totalorder %s3760_s24, 1  ;;  %s3760_s24 = sphi %s3816_s24, %s18_s24   ;;  %s3756_s1 = sphi %s3814_s1, %s7062_s1   ;;  %s3752_s23 = sphi %s3812_s23, %s7061_s23  }
   0x3   : > { %p32_p1 = scmp.ge.s32.totalorder %s30_s25, 2  ;;  %p331_p2 = scmp.lt.s32.totalorder %s3760_s24, 3 }
   0x5   : > { %s7064_s25 = smov (%p32_p1, %s30_s25), 0  ;;  %p332_p3 = pnand %p3609_p0, %p331_p2 }
   0x7   : > { %335 = sbr.rel (%p332_p3) target bundleno = 975 (0x3cf), region = 44 }
   0xc   : > { %s3610_s26 = sshll.u32 %s3752_s23, 5  ;;  %s3612_s27 = sshll.u32 %s3752_s23, 4  ;;  %vm500_vm0 = vcmask 1040384   ;;  %vm1582_vm1 = vcmask 1046528   ;;  %vm1320_vm3 = vcmask 1041408   ;;  %vm1777_vm7 = vcmask 1045504  }
   0xd   : > { %p394_p4 = scmp.lt.s32.totalorder %s3610_s26, 63  ;;  %s3613_s28 = sadd.s32 4294967295, %s3612_s27 }
   0xe   : > { %p404_p5 = scmp.gt.s32.totalorder %s3613_s28, 0  ;;  %s3762_s11 = smov 4  }
   0xf   : > { %s7066_s26 = smov (!%p394_p4, %s3610_s26), 63  ;;  %s3765_s16 = smov 8  }
  0x10   : > { %s3611_s29 = sshll.u32 %s7066_s26, 3  ;;  %s7068_s28 = smov (!%p404_p5, %s3613_s28), 0 }
  0x11   : > { %s3844_s9 = scalar_lea.vmem %s6370_s3, %s3611_s29  ;;  %s3614_s10 = sshll.u32 %s7068_s28, 1 }
  0x12   : > { %v469_v0 = vld [vmem:[%s3844_s9 + $0x18] sm:$0xff]  ;;  %v470_v1 = vld [vmem:[%s3844_s9 + $0x20] sm:$0xff]  ;;  %v471_v2 = vld [vmem:[%s3844_s9 + $0x28] sm:$0xff]  ;;  %p407_p6 = scmp.lt.s32.totalorder %s3614_s10, 63  ;;  %s3766_s17 = smov 12  }
  0x13   : > { %v544_v3 = vrot.slane %v469_v0, 7  ;;  %v546_v4 = vrot.slane %v470_v1, 7  ;;  %v548_v5 = vrot.slane %v471_v2, 7  ;;  %v467_v6 = vld [vmem:[%s3844_s9 + $0x8] sm:$0xff]  ;;  %v468_v7 = vld [vmem:[%s3844_s9 + $0x10] sm:$0xff]  ;;  %v466_v8 = vld [vmem:[%s3844_s9] sm:$0xff]  ;;  %s6060_s22 = scalar_lea.vmem %s6373_s6, %s3611_s29 }
  0x14   : > { %v540_v9 = vrot.slane %v467_v6, 7  ;;  %v542_v10 = vrot.slane %v468_v7, 7  ;;  %v539_v11 = vrot.slane %v466_v8, 7  ;;  %v472_v12 = vld [vmem:[%s3844_s9 + $0x30] sm:$0xff]  ;;  %s7070_s10 = smov (!%p407_p6, %s3614_s10), 63  ;;  %v473_v27 = vld [vmem:[%s3844_s9 + $0x38] sm:$0xff] }
  0x15   : > { %v3854_v13 = vsel %vm500_vm0, %v544_v3, %v546_v4  ;;  %v3857_v14 = vsel %vm500_vm0, %v546_v4, %v548_v5  ;;  %v550_v15 = vrot.slane %v472_v12, 7  ;;  %s3615_s12 = sshll.u32 %s7070_s10, 3  ;;  %v552_v34 = vrot.slane %v473_v27, 7  ;;  %v474_v45 = vld [vmem:[%s3844_s9 + $0x40] sm:$0xff]  ;;  %v475_v46 = vld [vmem:[%s3844_s9 + $0x48] sm:$0xff]  ;;  %v476_v47 = vld [vmem:[%s3844_s9 + $0x50] sm:$0xff] }
  0x16   : > { %6557 = vst [vmem:[#allocation2_spill] sm:$0xff] %v3854_v13  ;;  %v1594_v16 = vrot.slane %v3854_v13, 1  ;;  %v1596_v17 = vrot.slane %v3857_v14, 1  ;;  %v3862_v18 = vsel %vm500_vm0, %v540_v9, %v542_v10  ;;  %v3865_v19 = vsel %vm500_vm0, %v542_v10, %v544_v3  ;;  %s410_s15 = scalar_lea.vmem %s6371_s4, %s3615_s12  ;;  %v477_v60 = vld [vmem:[%s3844_s9 + $0x58] sm:$0xff]  ;;  %v478_v61 = vld [vmem:[%s3844_s9 + $0x60] sm:$0xff]  ;;  %v479_v62 = vld [vmem:[%s3844_s9 + $0x68] sm:$0xff] }
  0x17   : > { %6558 = vst [vmem:[#allocation3_spill] sm:$0xff] %v3857_v14  ;;  %v1590_v20 = vrot.slane %v3862_v18, 1  ;;  %v1592_v21 = vrot.slane %v3865_v19, 1  ;;  %v3870_v22 = vsel %vm500_vm0, %v539_v11, %v540_v9  ;;  %v3882_v26 = vsel %vm500_vm0, %v548_v5, %v550_v15  ;;  %v450_v29 = vld [vmem:[%s410_s15] sm:$0xff]  ;;  %v451_v30 = vld [vmem:[%s410_s15 + $0x8] sm:$0xff]  ;;  %v481_v12 = vld [vmem:[%s3844_s9 + $0x78] sm:$0xff] }
  0x18   : > { %6559 = vst [vmem:[#allocation4_spill] sm:$0xff] %v3862_v18  ;;  %v3873_v23 = vsel %vm1582_vm1, %v1594_v16, %v1596_v17  ;;  %v1588_v24 = vrot.slane %v3870_v22, 1  ;;  %v456_v31 = vmul.f32 0.0, %v450_v29  ;;  %v457_v32 = vmul.f32 0.0, %v451_v30  ;;  %s3767_s18 = smov 16   ;;  %s421_s19 = sadd.s32 16, %s3612_s27 }
  0x19   : > { %6560 = vst [vmem:[#allocation5_spill] sm:$0xff] %v3865_v19  ;;  %1660 = vrot.lane.b32.xlu0 %v3873_v23, %s3762_s11  ;;  %v3879_v25 = vsel %vm1582_vm1, %v1590_v20, %v1592_v21  ;;  %v1598_v33 = vrot.slane %v3882_v26, 1  ;;  %v3897_v37 = vsel %vm1582_vm1, %v1592_v21, %v1594_v16  ;;  %v3909_v41 = vsel %vm500_vm0, %v550_v15, %v552_v34  ;;  %v482_v15 = vld [vmem:[%s3844_s9 + $0x80] sm:$0xff]  ;;  %p422_p7 = scmp.lt.s32.totalorder %s421_s19, 31  ;;  %s3768_s28 = smov 20  }
  0x1a   : > { %6561 = vst [vmem:[#allocation6_spill] sm:$0xff] %v3870_v22  ;;  %1656 = vrot.lane.b32.xlu2 %v3879_v25, %s3762_s11  ;;  %v3888_v28 = vsel %vm1582_vm1, %v1588_v24, %v1590_v20  ;;  %v501_v35 = vrot.slane %v456_v31, 7  ;;  %v502_v36 = vrot.slane %v457_v32, 7  ;;  %v1600_v49 = vrot.slane %v3909_v41, 1  ;;  %s3769_s30 = smov 28   ;;  %s3770_s8 = smov 24  }
  0x1b   : > { %6562 = vst [vmem:[#allocation7_spill] sm:$0xff] %v3882_v26  ;;  %1654 = vrot.lane.b32.xlu1 %v3888_v28, %s3762_s11  ;;  %v3906_v40 = vsel %vm1582_vm1, %v1596_v17, %v1598_v33  ;;  %v554_v51 = vrot.slane %v474_v45, 7  ;;  %v556_v52 = vrot.slane %v475_v46, 7  ;;  %v558_v53 = vrot.slane %v476_v47, 7  ;;  %s7072_s19 = smov (!%p422_p7, %s421_s19), 31  ;;  %p445_p9 = scmp.lt.s32.totalorder %s3752_s23, 1 }
  0x1c   : > { %v3900_v38 = vsel %vm500_vm0, %v501_v35, %v502_v36  ;;  %v3903_v39 = vsel %vm500_vm0, 0.0, %v501_v35  ;;  %6565 = vst [vmem:[#allocation10_spill] sm:$0xff] %v3906_v40  ;;  %v3914_v44 = vsel %vm500_vm0, %v502_v36, %v539_v11  ;;  %v3928_v54 = vsel %vm1582_vm1, %v1598_v33, %v1600_v49  ;;  %v480_v11 = vld [vmem:[%s3844_s9 + $0x70] sm:$0xff]  ;;  %v483_v35 = vld [vmem:[%s3844_s9 + $0x88] sm:$0xff]  ;;  %s3617_s20 = sshll.u32 %s7072_s19, 1 }
  0x1d   : > { %6563 = vst [vmem:[#allocation8_spill] sm:$0xff] %v3900_v38  ;;  %v1583_v42 = vrot.slane %v3903_v39, 1  ;;  %v1584_v43 = vrot.slane %v3900_v38, 1  ;;  %v1586_v50 = vrot.slane %v3914_v44, 1  ;;  %v3934_v56 = vsel %vm500_vm0, %v554_v51, %v556_v52  ;;  %v484_v36 = vld [vmem:[%s3844_s9 + $0x90] sm:$0xff]  ;;  %p425_p8 = scmp.lt.s32.totalorder %s3617_s20, 63 }
  0x1e   : > { %6564 = vst [vmem:[#allocation9_spill] sm:$0xff] %v3903_v39  ;;  %v3937_v57 = vsel %vm500_vm0, %v556_v52, %v558_v53  ;;  %v3941_v59 = vsel %vm500_vm0, %v552_v34, %v554_v51  ;;  %v1604_v63 = vrot.slane %v3934_v56, 1  ;;  %v560_v2 = vrot.slane %v477_v60, 7  ;;  %s7076_s23 = smov (!%p445_p9, %s3752_s23), 1 }
  0x1f   : > { %6566 = vst [vmem:[#allocation11_spill] sm:$0xff] %v3909_v41  ;;  %v1585_v48 = vsel %vm1582_vm1, %v1583_v42, %v1584_v43  ;;  %v3931_v55 = vsel %vm1582_vm1, %v1586_v50, %v1588_v24  ;;  %v1587_v58 = vsel %vm1582_vm1, %v1584_v43, %v1586_v50  ;;  %v1606_v0 = vrot.slane %v3937_v57, 1  ;;  %v485_v42 = vld [vmem:[%s3844_s9 + $0x98] sm:$0xff]  ;;  %s7074_s20 = smov (!%p425_p8, %s3617_s20), 63  ;;  %s3621_s26 = sshll.u32 %s7076_s23, 1 }
  0x20   : > { %6567 = vst [vmem:[#allocation12_spill] sm:$0xff] %v3914_v44  ;;  %v1602_v1 = vrot.slane %v3941_v59, 1  ;;  %v562_v3 = vrot.slane %v478_v61, 7  ;;  %v564_v4 = vrot.slane %v479_v62, 7  ;;  %v3970_v10 = vsel %vm500_vm0, %v558_v53, %v560_v2  ;;  %v486_v61 = vld [vmem:[%s3844_s9 + $0xa0] sm:$0xff]  ;;  %v487_v62 = vld [vmem:[%s3844_s9 + $0xa8] sm:$0xff] }
  0x21   : > { %1648 = vrot.lane.b32.xlu0 %v1585_v48, %s3762_s11  ;;  %6568 = vst [vmem:[#allocation13_spill] sm:$0xff] %v3928_v54  ;;  %v3955_v5 = vsel %vm1582_vm1, %v1604_v63, %v1606_v0  ;;  %v1608_v20 = vrot.slane %v3970_v10, 1  ;;  %v566_v21 = vrot.slane %v480_v11, 7  ;;  %v568_v24 = vrot.slane %v481_v12, 7  ;;  %s3618_s21 = sshll.u32 %s7074_s20, 3 }
  0x22   : > { %1658 = vrot.lane.b32.xlu2 %v3897_v37, %s3762_s11  ;;  %6569 = vst [vmem:[#allocation14_spill] sm:$0xff] %v3934_v56  ;;  %v3958_v6 = vsel %vm1582_vm1, %v1602_v1, %v1604_v63  ;;  %v3961_v7 = vsel %vm500_vm0, %v560_v2, %v562_v3  ;;  %v3964_v8 = vsel %vm500_vm0, %v562_v3, %v564_v4  ;;  %v570_v27 = vrot.slane %v482_v15, 7  ;;  %v488_v63 = vld [vmem:[%s3844_s9 + $0xb0] sm:$0xff]  ;;  %s4828_s27 = scalar_lea.vmem %s6372_s5, %s3618_s21 }
  0x23   : > { %1662 = vrot.lane.b32.xlu1 %v3906_v40, %s3762_s11  ;;  %6570 = vst [vmem:[#allocation15_spill] sm:$0xff] %v3937_v57  ;;  %v3967_v9 = vsel %vm1582_vm1, %v1600_v49, %v1602_v1  ;;  %v1610_v16 = vrot.slane %v3961_v7, 1  ;;  %v1612_v17 = vrot.slane %v3964_v8, 1  ;;  %v3991_v31 = vsel %vm500_vm0, %v566_v21, %v568_v24 }
  0x24   : > { %6571 = vst [vmem:[#allocation16_spill] sm:$0xff] %v3941_v59  ;;  %v3994_v32 = vsel %vm500_vm0, %v568_v24, %v570_v27  ;;  %v3997_v33 = vsel %vm1582_vm1, %v1606_v0, %v1608_v20  ;;  %v4000_v34 = vsel %vm500_vm0, %v564_v4, %v566_v21  ;;  %v1616_v43 = vrot.slane %v3991_v31, 1 }
  0x25   : > { %6572 = vst [vmem:[#allocation17_spill] sm:$0xff] %v3955_v5  ;;  %v3985_v29 = vsel %vm1582_vm1, %v1610_v16, %v1612_v17  ;;  %v3988_v30 = vsel %vm1582_vm1, %v1608_v20, %v1610_v16  ;;  %v1618_v45 = vrot.slane %v3994_v32, 1  ;;  %v1614_v46 = vrot.slane %v4000_v34, 1 }
  0x26   : > { %6573 = vst [vmem:[#allocation18_spill] sm:$0xff] %v3958_v6  ;;  %v572_v47 = vrot.slane %v483_v35, 7  ;;  %v574_v48 = vrot.slane %v484_v36, 7  ;;  %v576_v49 = vrot.slane %v485_v42, 7  ;;  %v647_v0 = vlaneseq  ;;  %v489_v35 = vld [vmem:[%s3844_s9 + $0xb8] sm:$0xff]  ;;  %v490_v36 = vld [vmem:[%s3844_s9 + $0xc0] sm:$0xff] }
  0x27   : > { %6574 = vst [vmem:[#allocation19_spill] sm:$0xff] %v3967_v9  ;;  %v4015_v50 = vsel %vm1582_vm1, %v1616_v43, %v1618_v45  ;;  %v4018_v51 = vsel %vm1582_vm1, %v1614_v46, %v1616_v43  ;;  %v578_v4 = vrot.slane %v486_v61, 7  ;;  %v580_v11 = vrot.slane %v487_v62, 7  ;;  %v491_v42 = vld [vmem:[%s3844_s9 + $0xc8] sm:$0xff] }
  0x28   : > { %6575 = vst [vmem:[#allocation20_spill] sm:$0xff] %v3985_v29  ;;  %v4021_v52 = vsel %vm500_vm0, %v572_v47, %v574_v48  ;;  %v4024_v53 = vsel %vm500_vm0, %v574_v48, %v576_v49  ;;  %v4030_v60 = vsel %vm500_vm0, %v570_v27, %v572_v47  ;;  %v582_v12 = vrot.slane %v488_v63, 7 }
  0x29   : > { %1650 = vrot.lane.b32.xlu0 %v1587_v58, %s3762_s11  ;;  %6576 = vst [vmem:[#allocation21_spill] sm:$0xff] %v3988_v30  ;;  %v4027_v58 = vsel %vm1582_vm1, %v1612_v17, %v1614_v46  ;;  %v1622_v1 = vrot.slane %v4021_v52, 1  ;;  %v1624_v2 = vrot.slane %v4024_v53, 1  ;;  %v1620_v3 = vrot.slane %v4030_v60, 1 }
  0x2a   : > { %1664 = vrot.lane.b32.xlu2 %v3928_v54, %s3762_s11  ;;  %6577 = vst [vmem:[#allocation22_spill] sm:$0xff] %v3991_v31  ;;  %v4044_v15 = vshrl.u32 %v647_v0, 7  ;;  %v4053_v20 = vsel %vm500_vm0, %v578_v4, %v580_v11  ;;  %v4056_v21 = vsel %vm500_vm0, %v580_v11, %v582_v12  ;;  %v4062_v27 = vsel %vm500_vm0, %v576_v49, %v578_v4 }
  0x2b   : > { %1652 = vrot.lane.b32.xlu1 %v3931_v55, %s3762_s11  ;;  %6578 = vst [vmem:[#allocation23_spill] sm:$0xff] %v3997_v33  ;;  %v4047_v16 = vsel %vm1582_vm1, %v1622_v1, %v1624_v2  ;;  %v4050_v17 = vsel %vm1582_vm1, %v1620_v3, %v1622_v1  ;;  %v4059_v24 = vsel %vm1582_vm1, %v1618_v45, %v1620_v3  ;;  %v1628_v46 = vrot.slane %v4053_v20, 1 }
  0x2c   : > { %6579 = vst [vmem:[#allocation24_spill] sm:$0xff] %v4015_v50  ;;  %v649_v43 = vadd.s32 8, %v4044_v15  ;;  %v1630_v45 = vrot.slane %v4056_v21, 1  ;;  %v1626_v47 = vrot.slane %v4062_v27, 1  ;;  %v584_v48 = vrot.slane %v489_v35, 7  ;;  %v492_v35 = vld [vmem:[%s3844_s9 + $0xd0] sm:$0xff] }
  0x2d   : > { %6580 = vst [vmem:[#allocation25_spill] sm:$0xff] %v4018_v51  ;;  %v586_v49 = vrot.slane %v490_v36, 7  ;;  %v588_v61 = vrot.slane %v491_v42, 7  ;;  %v493_v36 = vld [vmem:[%s3844_s9 + $0xd8] sm:$0xff]  ;;  %v494_v42 = vld [vmem:[%s3844_s9 + $0xe0] sm:$0xff] }
  0x2e   : > { %6581 = vst [vmem:[#allocation26_spill] sm:$0xff] %v4027_v58  ;;  %v691_v62 = vand.u32 15, %v649_v43  ;;  %v4078_v63 = vsel %vm1582_vm1, %v1628_v46, %v1630_v45  ;;  %v4081_v0 = vsel %vm1582_vm1, %v1626_v47, %v1628_v46  ;;  %v4090_v4 = vsel %vm500_vm0, %v582_v12, %v584_v48 }
  0x2f   : > { %6582 = vst [vmem:[#allocation27_spill] sm:$0xff] %v4030_v60  ;;  %v4084_v1 = vsel %vm500_vm0, %v584_v48, %v586_v49  ;;  %v4087_v3 = vsel %vm500_vm0, %v586_v49, %v588_v61  ;;  %v4093_v11 = vsel %vm1582_vm1, %v1624_v2, %v1626_v47  ;;  %v651_v43 = vadd.s32 24, %v4044_v15 }
  0x30   : > { %6583 = vst [vmem:[#allocation28_spill] sm:$0xff] %v4047_v16  ;;  %vm1161_vm2 = vcmp.ne.s32.totalorder %v691_v62, 15  ;;  %v1634_v46 = vrot.slane %v4084_v1, 1  ;;  %v1636_v12 = vrot.slane %v4087_v3, 1  ;;  %v1632_v48 = vrot.slane %v4090_v4, 1 }
  0x31   : > { %1666 = vrot.lane.b32.xlu0 %v3967_v9, %s3762_s11  ;;  %6584 = vst [vmem:[#allocation29_spill] sm:$0xff] %v4050_v17  ;;  %v590_v2 = vrot.slane %v492_v35, 7  ;;  %v592_v47 = vrot.slane %v493_v36, 7  ;;  %v594_v49 = vrot.slane %v494_v42, 7  ;;  %v6389_v62 = vmov 0.0  }
  0x32   : > { %1670 = vrot.lane.b32.xlu2 %v3955_v5, %s3762_s11  ;;  %6585 = vst [vmem:[#allocation30_spill] sm:$0xff] %v4053_v20  ;;  %v3764_v35 = vmov 1.0  }
  0x33   : > { %1668 = vrot.lane.b32.xlu1 %v3958_v6, %s3762_s11  ;;  %6586 = vst [vmem:[#allocation31_spill] sm:$0xff] %v4059_v24  ;;  %v4121_v36 = vrot.slane %v3764_v35, 6  ;;  %v655_v35 = vadd.s32 56, %v4044_v15 }
  0x34   : > { %6587 = vst [vmem:[#allocation32_spill] sm:$0xff] %v4078_v63 }
  0x35   : > { %6588 = vst [vmem:[#allocation33_spill] sm:$0xff] %v4081_v0  ;;  %v1417_v5 = vmul.f32 %v4121_v36, %v3903_v39 }
  0x36   : > { %6589 = vst [vmem:[#allocation34_spill] sm:$0xff] %v4093_v11 }
  0x39   : > { %1672 = vrot.lane.b32.xlu0 %v3997_v33, %s3762_s11 }
  0x3a   : > { %1676 = vrot.lane.b32.xlu2 %v3985_v29, %s3762_s11 }
  0x3b   : > { %1674 = vrot.lane.b32.xlu1 %v3988_v30, %s3762_s11 }
  0x41   : > { %1678 = vrot.lane.b32.xlu0 %v4027_v58, %s3762_s11 }
  0x42   : > { %1682 = vrot.lane.b32.xlu2 %v4015_v50, %s3762_s11  ;;  %v4113_v50 = vsel %vm1582_vm1, %v1632_v48, %v1634_v46 }
  0x43   : > { %1680 = vrot.lane.b32.xlu1 %v4018_v51, %s3762_s11  ;;  %6591 = vst [vmem:[#allocation36_spill] sm:$0xff] %v4113_v50 }
  0x49   : > { %1684 = vrot.lane.b32.xlu0 %v4059_v24, %s3762_s11  ;;  %v4116_v24 = vsel %vm500_vm0, %v590_v2, %v592_v47 }
  0x4a   : > { %1688 = vrot.lane.b32.xlu2 %v4047_v16, %s3762_s11  ;;  %v705_v16 = vand.u32 15, %v651_v43  ;;  %6592 = vst [vmem:[#allocation37_spill] sm:$0xff] %v4116_v24  ;;  %v4127_v43 = vsel %vm500_vm0, %v588_v61, %v590_v2 }
  0x4b   : > { %1686 = vrot.lane.b32.xlu1 %v4050_v17, %s3762_s11  ;;  %v4124_v17 = vsel %vm1582_vm1, %v1630_v45, %v1632_v48  ;;  %v1640_v45 = vrot.slane %v4116_v24, 1 }
  0x4c   : > { %6593 = vst [vmem:[#allocation38_spill] sm:$0xff] %v4124_v17  ;;  %vm1163_vm4 = vcmp.ne.s32.totalorder %v705_v16, 15 }
  0x51   : > { %1690 = vrot.lane.b32.xlu0 %v4093_v11, %s3762_s11  ;;  %v4119_v11 = vsel %vm500_vm0, %v592_v47, %v594_v49  ;;  %v653_v47 = vadd.s32 40, %v4044_v15 }
  0x52   : > { %1694 = vrot.lane.b32.xlu2 %v4078_v63, %s3762_s11  ;;  %v3638_v63 = vsel %vm1161_vm2, 1.0, %v6389_v62  ;;  %v4133_v62 = vld [vmem:[%s3844_s9 + $0xf0] sm:$0xff]  ;;  %v1642_v61 = vrot.slane %v4119_v11, 1 }
  0x53   : > { %1692 = vrot.lane.b32.xlu1 %v4081_v0, %s3762_s11  ;;  %v4110_v0 = vsel %vm1582_vm1, %v1634_v46, %v1636_v12  ;;  %v1322_v42 = vrot.slane %v3638_v63, 6  ;;  %v495_v46 = vld [vmem:[%s3844_s9 + $0xe8] sm:$0xff]  ;;  %v1638_v63 = vrot.slane %v4127_v43, 1  ;;  %v719_v58 = vand.u32 15, %v653_v47 }
  0x54   : > { %6590 = vst [vmem:[#allocation35_spill] sm:$0xff] %v4110_v0  ;;  %v596_v16 = vrot.slane %v495_v46, 7  ;;  %v4151_v51 = vsel %vm1582_vm1, %v1640_v45, %v1642_v61  ;;  %v6599_v47 = vrot.slane %v4133_v62, 7 }
  0x55   : > { %v4146_v48 = vsel %vm1320_vm3, %v4121_v36, %v1322_v42  ;;  %6596 = vst [vmem:[#allocation40_spill] sm:$0xff] %v4151_v51  ;;  %v4158_v33 = vsel %vm1582_vm1, %v1638_v63, %v1640_v45  ;;  %v4161_v46 = vsel %vm1582_vm1, %v1636_v12, %v1638_v63  ;;  %vm1165_vm5 = vcmp.ne.s32.totalorder %v719_v58, 15 }
  0x56   : > { %6594 = vst [vmem:[#allocation39_spill] sm:$0xff] %v4146_v48  ;;  %v4164_v2 = vsel %vm500_vm0, %v594_v49, %v596_v16  ;;  %v657_v45 = vadd.s32 72, %v4044_v15  ;;  %v4190_v58 = vsel %vm1320_vm3, %v1322_v42, %v4121_v36 }
  0x57   : > { %6597 = vst [vmem:[#allocation41_spill] sm:$0xff] %v4158_v33  ;;  %v1644_v49 = vrot.slane %v4164_v2, 1  ;;  %v1419_v42 = vmul.f32 %v4190_v58, %v3914_v44 }
  0x58   : > { %6598 = vst [vmem:[#allocation42_spill] sm:$0xff] %v4161_v46 }
  0x59   : > { %1696 = vrot.lane.b32.xlu0 %v4124_v17, %s3762_s11  ;;  %v1418_v17 = vmul.f32 %v4146_v48, %v3900_v38  ;;  %6603 = vst [vmem:[#allocation46_spill] sm:$0xff] %v4190_v58 }
  0x5a   : > { %1700 = vrot.lane.b32.xlu2 %v4110_v0, %s3762_s11  ;;  %v6595_v0 = vmov 0.0  }
  0x5b   : > { %1698 = vrot.lane.b32.xlu1 %v4113_v50, %s3762_s11  ;;  %v3639_v29 = vsel %vm1163_vm4, 1.0, %v6595_v0  ;;  %v733_v50 = vand.u32 15, %v655_v35  ;;  %v4169_v35 = vsel %vm500_vm0, %v596_v16, %v6599_v47  ;;  %v1779_v12 = vrot.slane %v1418_v17, 2 }
  0x5c   : > { %v1326_v30 = vrot.slane %v3639_v29, 6  ;;  %6600 = vst [vmem:[#allocation43_spill] sm:$0xff] %v4169_v35  ;;  %v1778_v29 = vrot.slane %v1417_v5, 2  ;;  %v3640_v5 = vsel %vm1165_vm5, 1.0, %v6595_v0  ;;  %v747_v47 = vand.u32 15, %v657_v45 }
  0x5d   : > { %vm1167_vm6 = vcmp.ne.s32.totalorder %v733_v50, 15  ;;  %v1330_v48 = vrot.slane %v3640_v5, 6  ;;  %v4207_v45 = vsel %vm1582_vm1, %v1642_v61, %v1644_v49  ;;  %v1781_v5 = vrot.slane %v1419_v42, 2 }
  0x5e   : > { %v4182_v16 = vsel %vm1320_vm3, %v4121_v36, %v1326_v30  ;;  %v4186_v50 = vsel %vm1320_vm3, %v1326_v30, %v4121_v36  ;;  %v3641_v17 = vsel %vm1167_vm6, 1.0, %v6595_v0  ;;  %v1780_v38 = vsel %vm1777_vm7, %v1778_v29, %v1779_v12  ;;  %6606 = vst [vmem:[#allocation48_spill] sm:$0xff] %v4207_v45 }
  0x5f   : > { %6601 = vst [vmem:[#allocation44_spill] sm:$0xff] %v4182_v16  ;;  %v1420_v63 = vmul.f32 %v4182_v16, %v3870_v22  ;;  %v1421_v39 = vmul.f32 %v4186_v50, %v3862_v18  ;;  %v6604_v30 = vrot.slane %v4169_v35, 1  ;;  %vm1169_vm8 = vcmp.ne.s32.totalorder %v747_v47, 15 }
  0x60   : > { %6602 = vst [vmem:[#allocation45_spill] sm:$0xff] %v4186_v50  ;;  %v659_v29 = vadd.s32 88, %v4044_v15  ;;  %v661_v50 = vadd.s32 104, %v4044_v15  ;;  %v4218_v61 = vsel %vm1320_vm3, %v1330_v48, %v4121_v36 }
  0x61   : > { %1702 = vrot.lane.b32.xlu0 %v4161_v46, %s3762_s11  ;;  %v1334_v46 = vrot.slane %v3641_v17, 6  ;;  %v1785_v16 = vrot.slane %v1421_v39, 2  ;;  %6607 = vst [vmem:[#allocation49_spill] sm:$0xff] %v4218_v61  ;;  %v3642_v17 = vsel %vm1169_vm8, 1.0, %v6595_v0  ;;  %v1423_v42 = vmul.f32 %v4218_v61, %v3854_v13 }
  0x62   : > { %1706 = vrot.lane.b32.xlu2 %v4151_v51, %s3762_s11  ;;  %v4202_v51 = vsel %vm1582_vm1, %v1644_v49, %v6604_v30  ;;  %v1783_v30 = vrot.slane %v1420_v63, 2  ;;  %v4226_v49 = vsel %vm1320_vm3, %v4121_v36, %v1330_v48  ;;  %v761_v63 = vand.u32 15, %v659_v29 }
  0x63   : > { %1704 = vrot.lane.b32.xlu1 %v4158_v33, %s3762_s11  ;;  %6605 = vst [vmem:[#allocation47_spill] sm:$0xff] %v4202_v51  ;;  %v775_v39 = vand.u32 15, %v661_v50  ;;  %v1338_v33 = vrot.slane %v3642_v17, 6  ;;  %v1782_v48 = vsel %vm1777_vm7, %v1779_v12, %v1781_v5  ;;  %v663_v50 = vadd.s32 120, %v4044_v15 }
  0x64   : > { %6609 = vst [vmem:[#allocation51_spill] sm:$0xff] %v4226_v49  ;;  %v1786_v47 = vsel %vm1777_vm7, %v1783_v30, %v1785_v16  ;;  %vm1171_vm9 = vcmp.ne.s32.totalorder %v761_v63, 15  ;;  %v1789_v29 = vrot.slane %v1423_v42, 2 }
  0x65   : > { %vm1173_vm10 = vcmp.ne.s32.totalorder %v775_v39, 15  ;;  %v4246_v17 = vsel %vm1320_vm3, %v4121_v36, %v1338_v33  ;;  %v4250_v12 = vsel %vm1320_vm3, %v1338_v33, %v4121_v36  ;;  %v789_v63 = vand.u32 15, %v663_v50 }
  0x66   : > { %6611 = vst [vmem:[#allocation53_spill] sm:$0xff] %v4246_v17  ;;  %v665_v50 = vadd.s32 136, %v4044_v15 }
  0x67   : > { %6612 = vst [vmem:[#allocation54_spill] sm:$0xff] %v4250_v12  ;;  %vm1175_vm11 = vcmp.ne.s32.totalorder %v789_v63, 15 }
  0x68   : > { %v803_v63 = vand.u32 15, %v665_v50 }
  0x69   : > { %1708 = vrot.lane.b32.xlu0 %v4207_v45, %s3762_s11  ;;  %v1784_v45 = vsel %vm1777_vm7, %v1781_v5, %v1783_v30  ;;  %v4254_v5 = vsel %vm1320_vm3, %v1334_v46, %v4121_v36 }
  0x6a   : > { %1843 = vrot.lane.b32.xlu2 %v1780_v38, %s3765_s16  ;;  %v4222_v38 = vsel %vm1320_vm3, %v4121_v36, %v1334_v46  ;;  %6613 = vst [vmem:[#allocation55_spill] sm:$0xff] %v4254_v5  ;;  %v1425_v42 = vmul.f32 %v4254_v5, %v3882_v26  ;;  %vm1177_vm12 = vcmp.ne.s32.totalorder %v803_v63, 15 }
  0x6b   : > { %1710 = vrot.lane.b32.xlu1 %v4202_v51, %s3762_s11  ;;  %6608 = vst [vmem:[#allocation50_spill] sm:$0xff] %v4222_v38  ;;  %v1424_v58 = vmul.f32 %v4222_v38, %v3857_v14  ;;  %v1422_v51 = vmul.f32 %v4226_v49, %v3865_v19  ;;  %v667_v49 = vadd.s32 152, %v4044_v15  ;;  %v3646_v63 = vsel %vm1177_vm12, 1.0, %v6595_v0 }
  0x6c   : > { %v1793_v5 = vrot.slane %v1425_v42, 2 }
  0x6d   : > { %v1791_v61 = vrot.slane %v1424_v58, 2  ;;  %v1787_v30 = vrot.slane %v1422_v51, 2  ;;  %v3644_v58 = vsel %vm1173_vm10, 1.0, %v6595_v0  ;;  %v1426_v51 = vmul.f32 %v4246_v17, %v3909_v41 }
  0x6f   : > { %v1792_v39 = vsel %vm1777_vm7, %v1789_v29, %v1791_v61  ;;  %v1790_v33 = vsel %vm1777_vm7, %v1787_v30, %v1789_v29  ;;  %v1795_v17 = vrot.slane %v1426_v51, 2 }
  0x71   : > { %1845 = vrot.lane.b32.xlu0 %v1782_v48, %s3765_s16  ;;  %v1346_v48 = vrot.slane %v3644_v58, 6  ;;  %v3645_v58 = vsel %vm1175_vm11, 1.0, %v6595_v0 }
  0x72   : > { %1849 = vrot.lane.b32.xlu2 %v1786_v47, %s3765_s16  ;;  %v1427_v47 = vmul.f32 %v4250_v12, %v3941_v59 }
  0x73   : > { %1847 = vrot.lane.b32.xlu1 %v1784_v45, %s3765_s16  ;;  %v3643_v45 = vsel %vm1171_vm9, 1.0, %v6595_v0 }
  0x74   : > { %v4242_v38 = vpop.permute.xlu2 %1656  ;;  %v1342_v46 = vrot.slane %v3643_v45, 6  ;;  %v1797_v12 = vrot.slane %v1427_v47, 2 }
  0x75   : > { %6610 = vst [vmem:[#allocation52_spill] sm:$0xff] %v4242_v38  ;;  %v1788_v38 = vsel %vm1777_vm7, %v1785_v16, %v1787_v30  ;;  %v4280_v16 = vsel %vm1320_vm3, %v4121_v36, %v1346_v48 }
  0x76   : > { %v4276_v45 = vsel %vm1320_vm3, %v1342_v46, %v4121_v36  ;;  %6616 = vst [vmem:[#allocation58_spill] sm:$0xff] %v4280_v16  ;;  %v4284_v30 = vsel %vm1320_vm3, %v4121_v36, %v1342_v46  ;;  %v1430_v47 = vmul.f32 %v4280_v16, %v3970_v10  ;;  %v1794_v46 = vsel %vm1777_vm7, %v1791_v61, %v1793_v5 }
  0x77   : > { %6615 = vst [vmem:[#allocation57_spill] sm:$0xff] %v4276_v45  ;;  %v1429_v51 = vmul.f32 %v4276_v45, %v3937_v57  ;;  %v1428_v42 = vmul.f32 %v4284_v30, %v3934_v56 }
  0x78   : > { %6617 = vst [vmem:[#allocation59_spill] sm:$0xff] %v4284_v30  ;;  %v1803_v45 = vrot.slane %v1430_v47, 2  ;;  %v673_v30 = vadd.s32 200, %v4044_v15 }
  0x79   : > { %1851 = vrot.lane.b32.xlu0 %v1788_v38, %s3765_s16  ;;  %v1798_v38 = vsel %vm1777_vm7, %v1795_v17, %v1797_v12  ;;  %v1801_v50 = vrot.slane %v1429_v51, 2 }
  0x7a   : > { %1855 = vrot.lane.b32.xlu2 %v1792_v39, %s3765_s16  ;;  %v817_v39 = vand.u32 15, %v667_v49  ;;  %v669_v49 = vadd.s32 168, %v4044_v15 }
  0x7b   : > { %1853 = vrot.lane.b32.xlu1 %v1790_v33, %s3765_s16  ;;  %v1796_v33 = vsel %vm1777_vm7, %v1793_v5, %v1795_v17  ;;  %v1799_v17 = vrot.slane %v1428_v42, 2  ;;  %v4312_v5 = vsel %vm1320_vm3, %v1346_v48, %v4121_v36  ;;  %v1804_v51 = vsel %vm1777_vm7, %v1801_v50, %v1803_v45 }
  0x7c   : > { %v4272_v29 = vpop.permute.xlu2 %1658  ;;  %vm1179_vm13 = vcmp.ne.s32.totalorder %v817_v39, 15  ;;  %6621 = vst [vmem:[#allocation63_spill] sm:$0xff] %v4312_v5  ;;  %v1431_v42 = vmul.f32 %v4312_v5, %v3961_v7  ;;  %v1354_v48 = vrot.slane %v3646_v63, 6 }
  0x7d   : > { %6614 = vst [vmem:[#allocation56_spill] sm:$0xff] %v4272_v29  ;;  %v1350_v29 = vrot.slane %v3645_v58, 6  ;;  %v3647_v39 = vsel %vm1179_vm13, 1.0, %v6595_v0 }
  0x7e   : > { %v1805_v63 = vrot.slane %v1431_v42, 2 }
  0x7f   : > { %v4304_v58 = vsel %vm1320_vm3, %v4121_v36, %v1350_v29  ;;  %v4308_v61 = vsel %vm1320_vm3, %v1350_v29, %v4121_v36  ;;  %v1802_v29 = vsel %vm1777_vm7, %v1799_v17, %v1801_v50 }
  0x80   : > { %6619 = vst [vmem:[#allocation61_spill] sm:$0xff] %v4304_v58  ;;  %v1432_v47 = vmul.f32 %v4304_v58, %v3964_v8 }
  0x81   : > { %1857 = vrot.lane.b32.xlu0 %v1794_v46, %s3765_s16  ;;  %6620 = vst [vmem:[#allocation62_spill] sm:$0xff] %v4308_v61  ;;  %v1358_v46 = vrot.slane %v3647_v39, 6 }
  0x82   : > { %1861 = vrot.lane.b32.xlu2 %v1798_v38, %s3765_s16  ;;  %v831_v38 = vand.u32 15, %v669_v49  ;;  %v671_v49 = vadd.s32 184, %v4044_v15  ;;  %v1807_v58 = vrot.slane %v1432_v47, 2  ;;  %v859_v47 = vand.u32 15, %v673_v30 }
  0x83   : > { %1859 = vrot.lane.b32.xlu1 %v1796_v33, %s3765_s16  ;;  %v1433_v33 = vmul.f32 %v4308_v61, %v4000_v34  ;;  %v675_v30 = vadd.s32 216, %v4044_v15 }
  0x84   : > { %v4300_v16 = vpop.permute.xlu2 %1664  ;;  %vm1181_vm14 = vcmp.ne.s32.totalorder %v831_v38, 15  ;;  %v4346_v38 = vsel %vm1320_vm3, %v4121_v36, %v1354_v48  ;;  %vm1185_vm2 = vcmp.ne.s32.totalorder %v859_v47, 15 }
  0x85   : > { %6618 = vst [vmem:[#allocation60_spill] sm:$0xff] %v4300_v16  ;;  %v1800_v16 = vsel %vm1777_vm7, %v1797_v12, %v1799_v17  ;;  %v1809_v61 = vrot.slane %v1433_v33, 2  ;;  %v4336_v12 = vsel %vm1320_vm3, %v1354_v48, %v4121_v36  ;;  %v4340_v17 = vsel %vm1320_vm3, %v4121_v36, %v1358_v46 }
  0x86   : > { %6624 = vst [vmem:[#allocation66_spill] sm:$0xff] %v4336_v12  ;;  %v1436_v42 = vmul.f32 %v4340_v17, %v4030_v60  ;;  %v1806_v48 = vsel %vm1777_vm7, %v1803_v45, %v1805_v63  ;;  %v3650_v47 = vsel %vm1185_vm2, 1.0, %v6595_v0 }
  0x87   : > { %6625 = vst [vmem:[#allocation67_spill] sm:$0xff] %v4340_v17  ;;  %v1810_v33 = vsel %vm1777_vm7, %v1807_v58, %v1809_v61 }
  0x88   : > { %6627 = vst [vmem:[#allocation69_spill] sm:$0xff] %v4346_v38 }
  0x89   : > { %1863 = vrot.lane.b32.xlu0 %v1800_v16, %s3765_s16  ;;  %v3648_v16 = vsel %vm1181_vm14, 1.0, %v6595_v0 }
  0x8a   : > { %1867 = vrot.lane.b32.xlu2 %v1804_v51, %s3765_s16  ;;  %v845_v51 = vand.u32 15, %v671_v49 }
  0x8b   : > { %1865 = vrot.lane.b32.xlu1 %v1802_v29, %s3765_s16  ;;  %v4330_v50 = vpop.permute.xlu0 %1660  ;;  %v1435_v29 = vmul.f32 %v4336_v12, %v3994_v32  ;;  %v1815_v12 = vrot.slane %v1436_v42, 2 }
  0x8c   : > { %6622 = vst [vmem:[#allocation64_spill] sm:$0xff] %v4330_v50  ;;  %v4332_v5 = vpop.permute.xlu2 %1670  ;;  %v1808_v50 = vsel %vm1777_vm7, %v1805_v63, %v1807_v58  ;;  %vm1183_vm15 = vcmp.ne.s32.totalorder %v845_v51, 15 }
  0x8d   : > { %6623 = vst [vmem:[#allocation65_spill] sm:$0xff] %v4332_v5  ;;  %v4342_v39 = vpop.permute.xlu1 %1654  ;;  %v1434_v5 = vmul.f32 %v4346_v38, %v3991_v31  ;;  %v1813_v49 = vrot.slane %v1435_v29, 2  ;;  %v3649_v51 = vsel %vm1183_vm15, 1.0, %v6595_v0 }
  0x8e   : > { %6626 = vst [vmem:[#allocation68_spill] sm:$0xff] %v4342_v39  ;;  %v1362_v39 = vrot.slane %v3648_v16, 6 }
  0x8f   : > { %v1811_v58 = vrot.slane %v1434_v5, 2  ;;  %v873_v5 = vand.u32 15, %v675_v30  ;;  %v1816_v29 = vsel %vm1777_vm7, %v1813_v49, %v1815_v12  ;;  %v677_v30 = vadd.s32 232, %v4044_v15 }
  0x90   : > { %v4366_v16 = vsel %vm1320_vm3, %v4121_v36, %v1362_v39  ;;  %v4370_v45 = vsel %vm1320_vm3, %v1362_v39, %v4121_v36 }
  0x91   : > { %1869 = vrot.lane.b32.xlu0 %v1806_v48, %s3765_s16  ;;  %6629 = vst [vmem:[#allocation71_spill] sm:$0xff] %v4366_v16  ;;  %v1438_v42 = vmul.f32 %v4366_v16, %v4024_v53  ;;  %v1439_v39 = vmul.f32 %v4370_v45, %v4062_v27  ;;  %v1814_v48 = vsel %vm1777_vm7, %v1811_v58, %v1813_v49  ;;  %vm1187_vm4 = vcmp.ne.s32.totalorder %v873_v5, 15 }
  0x92   : > { %1873 = vrot.lane.b32.xlu2 %v1810_v33, %s3765_s16  ;;  %6630 = vst [vmem:[#allocation72_spill] sm:$0xff] %v4370_v45  ;;  %v1812_v38 = vsel %vm1777_vm7, %v1809_v61, %v1811_v58  ;;  %v3651_v5 = vsel %vm1187_vm4, 1.0, %v6595_v0 }
  0x93   : > { %1871 = vrot.lane.b32.xlu1 %v1808_v50, %s3765_s16  ;;  %v4376_v50 = vsel %vm1320_vm3, %v1358_v46, %v4121_v36  ;;  %v4380_v33 = vpop.permute.xlu0 %1648  ;;  %v1819_v16 = vrot.slane %v1438_v42, 2  ;;  %v1821_v45 = vrot.slane %v1439_v39, 2 }
  0x94   : > { %v4362_v17 = vpop.permute.xlu2 %1676  ;;  %6632 = vst [vmem:[#allocation74_spill] sm:$0xff] %v4376_v50  ;;  %v1437_v46 = vmul.f32 %v4376_v50, %v4021_v52 }
  0x95   : > { %6628 = vst [vmem:[#allocation70_spill] sm:$0xff] %v4362_v17  ;;  %v4372_v63 = vpop.permute.xlu1 %1662  ;;  %v1370_v17 = vrot.slane %v3650_v47, 6  ;;  %v1822_v39 = vsel %vm1777_vm7, %v1819_v16, %v1821_v45 }
  0x96   : > { %6631 = vst [vmem:[#allocation73_spill] sm:$0xff] %v4372_v63  ;;  %v1366_v63 = vrot.slane %v3649_v51, 6  ;;  %v1817_v50 = vrot.slane %v1437_v46, 2 }
  0x97   : > { %6633 = vst [vmem:[#allocation75_spill] sm:$0xff] %v4380_v33  ;;  %v679_v33 = vadd.s32 248, %v4044_v15  ;;  %v4404_v61 = vsel %vm1320_vm3, %v4121_v36, %v1370_v17 }
  0x98   : > { %v4400_v51 = vsel %vm1320_vm3, %v1366_v63, %v4121_v36  ;;  %6635 = vst [vmem:[#allocation77_spill] sm:$0xff] %v4404_v61  ;;  %v4410_v47 = vsel %vm1320_vm3, %v4121_v36, %v1366_v63  ;;  %v1442_v46 = vmul.f32 %v4404_v61, %v4090_v4  ;;  %v1818_v54 = vsel %vm1777_vm7, %v1815_v12, %v1817_v50 }
  0x99   : > { %1875 = vrot.lane.b32.xlu0 %v1812_v38, %s3765_s16  ;;  %6637 = vst [vmem:[#allocation79_spill] sm:$0xff] %v4410_v47  ;;  %v901_v42 = vand.u32 15, %v679_v33  ;;  %v1440_v63 = vmul.f32 %v4410_v47, %v4053_v20 }
  0x9a   : > { %1879 = vrot.lane.b32.xlu2 %v1816_v29, %s3765_s16  ;;  %v887_v29 = vand.u32 15, %v677_v30  ;;  %v1827_v30 = vrot.slane %v1442_v46, 2 }
  0x9b   : > { %1877 = vrot.lane.b32.xlu1 %v1814_v48, %s3765_s16  ;;  %v4413_v38 = vpop.permute.xlu0 %1650  ;;  %v1441_v48 = vmul.f32 %v4400_v51, %v4056_v21  ;;  %vm1191_vm6 = vcmp.ne.s32.totalorder %v901_v42, 15  ;;  %v1823_v61 = vrot.slane %v1440_v63, 2 }
  0x9c   : > { %v4396_v49 = vpop.permute.xlu2 %1682  ;;  %6638 = vst [vmem:[#allocation80_spill] sm:$0xff] %v4413_v38  ;;  %vm1189_vm5 = vcmp.ne.s32.totalorder %v887_v29, 15 }
  0x9d   : > { %6634 = vst [vmem:[#allocation76_spill] sm:$0xff] %v4396_v49  ;;  %v4406_v58 = vpop.permute.xlu1 %1652  ;;  %v1374_v49 = vrot.slane %v3651_v5, 6  ;;  %v1825_v33 = vrot.slane %v1441_v48, 2  ;;  %v3652_v5 = vsel %vm1189_vm5, 1.0, %v6595_v0 }
  0x9e   : > { %6636 = vst [vmem:[#allocation78_spill] sm:$0xff] %v4406_v58  ;;  %v1820_v58 = vsel %vm1777_vm7, %v1817_v50, %v1819_v16  ;;  %v1378_v46 = vrot.slane %v3652_v5, 6 }
  0x9f   : > { %v4431_v16 = vsel %vm1320_vm3, %v4121_v36, %v1374_v49  ;;  %v4435_v12 = vsel %vm1320_vm3, %v1374_v49, %v4121_v36  ;;  %v1828_v42 = vsel %vm1777_vm7, %v1825_v33, %v1827_v30  ;;  %v1826_v48 = vsel %vm1777_vm7, %v1823_v61, %v1825_v33 }
  0xa0   : > { %6640 = vst [vmem:[#allocation82_spill] sm:$0xff] %v4431_v16  ;;  %v1445_v49 = vmul.f32 %v4435_v12, %v4127_v43  ;;  %v4465_v33 = vsel %vm1320_vm3, %v1378_v46, %v4121_v36 }
  0xa1   : > { %1881 = vrot.lane.b32.xlu0 %v1818_v54, %s3765_s16  ;;  %6641 = vst [vmem:[#allocation83_spill] sm:$0xff] %v4435_v12  ;;  %v3653_v54 = vsel %vm1191_vm6, 1.0, %v6595_v0 }
  0xa2   : > { %1885 = vrot.lane.b32.xlu2 %v1822_v39, %s3765_s16  ;;  %v1444_v39 = vmul.f32 %v4431_v16, %v4087_v3  ;;  %v4455_v63 = vrot.slane %v3653_v54, 6  ;;  %6647 = vst [vmem:[#allocation89_spill] sm:$0xff] %v4465_v33 }
  0xa3   : > { %1883 = vrot.lane.b32.xlu1 %v1820_v58, %s3765_s16  ;;  %v4441_v58 = vsel %vm1320_vm3, %v1370_v17, %v4121_v36  ;;  %v4445_v29 = vpop.permute.xlu0 %1666 }
  0xa4   : > { %v4427_v38 = vpop.permute.xlu2 %1688  ;;  %6643 = vst [vmem:[#allocation85_spill] sm:$0xff] %v4441_v58  ;;  %v1443_v17 = vmul.f32 %v4441_v58, %v4084_v1  ;;  %v4470_v5 = vsel %vm1320_vm3, %v4121_v36, %v4455_v63 }
  0xa5   : > { %6639 = vst [vmem:[#allocation81_spill] sm:$0xff] %v4427_v38  ;;  %v4437_v50 = vpop.permute.xlu1 %1668  ;;  %v1833_v38 = vrot.slane %v1445_v49, 2 }
  0xa6   : > { %6642 = vst [vmem:[#allocation84_spill] sm:$0xff] %v4437_v50  ;;  %v1824_v50 = vsel %vm1777_vm7, %v1821_v45, %v1823_v61  ;;  %v1829_v12 = vrot.slane %v1443_v17, 2  ;;  %v4476_v61 = vsel %vm1320_vm3, %v4121_v36, %v1378_v46 }
  0xa7   : > { %6644 = vst [vmem:[#allocation86_spill] sm:$0xff] %v4445_v29  ;;  %v1831_v29 = vrot.slane %v1444_v39, 2  ;;  %v1448_v39 = vmul.f32 %v4470_v5, %v4164_v2 }
  0xa8   : > { %6645 = vst [vmem:[#allocation87_spill] sm:$0xff] %v4455_v63  ;;  %v1830_v17 = vsel %vm1777_vm7, %v1827_v30, %v1829_v12 }
  0xa9   : > { %1887 = vrot.lane.b32.xlu0 %v1824_v50, %s3765_s16  ;;  %6648 = vst [vmem:[#allocation90_spill] sm:$0xff] %v4470_v5  ;;  %v1834_v50 = vsel %vm1777_vm7, %v1831_v29, %v1833_v38  ;;  %v1832_v49 = vsel %vm1777_vm7, %v1829_v12, %v1831_v29  ;;  %v684_v29 = vand.u32 15, %v4044_v15 }
  0xaa   : > { %1891 = vrot.lane.b32.xlu2 %v1828_v42, %s3765_s16  ;;  %6650 = vst [vmem:[#allocation92_spill] sm:$0xff] %v4476_v61  ;;  %v1447_v42 = vmul.f32 %v4465_v33, %v4119_v11 }
  0xab   : > { %1889 = vrot.lane.b32.xlu1 %v1826_v48, %s3765_s16  ;;  %v4478_v54 = vpop.permute.xlu0 %1672  ;;  %v1446_v48 = vmul.f32 %v4476_v61, %v4116_v24  ;;  %vm1064_vm3 = vcmp.ne.s32.totalorder %v684_v29, 0 }
  0xac   : > { %v4461_v16 = vpop.permute.xlu2 %1694  ;;  %6651 = vst [vmem:[#allocation93_spill] sm:$0xff] %v4478_v54  ;;  %v1837_v46 = vrot.slane %v1447_v42, 2  ;;  %v1839_v54 = vrot.slane %v1448_v39, 2  ;;  %v652_v42 = vadd.s32 32, %v4044_v15  ;;  %v650_v39 = vadd.s32 16, %v4044_v15 }
  0xad   : > { %6646 = vst [vmem:[#allocation88_spill] sm:$0xff] %v4461_v16  ;;  %v4472_v45 = vpop.permute.xlu1 %1674 }
  0xae   : > { %6649 = vst [vmem:[#allocation91_spill] sm:$0xff] %v4472_v45  ;;  %v1835_v45 = vrot.slane %v1446_v48, 2  ;;  %v1840_v61 = vsel %vm1777_vm7, %v1837_v46, %v1839_v54  ;;  %v698_v29 = vand.u32 15, %v650_v39 }
  0xb0   : > { %v1838_v30 = vsel %vm1777_vm7, %v1835_v45, %v1837_v46  ;;  %v1836_v12 = vsel %vm1777_vm7, %v1833_v38, %v1835_v45  ;;  %v712_v38 = vand.u32 15, %v652_v42  ;;  %v4514_v45 = vsel %vm1064_vm3, 1.0, %v6595_v0 }
  0xb1   : > { %1893 = vrot.lane.b32.xlu0 %v1830_v17, %s3765_s16  ;;  %vm1066_vm9 = vcmp.ne.s32.totalorder %v698_v29, 0  ;;  %v658_v29 = vadd.s32 80, %v4044_v15 }
  0xb2   : > { %1897 = vrot.lane.b32.xlu2 %v1834_v50, %s3765_s16  ;;  %v1449_v50 = vmul.f32 %v4455_v63, %v4169_v35  ;;  %vm1068_vm8 = vcmp.ne.s32.totalorder %v712_v38, 0 }
  0xb3   : > { %1895 = vrot.lane.b32.xlu1 %v1832_v49, %s3765_s16  ;;  %v4496_v5 = vpop.permute.xlu0 %1678  ;;  %v4529_v42 = vsel %vm1068_vm8, 1.0, %v6595_v0 }
  0xb4   : > { %v4492_v16 = vpop.permute.xlu2 %1700  ;;  %v1841_v17 = vrot.slane %v1449_v50, 2  ;;  %6658 = vst [vmem:[#allocation100_spill] sm:$0xff] %v4529_v42 }
  0xb5   : > { %6652 = vst [vmem:[#allocation94_spill] sm:$0xff] %v4492_v16  ;;  %v4494_v33 = vpop.permute.xlu1 %1680 }
  0xb6   : > { %6653 = vst [vmem:[#allocation95_spill] sm:$0xff] %v4494_v33  ;;  %v664_v33 = vadd.s32 128, %v4044_v15 }
  0xb9   : > { %1899 = vrot.lane.b32.xlu0 %v1836_v12, %s3765_s16  ;;  %v654_v12 = vadd.s32 48, %v4044_v15 }
  0xba   : > { %1903 = vrot.lane.b32.xlu2 %v1840_v61, %s3765_s16  ;;  %v1450_v61 = vmul.f32 %v4514_v45, %v3914_v44 }
  0xbb   : > { %1901 = vrot.lane.b32.xlu1 %v1838_v30, %s3765_s16  ;;  %v4516_v46 = vpop.permute.xlu0 %1684  ;;  %v1842_v30 = vsel %vm1777_vm7, %v1839_v54, %v1841_v17  ;;  %v1454_v17 = vmul.f32 %v4529_v42, %v3854_v13  ;;  %v726_v38 = vand.u32 15, %v654_v12 }
  0xbc   : > { %v4509_v49 = vpop.permute.xlu2 %1706  ;;  %6656 = vst [vmem:[#allocation98_spill] sm:$0xff] %v4516_v46  ;;  %v676_v46 = vadd.s32 224, %v4044_v15 }
  0xbd   : > { %6654 = vst [vmem:[#allocation96_spill] sm:$0xff] %v4509_v49  ;;  %v4511_v48 = vpop.permute.xlu1 %1686  ;;  %v4538_v49 = vsel %vm1066_vm9, 1.0, %v6595_v0  ;;  %vm1070_vm10 = vcmp.ne.s32.totalorder %v726_v38, 0 }
  0xbe   : > { %6655 = vst [vmem:[#allocation97_spill] sm:$0xff] %v4511_v48  ;;  %v4553_v16 = vsel %vm1070_vm10, 1.0, %v6595_v0  ;;  %vm2785_vm10 = vcmask 31744  }
  0xbf   : > { %6663 = vst [vmem:[#allocation105_spill] sm:$0xff] %v4553_v16 }
  0xc1   : > { %1905 = vrot.lane.b32.xlu0 %v1842_v30, %s3765_s16  ;;  %v656_v30 = vadd.s32 64, %v4044_v15 }
  0xc2   : > { %1973 = vrot.lane.b32.xlu2 %v3870_v22, %s3766_s17 }
  0xc3   : > { %1971 = vrot.lane.b32.xlu1 %v1450_v61, %s3766_s17  ;;  %v4533_v54 = vpop.permute.xlu0 %1690  ;;  %v1452_v61 = vmul.f32 %v4538_v49, %v3862_v18  ;;  %v740_v38 = vand.u32 15, %v656_v30 }
  0xc4   : > { %v4526_v50 = vpop.permute.xlu2 %1843  ;;  %6660 = vst [vmem:[#allocation102_spill] sm:$0xff] %v4533_v54 }
  0xc5   : > { %6657 = vst [vmem:[#allocation99_spill] sm:$0xff] %v4526_v50  ;;  %v4531_v39 = vpop.permute.xlu1 %1692  ;;  %vm1072_vm12 = vcmp.ne.s32.totalorder %v740_v38, 0 }
  0xc6   : > { %6659 = vst [vmem:[#allocation101_spill] sm:$0xff] %v4531_v39  ;;  %v754_v39 = vand.u32 15, %v658_v29 }
  0xc8   : > { %vm1074_vm11 = vcmp.ne.s32.totalorder %v754_v39, 0 }
  0xc9   : > { %1975 = vrot.lane.b32.xlu0 %v1452_v61, %s3766_s17  ;;  %v660_v61 = vadd.s32 96, %v4044_v15  ;;  %v4568_v29 = vsel %vm1074_vm11, 1.0, %v6595_v0  ;;  %vm2818_vm11 = vcmask 64512  }
  0xca   : > { %1979 = vrot.lane.b32.xlu2 %v1454_v17, %s3766_s17  ;;  %v1456_v17 = vmul.f32 %v4553_v16, %v3882_v26  ;;  %6666 = vst [vmem:[#allocation108_spill] sm:$0xff] %v4568_v29  ;;  %v1460_v39 = vmul.f32 %v4568_v29, %v3937_v57  ;;  %v4577_v16 = vsel %vm1072_vm12, 1.0, %v6595_v0  ;;  %vm2851_vm12 = vcmask 97280  }
  0xcb   : > { %1977 = vrot.lane.b32.xlu1 %v3865_v19, %s3766_s17  ;;  %v4555_v48 = vpop.permute.xlu0 %1696  ;;  %v1458_v38 = vmul.f32 %v4577_v16, %v3941_v59 }
  0xcc   : > { %v4548_v50 = vpop.permute.xlu2 %1849  ;;  %6664 = vst [vmem:[#allocation106_spill] sm:$0xff] %v4555_v48  ;;  %v796_v48 = vand.u32 15, %v664_v33 }
  0xcd   : > { %6661 = vst [vmem:[#allocation103_spill] sm:$0xff] %v4548_v50  ;;  %v4550_v12 = vpop.permute.xlu1 %1698 }
  0xce   : > { %6662 = vst [vmem:[#allocation104_spill] sm:$0xff] %v4550_v12  ;;  %vm1080_vm14 = vcmp.ne.s32.totalorder %v796_v48, 0 }
  0xcf   : > { %v4607_v33 = vsel %vm1080_vm14, 1.0, %v6595_v0  ;;  %vm2917_vm14 = vcmask 162816  }
  0xd0   : > { %v1466_v48 = vmul.f32 %v4607_v33, %v3994_v32 }
  0xd1   : > { %1981 = vrot.lane.b32.xlu0 %v3857_v14, %s3766_s17 }
  0xd2   : > { %1985 = vrot.lane.b32.xlu2 %v3909_v41, %s3766_s17 }
  0xd3   : > { %1983 = vrot.lane.b32.xlu1 %v1456_v17, %s3766_s17  ;;  %v4572_v30 = vpop.permute.xlu0 %1702  ;;  %v768_v17 = vand.u32 15, %v660_v61 }
  0xd4   : > { %v4565_v50 = vpop.permute.xlu2 %1855  ;;  %6668 = vst [vmem:[#allocation110_spill] sm:$0xff] %v4572_v30 }
  0xd5   : > { %6665 = vst [vmem:[#allocation107_spill] sm:$0xff] %v4565_v50  ;;  %v4570_v12 = vpop.permute.xlu1 %1704  ;;  %vm1076_vm13 = vcmp.ne.s32.totalorder %v768_v17, 0  ;;  %v662_v50 = vadd.s32 112, %v4044_v15 }
  0xd6   : > { %6667 = vst [vmem:[#allocation109_spill] sm:$0xff] %v4570_v12  ;;  %v4592_v61 = vsel %vm1076_vm13, 1.0, %v6595_v0  ;;  %vm2884_vm13 = vcmask 130048  }
  0xd7   : > { %6671 = vst [vmem:[#allocation113_spill] sm:$0xff] %v4592_v61  ;;  %v782_v17 = vand.u32 15, %v662_v50 }
  0xd9   : > { %1987 = vrot.lane.b32.xlu0 %v1458_v38, %s3766_s17  ;;  %v666_v38 = vadd.s32 144, %v4044_v15  ;;  %vm1078_vm15 = vcmp.ne.s32.totalorder %v782_v17, 0 }
  0xda   : > { %1991 = vrot.lane.b32.xlu2 %v1460_v39, %s3766_s17  ;;  %v1462_v39 = vmul.f32 %v4592_v61, %v3961_v7  ;;  %v4616_v61 = vsel %vm1078_vm15, 1.0, %v6595_v0  ;;  %vm3151_vm15 = vcmask 1043456  }
  0xdb   : > { %1989 = vrot.lane.b32.xlu1 %v3934_v56, %s3766_s17  ;;  %v4594_v54 = vpop.permute.xlu0 %1708  ;;  %6676 = vst [vmem:[#allocation118_spill] sm:$0xff] %v4616_v61  ;;  %v1464_v17 = vmul.f32 %v4616_v61, %v4000_v34 }
  0xdc   : > { %v4587_v12 = vpop.permute.xlu2 %1861  ;;  %6672 = vst [vmem:[#allocation114_spill] sm:$0xff] %v4594_v54  ;;  %v670_v54 = vadd.s32 176, %v4044_v15 }
  0xdd   : > { %6669 = vst [vmem:[#allocation111_spill] sm:$0xff] %v4587_v12  ;;  %v4589_v30 = vpop.permute.xlu1 %1710 }
  0xde   : > { %6670 = vst [vmem:[#allocation112_spill] sm:$0xff] %v4589_v30  ;;  %v838_v61 = vand.u32 15, %v670_v54 }
  0xe0   : > { %vm1086_vm4 = vcmp.ne.s32.totalorder %v838_v61, 0 }
  0xe1   : > { %1993 = vrot.lane.b32.xlu0 %v3970_v10, %s3766_s17  ;;  %v4646_v54 = vsel %vm1086_vm4, 1.0, %v6595_v0  ;;  %vm2983_vm4 = vcmask 228352  }
  0xe2   : > { %1997 = vrot.lane.b32.xlu2 %v3964_v8, %s3766_s17  ;;  %6682 = vst [vmem:[#allocation124_spill] sm:$0xff] %v4646_v54  ;;  %v1472_v61 = vmul.f32 %v4646_v54, %v4056_v21 }
  0xe3   : > { %1995 = vrot.lane.b32.xlu1 %v1462_v39, %s3766_s17  ;;  %v4611_v50 = vpop.permute.xlu0 %1845  ;;  %v810_v39 = vand.u32 15, %v666_v38 }
  0xe4   : > { %v4604_v12 = vpop.permute.xlu2 %1867  ;;  %6675 = vst [vmem:[#allocation117_spill] sm:$0xff] %v4611_v50 }
  0xe5   : > { %6673 = vst [vmem:[#allocation115_spill] sm:$0xff] %v4604_v12  ;;  %v4609_v30 = vpop.permute.xlu1 %1847  ;;  %vm1082_vm2 = vcmp.ne.s32.totalorder %v810_v39, 0  ;;  %v668_v12 = vadd.s32 160, %v4044_v15 }
  0xe6   : > { %6674 = vst [vmem:[#allocation116_spill] sm:$0xff] %v4609_v30  ;;  %v4631_v38 = vsel %vm1082_vm2, 1.0, %v6595_v0  ;;  %vm2950_vm2 = vcmask 195584  }
  0xe7   : > { %6679 = vst [vmem:[#allocation121_spill] sm:$0xff] %v4631_v38  ;;  %v824_v39 = vand.u32 15, %v668_v12 }
  0xe9   : > { %1999 = vrot.lane.b32.xlu0 %v1464_v17, %s3766_s17  ;;  %v672_v17 = vadd.s32 192, %v4044_v15  ;;  %vm1084_vm5 = vcmp.ne.s32.totalorder %v824_v39, 0 }
  0xea   : > { %2003 = vrot.lane.b32.xlu2 %v1466_v48, %s3766_s17  ;;  %v1468_v48 = vmul.f32 %v4631_v38, %v4021_v52  ;;  %v4655_v29 = vsel %vm1084_vm5, 1.0, %v6595_v0  ;;  %vm3016_vm5 = vcmask 261120  }
  0xeb   : > { %2001 = vrot.lane.b32.xlu1 %v3991_v31, %s3766_s17  ;;  %v4633_v42 = vpop.permute.xlu0 %1851  ;;  %6685 = vst [vmem:[#allocation127_spill] sm:$0xff] %v4655_v29  ;;  %v1470_v39 = vmul.f32 %v4655_v29, %v4062_v27  ;;  %v880_v29 = vand.u32 15, %v676_v46 }
  0xec   : > { %v4626_v30 = vpop.permute.xlu2 %1873  ;;  %6680 = vst [vmem:[#allocation122_spill] sm:$0xff] %v4633_v42 }
  0xed   : > { %6677 = vst [vmem:[#allocation119_spill] sm:$0xff] %v4626_v30  ;;  %v4628_v50 = vpop.permute.xlu1 %1853  ;;  %vm1092_vm3 = vcmp.ne.s32.totalorder %v880_v29, 0 }
  0xee   : > { %6678 = vst [vmem:[#allocation120_spill] sm:$0xff] %v4628_v50 }
  0xf1   : > { %2005 = vrot.lane.b32.xlu0 %v4030_v60, %s3766_s17 }
  0xf2   : > { %2009 = vrot.lane.b32.xlu2 %v4024_v53, %s3766_s17 }
  0xf3   : > { %2007 = vrot.lane.b32.xlu1 %v1468_v48, %s3766_s17  ;;  %v4650_v12 = vpop.permute.xlu0 %1857  ;;  %v852_v48 = vand.u32 15, %v672_v17 }
  0xf4   : > { %v4643_v50 = vpop.permute.xlu2 %1879  ;;  %6684 = vst [vmem:[#allocation126_spill] sm:$0xff] %v4650_v12  ;;  %v674_v12 = vadd.s32 208, %v4044_v15 }
  0xf5   : > { %6681 = vst [vmem:[#allocation123_spill] sm:$0xff] %v4643_v50  ;;  %v4648_v42 = vpop.permute.xlu1 %1859  ;;  %vm1088_vm6 = vcmp.ne.s32.totalorder %v852_v48, 0 }
  0xf6   : > { %6683 = vst [vmem:[#allocation125_spill] sm:$0xff] %v4648_v42  ;;  %v4670_v17 = vsel %vm1088_vm6, 1.0, %v6595_v0  ;;  %v866_v48 = vand.u32 15, %v674_v12  ;;  %vm3054_vm6 = vcmask 293888  }
  0xf7   : > { %6688 = vst [vmem:[#allocation130_spill] sm:$0xff] %v4670_v17 }
  0xf8   : > { %vm1090_vm8 = vcmp.ne.s32.totalorder %v866_v48, 0 }
  0xf9   : > { %2011 = vrot.lane.b32.xlu0 %v1470_v39, %s3766_s17  ;;  %v678_v39 = vadd.s32 240, %v4044_v15  ;;  %v4694_v15 = vsel %vm1090_vm8, 1.0, %v6595_v0 }
  0xfa   : > { %2015 = vrot.lane.b32.xlu2 %v1472_v61, %s3766_s17  ;;  %v1474_v61 = vmul.f32 %v4670_v17, %v4084_v1  ;;  %6694 = vst [vmem:[#allocation136_spill] sm:$0xff] %v4694_v15  ;;  %v1476_v48 = vmul.f32 %v4694_v15, %v4127_v43  ;;  %v4699_v17 = vld [vmem:[%s3844_s9 + $0xf8] sm:$0xff]  ;;  %s3771_s9 = smov 32  }
  0xfb   : > { %2013 = vrot.lane.b32.xlu1 %v4053_v20, %s3766_s17  ;;  %v4672_v50 = vpop.permute.xlu0 %1863 }
  0xfc   : > { %v4665_v42 = vpop.permute.xlu2 %1885  ;;  %6689 = vst [vmem:[#allocation131_spill] sm:$0xff] %v4672_v50 }
  0xfd   : > { %6686 = vst [vmem:[#allocation128_spill] sm:$0xff] %v4665_v42  ;;  %v4667_v54 = vpop.permute.xlu1 %1865 }
  0xfe   : > { %6687 = vst [vmem:[#allocation129_spill] sm:$0xff] %v4667_v54  ;;  %v4685_v54 = vsel %vm1092_vm3, 1.0, %v6595_v0 }
  0xff   : > { %6691 = vst [vmem:[#allocation133_spill] sm:$0xff] %v4685_v54  ;;  %v1478_v29 = vmul.f32 %v4685_v54, %v4119_v11 }
 0x101   : > { %2017 = vrot.lane.b32.xlu0 %v4090_v4, %s3766_s17 }
 0x102   : > { %2021 = vrot.lane.b32.xlu2 %v4087_v3, %s3766_s17 }
 0x103   : > { %2019 = vrot.lane.b32.xlu1 %v1474_v61, %s3766_s17  ;;  %v4689_v12 = vpop.permute.xlu0 %1869  ;;  %v894_v61 = vand.u32 15, %v678_v39 }
 0x104   : > { %v4682_v46 = vpop.permute.xlu2 %1891  ;;  %6693 = vst [vmem:[#allocation135_spill] sm:$0xff] %v4689_v12  ;;  %v6499_v12 = vrot.slane %v4699_v17, 7 }
 0x105   : > { %6690 = vst [vmem:[#allocation132_spill] sm:$0xff] %v4682_v46  ;;  %v4687_v50 = vpop.permute.xlu1 %1871  ;;  %vm1094_vm9 = vcmp.ne.s32.totalorder %v894_v61, 0 }
 0x106   : > { %6692 = vst [vmem:[#allocation134_spill] sm:$0xff] %v4687_v50  ;;  %v4711_v39 = vsel %vm1094_vm9, 1.0, %v6595_v0 }
 0x107   : > { %6697 = vst [vmem:[#allocation139_spill] sm:$0xff] %v4711_v39  ;;  %v1480_v46 = vmul.f32 %v4711_v39, %v4169_v35 }
 0x109   : > { %2023 = vrot.lane.b32.xlu0 %v1476_v48, %s3766_s17 }
 0x10a   : > { %2027 = vrot.lane.b32.xlu2 %v1478_v29, %s3766_s17  ;;  %v6699_v29 = vrot.slane %v4133_v62, 7 }
 0x10b   : > { %2025 = vrot.lane.b32.xlu1 %v4116_v24, %s3766_s17  ;;  %v4713_v15 = vpop.permute.xlu0 %1875 }
 0x10c   : > { %v4706_v54 = vpop.permute.xlu2 %1897  ;;  %6698 = vst [vmem:[#allocation140_spill] sm:$0xff] %v4713_v15  ;;  %v4720_v61 = vsel %vm500_vm0, %v6699_v29, %v6499_v12 }
 0x10d   : > { %6695 = vst [vmem:[#allocation137_spill] sm:$0xff] %v4706_v54  ;;  %v4708_v50 = vpop.permute.xlu1 %1877  ;;  %v6746_v54 = vld [vmem:[#allocation42_spill] sm:$0xff] }
 0x10e   : > { %6696 = vst [vmem:[#allocation138_spill] sm:$0xff] %v4708_v50 }
 0x10f   : > { %6700 = vst [vmem:[#allocation141_spill] sm:$0xff] %v4720_v61 }
 0x111   : > { %2029 = vrot.lane.b32.xlu0 %v4164_v2, %s3766_s17 }
 0x112   : > { %2033 = vrot.lane.b32.xlu2 %v4720_v61, %s3766_s17 }
 0x113   : > { %2031 = vrot.lane.b32.xlu1 %v1480_v46, %s3766_s17  ;;  %v4733_v15 = vpop.permute.xlu0 %1881 }
 0x114   : > { %v4729_v0 = vpop.permute.xlu2 %1903  ;;  %6703 = vst [vmem:[#allocation144_spill] sm:$0xff] %v4733_v15 }
 0x115   : > { %6701 = vst [vmem:[#allocation142_spill] sm:$0xff] %v4729_v0  ;;  %v4731_v48 = vpop.permute.xlu1 %1883 }
 0x116   : > { %6702 = vst [vmem:[#allocation143_spill] sm:$0xff] %v4731_v48 }
 0x119   : > { %2072 = vrot.lane.b32.xlu0 %v3931_v55, %s3767_s18 }
 0x11a   : > { %2076 = vrot.lane.b32.xlu2 %v3879_v25, %s3767_s18 }
 0x11b   : > { %2074 = vrot.lane.b32.xlu1 %v3888_v28, %s3767_s18  ;;  %v4745_v29 = vpop.permute.xlu0 %1887 }
 0x11c   : > { %v4741_v62 = vpop.permute.xlu2 %1973  ;;  %6706 = vst [vmem:[#allocation147_spill] sm:$0xff] %v4745_v29 }
 0x11d   : > { %6704 = vst [vmem:[#allocation145_spill] sm:$0xff] %v4741_v62  ;;  %v4743_v46 = vpop.permute.xlu1 %1889  ;;  %v6710_v62 = vld [vmem:[#allocation13_spill] sm:$0xff] }
 0x11e   : > { %6705 = vst [vmem:[#allocation146_spill] sm:$0xff] %v4743_v46 }
 0x121   : > { %2078 = vrot.lane.b32.xlu0 %v3897_v37, %s3767_s18 }
 0x122   : > { %2082 = vrot.lane.b32.xlu2 %v3906_v40, %s3767_s18 }
 0x123   : > { %2080 = vrot.lane.b32.xlu1 %v3873_v23, %s3767_s18  ;;  %v4757_v55 = vpop.permute.xlu0 %1893 }
 0x124   : > { %v4753_v28 = vpop.permute.xlu2 %1979  ;;  %6709 = vst [vmem:[#allocation150_spill] sm:$0xff] %v4757_v55  ;;  %v6715_v55 = vld [vmem:[#allocation23_spill] sm:$0xff] }
 0x125   : > { %6707 = vst [vmem:[#allocation148_spill] sm:$0xff] %v4753_v28  ;;  %v4755_v12 = vpop.permute.xlu1 %1895  ;;  %v6714_v28 = vld [vmem:[#allocation21_spill] sm:$0xff] }
 0x126   : > { %6708 = vst [vmem:[#allocation149_spill] sm:$0xff] %v4755_v12 }
 0x129   : > { %2084 = vrot.lane.b32.xlu0 %v6710_v62, %s3767_s18 }
 0x12a   : > { %2088 = vrot.lane.b32.xlu2 %v3958_v6, %s3767_s18  ;;  %v6716_v6 = vld [vmem:[#allocation17_spill] sm:$0xff] }
 0x12b   : > { %2086 = vrot.lane.b32.xlu1 %v3967_v9, %s3767_s18  ;;  %v4769_v15 = vpop.permute.xlu0 %1899 }
 0x12c   : > { %v4765_v29 = vpop.permute.xlu2 %1985  ;;  %6713 = vst [vmem:[#allocation153_spill] sm:$0xff] %v4769_v15  ;;  %v6721_v15 = vld [vmem:[#allocation26_spill] sm:$0xff] }
 0x12d   : > { %6711 = vst [vmem:[#allocation151_spill] sm:$0xff] %v4765_v29  ;;  %v4767_v46 = vpop.permute.xlu1 %1901  ;;  %v6720_v29 = vld [vmem:[#allocation25_spill] sm:$0xff] }
 0x12e   : > { %6712 = vst [vmem:[#allocation152_spill] sm:$0xff] %v4767_v46  ;;  %v6722_v46 = vld [vmem:[#allocation20_spill] sm:$0xff] }
 0x131   : > { %2090 = vrot.lane.b32.xlu0 %v6716_v6, %s3767_s18 }
 0x132   : > { %2094 = vrot.lane.b32.xlu2 %v6714_v28, %s3767_s18 }
 0x133   : > { %2092 = vrot.lane.b32.xlu1 %v6715_v55, %s3767_s18  ;;  %v4781_v48 = vpop.permute.xlu0 %1905 }
 0x134   : > { %v4777_v12 = vpop.permute.xlu2 %1991  ;;  %6719 = vst [vmem:[#allocation155_spill] sm:$0xff] %v4781_v48  ;;  %v6727_v48 = vld [vmem:[#allocation31_spill] sm:$0xff] }
 0x135   : > { %6717 = vst [vmem:[#allocation23_spill] sm:$0xff] %v4777_v12  ;;  %v4779_v9 = vpop.permute.xlu1 %1971 }
 0x136   : > { %6718 = vst [vmem:[#allocation154_spill] sm:$0xff] %v4779_v9  ;;  %v6726_v9 = vld [vmem:[#allocation29_spill] sm:$0xff] }
 0x139   : > { %2096 = vrot.lane.b32.xlu0 %v6722_v46, %s3767_s18  ;;  %v6755_v46 = vld [vmem:[#allocation48_spill] sm:$0xff] }
 0x13a   : > { %2100 = vrot.lane.b32.xlu2 %v6720_v29, %s3767_s18  ;;  %v6728_v29 = vld [vmem:[#allocation24_spill] sm:$0xff] }
 0x13b   : > { %2098 = vrot.lane.b32.xlu1 %v6721_v15, %s3767_s18  ;;  %v4795_v12 = vpop.permute.xlu0 %1975 }
 0x13c   : > { %v4791_v0 = vpop.permute.xlu2 %1997  ;;  %6725 = vst [vmem:[#allocation158_spill] sm:$0xff] %v4795_v12  ;;  %v6733_v12 = vld [vmem:[#allocation34_spill] sm:$0xff] }
 0x13d   : > { %6723 = vst [vmem:[#allocation156_spill] sm:$0xff] %v4791_v0  ;;  %v4793_v6 = vpop.permute.xlu1 %1977  ;;  %v6747_v0 = vld [vmem:[#allocation35_spill] sm:$0xff] }
 0x13e   : > { %6724 = vst [vmem:[#allocation157_spill] sm:$0xff] %v4793_v6  ;;  %v6732_v6 = vld [vmem:[#allocation33_spill] sm:$0xff] }
 0x141   : > { %2102 = vrot.lane.b32.xlu0 %v6728_v29, %s3767_s18 }
 0x142   : > { %2106 = vrot.lane.b32.xlu2 %v6726_v9, %s3767_s18  ;;  %v6734_v9 = vld [vmem:[#allocation28_spill] sm:$0xff] }
 0x143   : > { %2104 = vrot.lane.b32.xlu1 %v6727_v48, %s3767_s18  ;;  %v4807_v50 = vpop.permute.xlu0 %1981 }
 0x144   : > { %v4803_v15 = vpop.permute.xlu2 %2003  ;;  %6731 = vst [vmem:[#allocation161_spill] sm:$0xff] %v4807_v50  ;;  %v6739_v50 = vld [vmem:[#allocation38_spill] sm:$0xff] }
 0x145   : > { %6729 = vst [vmem:[#allocation159_spill] sm:$0xff] %v4803_v15  ;;  %v4805_v39 = vpop.permute.xlu1 %1983 }
 0x146   : > { %6730 = vst [vmem:[#allocation160_spill] sm:$0xff] %v4805_v39  ;;  %v6738_v39 = vld [vmem:[#allocation36_spill] sm:$0xff] }
 0x149   : > { %2108 = vrot.lane.b32.xlu0 %v6734_v9, %s3767_s18 }
 0x14a   : > { %2112 = vrot.lane.b32.xlu2 %v6732_v6, %s3767_s18  ;;  %v6740_v6 = vld [vmem:[#allocation32_spill] sm:$0xff] }
 0x14b   : > { %2110 = vrot.lane.b32.xlu1 %v6733_v12, %s3767_s18  ;;  %v4819_v15 = vpop.permute.xlu0 %1987  ;;  %v458_v12 = vld [vmem:[%s4828_s27] sm:$0xff] }
 0x14c   : > { %v4815_v48 = vpop.permute.xlu2 %2009  ;;  %6737 = vst [vmem:[#allocation164_spill] sm:$0xff] %v4819_v15 }
 0x14d   : > { %6735 = vst [vmem:[#allocation162_spill] sm:$0xff] %v4815_v48  ;;  %v4817_v29 = vpop.permute.xlu1 %1989 }
 0x14e   : > { %6736 = vst [vmem:[#allocation163_spill] sm:$0xff] %v4817_v29 }
 0x151   : > { %2114 = vrot.lane.b32.xlu0 %v6740_v6, %s3767_s18 }
 0x152   : > { %2118 = vrot.lane.b32.xlu2 %v6738_v39, %s3767_s18  ;;  %v4839_v39 = vmul.f32 0.0, %v458_v12  ;;  %v1482_v12 = vmul.f32 %v4121_v36, %v3914_v44  ;;  %v6756_v44 = vld [vmem:[#allocation40_spill] sm:$0xff] }
 0x153   : > { %2116 = vrot.lane.b32.xlu1 %v6739_v50, %s3767_s18  ;;  %v4836_v15 = vpop.permute.xlu0 %1993  ;;  %v6745_v50 = vld [vmem:[#allocation41_spill] sm:$0xff] }
 0x154   : > { %v4832_v48 = vpop.permute.xlu2 %2015  ;;  %6743 = vst [vmem:[#allocation167_spill] sm:$0xff] %v4836_v15  ;;  %v6751_v15 = vld [vmem:[#allocation39_spill] sm:$0xff] }
 0x155   : > { %6741 = vst [vmem:[#allocation165_spill] sm:$0xff] %v4832_v48  ;;  %v4834_v29 = vpop.permute.xlu1 %1995 }
 0x156   : > { %6742 = vst [vmem:[#allocation166_spill] sm:$0xff] %v4834_v29  ;;  %v6507_v29 = vrot.slane %v4839_v39, 7 }
 0x157   : > { %6744 = vst [vmem:[#allocation168_spill] sm:$0xff] %v4839_v39  ;;  %v2068_v39 = vrot.slane %v4720_v61, 1 }
 0x159   : > { %2120 = vrot.lane.b32.xlu0 %v6747_v0, %s3767_s18 }
 0x15a   : > { %2124 = vrot.lane.b32.xlu2 %v6745_v50, %s3767_s18  ;;  %v1483_v50 = vmul.f32 %v6751_v15, %v3870_v22 }
 0x15b   : > { %2122 = vrot.lane.b32.xlu1 %v6746_v54, %s3767_s18  ;;  %v4852_v48 = vpop.permute.xlu0 %1999  ;;  %v6752_v54 = vrot.slane %v4699_v17, 7 }
 0x15c   : > { %v4847_v62 = vpop.permute.xlu2 %2021  ;;  %6750 = vst [vmem:[#allocation171_spill] sm:$0xff] %v4852_v48  ;;  %v2201_v48 = vrot.slane %v1482_v12, 2  ;;  %v2202_v42 = vrot.slane %v1483_v50, 2  ;;  %v6761_v50 = vld [vmem:[#allocation45_spill] sm:$0xff] }
 0x15d   : > { %6748 = vst [vmem:[#allocation169_spill] sm:$0xff] %v4847_v62  ;;  %v4849_v6 = vpop.permute.xlu1 %2001  ;;  %v4863_v0 = vsel %vm500_vm0, %v6752_v54, %v6507_v29  ;;  %v6754_v62 = vld [vmem:[#allocation47_spill] sm:$0xff]  ;;  %v1486_v12 = vmul.f32 %v6761_v50, %v3854_v13  ;;  %v6770_v50 = vld [vmem:[#allocation50_spill] sm:$0xff] }
 0x15e   : > { %6749 = vst [vmem:[#allocation170_spill] sm:$0xff] %v4849_v6  ;;  %v6511_v17 = vrot.slane %v4863_v0, 1  ;;  %v2203_v29 = vsel %vm1777_vm7, %v2201_v48, %v2202_v42 }
 0x15f   : > { %6753 = vst [vmem:[#allocation39_spill] sm:$0xff] %v4863_v0  ;;  %v2208_v40 = vrot.slane %v1486_v12, 2  ;;  %v6771_v12 = vld [vmem:[#allocation51_spill] sm:$0xff] }
 0x161   : > { %2126 = vrot.lane.b32.xlu0 %v6756_v44, %s3767_s18  ;;  %v4887_v44 = vsel %vm1582_vm1, %v2068_v39, %v6511_v17 }
 0x162   : > { %2130 = vrot.lane.b32.xlu2 %v6754_v62, %s3767_s18  ;;  %v6760_v62 = vld [vmem:[#allocation44_spill] sm:$0xff] }
 0x163   : > { %2128 = vrot.lane.b32.xlu1 %v6755_v46, %s3767_s18  ;;  %v4877_v54 = vpop.permute.xlu0 %2005  ;;  %v1485_v46 = vmul.f32 %v6760_v62, %v3865_v19  ;;  %6762 = vst [vmem:[#allocation44_spill] sm:$0xff] %v4887_v44 }
 0x164   : > { %v4871_v9 = vpop.permute.xlu2 %2027  ;;  %6759 = vst [vmem:[#allocation174_spill] sm:$0xff] %v4877_v54 }
 0x165   : > { %6757 = vst [vmem:[#allocation172_spill] sm:$0xff] %v4871_v9  ;;  %v4875_v22 = vpop.permute.xlu1 %2007  ;;  %v6763_v9 = vld [vmem:[#allocation46_spill] sm:$0xff]  ;;  %v2206_v48 = vrot.slane %v1485_v46, 2 }
 0x166   : > { %6758 = vst [vmem:[#allocation173_spill] sm:$0xff] %v4875_v22  ;;  %v1484_v38 = vmul.f32 %v6763_v9, %v3862_v18  ;;  %v6764_v22 = vrot.slane %v4169_v35, 1 }
 0x168   : > { %v4894_v54 = vsel %vm1582_vm1, %v6764_v22, %v2068_v39  ;;  %v2204_v28 = vrot.slane %v1484_v38, 2  ;;  %v2209_v22 = vsel %vm1777_vm7, %v2206_v48, %v2208_v40  ;;  %v6769_v39 = vld [vmem:[#allocation49_spill] sm:$0xff] }
 0x169   : > { %6765 = vst [vmem:[#allocation46_spill] sm:$0xff] %v4894_v54  ;;  %2132 = vrot.lane.b32.xlu0 %v4894_v54, %s3767_s18  ;;  %v1487_v54 = vmul.f32 %v6771_v12, %v3857_v14  ;;  %v6775_v12 = vld [vmem:[#allocation53_spill] sm:$0xff] }
 0x16a   : > { %2266 = vrot.lane.b32.xlu2 %v2203_v29, %s3768_s28  ;;  %v1488_v29 = vmul.f32 %v6769_v39, %v3882_v26  ;;  %v2207_v46 = vsel %vm1777_vm7, %v2204_v28, %v2206_v48 }
 0x16b   : > { %2134 = vrot.lane.b32.xlu1 %v4887_v44, %s3767_s18  ;;  %v4905_v30 = vpop.permute.xlu0 %2011  ;;  %v1489_v44 = vmul.f32 %v6770_v50, %v3909_v41  ;;  %v2210_v39 = vrot.slane %v1487_v54, 2 }
 0x16c   : > { %v4901_v17 = vpop.permute.xlu2 %2033  ;;  %6768 = vst [vmem:[#allocation177_spill] sm:$0xff] %v4905_v30  ;;  %v2212_v38 = vrot.slane %v1488_v29, 2 }
 0x16d   : > { %6766 = vst [vmem:[#allocation175_spill] sm:$0xff] %v4901_v17  ;;  %v4903_v6 = vpop.permute.xlu1 %2013  ;;  %v2205_v17 = vsel %vm1777_vm7, %v2202_v42, %v2204_v28  ;;  %v2214_v30 = vrot.slane %v1489_v44, 2  ;;  %v1491_v42 = vmul.f32 %v6775_v12, %v3934_v56  ;;  %v6776_v28 = vld [vmem:[#allocation54_spill] sm:$0xff]  ;;  %v6777_v44 = vld [vmem:[#allocation55_spill] sm:$0xff] }
 0x16e   : > { %6767 = vst [vmem:[#allocation176_spill] sm:$0xff] %v4903_v6  ;;  %v2213_v29 = vsel %vm1777_vm7, %v2210_v39, %v2212_v38 }
 0x16f   : > { %v2215_v48 = vsel %vm1777_vm7, %v2212_v38, %v2214_v30  ;;  %v2218_v54 = vrot.slane %v1491_v42, 2 }
 0x171   : > { %2268 = vrot.lane.b32.xlu0 %v2205_v17, %s3768_s28  ;;  %v1490_v17 = vmul.f32 %v6777_v44, %v3941_v59  ;;  %v6781_v59 = vld [vmem:[#allocation57_spill] sm:$0xff] }
 0x172   : > { %2272 = vrot.lane.b32.xlu2 %v2209_v22, %s3768_s28  ;;  %v1492_v22 = vmul.f32 %v6776_v28, %v3937_v57 }
 0x173   : > { %2270 = vrot.lane.b32.xlu1 %v2207_v46, %s3768_s28  ;;  %v4923_v50 = vpop.permute.xlu0 %2017  ;;  %v2211_v46 = vsel %vm1777_vm7, %v2208_v40, %v2210_v39  ;;  %v2216_v56 = vrot.slane %v1490_v17, 2  ;;  %v1494_v40 = vmul.f32 %v6781_v59, %v3961_v7  ;;  %v6782_v39 = vld [vmem:[#allocation58_spill] sm:$0xff] }
 0x174   : > { %v4919_v6 = vpop.permute.xlu2 %2076  ;;  %6774 = vst [vmem:[#allocation180_spill] sm:$0xff] %v4923_v50 }
 0x175   : > { %6772 = vst [vmem:[#allocation178_spill] sm:$0xff] %v4919_v6  ;;  %v4921_v26 = vpop.permute.xlu1 %2019  ;;  %v2220_v6 = vrot.slane %v1492_v22, 2  ;;  %v2219_v42 = vsel %vm1777_vm7, %v2216_v56, %v2218_v54  ;;  %v6783_v22 = vld [vmem:[#allocation59_spill] sm:$0xff]  ;;  %v2224_v17 = vrot.slane %v1494_v40, 2 }
 0x176   : > { %6773 = vst [vmem:[#allocation179_spill] sm:$0xff] %v4921_v26 }
 0x177   : > { %v2221_v38 = vsel %vm1777_vm7, %v2218_v54, %v2220_v6 }
 0x179   : > { %2274 = vrot.lane.b32.xlu0 %v2211_v46, %s3768_s28  ;;  %v2217_v46 = vsel %vm1777_vm7, %v2214_v30, %v2216_v56  ;;  %v6788_v30 = vld [vmem:[#allocation62_spill] sm:$0xff] }
 0x17a   : > { %2278 = vrot.lane.b32.xlu2 %v2215_v48, %s3768_s28  ;;  %v1495_v48 = vmul.f32 %v6782_v39, %v3964_v8 }
 0x17b   : > { %2276 = vrot.lane.b32.xlu1 %v2213_v29, %s3768_s28  ;;  %v4941_v41 = vpop.permute.xlu0 %2023  ;;  %v1493_v29 = vmul.f32 %v6783_v22, %v3970_v10  ;;  %v6787_v22 = vld [vmem:[#allocation61_spill] sm:$0xff] }
 0x17c   : > { %v4937_v50 = vpop.permute.xlu2 %2082  ;;  %6780 = vst [vmem:[#allocation55_spill] sm:$0xff] %v4941_v41  ;;  %v1497_v56 = vmul.f32 %v6787_v22, %v3991_v31 }
 0x17d   : > { %6778 = vst [vmem:[#allocation53_spill] sm:$0xff] %v4937_v50  ;;  %v4939_v26 = vpop.permute.xlu1 %2025  ;;  %v2226_v50 = vrot.slane %v1495_v48, 2  ;;  %v2222_v59 = vrot.slane %v1493_v29, 2  ;;  %v6789_v48 = vld [vmem:[#allocation63_spill] sm:$0xff] }
 0x17e   : > { %6779 = vst [vmem:[#allocation54_spill] sm:$0xff] %v4939_v26  ;;  %v2230_v29 = vrot.slane %v1497_v56, 2 }
 0x17f   : > { %v2227_v54 = vsel %vm1777_vm7, %v2224_v17, %v2226_v50  ;;  %v2225_v40 = vsel %vm1777_vm7, %v2222_v59, %v2224_v17 }
 0x181   : > { %2280 = vrot.lane.b32.xlu0 %v2217_v46, %s3768_s28  ;;  %v2223_v46 = vsel %vm1777_vm7, %v2220_v6, %v2222_v59  ;;  %v6794_v6 = vld [vmem:[#allocation67_spill] sm:$0xff] }
 0x182   : > { %2284 = vrot.lane.b32.xlu2 %v2221_v38, %s3768_s28  ;;  %v1498_v38 = vmul.f32 %v6788_v30, %v3994_v32 }
 0x183   : > { %2282 = vrot.lane.b32.xlu1 %v2219_v42, %s3768_s28  ;;  %v4959_v39 = vpop.permute.xlu0 %2029  ;;  %v1496_v42 = vmul.f32 %v6789_v48, %v4000_v34  ;;  %v6793_v48 = vld [vmem:[#allocation66_spill] sm:$0xff] }
 0x184   : > { %v4955_v41 = vpop.permute.xlu2 %2088  ;;  %6786 = vst [vmem:[#allocation183_spill] sm:$0xff] %v4959_v39  ;;  %v1500_v59 = vmul.f32 %v6793_v48, %v4021_v52 }
 0x185   : > { %6784 = vst [vmem:[#allocation181_spill] sm:$0xff] %v4955_v41  ;;  %v4957_v26 = vpop.permute.xlu1 %2031  ;;  %v2232_v41 = vrot.slane %v1498_v38, 2  ;;  %v2228_v22 = vrot.slane %v1496_v42, 2  ;;  %v6795_v38 = vld [vmem:[#allocation69_spill] sm:$0xff] }
 0x186   : > { %6785 = vst [vmem:[#allocation182_spill] sm:$0xff] %v4957_v26  ;;  %v2236_v42 = vrot.slane %v1500_v59, 2 }
 0x187   : > { %v2233_v17 = vsel %vm1777_vm7, %v2230_v29, %v2232_v41  ;;  %v2231_v56 = vsel %vm1777_vm7, %v2228_v22, %v2230_v29 }
 0x189   : > { %2286 = vrot.lane.b32.xlu0 %v2223_v46, %s3768_s28  ;;  %v2229_v46 = vsel %vm1777_vm7, %v2226_v50, %v2228_v22  ;;  %v6799_v22 = vld [vmem:[#allocation72_spill] sm:$0xff] }
 0x18a   : > { %2290 = vrot.lane.b32.xlu2 %v2227_v54, %s3768_s28  ;;  %v1501_v54 = vmul.f32 %v6794_v6, %v4024_v53 }
 0x18b   : > { %2288 = vrot.lane.b32.xlu1 %v2225_v40, %s3768_s28  ;;  %v4977_v31 = vpop.permute.xlu0 %2072  ;;  %v1499_v40 = vmul.f32 %v6795_v38, %v4030_v60  ;;  %v6798_v60 = vld [vmem:[#allocation71_spill] sm:$0xff] }
 0x18c   : > { %v4973_v39 = vpop.permute.xlu2 %2094  ;;  %6792 = vst [vmem:[#allocation185_spill] sm:$0xff] %v4977_v31  ;;  %v1503_v50 = vmul.f32 %v6798_v60, %v4053_v20 }
 0x18d   : > { %6790 = vst [vmem:[#allocation62_spill] sm:$0xff] %v4973_v39  ;;  %v4975_v26 = vpop.permute.xlu1 %2074  ;;  %v2238_v39 = vrot.slane %v1501_v54, 2  ;;  %v2234_v31 = vrot.slane %v1499_v40, 2  ;;  %v6800_v54 = vld [vmem:[#allocation74_spill] sm:$0xff] }
 0x18e   : > { %6791 = vst [vmem:[#allocation184_spill] sm:$0xff] %v4975_v26  ;;  %v2242_v40 = vrot.slane %v1503_v50, 2 }
 0x18f   : > { %v2239_v29 = vsel %vm1777_vm7, %v2236_v42, %v2238_v39  ;;  %v2237_v59 = vsel %vm1777_vm7, %v2234_v31, %v2236_v42 }
 0x191   : > { %2292 = vrot.lane.b32.xlu0 %v2229_v46, %s3768_s28  ;;  %v2235_v46 = vsel %vm1777_vm7, %v2232_v41, %v2234_v31  ;;  %v1506_v41 = vmul.f32 %v4400_v51, %v4084_v1  ;;  %v6803_v31 = vld [vmem:[#allocation77_spill] sm:$0xff] }
 0x192   : > { %2296 = vrot.lane.b32.xlu2 %v2233_v17, %s3768_s28  ;;  %v1504_v17 = vmul.f32 %v6799_v22, %v4056_v21 }
 0x193   : > { %2294 = vrot.lane.b32.xlu1 %v2231_v56, %s3768_s28  ;;  %v4995_v6 = vpop.permute.xlu0 %2078  ;;  %v1502_v56 = vmul.f32 %v6800_v54, %v4062_v27 }
 0x194   : > { %v4991_v26 = vpop.permute.xlu2 %2100  ;;  %6797 = vst [vmem:[#allocation186_spill] sm:$0xff] %v4995_v6 }
 0x195   : > { %v4993_v48 = vpop.permute.xlu1 %2080  ;;  %v2240_v60 = vrot.slane %v1502_v56, 2  ;;  %v2248_v56 = vrot.slane %v1506_v41, 2 }
 0x196   : > { %6796 = vst [vmem:[#allocation69_spill] sm:$0xff] %v4993_v48  ;;  %v2244_v48 = vrot.slane %v1504_v17, 2  ;;  %v1505_v17 = vmul.f32 %v4410_v47, %v4090_v4  ;;  %v6806_v47 = vld [vmem:[#allocation82_spill] sm:$0xff] }
 0x197   : > { %v2243_v50 = vsel %vm1777_vm7, %v2240_v60, %v2242_v40 }
 0x198   : > { %v2245_v42 = vsel %vm1777_vm7, %v2242_v40, %v2244_v48 }
 0x199   : > { %2298 = vrot.lane.b32.xlu0 %v2235_v46, %s3768_s28 }
 0x19a   : > { %2302 = vrot.lane.b32.xlu2 %v2239_v29, %s3768_s28  ;;  %v1507_v29 = vmul.f32 %v6803_v31, %v4087_v3 }
 0x19b   : > { %2300 = vrot.lane.b32.xlu1 %v2237_v59, %s3768_s28  ;;  %v5013_v22 = vpop.permute.xlu0 %2084  ;;  %v2241_v59 = vsel %vm1777_vm7, %v2238_v39, %v2240_v60  ;;  %v1509_v60 = vmul.f32 %v6806_v47, %v4116_v24  ;;  %v6807_v39 = vld [vmem:[#allocation83_spill] sm:$0xff] }
 0x19c   : > { %v5009_v6 = vpop.permute.xlu2 %2106  ;;  %6802 = vst [vmem:[#allocation188_spill] sm:$0xff] %v5013_v22  ;;  %v2250_v46 = vrot.slane %v1507_v29, 2  ;;  %v2246_v22 = vrot.slane %v1505_v17, 2  ;;  %v1508_v29 = vmul.f32 %v4441_v58, %v4127_v43  ;;  %v6809_v58 = vld [vmem:[#allocation89_spill] sm:$0xff] }
 0x19d   : > { %v5011_v20 = vpop.permute.xlu1 %2086  ;;  %v2254_v17 = vrot.slane %v1509_v60, 2 }
 0x19e   : > { %6801 = vst [vmem:[#allocation187_spill] sm:$0xff] %v5011_v20  ;;  %v2251_v40 = vsel %vm1777_vm7, %v2248_v56, %v2250_v46  ;;  %v2249_v41 = vsel %vm1777_vm7, %v2246_v22, %v2248_v56  ;;  %v2252_v47 = vrot.slane %v1508_v29, 2 }
 0x1a0   : > { %v2255_v60 = vsel %vm1777_vm7, %v2252_v47, %v2254_v17 }
 0x1a1   : > { %2304 = vrot.lane.b32.xlu0 %v2241_v59, %s3768_s28 }
 0x1a2   : > { %2308 = vrot.lane.b32.xlu2 %v2245_v42, %s3768_s28  ;;  %v1510_v42 = vmul.f32 %v6807_v39, %v4119_v11 }
 0x1a3   : > { %2306 = vrot.lane.b32.xlu1 %v2243_v50, %s3768_s28  ;;  %v5031_v31 = vpop.permute.xlu0 %2090  ;;  %v2247_v50 = vsel %vm1777_vm7, %v2244_v48, %v2246_v22  ;;  %v1512_v48 = vmul.f32 %v6809_v58, %v4169_v35  ;;  %v6810_v22 = vld [vmem:[#allocation90_spill] sm:$0xff] }
 0x1a4   : > { %v5027_v20 = vpop.permute.xlu2 %2112  ;;  %6805 = vst [vmem:[#allocation190_spill] sm:$0xff] %v5031_v31  ;;  %v2256_v59 = vrot.slane %v1510_v42, 2  ;;  %v6811_v42 = vld [vmem:[#allocation92_spill] sm:$0xff] }
 0x1a5   : > { %v5029_v54 = vpop.permute.xlu1 %2092  ;;  %v2260_v29 = vrot.slane %v1512_v48, 2 }
 0x1a6   : > { %6804 = vst [vmem:[#allocation189_spill] sm:$0xff] %v5029_v54  ;;  %v2257_v56 = vsel %vm1777_vm7, %v2254_v17, %v2256_v59 }
 0x1a9   : > { %2310 = vrot.lane.b32.xlu0 %v2247_v50, %s3768_s28  ;;  %v2253_v50 = vsel %vm1777_vm7, %v2250_v46, %v2252_v47  ;;  %v1514_v46 = vmul.f32 %v4455_v63, %v4863_v0  ;;  %v6817_v0 = vld [vmem:[#allocation170_spill] sm:$0xff] }
 0x1aa   : > { %2314 = vrot.lane.b32.xlu2 %v2251_v40, %s3768_s28  ;;  %v1513_v40 = vmul.f32 %v6810_v22, %v4720_v61 }
 0x1ab   : > { %2312 = vrot.lane.b32.xlu1 %v2249_v41, %s3768_s28  ;;  %v5049_v39 = vpop.permute.xlu0 %2096  ;;  %v1511_v41 = vmul.f32 %v6811_v42, %v4164_v2 }
 0x1ac   : > { %v5045_v54 = vpop.permute.xlu2 %2118  ;;  %6808 = vst [vmem:[#allocation191_spill] sm:$0xff] %v5049_v39  ;;  %v2262_v39 = vrot.slane %v1513_v40, 2  ;;  %v2264_v40 = vrot.slane %v1514_v46, 2 }
 0x1ad   : > { %v5047_v31 = vpop.permute.xlu1 %2098  ;;  %v2258_v58 = vrot.slane %v1511_v41, 2  ;;  %v1515_v41 = vmul.f32 %v4514_v45, %v3862_v18 }
 0x1ae   : > { %v2263_v17 = vsel %vm1777_vm7, %v2260_v29, %v2262_v39 }
 0x1af   : > { %v2261_v42 = vsel %vm1777_vm7, %v2258_v58, %v2260_v29  ;;  %v2259_v47 = vsel %vm1777_vm7, %v2256_v59, %v2258_v58  ;;  %v2265_v58 = vsel %vm1777_vm7, %v2262_v39, %v2264_v40  ;;  %v1547_v59 = vmul.f32 %v4121_v36, %v3862_v18 }
 0x1b1   : > { %2316 = vrot.lane.b32.xlu0 %v2253_v50, %s3768_s28  ;;  %v2624_v39 = vrot.slane %v1547_v59, 2 }
 0x1b2   : > { %2320 = vrot.lane.b32.xlu2 %v2257_v56, %s3768_s28 }
 0x1b3   : > { %2318 = vrot.lane.b32.xlu1 %v2255_v60, %s3768_s28  ;;  %v5067_v22 = vpop.permute.xlu0 %2102 }
 0x1b4   : > { %v5063_v24 = vpop.permute.xlu2 %2124 }
 0x1b5   : > { %v5065_v35 = vpop.permute.xlu1 %2104 }
 0x1b9   : > { %2322 = vrot.lane.b32.xlu0 %v2259_v47, %s3768_s28 }
 0x1ba   : > { %2326 = vrot.lane.b32.xlu2 %v2263_v17, %s3768_s28 }
 0x1bb   : > { %2324 = vrot.lane.b32.xlu1 %v2261_v42, %s3768_s28  ;;  %v5081_v60 = vpop.permute.xlu0 %2108  ;;  %v1548_v42 = vmul.f32 %v6751_v15, %v3865_v19  ;;  %v1549_v15 = vmul.f32 %v6763_v9, %v3854_v13  ;;  %v1517_v9 = vmul.f32 %v4538_v49, %v3854_v13 }
 0x1bc   : > { %v5077_v56 = vpop.permute.xlu2 %2130 }
 0x1bd   : > { %v5079_v48 = vpop.permute.xlu1 %2110  ;;  %v2625_v17 = vrot.slane %v1548_v42, 2  ;;  %v2627_v40 = vrot.slane %v1549_v15, 2 }
 0x1bf   : > { %v2626_v36 = vsel %vm1777_vm7, %v2624_v39, %v2625_v17  ;;  %v2628_v59 = vsel %vm1777_vm7, %v2625_v17, %v2627_v40  ;;  %v1556_v17 = vmul.f32 %v6775_v12, %v3970_v10 }
 0x1c1   : > { %2328 = vrot.lane.b32.xlu0 %v2265_v58, %s3768_s28  ;;  %v1523_v58 = vmul.f32 %v4577_v16, %v3937_v57 }
 0x1c2   : > { %2495 = vrot.lane.b32.xlu2 %v3879_v25, %s3769_s30 }
 0x1c3   : > { %2394 = vrot.lane.b32.xlu1 %v1515_v41, %s3770_s8  ;;  %v5098_v47 = vpop.permute.xlu0 %2114 }
 0x1c4   : > { %v5094_v50 = vpop.permute.xlu2 %2266 }
 0x1c5   : > { %v5096_v29 = vpop.permute.xlu1 %2116 }
 0x1c9   : > { %2689 = vrot.lane.b32.xlu0 %v2626_v36, %s3771_s9 }
 0x1ca   : > { %2497 = vrot.lane.b32.xlu2 %v3897_v37, %s3769_s30  ;;  %v1550_v37 = vmul.f32 %v6760_v62, %v3857_v14  ;;  %v5133_v62 = vmul.f32 %v6777_v44, %v3937_v57 }
 0x1cb   : > { %2396 = vrot.lane.b32.xlu1 %v3865_v19, %s3770_s8  ;;  %v5112_v41 = vpop.permute.xlu0 %2120 }
 0x1cc   : > { %v5108_v25 = vpop.permute.xlu2 %2272  ;;  %v2629_v42 = vrot.slane %v1550_v37, 2  ;;  %v2641_v37 = vrot.slane %v1556_v17, 2  ;;  %v5167_v17 = vmul.f32 %v6776_v28, %v3961_v7  ;;  %v6818_v28 = vld [vmem:[#allocation21_spill] sm:$0xff] }
 0x1cd   : > { %v5110_v46 = vpop.permute.xlu1 %2122 }
 0x1ce   : > { %v2630_v63 = vsel %vm1777_vm7, %v2627_v40, %v2629_v42  ;;  %v6535_v40 = vrot.slane %v5133_v62, 2 }
 0x1d0   : > { %v2642_v12 = vsel %vm1777_vm7, %v6535_v40, %v2641_v37  ;;  %v2801_v40 = vsel %vm2785_vm10, %v3964_v8, %v4496_v5 }
 0x1d1   : > { %2691 = vrot.lane.b32.xlu0 %v2628_v59, %s3771_s9  ;;  %v1531_v59 = vmul.f32 %v4607_v33, %v4021_v52 }
 0x1d2   : > { %2410 = vrot.lane.b32.xlu2 %v1523_v58, %s3770_s8 }
 0x1d3   : > { %2398 = vrot.lane.b32.xlu1 %v1517_v9, %s3770_s8  ;;  %v5128_v15 = vpop.permute.xlu0 %2126 }
 0x1d4   : > { %v5124_v39 = vpop.permute.xlu2 %2278 }
 0x1d5   : > { %6812 = vst [vmem:[#allocation192_spill] sm:$0xff] %v5124_v39  ;;  %v5126_v36 = vpop.permute.xlu1 %2128 }
 0x1d9   : > { %2499 = vrot.lane.b32.xlu0 %v3873_v23, %s3769_s30 }
 0x1da   : > { %2693 = vrot.lane.b32.xlu2 %v2630_v63, %s3771_s9 }
 0x1db   : > { %2511 = vrot.lane.b32.xlu1 %v6715_v55, %s3769_s30  ;;  %v5147_v44 = vpop.permute.xlu0 %2132 }
 0x1dc   : > { %v5142_v58 = vpop.permute.xlu2 %2284 }
 0x1dd   : > { %v5144_v9 = vpop.permute.xlu1 %2134 }
 0x1e1   : > { %2705 = vrot.lane.b32.xlu0 %v2642_v12, %s3771_s9  ;;  %v6814_v12 = vld [vmem:[#allocation7_spill] sm:$0xff] }
 0x1e2   : > { %2412 = vrot.lane.b32.xlu2 %v3970_v10, %s3770_s8 }
 0x1e3   : > { %2400 = vrot.lane.b32.xlu1 %v3857_v14, %s3770_s8  ;;  %v5161_v55 = vpop.permute.xlu0 %2268  ;;  %v6815_v14 = vld [vmem:[#allocation45_spill] sm:$0xff] }
 0x1e4   : > { %v5157_v23 = vpop.permute.xlu2 %2290  ;;  %v5174_v39 = vmul.f32 %v6815_v14, %v6814_v12  ;;  %v6819_v14 = vld [vmem:[#allocation10_spill] sm:$0xff] }
 0x1e5   : > { %6813 = vst [vmem:[#allocation193_spill] sm:$0xff] %v5157_v23  ;;  %v5159_v63 = vpop.permute.xlu1 %2270  ;;  %v6816_v23 = vld [vmem:[#allocation119_spill] sm:$0xff] }
 0x1e6   : > { %v2834_v13 = vsel %vm2818_vm11, %v2801_v40, %v6816_v23  ;;  %v6545_v40 = vrot.slane %v5167_v17, 2  ;;  %v6820_v23 = vld [vmem:[#allocation121_spill] sm:$0xff] }
 0x1e7   : > { %v2867_v57 = vsel %vm2851_vm12, %v2834_v13, %v6817_v0  ;;  %v6546_v0 = vrot.slane %v5174_v39, 2 }
 0x1e8   : > { %v2900_v5 = vsel %vm2884_vm13, %v2867_v57, %v5067_v22  ;;  %v2644_v57 = vsel %vm1777_vm7, %v2641_v37, %v6545_v40  ;;  %v6824_v22 = vld [vmem:[#allocation98_spill] sm:$0xff]  ;;  %v6827_v37 = vld [vmem:[#allocation28_spill] sm:$0xff]  ;;  %v6828_v40 = vld [vmem:[#allocation173_spill] sm:$0xff] }
 0x1e9   : > { %2501 = vrot.lane.b32.xlu0 %v6819_v14, %s3769_s30  ;;  %v2632_v18 = vsel %vm1777_vm7, %v2629_v42, %v6546_v0 }
 0x1ea   : > { %2426 = vrot.lane.b32.xlu2 %v1531_v59, %s3770_s8  ;;  %v1274_v59 = vmul.f32 %v6820_v23, %v3994_v32 }
 0x1eb   : > { %2513 = vrot.lane.b32.xlu1 %v6818_v28, %s3769_s30  ;;  %v5196_v28 = vpop.permute.xlu0 %2274 }
 0x1ec   : > { %v2297_v61 = vpop.permute.xlu2 %2296  ;;  %6823 = vst [vmem:[#allocation119_spill] sm:$0xff] %v5196_v28  ;;  %v2804_v14 = vsel %vm2785_vm10, %v1274_v59, %v6824_v22 }
 0x1ed   : > { %v5191_v19 = vsel %vm2917_vm14, %v2900_v5, %v2297_v61  ;;  %v5193_v13 = vpop.permute.xlu1 %2276  ;;  %v5208_v61 = vmul.f32 %v6788_v30, %v4021_v52  ;;  %v5212_v5 = vmul.f32 %v6795_v38, %v4024_v53 }
 0x1ee   : > { %6821 = vst [vmem:[#allocation7_spill] sm:$0xff] %v5191_v19  ;;  %v6826_v19 = vld [vmem:[#allocation123_spill] sm:$0xff] }
 0x1ef   : > { %6822 = vst [vmem:[#allocation45_spill] sm:$0xff] %v5193_v13  ;;  %v2837_v13 = vsel %vm2818_vm11, %v2804_v14, %v6826_v19  ;;  %v6548_v19 = vrot.slane %v5208_v61, 2  ;;  %v6549_v14 = vrot.slane %v5212_v5, 2 }
 0x1f0   : > { %6825 = vst [vmem:[#allocation170_spill] sm:$0xff] %v5208_v61  ;;  %v2870_v59 = vsel %vm2851_vm12, %v2837_v13, %v6828_v40  ;;  %v6831_v40 = vld [vmem:[#allocation108_spill] sm:$0xff]  ;;  %v6836_v61 = vld [vmem:[#allocation130_spill] sm:$0xff] }
 0x1f1   : > { %v2903_v42 = vsel %vm2884_vm13, %v2870_v59, %v5081_v60  ;;  %2695 = vrot.lane.b32.xlu0 %v2632_v18, %s3771_s9  ;;  %v1525_v13 = vmul.f32 %v6831_v40, %v3961_v7  ;;  %v6833_v59 = vld [vmem:[#allocation102_spill] sm:$0xff] }
 0x1f2   : > { %2527 = vrot.lane.b32.xlu2 %v6827_v37, %s3769_s30  ;;  %v2807_v18 = vsel %vm2785_vm10, %v4024_v53, %v6833_v59 }
 0x1f3   : > { %2707 = vrot.lane.b32.xlu1 %v2644_v57, %s3771_s9  ;;  %v5231_v37 = vpop.permute.xlu0 %2280  ;;  %v6832_v57 = vld [vmem:[#allocation100_spill] sm:$0xff] }
 0x1f4   : > { %v2303_v30 = vpop.permute.xlu2 %2302  ;;  %6830 = vst [vmem:[#allocation10_spill] sm:$0xff] %v5231_v37  ;;  %v1519_v60 = vmul.f32 %v6832_v57, %v6814_v12  ;;  %v6835_v37 = vld [vmem:[#allocation176_spill] sm:$0xff]  ;;  %v1280_v57 = vmul.f32 %v6836_v61, %v4056_v21 }
 0x1f5   : > { %v5225_v38 = vsel %vm2917_vm14, %v2903_v42, %v2303_v30  ;;  %v5227_v22 = vpop.permute.xlu1 %2282  ;;  %v2658_v42 = vsel %vm1777_vm7, %v6548_v19, %v6549_v14  ;;  %v6834_v30 = vld [vmem:[#allocation128_spill] sm:$0xff]  ;;  %v6844_v14 = vld [vmem:[#allocation51_spill] sm:$0xff] }
 0x1f6   : > { %6829 = vst [vmem:[#allocation21_spill] sm:$0xff] %v5225_v38  ;;  %v2840_v0 = vsel %vm2818_vm11, %v2807_v18, %v6834_v30 }
 0x1f7   : > { %v2873_v38 = vsel %vm2851_vm12, %v2840_v0, %v6835_v37  ;;  %v6841_v37 = vld [vmem:[#allocation59_spill] sm:$0xff] }
 0x1f8   : > { %v2906_v28 = vsel %vm2884_vm13, %v2873_v38, %v5098_v47  ;;  %v6842_v47 = vld [vmem:[#allocation106_spill] sm:$0xff] }
 0x1f9   : > { %2721 = vrot.lane.b32.xlu0 %v2658_v42, %s3771_s9  ;;  %v2810_v38 = vsel %vm2785_vm10, %v1280_v57, %v6842_v47  ;;  %v6843_v42 = vld [vmem:[#allocation11_spill] sm:$0xff] }
 0x1fa   : > { %2414 = vrot.lane.b32.xlu2 %v1525_v13, %s3770_s8  ;;  %v6839_v13 = vld [vmem:[#allocation118_spill] sm:$0xff]  ;;  %v5273_v40 = vmul.f32 %v6844_v14, %v6843_v42  ;;  %v6849_v47 = vld [vmem:[#allocation179_spill] sm:$0xff] }
 0x1fb   : > { %2402 = vrot.lane.b32.xlu1 %v1519_v60, %s3770_s8  ;;  %v1270_v30 = vmul.f32 %v6839_v13, %v3961_v7  ;;  %v5263_v0 = vpop.permute.xlu0 %2286  ;;  %v5267_v60 = vmul.f32 %v6841_v37, %v3964_v8  ;;  %v6847_v7 = vld [vmem:[#allocation91_spill] sm:$0xff]  ;;  %v6850_v13 = vld [vmem:[#allocation20_spill] sm:$0xff] }
 0x1fc   : > { %v2309_v59 = vpop.permute.xlu2 %2308  ;;  %6840 = vst [vmem:[#allocation123_spill] sm:$0xff] %v5263_v0  ;;  %v2799_v37 = vsel %vm2785_vm10, %v3970_v10, %v6847_v7  ;;  %v6848_v0 = vld [vmem:[#allocation134_spill] sm:$0xff]  ;;  %v6853_v10 = vld [vmem:[#allocation13_spill] sm:$0xff] }
 0x1fd   : > { %v5257_v19 = vsel %vm2917_vm14, %v2906_v28, %v2309_v59  ;;  %v5259_v18 = vpop.permute.xlu1 %2288  ;;  %v6845_v28 = vld [vmem:[#allocation70_spill] sm:$0xff] }
 0x1fe   : > { %6837 = vst [vmem:[#allocation121_spill] sm:$0xff] %v5257_v19  ;;  %v2800_v59 = vsel %vm2785_vm10, %v1270_v30, %v6845_v28  ;;  %v6846_v19 = vld [vmem:[#allocation132_spill] sm:$0xff]  ;;  %v6851_v30 = vld [vmem:[#allocation135_spill] sm:$0xff] }
 0x1ff   : > { %6838 = vst [vmem:[#allocation98_spill] sm:$0xff] %v5259_v18  ;;  %v2843_v18 = vsel %vm2818_vm11, %v2810_v38, %v6846_v19  ;;  %v2833_v57 = vsel %vm2818_vm11, %v2800_v59, %v6848_v0  ;;  %v2832_v28 = vsel %vm2818_vm11, %v2799_v37, %v6851_v30  ;;  %v6852_v19 = vld [vmem:[#allocation171_spill] sm:$0xff]  ;;  %v6551_v0 = vrot.slane %v5267_v60, 2  ;;  %v6854_v59 = vld [vmem:[#allocation156_spill] sm:$0xff] }
 0x200   : > { %v2876_v14 = vsel %vm2851_vm12, %v2843_v18, %v6849_v47  ;;  %v2866_v38 = vsel %vm2851_vm12, %v2833_v57, %v6852_v19  ;;  %v2865_v18 = vsel %vm2851_vm12, %v2832_v28, %v6854_v59  ;;  %v6550_v57 = vrot.slane %v5273_v40, 2 }
 0x201   : > { %2503 = vrot.lane.b32.xlu0 %v6853_v10, %s3769_s30  ;;  %v1272_v19 = vmul.f32 %v4607_v33, %v4000_v34  ;;  %v6858_v10 = vrot.slane %v5174_v39, 2  ;;  %v6859_v33 = vld [vmem:[#allocation66_spill] sm:$0xff] }
 0x202   : > { %2428 = vrot.lane.b32.xlu2 %v4024_v53, %s3770_s8  ;;  %v2909_v53 = vsel %vm2884_vm13, %v2876_v14, %v5112_v41  ;;  %v2898_v41 = vsel %vm2884_vm13, %v2865_v18, %v5047_v31  ;;  %v5332_v59 = vmul.f32 %v6859_v33, %v4062_v27  ;;  %v6860_v18 = vld [vmem:[#allocation76_spill] sm:$0xff]  ;;  %v6865_v39 = vld [vmem:[#allocation138_spill] sm:$0xff] }
 0x203   : > { %2515 = vrot.lane.b32.xlu1 %v6850_v13, %s3769_s30  ;;  %v2899_v13 = vsel %vm2884_vm13, %v2866_v38, %v4991_v26  ;;  %v2293_v14 = vpop.permute.xlu0 %2292  ;;  %v6856_v26 = vrot.slane %v5167_v17, 2 }
 0x204   : > { %v2315_v7 = vpop.permute.xlu2 %2314  ;;  %v5315_v28 = vsel %vm2917_vm14, %v2898_v41, %v2293_v14  ;;  %v6863_v14 = vld [vmem:[#allocation34_spill] sm:$0xff] }
 0x205   : > { %v5304_v37 = vsel %vm2917_vm14, %v2909_v53, %v2315_v7  ;;  %v2295_v47 = vpop.permute.xlu1 %2294  ;;  %v2646_v38 = vsel %vm1777_vm7, %v6856_v26, %v6551_v0  ;;  %v6857_v53 = vld [vmem:[#allocation110_spill] sm:$0xff]  ;;  %v2634_v7 = vsel %vm1777_vm7, %v6858_v10, %v6550_v57  ;;  %v6864_v26 = vld [vmem:[#allocation95_spill] sm:$0xff] }
 0x206   : > { %v5310_v30 = vsel %vm2917_vm14, %v2899_v13, %v2295_v47  ;;  %v2813_v31 = vsel %vm2785_vm10, %v4087_v3, %v6857_v53  ;;  %v6861_v13 = vld [vmem:[#allocation22_spill] sm:$0xff]  ;;  %v6862_v47 = vld [vmem:[#allocation137_spill] sm:$0xff]  ;;  %v2802_v53 = vsel %vm2785_vm10, %v1272_v19, %v6864_v26  ;;  %v6867_v0 = vld [vmem:[#allocation139_spill] sm:$0xff] }
 0x207   : > { %6855 = vst [vmem:[#allocation28_spill] sm:$0xff] %v5310_v30  ;;  %v2803_v17 = vsel %vm2785_vm10, %v6861_v13, %v6860_v18  ;;  %v2846_v41 = vsel %vm2818_vm11, %v2813_v31, %v6862_v47  ;;  %v6866_v57 = vld [vmem:[#allocation54_spill] sm:$0xff]  ;;  %v1286_v18 = vmul.f32 %v6867_v0, %v4119_v11  ;;  %v6868_v30 = vld [vmem:[#allocation140_spill] sm:$0xff]  ;;  %v6870_v26 = vld [vmem:[#allocation159_spill] sm:$0xff] }
 0x208   : > { %v2836_v10 = vsel %vm2818_vm11, %v2803_v17, %v6865_v39  ;;  %v2879_v33 = vsel %vm2851_vm12, %v2846_v41, %v6866_v57  ;;  %v2835_v31 = vsel %vm2818_vm11, %v2802_v53, %v6868_v30  ;;  %v6869_v47 = vld [vmem:[#allocation174_spill] sm:$0xff]  ;;  %v6552_v30 = vrot.slane %v5332_v59, 2  ;;  %v6872_v53 = vld [vmem:[#allocation127_spill] sm:$0xff] }
 0x209   : > { %v2912_v19 = vsel %vm2884_vm13, %v2879_v33, %v5128_v15  ;;  %2697 = vrot.lane.b32.xlu0 %v2634_v7, %s3771_s9  ;;  %v2868_v57 = vsel %vm2851_vm12, %v2835_v31, %v6870_v26 }
 0x20a   : > { %2529 = vrot.lane.b32.xlu2 %v6863_v14, %s3769_s30  ;;  %v2869_v14 = vsel %vm2851_vm12, %v2836_v10, %v6869_v47  ;;  %v1276_v10 = vmul.f32 %v6872_v53, %v4021_v52  ;;  %v2901_v15 = vsel %vm2884_vm13, %v2868_v57, %v5065_v35  ;;  %v6875_v52 = vld [vmem:[#allocation81_spill] sm:$0xff]  ;;  %v6876_v35 = vld [vmem:[#allocation142_spill] sm:$0xff] }
 0x20b   : > { %2709 = vrot.lane.b32.xlu1 %v2646_v38, %s3771_s9  ;;  %v2902_v38 = vsel %vm2884_vm13, %v2869_v14, %v5009_v6  ;;  %v2299_v7 = vpop.permute.xlu0 %2298  ;;  %v6873_v6 = vld [vmem:[#allocation114_spill] sm:$0xff]  ;;  %v6874_v14 = vrot.slane %v5212_v5, 2  ;;  %v6877_v57 = vld [vmem:[#allocation97_spill] sm:$0xff] }
 0x20c   : > { %v2321_v17 = vpop.permute.xlu2 %2320  ;;  %v5373_v31 = vsel %vm2917_vm14, %v2901_v15, %v2299_v7  ;;  %v2816_v47 = vsel %vm2785_vm10, %v1286_v18, %v6873_v6  ;;  %v6879_v18 = vld [vmem:[#allocation143_spill] sm:$0xff]  ;;  %v6880_v7 = vld [vmem:[#allocation182_spill] sm:$0xff] }
 0x20d   : > { %v5362_v41 = vsel %vm2917_vm14, %v2912_v19, %v2321_v17  ;;  %v2301_v39 = vpop.permute.xlu1 %2300  ;;  %v2660_v19 = vsel %vm1777_vm7, %v6874_v14, %v6552_v30  ;;  %v2806_v17 = vsel %vm2785_vm10, %v1276_v10, %v6875_v52  ;;  %v2849_v26 = vsel %vm2818_vm11, %v2816_v47, %v6876_v35  ;;  %v6881_v10 = vld [vmem:[#allocation144_spill] sm:$0xff]  ;;  %v6882_v47 = vld [vmem:[#allocation177_spill] sm:$0xff]  ;;  %v6883_v35 = vld [vmem:[#allocation162_spill] sm:$0xff] }
 0x20e   : > { %6871 = vst [vmem:[#allocation173_spill] sm:$0xff] %v5362_v41  ;;  %v5370_v33 = vsel %vm2917_vm14, %v2902_v38, %v2301_v39  ;;  %v6878_v38 = vld [vmem:[#allocation27_spill] sm:$0xff]  ;;  %v2839_v15 = vsel %vm2818_vm11, %v2806_v17, %v6879_v18  ;;  %v2882_v5 = vsel %vm2851_vm12, %v2849_v26, %v6880_v7 }
 0x20f   : > { %v2805_v39 = vsel %vm2785_vm10, %v6878_v38, %v6877_v57  ;;  %v2872_v14 = vsel %vm2851_vm12, %v2839_v15, %v6882_v47  ;;  %v6887_v47 = vld [vmem:[#allocation16_spill] sm:$0xff] }
 0x210   : > { %v2838_v6 = vsel %vm2818_vm11, %v2805_v39, %v6881_v10  ;;  %v2905_v26 = vsel %vm2884_vm13, %v2872_v14, %v5027_v20  ;;  %v6885_v20 = vld [vmem:[#allocation124_spill] sm:$0xff]  ;;  %v6888_v14 = vld [vmem:[#allocation49_spill] sm:$0xff] }
 0x211   : > { %2723 = vrot.lane.b32.xlu0 %v2660_v19, %s3771_s9  ;;  %v2871_v17 = vsel %vm2851_vm12, %v2838_v6, %v6883_v35  ;;  %v3053_v19 = vld [vmem:[%s6369_s2 + $0x20] sm:$0xf] }
 0x212   : > { %2416 = vrot.lane.b32.xlu2 %v3964_v8, %s3770_s8  ;;  %v2915_v8 = vsel %vm2884_vm13, %v2882_v5, %v5147_v44  ;;  %v2904_v39 = vsel %vm2884_vm13, %v2871_v17, %v5079_v48  ;;  %v1533_v44 = vmul.f32 %v6820_v23, %v4062_v27  ;;  %v1278_v5 = vmul.f32 %v6885_v20, %v4062_v27  ;;  %v6886_v48 = vld [vmem:[#allocation57_spill] sm:$0xff]  ;;  %v3051_v27 = vld [vmem:[%s6369_s2 + $0x10] sm:$0xff]  ;;  %v6890_v35 = vld [vmem:[#allocation30_spill] sm:$0xff] }
 0x213   : > { %2404 = vrot.lane.b32.xlu1 %v6843_v42, %s3770_s8  ;;  %v2305_v15 = vpop.permute.xlu0 %2304  ;;  %v5428_v6 = vmul.f32 %v6886_v48, %v4000_v34  ;;  %3654 = vmatpush.msk.msra.mxu0 %vm3151_vm15, %v3053_v19  ;;  %v3052_v23 = vld [vmem:[%s6369_s2 + $0x18] sm:$0xff]  ;;  %v6893_v48 = vld [vmem:[#allocation26_spill] sm:$0xff] }
 0x214   : > { %v2327_v52 = vpop.permute.xlu2 %2326  ;;  %v5424_v10 = vsel %vm2917_vm14, %v2904_v39, %v2305_v15  ;;  %3689 = vmatpush.msk.msra.mxu1 %vm3151_vm15, %v3053_v19  ;;  %3690 = vmatpush.msk.msra.mxu2 %vm3151_vm15, %v3053_v19  ;;  %v6892_v39 = vld [vmem:[#allocation146_spill] sm:$0xff] }
 0x215   : > { %v5409_v57 = vsel %vm2917_vm14, %v2915_v8, %v2327_v52  ;;  %v2307_v18 = vpop.permute.xlu1 %2306  ;;  %v5435_v8 = vmul.f32 %v6888_v14, %v6887_v47  ;;  %3691 = vmatpush.msk.msra.mxu3 %vm3151_vm15, %v3053_v19  ;;  %3167 = vmatpush.msra.mxu0 %v3052_v23  ;;  %v6889_v52 = vld [vmem:[#allocation88_spill] sm:$0xff]  ;;  %v6553_v19 = vrot.slane %v5428_v6, 2  ;;  %v6894_v14 = vld [vmem:[#allocation147_spill] sm:$0xff] }
 0x216   : > { %6884 = vst [vmem:[#allocation102_spill] sm:$0xff] %v5409_v57  ;;  %v5414_v7 = vsel %vm2917_vm14, %v2905_v26, %v2307_v18  ;;  %3692 = vmatpush.msra.mxu1 %v3052_v23  ;;  %v2809_v17 = vsel %vm2785_vm10, %v6890_v35, %v6889_v52  ;;  %3693 = vmatpush.msra.mxu2 %v3052_v23  ;;  %v6891_v26 = vld [vmem:[#allocation101_spill] sm:$0xff]  ;;  %v6895_v57 = vld [vmem:[#allocation180_spill] sm:$0xff] }
 0x217   : > { %v2808_v18 = vsel %vm2785_vm10, %v1278_v5, %v6891_v26  ;;  %v2842_v15 = vsel %vm2818_vm11, %v2809_v17, %v6892_v39  ;;  %3168 = vmatpush.msra.mxu0 %v3051_v27  ;;  %v3050_v17 = vld [vmem:[%s6369_s2 + $0x8] sm:$0xff]  ;;  %v6897_v26 = vld [vmem:[#allocation165_spill] sm:$0xff]  ;;  %3694 = vmatpush.msra.mxu3 %v3052_v23  ;;  %v6903_v23 = vrot.slane %v5435_v8, 2 }
 0x218   : > { %v2841_v30 = vsel %vm2818_vm11, %v2808_v18, %v6894_v14  ;;  %v2875_v52 = vsel %vm2851_vm12, %v2842_v15, %v6895_v57  ;;  %3695 = vmatpush.msra.mxu1 %v3051_v27  ;;  %3696 = vmatpush.msra.mxu2 %v3051_v27  ;;  %v6898_v57 = vld [vmem:[#allocation136_spill] sm:$0xff] }
 0x219   : > { %v2874_v39 = vsel %vm2851_vm12, %v2841_v30, %v6897_v26  ;;  %v2908_v18 = vsel %vm2884_vm13, %v2875_v52, %v5045_v54  ;;  %3169 = vmatpush.msra.mxu0 %v3050_v17  ;;  %v1282_v15 = vmul.f32 %v6898_v57, %v4084_v1  ;;  %v3049_v30 = vld [vmem:[%s6369_s2] sm:$0xff]  ;;  %v6901_v52 = vrot.slane %v5267_v60, 2  ;;  %3697 = vmatpush.msra.mxu3 %v3051_v27 }
 0x21a   : > { %2430 = vrot.lane.b32.xlu2 %v1533_v44, %s3770_s8  ;;  %v6896_v44 = vld [vmem:[#allocation19_spill] sm:$0xff]  ;;  %v2907_v14 = vsel %vm2884_vm13, %v2874_v39, %v5096_v29  ;;  %3698 = vmatpush.msra.mxu1 %v3050_v17  ;;  %v6905_v60 = vld [vmem:[#allocation94_spill] sm:$0xff] }
 0x21b   : > { %2517 = vrot.lane.b32.xlu1 %v6893_v48, %s3769_s30  ;;  %2505 = vrot.lane.b32.xlu0 %v6896_v44, %s3769_s30  ;;  %v2311_v44 = vpop.permute.xlu0 %2310  ;;  %v2648_v26 = vsel %vm1777_vm7, %v6901_v52, %v6553_v19  ;;  %v6902_v29 = vld [vmem:[#allocation67_spill] sm:$0xff]  ;;  %v6906_v52 = vld [vmem:[#allocation104_spill] sm:$0xff] }
 0x21c   : > { %v5457_v41 = vpop.permute.xlu2 %2495  ;;  %v5478_v54 = vsel %vm2917_vm14, %v2907_v14, %v2311_v44  ;;  %v5487_v39 = vmul.f32 %v6902_v29, %v6890_v35  ;;  %3170 = vmatpush.msra.mxu0 %v3049_v30  ;;  %3699 = vmatpush.msra.mxu2 %v3050_v17  ;;  %v2812_v44 = vsel %vm2785_vm10, %v1282_v15, %v6905_v60 }
 0x21d   : > { %v2313_v48 = vpop.permute.xlu1 %2312  ;;  %6900 = vst [vmem:[#allocation176_spill] sm:$0xff] %v5478_v54  ;;  %3701 = vmatpush.msra.mxu1 %v3049_v30  ;;  %3700 = vmatpush.msra.mxu3 %v3050_v17  ;;  %v2811_v29 = vsel %vm2785_vm10, %v4090_v4, %v6906_v52  ;;  %v6937_v54 = vld [vmem:[#allocation50_spill] sm:$0xff] }
 0x21e   : > { %v5472_v5 = vsel %vm2917_vm14, %v2908_v18, %v2313_v48  ;;  %v1539_v18 = vmul.f32 %v6836_v61, %v4127_v43  ;;  %v6904_v48 = vrot.slane %v5273_v40, 2  ;;  %3702 = vmatpush.msra.mxu2 %v3049_v30  ;;  %v6907_v61 = vld [vmem:[#allocation149_spill] sm:$0xff]  ;;  %v6554_v40 = vrot.slane %v5487_v39, 2 }
 0x21f   : > { %6899 = vst [vmem:[#allocation128_spill] sm:$0xff] %v5472_v5  ;;  %v2845_v19 = vsel %vm2818_vm11, %v2812_v44, %v6907_v61  ;;  %3703 = vmatpush.msra.mxu3 %v3049_v30  ;;  %v6912_v30 = vrot.slane %v5332_v59, 2  ;;  %v6917_v59 = vld [vmem:[#allocation152_spill] sm:$0xff]  ;;  %v6932_v5 = vld [vmem:[#allocation99_spill] sm:$0xff] }
 0x220   : > { %v2636_v14 = vsel %vm1777_vm7, %v6904_v48, %v6903_v23  ;;  %v6908_v23 = vld [vmem:[#allocation150_spill] sm:$0xff]  ;;  %v6909_v48 = vld [vmem:[#allocation55_spill] sm:$0xff] }
 0x221   : > { %v2844_v27 = vsel %vm2818_vm11, %v2811_v29, %v6908_v23  ;;  %v2878_v15 = vsel %vm2851_vm12, %v2845_v19, %v6909_v48  ;;  %v6911_v19 = vld [vmem:[#allocation133_spill] sm:$0xff] }
 0x222   : > { %2711 = vrot.lane.b32.xlu2 %v2648_v26, %s3771_s9  ;;  %v6910_v26 = vld [vmem:[#allocation169_spill] sm:$0xff]  ;;  %v2911_v44 = vsel %vm2884_vm13, %v2878_v15, %v5063_v24  ;;  %v2662_v24 = vsel %vm1777_vm7, %v6912_v30, %v6554_v40  ;;  %v6920_v30 = vld [vmem:[#allocation183_spill] sm:$0xff] }
 0x223   : > { %2699 = vrot.lane.b32.xlu1 %v2636_v14, %s3771_s9  ;;  %2442 = vrot.lane.b32.xlu0 %v1539_v18, %s3770_s8  ;;  %v2877_v60 = vsel %vm2851_vm12, %v2844_v27, %v6910_v26  ;;  %v2317_v61 = vpop.permute.xlu0 %2316  ;;  %v1284_v18 = vmul.f32 %v6911_v19, %v4127_v43  ;;  %v5534_v27 = vmul.f32 %v4400_v51, %v4127_v43  ;;  %v6914_v48 = vld [vmem:[#allocation77_spill] sm:$0xff]  ;;  %v6915_v26 = vld [vmem:[#allocation96_spill] sm:$0xff] }
 0x224   : > { %v5511_v17 = vpop.permute.xlu2 %2497  ;;  %v2910_v52 = vsel %vm2884_vm13, %v2877_v60, %v5110_v46  ;;  %v6913_v46 = vld [vmem:[#allocation37_spill] sm:$0xff] }
 0x225   : > { %v2319_v14 = vpop.permute.xlu1 %2318  ;;  %v5525_v23 = vsel %vm2917_vm14, %v2910_v52, %v2317_v61  ;;  %v5538_v15 = vmul.f32 %v6914_v48, %v6913_v46  ;;  %v2815_v60 = vsel %vm2785_vm10, %v6913_v46, %v6915_v26  ;;  %v6918_v61 = vld [vmem:[#allocation41_spill] sm:$0xff] }
 0x226   : > { %v5520_v29 = vsel %vm2917_vm14, %v2911_v44, %v2319_v14  ;;  %v6916_v44 = vld [vmem:[#allocation109_spill] sm:$0xff]  ;;  %v2848_v52 = vsel %vm2818_vm11, %v2815_v60, %v6917_v59  ;;  %v6555_v59 = vrot.slane %v5534_v27, 2 }
 0x227   : > { %v2814_v14 = vsel %vm2785_vm10, %v1284_v18, %v6916_v44  ;;  %v6919_v43 = vld [vmem:[#allocation153_spill] sm:$0xff]  ;;  %v2881_v48 = vsel %vm2851_vm12, %v2848_v52, %v6920_v30 }
 0x228   : > { %v2847_v51 = vsel %vm2818_vm11, %v2814_v14, %v6919_v43  ;;  %v6921_v40 = vld [vmem:[#allocation33_spill] sm:$0xff]  ;;  %v2914_v60 = vsel %vm2884_vm13, %v2881_v48, %v5077_v56 }
 0x229   : > { %v6926_v56 = vld [vmem:[#allocation105_spill] sm:$0xff] }
 0x22a   : > { %2725 = vrot.lane.b32.xlu2 %v2662_v24, %s3771_s9  ;;  %v6922_v24 = vld [vmem:[#allocation172_spill] sm:$0xff]  ;;  %v1521_v48 = vmul.f32 %v6926_v56, %v6887_v47 }
 0x22b   : > { %2543 = vrot.lane.b32.xlu1 %v6918_v61, %s3769_s30  ;;  %2531 = vrot.lane.b32.xlu0 %v6921_v40, %s3769_s30  ;;  %v2880_v18 = vsel %vm2851_vm12, %v2847_v51, %v6922_v24  ;;  %v6556_v61 = vrot.slane %v5538_v15, 2  ;;  %v2323_v52 = vpop.permute.xlu0 %2322  ;;  %v6924_v40 = vld [vmem:[#allocation113_spill] sm:$0xff] }
 0x22c   : > { %v5556_v26 = vpop.permute.xlu2 %2410  ;;  %v2913_v14 = vsel %vm2884_vm13, %v2880_v18, %v5126_v36  ;;  %v1527_v30 = vmul.f32 %v6924_v40, %v4000_v34  ;;  %v6927_v36 = vld [vmem:[#allocation9_spill] sm:$0xff] }
 0x22d   : > { %v2325_v44 = vpop.permute.xlu1 %2324  ;;  %v5572_v51 = vsel %vm2917_vm14, %v2913_v14, %v2323_v52  ;;  %v2674_v24 = vsel %vm1777_vm7, %v6555_v59, %v6556_v61  ;;  %v1256_v18 = vmul.f32 %v4514_v45, %v6927_v36  ;;  %v6931_v45 = vld [vmem:[#allocation75_spill] sm:$0xff] }
 0x22e   : > { %v5567_v43 = vsel %vm2917_vm14, %v2914_v60, %v2325_v44  ;;  %6925 = vst [vmem:[#allocation59_spill] sm:$0xff] %v5572_v51  ;;  %v6928_v60 = vld [vmem:[#allocation112_spill] sm:$0xff]  ;;  %v6929_v44 = vld [vmem:[#allocation155_spill] sm:$0xff]  ;;  %v6935_v51 = vld [vmem:[#allocation154_spill] sm:$0xff] }
 0x22f   : > { %6923 = vst [vmem:[#allocation130_spill] sm:$0xff] %v5567_v43  ;;  %v2817_v34 = vsel %vm2785_vm10, %v4164_v2, %v6928_v60  ;;  %v6930_v43 = vld [vmem:[#allocation175_spill] sm:$0xff] }
 0x230   : > { %v2850_v14 = vsel %vm2818_vm11, %v2817_v34, %v6929_v44 }
 0x231   : > { %v2883_v59 = vsel %vm2851_vm12, %v2850_v14, %v6930_v43  ;;  %v6936_v14 = vld [vmem:[#allocation14_spill] sm:$0xff] }
 0x232   : > { %2418 = vrot.lane.b32.xlu2 %v1527_v30, %s3770_s8  ;;  %v2786_v30 = vsel %vm2785_vm10, %v1256_v18, %v6931_v45  ;;  %v2916_v36 = vsel %vm2884_vm13, %v2883_v59, %v5144_v9  ;;  %v5612_v18 = vmul.f32 %v6937_v54, %v6936_v14  ;;  %v6938_v45 = vld [vmem:[#allocation185_spill] sm:$0xff]  ;;  %v6940_v54 = vld [vmem:[#allocation18_spill] sm:$0xff] }
 0x233   : > { %2406 = vrot.lane.b32.xlu1 %v1521_v48, %s3770_s8  ;;  %2737 = vrot.lane.b32.xlu0 %v2674_v24, %s3771_s9  ;;  %v2329_v60 = vpop.permute.xlu0 %2328  ;;  %v2819_v48 = vsel %vm2818_vm11, %v2786_v30, %v6932_v5  ;;  %v6934_v24 = vld [vmem:[#allocation58_spill] sm:$0xff]  ;;  %v6939_v30 = vld [vmem:[#allocation25_spill] sm:$0xff] }
 0x234   : > { %v5591_v52 = vpop.permute.xlu2 %2693  ;;  %v5602_v34 = vsel %vm2917_vm14, %v2916_v36, %v2329_v60  ;;  %v5606_v44 = vmul.f32 %v6934_v24, %v6861_v13  ;;  %v2852_v43 = vsel %vm2851_vm12, %v2819_v48, %v6935_v51  ;;  %v6941_v48 = vld [vmem:[#allocation80_spill] sm:$0xff] }
 0x235   : > { %v2395_v61 = vpop.permute.xlu1 %2394  ;;  %6933 = vst [vmem:[#allocation106_spill] sm:$0xff] %v5602_v34  ;;  %v2885_v9 = vsel %vm2884_vm13, %v2852_v43, %v6938_v45  ;;  %v6943_v45 = vld [vmem:[#allocation117_spill] sm:$0xff] }
 0x236   : > { %v2918_v5 = vsel %vm2917_vm14, %v2885_v9, %v5094_v50  ;;  %v2649_v51 = vrot.slane %v5606_v44, 2  ;;  %v6945_v50 = vld [vmem:[#allocation74_spill] sm:$0xff]  ;;  %v6973_v44 = vrot.slane %v5612_v18, 2 }
 0x237   : > { %v2951_v59 = vsel %vm2950_vm2, %v2918_v5, %v2395_v61  ;;  %v5644_v34 = vmul.f32 %v6945_v50, %v4056_v21 }
 0x238   : > { %v2984_v43 = vsel %vm2983_vm4, %v2951_v59, %v5457_v41  ;;  %v6947_v41 = vrot.slane %v5612_v18, 2  ;;  %v6948_v59 = vrot.slane %v5435_v8, 2 }
 0x23a   : > { %2432 = vrot.lane.b32.xlu2 %v6890_v35, %s3770_s8  ;;  %v6942_v35 = vld [vmem:[#allocation8_spill] sm:$0xff] }
 0x23b   : > { %2519 = vrot.lane.b32.xlu1 %v6939_v30, %s3769_s30  ;;  %2507 = vrot.lane.b32.xlu0 %v6940_v54, %s3769_s30  ;;  %v2787_v61 = vsel %vm2785_vm10, %v6942_v35, %v6941_v48  ;;  %v2690_v24 = vpop.permute.xlu0 %2689  ;;  %v6944_v30 = vrot.slane %v5428_v6, 2  ;;  %v6946_v48 = vld [vmem:[#allocation145_spill] sm:$0xff] }
 0x23c   : > { %v5626_v36 = vpop.permute.xlu2 %2412  ;;  %v2820_v9 = vsel %vm2818_vm11, %v2787_v61, %v6943_v45  ;;  %v3017_v5 = vsel %vm3016_vm5, %v2984_v43, %v2690_v24  ;;  %v2638_v61 = vsel %vm1777_vm7, %v6948_v59, %v6947_v41  ;;  %v6949_v24 = vld [vmem:[#allocation184_spill] sm:$0xff]  ;;  %v2663_v45 = vrot.slane %v5644_v34, 2 }
 0x23d   : > { %v2397_v60 = vpop.permute.xlu1 %2396  ;;  %v2650_v54 = vsel %vm1777_vm7, %v6944_v30, %v2649_v51  ;;  %v2853_v35 = vsel %vm2851_vm12, %v2820_v9, %v6946_v48  ;;  %3655 = vmatmul.msk.f32.vlgmr.msra.gmra.mxu0 %vm3054_vm6, %v3017_v5  ;;  %v6950_v9 = vld [vmem:[#allocation12_spill] sm:$0xff] }
 0x23e   : > { %v2886_v6 = vsel %vm2884_vm13, %v2853_v35, %v6949_v24  ;;  %v1258_v5 = vmul.f32 %v4538_v49, %v6950_v9  ;;  %v6953_v49 = vld [vmem:[#allocation85_spill] sm:$0xff]  ;;  %v6955_v24 = vld [vmem:[#allocation158_spill] sm:$0xff] }
 0x23f   : > { %v2919_v43 = vsel %vm2917_vm14, %v2886_v6, %v5161_v55  ;;  %v5681_v59 = vmul.f32 %v6953_v49, %v4119_v11 }
 0x240   : > { %v2952_v50 = vsel %vm2950_vm2, %v2919_v43, %v2397_v60  ;;  %v6951_v60 = vrot.slane %v5487_v39, 2  ;;  %v6956_v39 = vld [vmem:[#allocation40_spill] sm:$0xff]  ;;  %v1264_v43 = vmul.f32 %v4577_v16, %v6814_v12 }
 0x241   : > { %v2985_v55 = vsel %vm2983_vm4, %v2952_v50, %v5511_v17  ;;  %v6957_v50 = vld [vmem:[#allocation178_spill] sm:$0xff]  ;;  %v6959_v16 = vld [vmem:[#allocation60_spill] sm:$0xff] }
 0x242   : > { %2713 = vrot.lane.b32.xlu2 %v2650_v54, %s3771_s9  ;;  %v2664_v35 = vsel %vm1777_vm7, %v6951_v60, %v2663_v45  ;;  %v2675_v60 = vrot.slane %v5681_v59, 2  ;;  %v2794_v12 = vsel %vm2785_vm10, %v1264_v43, %v6959_v16 }
 0x243   : > { %2701 = vrot.lane.b32.xlu1 %v2638_v61, %s3771_s9  ;;  %2444 = vrot.lane.b32.xlu0 %v6913_v46, %s3770_s8  ;;  %v2692_v48 = vpop.permute.xlu0 %2691  ;;  %v6952_v46 = vld [vmem:[#allocation78_spill] sm:$0xff]  ;;  %v6954_v61 = vld [vmem:[#allocation116_spill] sm:$0xff] }
 0x244   : > { %v5664_v8 = vpop.permute.xlu2 %2426  ;;  %v3018_v54 = vsel %vm3016_vm5, %v2985_v55, %v2692_v48  ;;  %v2788_v41 = vsel %vm2785_vm10, %v1258_v5, %v6952_v46  ;;  %v6958_v5 = vld [vmem:[#allocation32_spill] sm:$0xff] }
 0x245   : > { %v2399_v30 = vpop.permute.xlu1 %2398  ;;  %3656 = vmatmul.msk.f32.gmra.mxu0 %vm3054_vm6, %v3018_v54  ;;  %v2821_v17 = vsel %vm2818_vm11, %v2788_v41, %v6954_v61  ;;  %v6960_v61 = vld [vmem:[#allocation125_spill] sm:$0xff]  ;;  %v2967_v34 = vsel %vm2950_vm2, %v5373_v31, %v5664_v8  ;;  %v6984_v8 = vld [vmem:[#allocation31_spill] sm:$0xff] }
 0x246   : > { %v2854_v6 = vsel %vm2851_vm12, %v2821_v17, %v6955_v24  ;;  %v2827_v17 = vsel %vm2818_vm11, %v2794_v12, %v6960_v61  ;;  %v6962_v24 = vld [vmem:[#allocation164_spill] sm:$0xff]  ;;  %v6967_v12 = vld [vmem:[#allocation86_spill] sm:$0xff] }
 0x247   : > { %v2887_v9 = vsel %vm2884_vm13, %v2854_v6, %v6957_v50  ;;  %v2860_v6 = vsel %vm2851_vm12, %v2827_v17, %v6962_v24  ;;  %v6968_v17 = vld [vmem:[#allocation71_spill] sm:$0xff]  ;;  %v6970_v24 = vld [vmem:[#allocation6_spill] sm:$0xff] }
 0x248   : > { %v2920_v55 = vsel %vm2917_vm14, %v2887_v9, %v5159_v63  ;;  %v6961_v63 = vrot.slane %v5538_v15, 2 }
 0x24a   : > { %2727 = vrot.lane.b32.xlu2 %v2664_v35, %s3771_s9  ;;  %v2953_v35 = vsel %vm2950_vm2, %v2920_v55, %v2399_v30  ;;  %v2676_v30 = vsel %vm1777_vm7, %v6961_v63, %v2675_v60  ;;  %v1535_v55 = vmul.f32 %v6872_v53, %v4056_v21  ;;  %v5755_v63 = vmul.f32 %v6968_v17, %v4090_v4 }
 0x24b   : > { %2545 = vrot.lane.b32.xlu1 %v6956_v39, %s3769_s30  ;;  %2533 = vrot.lane.b32.xlu0 %v6958_v5, %s3769_s30  ;;  %v2500_v46 = vpop.permute.xlu0 %2499  ;;  %v6963_v39 = vld [vmem:[#allocation181_spill] sm:$0xff] }
 0x24c   : > { %v5696_v48 = vpop.permute.xlu2 %2527  ;;  %v2986_v41 = vsel %vm2983_vm4, %v2953_v35, %v2500_v46  ;;  %v6964_v46 = vld [vmem:[#allocation63_spill] sm:$0xff]  ;;  %v2665_v18 = vrot.slane %v5755_v63, 2 }
 0x24d   : > { %v2512_v54 = vpop.permute.xlu1 %2511  ;;  %v3019_v49 = vsel %vm3016_vm5, %v2986_v41, %v5591_v52  ;;  %v2893_v52 = vsel %vm2884_vm13, %v2860_v6, %v6963_v39  ;;  %v5736_v41 = vmul.f32 %v6964_v46, %v3994_v32  ;;  %v6971_v39 = vld [vmem:[#allocation111_spill] sm:$0xff] }
 0x24e   : > { %3657 = vmatmul.msk.f32.gmra.mxu0 %vm3054_vm6, %v3019_v49  ;;  %v2926_v43 = vsel %vm2917_vm14, %v2893_v52, %v5227_v22  ;;  %v6965_v22 = vld [vmem:[#allocation24_spill] sm:$0xff]  ;;  %v2795_v49 = vsel %vm2785_vm10, %v6843_v42, %v6967_v12  ;;  %v6972_v42 = vrot.slane %v5133_v62, 2 }
 0x24f   : > { %v2959_v50 = vsel %vm2950_vm2, %v2926_v43, %v5556_v26  ;;  %v2651_v26 = vrot.slane %v5736_v41, 2  ;;  %v2828_v52 = vsel %vm2818_vm11, %v2795_v49, %v6971_v39  ;;  %v1541_v43 = vmul.f32 %v6898_v57, %v4119_v11  ;;  %v6977_v41 = vld [vmem:[#allocation190_spill] sm:$0xff] }
 0x250   : > { %v2992_v5 = vsel %vm2983_vm4, %v2959_v50, %v2512_v54  ;;  %v6966_v54 = vld [vmem:[#allocation17_spill] sm:$0xff]  ;;  %v6974_v50 = vld [vmem:[#allocation103_spill] sm:$0xff]  ;;  %v6978_v11 = vld [vmem:[#allocation186_spill] sm:$0xff] }
 0x251   : > { %v2652_v61 = vsel %vm1777_vm7, %v2649_v51, %v2651_v26  ;;  %v2640_v51 = vsel %vm1777_vm7, %v6973_v44, %v6972_v42  ;;  %v3000_v42 = vsel %vm2983_vm4, %v2967_v34, %v5696_v48  ;;  %v6985_v48 = vld [vmem:[#allocation108_spill] sm:$0xff] }
 0x252   : > { %2420 = vrot.lane.b32.xlu2 %v6861_v13, %s3770_s8 }
 0x253   : > { %2408 = vrot.lane.b32.xlu1 %v6936_v14, %s3770_s8  ;;  %2739 = vrot.lane.b32.xlu0 %v2676_v30, %s3771_s9  ;;  %v2706_v13 = vpop.permute.xlu0 %2705  ;;  %v6969_v30 = vld [vmem:[#allocation68_spill] sm:$0xff] }
 0x254   : > { %v5726_v15 = vpop.permute.xlu2 %2414  ;;  %v3025_v35 = vsel %vm3016_vm5, %v2992_v5, %v2706_v13  ;;  %v2789_v6 = vsel %vm2785_vm10, %v6970_v24, %v6969_v30  ;;  %v6975_v13 = vld [vmem:[#allocation163_spill] sm:$0xff] }
 0x255   : > { %v2401_v9 = vpop.permute.xlu1 %2400  ;;  %3663 = vmatmul.msk.f32.vlgmr.msra.gmra.mxu1 %vm3054_vm6, %v3025_v35  ;;  %v2822_v5 = vsel %vm2818_vm11, %v2789_v6, %v6974_v50  ;;  %v6976_v35 = vld [vmem:[#allocation157_spill] sm:$0xff]  ;;  %v6982_v50 = vld [vmem:[#allocation118_spill] sm:$0xff] }
 0x256   : > { %v2855_v46 = vsel %vm2851_vm12, %v2822_v5, %v6976_v35  ;;  %v1529_v5 = vmul.f32 %v6982_v50, %v3994_v32  ;;  %v1266_v35 = vmul.f32 %v6985_v48, %v6887_v47  ;;  %v6998_v50 = vld [vmem:[#allocation119_spill] sm:$0xff] }
 0x257   : > { %v2888_v62 = vsel %vm2884_vm13, %v2855_v46, %v6978_v11  ;;  %v6986_v46 = vld [vmem:[#allocation4_spill] sm:$0xff] }
 0x25a   : > { %2434 = vrot.lane.b32.xlu2 %v1535_v55, %s3770_s8  ;;  %v2861_v55 = vsel %vm2851_vm12, %v2828_v52, %v6975_v13  ;;  %v6983_v13 = vld [vmem:[#allocation61_spill] sm:$0xff] }
 0x25b   : > { %2521 = vrot.lane.b32.xlu1 %v6965_v22, %s3769_s30  ;;  %2509 = vrot.lane.b32.xlu0 %v6966_v54, %s3769_s30  ;;  %v2502_v53 = vpop.permute.xlu0 %2501  ;;  %v2894_v22 = vsel %vm2884_vm13, %v2861_v55, %v6977_v41  ;;  %v2921_v54 = vsel %vm2917_vm14, %v2888_v62, %v5108_v25  ;;  %v2666_v25 = vsel %vm1777_vm7, %v2663_v45, %v2665_v18  ;;  %v6987_v41 = vld [vmem:[#allocation100_spill] sm:$0xff] }
 0x25c   : > { %v5745_v16 = vpop.permute.xlu2 %2428  ;;  %v2927_v57 = vsel %vm2917_vm14, %v2894_v22, %v5142_v58  ;;  %v5825_v55 = vmul.f32 %v6983_v13, %v6878_v38  ;;  %v1260_v22 = vmul.f32 %v6987_v41, %v6986_v46 }
 0x25d   : > { %v2514_v21 = vpop.permute.xlu1 %2513  ;;  %v2960_v12 = vsel %vm2950_vm2, %v2927_v57, %v5626_v36  ;;  %v6979_v36 = vld [vmem:[#allocation82_spill] sm:$0xff]  ;;  %v2968_v63 = vsel %vm2950_vm2, %v5370_v33, %v5745_v16  ;;  %v7005_v16 = vld [vmem:[#allocation167_spill] sm:$0xff] }
 0x25e   : > { %v2993_v17 = vsel %vm2983_vm4, %v2960_v12, %v2514_v21  ;;  %v6980_v21 = vld [vmem:[#allocation48_spill] sm:$0xff]  ;;  %v2653_v32 = vrot.slane %v5825_v55, 2  ;;  %v7016_v55 = vld [vmem:[#allocation53_spill] sm:$0xff] }
 0x260   : > { %v2654_v47 = vsel %vm1777_vm7, %v2651_v26, %v2653_v32  ;;  %v6995_v26 = vld [vmem:[#allocation189_spill] sm:$0xff] }
 0x262   : > { %2715 = vrot.lane.b32.xlu2 %v2652_v61, %s3771_s9  ;;  %v2954_v61 = vsel %vm2950_vm2, %v2921_v54, %v2401_v9  ;;  %v5805_v9 = vmul.f32 %v6979_v36, %v4164_v2  ;;  %v6989_v54 = vld [vmem:[#allocation72_spill] sm:$0xff] }
 0x263   : > { %2703 = vrot.lane.b32.xlu1 %v2640_v51, %s3771_s9  ;;  %2446 = vrot.lane.b32.xlu0 %v1541_v43, %s3770_s8  ;;  %v2987_v58 = vsel %vm2983_vm4, %v2954_v61, %v2502_v53  ;;  %v2696_v24 = vpop.permute.xlu0 %2695  ;;  %v6981_v53 = vld [vmem:[#allocation38_spill] sm:$0xff]  ;;  %v5849_v12 = vmul.f32 %v6989_v54, %v4084_v1  ;;  %v6990_v61 = vld [vmem:[#allocation52_spill] sm:$0xff] }
 0x264   : > { %v5789_v49 = vpop.permute.xlu2 %2529  ;;  %v3020_v39 = vsel %vm3016_vm5, %v2987_v58, %v2696_v24  ;;  %v2677_v43 = vrot.slane %v5805_v9, 2  ;;  %v6992_v24 = vld [vmem:[#allocation122_spill] sm:$0xff]  ;;  %v6994_v36 = vld [vmem:[#allocation148_spill] sm:$0xff] }
 0x265   : > { %v2708_v30 = vpop.permute.xlu1 %2707  ;;  %3658 = vmatmul.msk.f32.gmra.mxu0 %vm3054_vm6, %v3020_v39  ;;  %v6993_v39 = vld [vmem:[#allocation23_spill] sm:$0xff]  ;;  %v3001_v54 = vsel %vm2983_vm4, %v2968_v63, %v5789_v49  ;;  %v7007_v49 = vld [vmem:[#allocation62_spill] sm:$0xff] }
 0x266   : > { %v3026_v6 = vsel %vm3016_vm5, %v2993_v17, %v2708_v30  ;;  %v2678_v31 = vsel %vm1777_vm7, %v2675_v60, %v2677_v43  ;;  %v6988_v60 = vld [vmem:[#allocation84_spill] sm:$0xff]  ;;  %v2790_v17 = vsel %vm2785_vm10, %v1260_v22, %v6990_v61  ;;  %v6991_v30 = vld [vmem:[#allocation131_spill] sm:$0xff] }
 0x267   : > { %3664 = vmatmul.msk.f32.gmra.mxu1 %vm3054_vm6, %v3026_v6  ;;  %v2796_v57 = vsel %vm2785_vm10, %v1266_v35, %v6988_v60  ;;  %v2823_v6 = vsel %vm2818_vm11, %v2790_v17, %v6992_v24  ;;  %v7002_v60 = vld [vmem:[#allocation36_spill] sm:$0xff]  ;;  %v7004_v24 = vld [vmem:[#allocation129_spill] sm:$0xff] }
 0x268   : > { %v2829_v58 = vsel %vm2818_vm11, %v2796_v57, %v6991_v30  ;;  %v2856_v9 = vsel %vm2851_vm12, %v2823_v6, %v6994_v36  ;;  %v7003_v30 = vld [vmem:[#allocation65_spill] sm:$0xff] }
 0x26a   : > { %2729 = vrot.lane.b32.xlu2 %v2666_v25, %s3771_s9  ;;  %v2862_v25 = vsel %vm2851_vm12, %v2829_v58, %v6993_v39  ;;  %v2797_v58 = vsel %vm2785_vm10, %v6936_v14, %v7003_v30  ;;  %v7008_v14 = vld [vmem:[#allocation98_spill] sm:$0xff]  ;;  %v7021_v30 = vld [vmem:[#allocation35_spill] sm:$0xff] }
 0x26b   : > { %2547 = vrot.lane.b32.xlu1 %v6980_v21, %s3769_s30  ;;  %2535 = vrot.lane.b32.xlu0 %v6981_v53, %s3769_s30  ;;  %v2722_v44 = vpop.permute.xlu0 %2721  ;;  %v2895_v21 = vsel %vm2884_vm13, %v2862_v25, %v6995_v26  ;;  %v6996_v53 = vld [vmem:[#allocation69_spill] sm:$0xff]  ;;  %v2830_v6 = vsel %vm2818_vm11, %v2797_v58, %v7004_v24 }
 0x26c   : > { %v5812_v52 = vpop.permute.xlu2 %2416  ;;  %v3033_v51 = vsel %vm3016_vm5, %v3000_v42, %v2722_v44  ;;  %v2889_v34 = vsel %vm2884_vm13, %v2856_v9, %v6996_v53  ;;  %v6997_v42 = vld [vmem:[#allocation123_spill] sm:$0xff]  ;;  %v2863_v39 = vsel %vm2851_vm12, %v2830_v6, %v7005_v16  ;;  %v7006_v25 = vld [vmem:[#allocation29_spill] sm:$0xff]  ;;  %v7009_v53 = vld [vmem:[#allocation56_spill] sm:$0xff] }
 0x26d   : > { %v2403_v45 = vpop.permute.xlu1 %2402  ;;  %3671 = vmatmul.msk.f32.vlgmr.msra.gmra.mxu2 %vm3054_vm6, %v3033_v51  ;;  %v2928_v44 = vsel %vm2917_vm14, %v2895_v21, %v6997_v42  ;;  %v2667_v51 = vrot.slane %v5849_v12, 2  ;;  %v2896_v36 = vsel %vm2884_vm13, %v2863_v39, %v7007_v49  ;;  %v459_v39 = vld [vmem:[%s4828_s27 + $0x8] sm:$0xff]  ;;  %s448_s27 = scalar_lea.vmem %s6374_s7, %s3621_s26 }
 0x26e   : > { %v2961_v13 = vsel %vm2950_vm2, %v2928_v44, %v5726_v15  ;;  %v6999_v15 = vld [vmem:[#allocation43_spill] sm:$0xff]  ;;  %v2929_v9 = vsel %vm2917_vm14, %v2896_v36, %v7008_v14  ;;  %v465_v36 = vmul.f32 0.0, %v459_v39 }
 0x26f   : > { %v7023_v14 = vld [vmem:[#allocation15_spill] sm:$0xff] }
 0x272   : > { %2523 = vrot.lane.b32.xlu2 %v6984_v8, %s3769_s30 }
 0x273   : > { %2422 = vrot.lane.b32.xlu1 %v1529_v5, %s3770_s8  ;;  %2741 = vrot.lane.b32.xlu0 %v2678_v31, %s3771_s9  ;;  %v2504_v62 = vpop.permute.xlu0 %2503  ;;  %v2922_v5 = vsel %vm2917_vm14, %v2889_v34, %v6998_v50  ;;  %v7010_v34 = vld [vmem:[#allocation5_spill] sm:$0xff] }
 0x274   : > { %v5840_v11 = vpop.permute.xlu2 %2430  ;;  %v2955_v8 = vsel %vm2950_vm2, %v2922_v5, %v2403_v45  ;;  %v7000_v45 = vld [vmem:[#allocation83_spill] sm:$0xff]  ;;  %v2791_v42 = vsel %vm2785_vm10, %v7010_v34, %v7009_v53  ;;  %v7011_v5 = vld [vmem:[#allocation170_spill] sm:$0xff]  ;;  %v638_v53 = vrot.slane %v465_v36, 7 }
 0x275   : > { %v2516_v59 = vpop.permute.xlu1 %2515  ;;  %v2988_v46 = vsel %vm2983_vm4, %v2955_v8, %v2504_v62  ;;  %v7001_v62 = vld [vmem:[#allocation47_spill] sm:$0xff] }
 0x276   : > { %v2994_v48 = vsel %vm2983_vm4, %v2961_v13, %v2516_v59  ;;  %v5891_v59 = vmul.f32 %v7000_v45, %v6999_v15  ;;  %v7012_v13 = vrot.slane %v7011_v5, 2  ;;  %v7028_v5 = vld [vmem:[#allocation89_spill] sm:$0xff] }
 0x278   : > { %v2656_v8 = vsel %vm1777_vm7, %v2653_v32, %v7012_v13 }
 0x27a   : > { %2717 = vrot.lane.b32.xlu2 %v2654_v47, %s3771_s9  ;;  %v2679_v47 = vrot.slane %v5891_v59, 2 }
 0x27b   : > { %2448 = vrot.lane.b32.xlu1 %v4164_v2, %s3770_s8  ;;  %2436 = vrot.lane.b32.xlu0 %v4090_v4, %s3770_s8  ;;  %v2698_v2 = vpop.permute.xlu0 %2697  ;;  %v2668_v4 = vsel %vm1777_vm7, %v2665_v18, %v2667_v51 }
 0x27c   : > { %v2712_v31 = vpop.permute.xlu2 %2711  ;;  %v3021_v22 = vsel %vm3016_vm5, %v2988_v46, %v2698_v2  ;;  %v2680_v33 = vsel %vm1777_vm7, %v2677_v43, %v2679_v47  ;;  %v2962_v43 = vsel %vm2950_vm2, %v2929_v9, %v5812_v52  ;;  %v7013_v52 = vld [vmem:[#allocation79_spill] sm:$0xff]  ;;  %v7014_v46 = vld [vmem:[#allocation120_spill] sm:$0xff] }
 0x27d   : > { %v2710_v35 = vpop.permute.xlu1 %2709  ;;  %3659 = vmatmul.msk.f32.gmra.mxu0 %vm3054_vm6, %v3021_v22  ;;  %v2824_v2 = vsel %vm2818_vm11, %v2791_v42, %v7014_v46  ;;  %v7024_v42 = vrot.slane %v5534_v27, 2  ;;  %v7032_v46 = vld [vmem:[#allocation2_spill] sm:$0xff] }
 0x27e   : > { %v3027_v41 = vsel %vm3016_vm5, %v2994_v48, %v2710_v35  ;;  %v1543_v48 = vmul.f32 %v6911_v19, %v6999_v15  ;;  %v1570_v35 = vmul.f32 %v7013_v52, %v4087_v3  ;;  %v7017_v19 = vld [vmem:[#allocation45_spill] sm:$0xff]  ;;  %v7030_v52 = vld [vmem:[#allocation168_spill] sm:$0xff] }
 0x27f   : > { %3665 = vmatmul.msk.f32.gmra.mxu1 %vm3054_vm6, %v3027_v41  ;;  %v7015_v41 = vld [vmem:[#allocation161_spill] sm:$0xff] }
 0x280   : > { %v2857_v22 = vsel %vm2851_vm12, %v2824_v2, %v7015_v41  ;;  %v2669_v15 = vrot.slane %v1570_v35, 2  ;;  %v7031_v35 = vrot.slane %v7030_v52, 7  ;;  %v1262_v2 = vmul.f32 %v6926_v56, %v7032_v46 }
 0x281   : > { %v2890_v32 = vsel %vm2884_vm13, %v2857_v22, %v7016_v55  ;;  %v7034_v22 = vld [vmem:[#allocation44_spill] sm:$0xff] }
 0x282   : > { %2731 = vrot.lane.b32.xlu2 %v2668_v4, %s3771_s9  ;;  %v2923_v4 = vsel %vm2917_vm14, %v2890_v32, %v7017_v19  ;;  %v2670_v63 = vsel %vm1777_vm7, %v2667_v51, %v2669_v15  ;;  %v639_v27 = vsel %vm500_vm0, %v7031_v35, %v638_v53  ;;  %v7035_v32 = vld [vmem:[#allocation193_spill] sm:$0xff] }
 0x283   : > { %2549 = vrot.lane.b32.xlu1 %v7001_v62, %s3769_s30  ;;  %2537 = vrot.lane.b32.xlu0 %v7002_v60, %s3769_s30  ;;  %v2724_v61 = vpop.permute.xlu0 %2723  ;;  %v2491_v55 = vrot.slane %v639_v27, 1 }
 0x284   : > { %v2726_v57 = vpop.permute.xlu2 %2725  ;;  %v3034_v17 = vsel %vm3016_vm5, %v3001_v54, %v2724_v61  ;;  %v7018_v54 = vld [vmem:[#allocation141_spill] sm:$0xff]  ;;  %v7019_v61 = vld [vmem:[#allocation92_spill] sm:$0xff] }
 0x285   : > { %v2405_v18 = vpop.permute.xlu1 %2404  ;;  %3672 = vmatmul.msk.f32.gmra.mxu2 %vm3054_vm6, %v3034_v17  ;;  %v7020_v17 = vld [vmem:[#allocation46_spill] sm:$0xff] }
 0x286   : > { %v2956_v45 = vsel %vm2950_vm2, %v2923_v4, %v2405_v18  ;;  %v1576_v18 = vmul.f32 %v7019_v61, %v7018_v54  ;;  %v7036_v4 = vld [vmem:[#allocation42_spill] sm:$0xff] }
 0x288   : > { %v2681_v6 = vrot.slane %v1576_v18, 2 }
 0x28a   : > { %2525 = vrot.lane.b32.xlu2 %v7006_v25, %s3769_s30  ;;  %v2682_v49 = vsel %vm1777_vm7, %v2679_v47, %v2681_v6 }
 0x28b   : > { %2424 = vrot.lane.b32.xlu1 %v6878_v38, %s3770_s8  ;;  %2743 = vrot.lane.b32.xlu0 %v2680_v33, %s3771_s9  ;;  %v7022_v33 = vld [vmem:[#allocation21_spill] sm:$0xff] }
 0x28c   : > { %v5923_v26 = vpop.permute.xlu2 %2418  ;;  %v2969_v12 = vsel %vm2950_vm2, %v7022_v33, %v5840_v11  ;;  %v1268_v11 = vmul.f32 %v6924_v40, %v7023_v14 }
 0x28d   : > { %v2518_v21 = vpop.permute.xlu1 %2517  ;;  %v2506_v44 = vpop.permute.xlu0 %2505 }
 0x28e   : > { %v2995_v50 = vsel %vm2983_vm4, %v2962_v43, %v2518_v21 }
 0x28f   : > { %v3028_v38 = vsel %vm3016_vm5, %v2995_v50, %v2712_v31  ;;  %v1537_v31 = vmul.f32 %v6885_v20, %v4084_v1  ;;  %v2989_v1 = vsel %vm2983_vm4, %v2956_v45, %v2506_v44  ;;  %v7025_v44 = vld [vmem:[#allocation93_spill] sm:$0xff]  ;;  %v7026_v50 = vld [vmem:[#allocation115_spill] sm:$0xff] }
 0x290   : > { %3666 = vmatmul.msk.f32.gmra.mxu1 %vm3054_vm6, %v3028_v38  ;;  %v2798_v40 = vsel %vm2785_vm10, %v1268_v11, %v7025_v44  ;;  %v7027_v38 = vld [vmem:[#allocation39_spill] sm:$0xff] }
 0x291   : > { %v1577_v13 = vmul.f32 %v7028_v5, %v7027_v38  ;;  %v1545_v61 = vmul.f32 %v6867_v0, %v7027_v38  ;;  %v7038_v18 = vrot.slane %v7027_v38, 1  ;;  %v646_v0 = vsel %vm500_vm0, %v638_v53, 0.0 }
 0x292   : > { %2719 = vrot.lane.b32.xlu2 %v2656_v8, %s3771_s9  ;;  %v7029_v8 = vld [vmem:[#allocation166_spill] sm:$0xff]  ;;  %v2493_v36 = vrot.slane %v646_v0, 1 }
 0x293   : > { %2450 = vrot.lane.b32.xlu1 %v1543_v48, %s3770_s8  ;;  %2438 = vrot.lane.b32.xlu0 %v1537_v31, %s3770_s8  ;;  %v7033_v31 = vld [vmem:[#allocation191_spill] sm:$0xff] }
 0x294   : > { %v5956_v59 = vpop.permute.xlu2 %2432  ;;  %v2494_v53 = vsel %vm1582_vm1, %v2491_v55, %v2493_v36 }
 0x295   : > { %v2700_v20 = vpop.permute.xlu1 %2699  ;;  %v2443_v62 = vpop.permute.xlu0 %2442 }
 0x296   : > { %v3022_v60 = vsel %vm3016_vm5, %v2989_v1, %v2700_v20  ;;  %v2975_v9 = vsel %vm2950_vm2, %v5304_v37, %v2443_v62  ;;  %v2831_v37 = vsel %vm2818_vm11, %v2798_v40, %v7026_v50  ;;  %v2683_v1 = vrot.slane %v1577_v13, 2  ;;  %v7037_v62 = vld [vmem:[#allocation64_spill] sm:$0xff] }
 0x297   : > { %3660 = vmatmul.msk.f32.gmra.mxu0 %vm3054_vm6, %v3022_v60  ;;  %v2864_v48 = vsel %vm2851_vm12, %v2831_v37, %v7029_v8  ;;  %v2792_v60 = vsel %vm2785_vm10, %v1262_v2, %v7037_v62  ;;  %v2970_v37 = vsel %vm2950_vm2, %v5424_v10, %v5956_v59  ;;  %v7046_v62 = vld [vmem:[#allocation3_spill] sm:$0xff] }
 0x298   : > { %v2897_v41 = vsel %vm2884_vm13, %v2864_v48, %v7033_v31 }
 0x299   : > { %v2930_v19 = vsel %vm2917_vm14, %v2897_v41, %v7035_v32 }
 0x29a   : > { %2733 = vrot.lane.b32.xlu2 %v2670_v63, %s3771_s9 }
 0x29b   : > { %2551 = vrot.lane.b32.xlu1 %v7020_v17, %s3769_s30  ;;  %2539 = vrot.lane.b32.xlu0 %v7021_v30, %s3769_s30  ;;  %v2492_v17 = vsel %vm1582_vm1, %v7038_v18, %v2491_v55  ;;  %v7039_v30 = vld [vmem:[#allocation107_spill] sm:$0xff]  ;;  %vm3471_vm1 = vcmask 58368  }
 0x29c   : > { %v2714_v58 = vpop.permute.xlu2 %2713 }
 0x29d   : > { %v2544_v24 = vpop.permute.xlu1 %2543  ;;  %v2532_v16 = vpop.permute.xlu0 %2531 }
 0x29e   : > { %v3002_v51 = vsel %vm2983_vm4, %v2969_v12, %v2532_v16  ;;  %v3008_v47 = vsel %vm2983_vm4, %v2975_v9, %v2544_v24  ;;  %v7040_v24 = vld [vmem:[#allocation160_spill] sm:$0xff]  ;;  %v2684_v12 = vsel %vm1777_vm7, %v2681_v6, %v2683_v1  ;;  %v7041_v16 = vld [vmem:[#allocation90_spill] sm:$0xff] }
 0x29f   : > { %v3035_v25 = vsel %vm3016_vm5, %v3002_v51, %v2726_v57  ;;  %v1578_v51 = vmul.f32 %v7041_v16, %v639_v27 }
 0x2a0   : > { %3673 = vmatmul.msk.f32.gmra.mxu2 %vm3054_vm6, %v3035_v25  ;;  %v7043_v25 = vld [vmem:[#allocation192_spill] sm:$0xff] }
 0x2a1   : > { %v2685_v9 = vrot.slane %v1578_v51, 2  ;;  %v7050_v51 = vld [vmem:[#allocation10_spill] sm:$0xff] }
 0x2a2   : > { %2452 = vrot.lane.b32.xlu2 %v7018_v54, %s3770_s8 }
 0x2a3   : > { %2440 = vrot.lane.b32.xlu1 %v4087_v3, %s3770_s8  ;;  %2745 = vrot.lane.b32.xlu0 %v2682_v49, %s3771_s9  ;;  %v2672_v3 = vsel %vm1777_vm7, %v2669_v15, %v7024_v42  ;;  %v2963_v15 = vsel %vm2950_vm2, %v2930_v19, %v5923_v26  ;;  %v2825_v26 = vsel %vm2818_vm11, %v2792_v60, %v7039_v30  ;;  %v7048_v30 = vld [vmem:[#allocation151_spill] sm:$0xff] }
 0x2a4   : > { %v5988_v57 = vpop.permute.xlu2 %2727  ;;  %v2858_v33 = vsel %vm2851_vm12, %v2825_v26, %v7040_v24  ;;  %v2686_v42 = vsel %vm1777_vm7, %v2683_v1, %v2685_v9 }
 0x2a5   : > { %v2407_v43 = vpop.permute.xlu1 %2406  ;;  %v2738_v21 = vpop.permute.xlu0 %2737 }
 0x2a6   : > { %v3041_v34 = vsel %vm3016_vm5, %v3008_v47, %v2738_v21 }
 0x2a7   : > { %3679 = vmatmul.msk.f32.vlgmr.msra.gmra.mxu3 %vm3054_vm6, %v3041_v34 }
 0x2aa   : > { %2735 = vrot.lane.b32.xlu2 %v2672_v3, %s3771_s9  ;;  %v7044_v3 = vld [vmem:[#allocation87_spill] sm:$0xff] }
 0x2ab   : > { %2553 = vrot.lane.b32.xlu1 %v7034_v22, %s3769_s30  ;;  %2541 = vrot.lane.b32.xlu0 %v7036_v4, %s3769_s30  ;;  %v1579_v44 = vmul.f32 %v7044_v3, %v646_v0 }
 0x2ac   : > { %v2421_v63 = vpop.permute.xlu2 %2420 }
 0x2ad   : > { %v2520_v45 = vpop.permute.xlu1 %2519  ;;  %v2508_v20 = vpop.permute.xlu0 %2507  ;;  %v2687_v50 = vrot.slane %v1579_v44, 2  ;;  %v2964_v19 = vsel %vm2950_vm2, %v5315_v28, %v2421_v63 }
 0x2ae   : > { %v2996_v56 = vsel %vm2983_vm4, %v2963_v15, %v2520_v45 }
 0x2af   : > { %v3029_v54 = vsel %vm3016_vm5, %v2996_v56, %v2714_v58  ;;  %v7042_v58 = vld [vmem:[#allocation188_spill] sm:$0xff]  ;;  %v2688_v8 = vsel %vm1777_vm7, %v2685_v9, %v2687_v50  ;;  %v7045_v56 = vld [vmem:[#allocation73_spill] sm:$0xff] }
 0x2b0   : > { %3667 = vmatmul.msk.f32.gmra.mxu1 %vm3054_vm6, %v3029_v54  ;;  %v2891_v39 = vsel %vm2884_vm13, %v2858_v33, %v7042_v58  ;;  %v2793_v60 = vsel %vm2785_vm10, %v7046_v62, %v7045_v56  ;;  %v7049_v33 = vld [vmem:[#allocation187_spill] sm:$0xff] }
 0x2b1   : > { %v2924_v49 = vsel %vm2917_vm14, %v2891_v39, %v7043_v25 }
 0x2b2   : > { %2555 = vrot.lane.b32.xlu2 %v2492_v17, %s3769_s30  ;;  %v2957_v14 = vsel %vm2950_vm2, %v2924_v49, %v2407_v43  ;;  %v7047_v17 = vld [vmem:[#allocation126_spill] sm:$0xff] }
 0x2b3   : > { %2454 = vrot.lane.b32.xlu1 %v1545_v61, %s3770_s8  ;;  %2747 = vrot.lane.b32.xlu0 %v2684_v12, %s3771_s9  ;;  %v2990_v6 = vsel %vm2983_vm4, %v2957_v14, %v2508_v20  ;;  %v2826_v28 = vsel %vm2818_vm11, %v2793_v60, %v7047_v17  ;;  %v7054_v60 = vld [vmem:[#allocation7_spill] sm:$0xff] }
 0x2b4   : > { %v6049_v34 = vpop.permute.xlu2 %2434  ;;  %v2859_v26 = vsel %vm2851_vm12, %v2826_v28, %v7048_v30 }
 0x2b5   : > { %v2702_v11 = vpop.permute.xlu1 %2701  ;;  %v2445_v47 = vpop.permute.xlu0 %2444  ;;  %v2892_v12 = vsel %vm2884_vm13, %v2859_v26, %v7049_v33  ;;  %v2971_v9 = vsel %vm2950_vm2, %v5414_v7, %v6049_v34 }
 0x2b6   : > { %v3023_v21 = vsel %vm3016_vm5, %v2990_v6, %v2702_v11  ;;  %v2976_v35 = vsel %vm2950_vm2, %v5525_v23, %v2445_v47  ;;  %v2925_v58 = vsel %vm2917_vm14, %v2892_v12, %v7050_v51 }
 0x2b7   : > { %3661 = vmatmul.msk.f32.gmra.mxu0 %vm3054_vm6, %v3023_v21 }
 0x2ba   : > { %2557 = vrot.lane.b32.xlu2 %v2494_v53, %s3769_s30  ;;  %v3172_v43 = vpop.f32.mrf.mxu0 }
 0x2bb   : > { %2456 = vrot.lane.b32.xlu1 %v639_v27, %s3770_s8  ;;  %2749 = vrot.lane.b32.xlu0 %v2686_v42, %s3771_s9  ;;  %3268 = vst.msk [vmem:[%s6060_s22] sm:$0xff] %vm2818_vm11, %v3172_v43  ;;  %v3369_v52 = vmul.f32 %v3172_v43, %v3172_v43  ;;  %v3300_v27 = vsel %vm2818_vm11, %v3172_v43, 0.0 }
 0x2bc   : > { %v2716_v48 = vpop.permute.xlu2 %2715 }
 0x2bd   : > { %v2546_v40 = vpop.permute.xlu1 %2545  ;;  %v2534_v38 = vpop.permute.xlu0 %2533  ;;  %v3401_v55 = vsel %vm2818_vm11, %v3369_v52, 0.0 }
 0x2be   : > { %v3003_v5 = vsel %vm2983_vm4, %v2970_v37, %v2534_v38  ;;  %v3009_v46 = vsel %vm2983_vm4, %v2976_v35, %v2546_v40  ;;  %v7051_v38 = vld [vmem:[#allocation28_spill] sm:$0xff] }
 0x2bf   : > { %v3036_v13 = vsel %vm3016_vm5, %v3003_v5, %v5988_v57 }
 0x2c0   : > { %3674 = vmatmul.msk.f32.gmra.mxu2 %vm3054_vm6, %v3036_v13 }
 0x2c2   : > { %v3175_v10 = vpop.f32.mrf.mxu0 }
 0x2c3   : > { %2751 = vrot.lane.b32.xlu0 %v2688_v8, %s3771_s9  ;;  %3269 = vst.msk [vmem:[%s6060_s22 + $0x8] sm:$0xff] %vm2818_vm11, %v3175_v10  ;;  %v3301_v57 = vsel %vm2818_vm11, %v3175_v10, 0.0  ;;  %v3370_v2 = vmul.f32 %v3175_v10, %v3175_v10 }
 0x2c4   : > { %v3302_v41 = vadd.f32 %v3301_v57, %v3300_v27  ;;  %v2730_v4 = vpop.permute.xlu2 %2729 }
 0x2c5   : > { %v2409_v59 = vpop.permute.xlu1 %2408  ;;  %v2740_v31 = vpop.permute.xlu0 %2739  ;;  %v3402_v23 = vsel %vm2818_vm11, %v3370_v2, 0.0 }
 0x2c6   : > { %v3042_v22 = vsel %vm3016_vm5, %v3009_v46, %v2740_v31  ;;  %v3403_v32 = vadd.f32 %v3402_v23, %v3401_v55  ;;  %v2958_v39 = vsel %vm2950_vm2, %v2925_v58, %v2409_v59  ;;  %v7052_v31 = vld [vmem:[#allocation121_spill] sm:$0xff] }
 0x2c7   : > { %3680 = vmatmul.msk.f32.gmra.mxu3 %vm3054_vm6, %v3042_v22 }
 0x2cb   : > { %v3178_v1 = vpop.f32.mrf.mxu0 }
 0x2cc   : > { %3270 = vst.msk [vmem:[%s6060_s22 + $0x10] sm:$0xff] %vm2818_vm11, %v3178_v1  ;;  %v3303_v54 = vsel %vm2818_vm11, %v3178_v1, 0.0  ;;  %v3371_v61 = vmul.f32 %v3178_v1, %v3178_v1  ;;  %v2524_v6 = vpop.permute.xlu2 %2523 }
 0x2cd   : > { %v2522_v15 = vpop.permute.xlu1 %2521  ;;  %v2510_v45 = vpop.permute.xlu0 %2509  ;;  %v3304_v63 = vadd.f32 %v3303_v54, %v3302_v41 }
 0x2ce   : > { %v2997_v20 = vsel %vm2983_vm4, %v2964_v19, %v2522_v15  ;;  %v3404_v24 = vsel %vm2818_vm11, %v3371_v61, 0.0  ;;  %v2991_v0 = vsel %vm2983_vm4, %v2958_v39, %v2510_v45  ;;  %v7053_v19 = vld [vmem:[#allocation173_spill] sm:$0xff]  ;;  %v7055_v39 = vld [vmem:[#allocation176_spill] sm:$0xff] }
 0x2cf   : > { %v3030_v18 = vsel %vm3016_vm5, %v2997_v20, %v2716_v48  ;;  %v3405_v16 = vadd.f32 %v3404_v24, %v3403_v32 }
 0x2d0   : > { %3668 = vmatmul.msk.f32.gmra.mxu1 %vm3054_vm6, %v3030_v18 }
 0x2d2   : > { %v6107_v25 = vpop.f32.mrf.mxu1 }
 0x2d3   : > { %3276 = vst.msk [vmem:[%s6060_s22 + $0x40] sm:$0xff] %vm2818_vm11, %v6107_v25 }
 0x2d4   : > { %v2718_v42 = vpop.permute.xlu2 %2717 }
 0x2d5   : > { %v2704_v49 = vpop.permute.xlu1 %2703  ;;  %v2447_v36 = vpop.permute.xlu0 %2446 }
 0x2d6   : > { %v3024_v14 = vsel %vm3016_vm5, %v2991_v0, %v2704_v49  ;;  %v2977_v44 = vsel %vm2950_vm2, %v5520_v29, %v2447_v36 }
 0x2d7   : > { %3662 = vmatmul.msk.f32.gmra.mxu0 %vm3054_vm6, %v3024_v14 }
 0x2dc   : > { %v2732_v10 = vpop.permute.xlu2 %2731 }
 0x2dd   : > { %v2548_v11 = vpop.permute.xlu1 %2547  ;;  %v2536_v47 = vpop.permute.xlu0 %2535 }
 0x2de   : > { %v3004_v21 = vsel %vm2983_vm4, %v2971_v9, %v2536_v47  ;;  %v3010_v7 = vsel %vm2983_vm4, %v2977_v44, %v2548_v11  ;;  %v7056_v9 = vld [vmem:[#allocation59_spill] sm:$0xff] }
 0x2df   : > { %v3037_v53 = vsel %vm3016_vm5, %v3004_v21, %v2730_v4 }
 0x2e0   : > { %3675 = vmatmul.msk.f32.gmra.mxu2 %vm3054_vm6, %v3037_v53 }
 0x2e2   : > { %v3181_v43 = vpop.f32.mrf.mxu0 }
 0x2e3   : > { %3271 = vst.msk [vmem:[%s6060_s22 + $0x18] sm:$0xff] %vm2818_vm11, %v3181_v43  ;;  %v3305_v34 = vsel %vm2818_vm11, %v3181_v43, 0.0  ;;  %v3372_v50 = vmul.f32 %v3181_v43, %v3181_v43 }
 0x2e4   : > { %v6120_v3 = vpop.f32.mrf.mxu1  ;;  %v3306_v13 = vadd.f32 %v3305_v34, %v3304_v63  ;;  %v2526_v57 = vpop.permute.xlu2 %2525 }
 0x2e5   : > { %3277 = vst.msk [vmem:[%s6060_s22 + $0x48] sm:$0xff] %vm2818_vm11, %v6120_v3  ;;  %v2423_v40 = vpop.permute.xlu1 %2422  ;;  %v2742_v37 = vpop.permute.xlu0 %2741  ;;  %v3406_v48 = vsel %vm2818_vm11, %v3372_v50, 0.0 }
 0x2e6   : > { %v2965_v5 = vsel %vm2950_vm2, %v7051_v38, %v2423_v40  ;;  %v3043_v29 = vsel %vm3016_vm5, %v3010_v7, %v2742_v37  ;;  %v3407_v35 = vadd.f32 %v3406_v48, %v3405_v16 }
 0x2e7   : > { %v2998_v8 = vsel %vm2983_vm4, %v2965_v5, %v2524_v6  ;;  %3681 = vmatmul.msk.f32.gmra.mxu3 %vm3054_vm6, %v3043_v29  ;;  %v7057_v5 = vld [vmem:[#allocation128_spill] sm:$0xff] }
 0x2e8   : > { %v3031_v52 = vsel %vm3016_vm5, %v2998_v8, %v2718_v42 }
 0x2e9   : > { %3669 = vmatmul.msk.f32.gmra.mxu1 %vm3054_vm6, %v3031_v52 }
 0x2ec   : > { %v2720_v61 = vpop.permute.xlu2 %2719 }
 0x2ed   : > { %v2449_v59 = vpop.permute.xlu1 %2448  ;;  %v2437_v27 = vpop.permute.xlu0 %2436 }
 0x2ee   : > { %v2972_v41 = vsel %vm2950_vm2, %v7052_v31, %v2437_v27  ;;  %v2978_v4 = vsel %vm2950_vm2, %v7053_v19, %v2449_v59 }
 0x2f0   : > { %v6139_v46 = vpop.f32.mrf.mxu2 }
 0x2f1   : > { %3284 = vst.msk [vmem:[%s6060_s22 + $0x80] sm:$0xff] %vm2818_vm11, %v6139_v46 }
 0x2f4   : > { %v2734_v12 = vpop.permute.xlu2 %2733 }
 0x2f5   : > { %v2550_v2 = vpop.permute.xlu1 %2549  ;;  %v2538_v22 = vpop.permute.xlu0 %2537 }
 0x2f6   : > { %v3005_v55 = vsel %vm2983_vm4, %v2972_v41, %v2538_v22  ;;  %v3011_v1 = vsel %vm2983_vm4, %v2978_v4, %v2550_v2  ;;  %v7059_v41 = vld [vmem:[#allocation102_spill] sm:$0xff] }
 0x2f7   : > { %v3038_v23 = vsel %vm3016_vm5, %v3005_v55, %v2732_v10 }
 0x2f8   : > { %3676 = vmatmul.msk.f32.gmra.mxu2 %vm3054_vm6, %v3038_v23 }
 0x2fa   : > { %v3184_v15 = vpop.f32.mrf.mxu0 }
 0x2fb   : > { %3272 = vst.msk [vmem:[%s6060_s22 + $0x20] sm:$0xff] %vm2818_vm11, %v3184_v15  ;;  %v3307_v20 = vsel %vm2818_vm11, %v3184_v15, 0.0  ;;  %v3373_v56 = vmul.f32 %v3184_v15, %v3184_v15 }
 0x2fc   : > { %v6149_v32 = vpop.f32.mrf.mxu1  ;;  %v3308_v18 = vadd.f32 %v3307_v20, %v3306_v13  ;;  %v2453_v11 = vpop.permute.xlu2 %2452 }
 0x2fd   : > { %3278 = vst.msk [vmem:[%s6060_s22 + $0x50] sm:$0xff] %vm2818_vm11, %v6149_v32  ;;  %v2425_v45 = vpop.permute.xlu1 %2424  ;;  %v2744_v62 = vpop.permute.xlu0 %2743  ;;  %v3408_v63 = vsel %vm2818_vm11, %v3373_v56, 0.0 }
 0x2fe   : > { %v2966_v54 = vsel %vm2950_vm2, %v7054_v60, %v2425_v45  ;;  %v3044_v17 = vsel %vm3016_vm5, %v3011_v1, %v2744_v62  ;;  %v3409_v26 = vadd.f32 %v3408_v63, %v3407_v35  ;;  %v7058_v35 = vld [vmem:[#allocation130_spill] sm:$0xff] }
 0x2ff   : > { %v2999_v28 = vsel %vm2983_vm4, %v2966_v54, %v2526_v57  ;;  %3682 = vmatmul.msk.f32.gmra.mxu3 %vm3054_vm6, %v3044_v17  ;;  %v2980_v10 = vsel %vm2950_vm2, %v7058_v35, %v2453_v11  ;;  %v7060_v1 = vld [vmem:[#allocation106_spill] sm:$0xff] }
 0x300   : > { %v3032_v30 = vsel %vm3016_vm5, %v2999_v28, %v2720_v61 }
 0x301   : > { %3670 = vmatmul.msk.f32.gmra.mxu1 %vm3054_vm6, %v3032_v30 }
 0x304   : > { %v2736_v38 = vpop.permute.xlu2 %2735 }
 0x305   : > { %v2451_v24 = vpop.permute.xlu1 %2450  ;;  %v2439_v33 = vpop.permute.xlu0 %2438 }
 0x306   : > { %v2973_v0 = vsel %vm2950_vm2, %v7055_v39, %v2439_v33  ;;  %v2979_v47 = vsel %vm2950_vm2, %v7056_v9, %v2451_v24 }
 0x308   : > { %v6168_v16 = vpop.f32.mrf.mxu2 }
 0x309   : > { %3285 = vst.msk [vmem:[%s6060_s22 + $0x88] sm:$0xff] %vm2818_vm11, %v6168_v16 }
 0x30c   : > { %v2556_v31 = vpop.permute.xlu2 %2555 }
 0x30d   : > { %v6173_v51 = vpop.f32.mrf.mxu1  ;;  %v2552_v58 = vpop.permute.xlu1 %2551 }
 0x30e   : > { %v2540_v49 = vpop.permute.xlu0 %2539  ;;  %3279 = vst.msk [vmem:[%s6060_s22 + $0x58] sm:$0xff] %vm2818_vm11, %v6173_v51  ;;  %v3012_v44 = vsel %vm2983_vm4, %v2979_v47, %v2552_v58  ;;  %v3377_v58 = vmul.f32 %v6107_v25, %v6107_v25 }
 0x30f   : > { %v3006_v36 = vsel %vm2983_vm4, %v2973_v0, %v2540_v49 }
 0x310   : > { %v3039_v14 = vsel %vm3016_vm5, %v3006_v36, %v2734_v12  ;;  %v3315_v36 = vsel %vm2818_vm11, %v6107_v25, 0.0  ;;  %v3416_v47 = vsel %vm2818_vm11, %v3377_v58, 0.0  ;;  %v3319_v25 = vsel %vm2818_vm11, %v6149_v32, 0.0 }
 0x311   : > { %3677 = vmatmul.msk.f32.gmra.mxu2 %vm3054_vm6, %v3039_v14  ;;  %v3378_v14 = vmul.f32 %v6120_v3, %v6120_v3 }
 0x314   : > { %v3187_v6 = vpop.f32.mrf.mxu0  ;;  %v2558_v56 = vpop.permute.xlu2 %2557 }
 0x315   : > { %3273 = vst.msk [vmem:[%s6060_s22 + $0x28] sm:$0xff] %vm2818_vm11, %v3187_v6  ;;  %v3309_v21 = vsel %vm2818_vm11, %v3187_v6, 0.0  ;;  %v3374_v53 = vmul.f32 %v3187_v6, %v3187_v6  ;;  %v2441_v42 = vpop.permute.xlu1 %2440 }
 0x316   : > { %v3310_v43 = vadd.f32 %v3309_v21, %v3308_v18  ;;  %v2746_v40 = vpop.permute.xlu0 %2745  ;;  %v2974_v13 = vsel %vm2950_vm2, %v7057_v5, %v2441_v42  ;;  %v3317_v21 = vsel %vm2818_vm11, %v6120_v3, 0.0  ;;  %v3321_v3 = vsel %vm2818_vm11, %v6173_v51, 0.0 }
 0x317   : > { %v3410_v7 = vsel %vm2818_vm11, %v3374_v53, 0.0  ;;  %v3045_v34 = vsel %vm3016_vm5, %v3012_v44, %v2746_v40  ;;  %v3379_v53 = vmul.f32 %v6149_v32, %v6149_v32  ;;  %v3380_v40 = vmul.f32 %v6173_v51, %v6173_v51 }
 0x318   : > { %v3411_v50 = vadd.f32 %v3410_v7, %v3409_v26  ;;  %3683 = vmatmul.msk.f32.gmra.mxu3 %vm3054_vm6, %v3045_v34 }
 0x31d   : > { %v2554_v37 = vpop.permute.xlu1 %2553 }
 0x31e   : > { %v2542_v29 = vpop.permute.xlu0 %2541  ;;  %v3013_v59 = vsel %vm2983_vm4, %v2980_v10, %v2554_v37 }
 0x31f   : > { %v3007_v8 = vsel %vm2983_vm4, %v2974_v13, %v2542_v29  ;;  %v3422_v13 = vsel %vm2818_vm11, %v3380_v40, 0.0 }
 0x320   : > { %v3040_v48 = vsel %vm3016_vm5, %v3007_v8, %v2736_v38 }
 0x321   : > { %3678 = vmatmul.msk.f32.gmra.mxu2 %vm3054_vm6, %v3040_v48 }
 0x323   : > { %v6197_v52 = vpop.f32.mrf.mxu2 }
 0x324   : > { %3286 = vst.msk [vmem:[%s6060_s22 + $0x90] sm:$0xff] %vm2818_vm11, %v6197_v52 }
 0x325   : > { %v2455_v57 = vpop.permute.xlu1 %2454 }
 0x326   : > { %v2748_v27 = vpop.permute.xlu0 %2747  ;;  %v2981_v22 = vsel %vm2950_vm2, %v7059_v41, %v2455_v57 }
 0x327   : > { %v3046_v2 = vsel %vm3016_vm5, %v3013_v59, %v2748_v27  ;;  %v3014_v19 = vsel %vm2983_vm4, %v2981_v22, %v2556_v31 }
 0x328   : > { %3684 = vmatmul.msk.f32.gmra.mxu3 %vm3054_vm6, %v3046_v2 }
 0x32a   : > { %v6209_v55 = vpop.f32.mrf.mxu3 }
 0x32b   : > { %3292 = vst.msk [vmem:[%s6060_s22 + $0xc0] sm:$0xff] %vm2818_vm11, %v6209_v55 }
 0x32d   : > { %v3208_v23 = vpop.f32.mrf.mxu1  ;;  %v2457_v45 = vpop.permute.xlu1 %2456 }
 0x32e   : > { %v2750_v4 = vpop.permute.xlu0 %2749  ;;  %3280 = vst.msk [vmem:[%s6060_s22 + $0x60] sm:$0xff] %vm2818_vm11, %v3208_v23  ;;  %v2982_v20 = vsel %vm2950_vm2, %v7060_v1, %v2457_v45  ;;  %v3381_v37 = vmul.f32 %v3208_v23, %v3208_v23  ;;  %v3323_v32 = vsel %vm2818_vm11, %v3208_v23, 0.0  ;;  %v3385_v1 = vmul.f32 %v6139_v46, %v6139_v46 }
 0x32f   : > { %v3047_v15 = vsel %vm3016_vm5, %v3014_v19, %v2750_v4  ;;  %v3015_v61 = vsel %vm2983_vm4, %v2982_v20, %v2558_v56 }
 0x330   : > { %3685 = vmatmul.msk.f32.gmra.mxu3 %vm3054_vm6, %v3047_v15  ;;  %v3424_v35 = vsel %vm2818_vm11, %v3381_v37, 0.0 }
 0x334   : > { %v3190_v62 = vpop.f32.mrf.mxu0 }
 0x335   : > { %3274 = vst.msk [vmem:[%s6060_s22 + $0x30] sm:$0xff] %vm2818_vm11, %v3190_v62  ;;  %v3311_v60 = vsel %vm2818_vm11, %v3190_v62, 0.0  ;;  %v3375_v54 = vmul.f32 %v3190_v62, %v3190_v62 }
 0x336   : > { %v3312_v18 = vadd.f32 %v3311_v60, %v3310_v43  ;;  %v2752_v17 = vpop.permute.xlu0 %2751  ;;  %v3418_v43 = vsel %vm2818_vm11, %v3378_v14, 0.0 }
 0x337   : > { %v3412_v28 = vsel %vm2818_vm11, %v3375_v54, 0.0  ;;  %v3048_v63 = vsel %vm3016_vm5, %v3015_v61, %v2752_v17  ;;  %v3331_v54 = vsel %vm2818_vm11, %v6139_v46, 0.0  ;;  %v3386_v61 = vmul.f32 %v6168_v16, %v6168_v16 }
 0x338   : > { %v3413_v30 = vadd.f32 %v3412_v28, %v3411_v50  ;;  %3686 = vmatmul.msk.f32.gmra.mxu3 %vm3054_vm6, %v3048_v63  ;;  %v3420_v50 = vsel %vm2818_vm11, %v3379_v53, 0.0  ;;  %v3432_v63 = vsel %vm2818_vm11, %v3385_v1, 0.0 }
 0x339   : > { %v3434_v46 = vsel %vm2818_vm11, %v3386_v61, 0.0 }
 0x343   : > { %v6228_v26 = vpop.f32.mrf.mxu2 }
 0x344   : > { %3287 = vst.msk [vmem:[%s6060_s22 + $0x98] sm:$0xff] %vm2818_vm11, %v6228_v26 }
 0x34a   : > { %v6233_v24 = vpop.f32.mrf.mxu3 }
 0x34b   : > { %3293 = vst.msk [vmem:[%s6060_s22 + $0xc8] sm:$0xff] %vm2818_vm11, %v6233_v24 }
 0x34d   : > { %v3211_v33 = vpop.f32.mrf.mxu1 }
 0x34e   : > { %3281 = vst.msk [vmem:[%s6060_s22 + $0x68] sm:$0xff] %vm2818_vm11, %v3211_v33  ;;  %v3382_v29 = vmul.f32 %v3211_v33, %v3211_v33  ;;  %v3325_v10 = vsel %vm2818_vm11, %v3211_v33, 0.0  ;;  %v3387_v33 = vmul.f32 %v6197_v52, %v6197_v52 }
 0x350   : > { %v3426_v27 = vsel %vm2818_vm11, %v3382_v29, 0.0  ;;  %v3436_v14 = vsel %vm2818_vm11, %v3387_v33, 0.0  ;;  %v3393_v29 = vmul.f32 %v6209_v55, %v6209_v55 }
 0x354   : > { %v3193_v12 = vpop.f32.mrf.mxu0 }
 0x355   : > { %3275 = vst.msk [vmem:[%s6060_s22 + $0x38] sm:$0xff] %vm2818_vm11, %v3193_v12  ;;  %v3313_v39 = vsel %vm2818_vm11, %v3193_v12, 0.0  ;;  %v3376_v0 = vmul.f32 %v3193_v12, %v3193_v12 }
 0x356   : > { %v3314_v49 = vadd.f32 %v3313_v39, %v3312_v18 }
 0x357   : > { %v3414_v6 = vsel %vm2818_vm11, %v3376_v0, 0.0  ;;  %v3335_v0 = vsel %vm2818_vm11, %v6197_v52, 0.0 }
 0x358   : > { %v3316_v11 = vadd.f32 %v3315_v36, %v3314_v49  ;;  %v3415_v9 = vadd.f32 %v3414_v6, %v3413_v30  ;;  %v3333_v30 = vsel %vm2818_vm11, %v6168_v16, 0.0  ;;  %v3388_v49 = vmul.f32 %v6228_v26, %v6228_v26 }
 0x359   : > { %v3337_v6 = vsel %vm2818_vm11, %v6228_v26, 0.0 }
 0x35a   : > { %v3318_v42 = vadd.f32 %v3317_v21, %v3316_v11  ;;  %v3417_v44 = vadd.f32 %v3416_v47, %v3415_v9  ;;  %v3438_v21 = vsel %vm2818_vm11, %v3388_v49, 0.0 }
 0x35c   : > { %v3320_v7 = vadd.f32 %v3319_v25, %v3318_v42  ;;  %v3419_v34 = vadd.f32 %v3418_v43, %v3417_v44 }
 0x35e   : > { %v3421_v38 = vadd.f32 %v3420_v50, %v3419_v34  ;;  %v3322_v5 = vadd.f32 %v3321_v3, %v3320_v7 }
 0x360   : > { %v3324_v8 = vadd.f32 %v3323_v32, %v3322_v5  ;;  %v3423_v48 = vadd.f32 %v3422_v13, %v3421_v38 }
 0x362   : > { %v3326_v59 = vadd.f32 %v3325_v10, %v3324_v8  ;;  %v3425_v51 = vadd.f32 %v3424_v35, %v3423_v48 }
 0x363   : > { %v3232_v57 = vpop.f32.mrf.mxu2 }
 0x364   : > { %v3427_v2 = vadd.f32 %v3426_v27, %v3425_v51  ;;  %3288 = vst.msk [vmem:[%s6060_s22 + $0xa0] sm:$0xff] %vm2818_vm11, %v3232_v57  ;;  %v3389_v11 = vmul.f32 %v3232_v57, %v3232_v57  ;;  %v3339_v53 = vsel %vm2818_vm11, %v3232_v57, 0.0  ;;  %v3394_v51 = vmul.f32 %v6233_v24, %v6233_v24 }
 0x366   : > { %v3214_v31 = vpop.f32.mrf.mxu1  ;;  %v3440_v44 = vsel %vm2818_vm11, %v3389_v11, 0.0 }
 0x367   : > { %3282 = vst.msk [vmem:[%s6060_s22 + $0x70] sm:$0xff] %vm2818_vm11, %v3214_v31  ;;  %v3383_v22 = vmul.f32 %v3214_v31, %v3214_v31  ;;  %v3327_v23 = vsel %vm2818_vm11, %v3214_v31, 0.0  ;;  %v3448_v31 = vsel %vm2818_vm11, %v3393_v29, 0.0 }
 0x368   : > { %v3328_v15 = vadd.f32 %v3327_v23, %v3326_v59  ;;  %v3347_v59 = vsel %vm2818_vm11, %v6209_v55, 0.0  ;;  %v3450_v55 = vsel %vm2818_vm11, %v3394_v51, 0.0 }
 0x369   : > { %v3428_v4 = vsel %vm2818_vm11, %v3383_v22, 0.0  ;;  %v3349_v22 = vsel %vm2818_vm11, %v6233_v24, 0.0 }
 0x36a   : > { %v6272_v41 = vpop.f32.mrf.mxu3  ;;  %v3429_v62 = vadd.f32 %v3428_v4, %v3427_v2 }
 0x36b   : > { %3294 = vst.msk [vmem:[%s6060_s22 + $0xd0] sm:$0xff] %vm2818_vm11, %v6272_v41  ;;  %v3395_v23 = vmul.f32 %v6272_v41, %v6272_v41 }
 0x37b   : > { %v3235_v19 = vpop.f32.mrf.mxu2 }
 0x37c   : > { %3289 = vst.msk [vmem:[%s6060_s22 + $0xa8] sm:$0xff] %vm2818_vm11, %v3235_v19  ;;  %v3390_v26 = vmul.f32 %v3235_v19, %v3235_v19  ;;  %v3341_v34 = vsel %vm2818_vm11, %v3235_v19, 0.0 }
 0x37e   : > { %v3217_v45 = vpop.f32.mrf.mxu1  ;;  %v3442_v37 = vsel %vm2818_vm11, %v3390_v26, 0.0 }
 0x37f   : > { %3283 = vst.msk [vmem:[%s6060_s22 + $0x78] sm:$0xff] %vm2818_vm11, %v3217_v45  ;;  %v3329_v20 = vsel %vm2818_vm11, %v3217_v45, 0.0  ;;  %v3384_v56 = vmul.f32 %v3217_v45, %v3217_v45 }
 0x380   : > { %v3330_v60 = vadd.f32 %v3329_v20, %v3328_v15  ;;  %v3351_v15 = vsel %vm2818_vm11, %v6272_v41, 0.0 }
 0x381   : > { %v3430_v18 = vsel %vm2818_vm11, %v3384_v56, 0.0 }
 0x382   : > { %v3332_v17 = vadd.f32 %v3331_v54, %v3330_v60  ;;  %v3431_v28 = vadd.f32 %v3430_v18, %v3429_v62  ;;  %v3253_v12 = vpop.f32.mrf.mxu3  ;;  %v3452_v62 = vsel %vm2818_vm11, %v3395_v23, 0.0 }
 0x383   : > { %3295 = vst.msk [vmem:[%s6060_s22 + $0xd8] sm:$0xff] %vm2818_vm11, %v3253_v12  ;;  %v3396_v1 = vmul.f32 %v3253_v12, %v3253_v12  ;;  %v3353_v24 = vsel %vm2818_vm11, %v3253_v12, 0.0 }
 0x384   : > { %v3334_v58 = vadd.f32 %v3333_v30, %v3332_v17  ;;  %v3433_v39 = vadd.f32 %v3432_v63, %v3431_v28 }
 0x385   : > { %v3454_v61 = vsel %vm2818_vm11, %v3396_v1, 0.0 }
 0x386   : > { %v3336_v36 = vadd.f32 %v3335_v0, %v3334_v58  ;;  %v3435_v16 = vadd.f32 %v3434_v46, %v3433_v39 }
 0x388   : > { %v3437_v9 = vadd.f32 %v3436_v14, %v3435_v16  ;;  %v3338_v47 = vadd.f32 %v3337_v6, %v3336_v36 }
 0x38a   : > { %v3340_v52 = vadd.f32 %v3339_v53, %v3338_v47  ;;  %v3439_v42 = vadd.f32 %v3438_v21, %v3437_v9 }
 0x38c   : > { %v3441_v43 = vadd.f32 %v3440_v44, %v3439_v42  ;;  %v3342_v3 = vadd.f32 %v3341_v34, %v3340_v52 }
 0x38e   : > { %v3443_v13 = vadd.f32 %v3442_v37, %v3441_v43 }
 0x394   : > { %v3238_v25 = vpop.f32.mrf.mxu2 }
 0x395   : > { %3290 = vst.msk [vmem:[%s6060_s22 + $0xb0] sm:$0xff] %vm2818_vm11, %v3238_v25  ;;  %v3391_v7 = vmul.f32 %v3238_v25, %v3238_v25  ;;  %v3343_v50 = vsel %vm2818_vm11, %v3238_v25, 0.0 }
 0x396   : > { %v3344_v5 = vadd.f32 %v3343_v50, %v3342_v3 }
 0x397   : > { %v3444_v38 = vsel %vm2818_vm11, %v3391_v7, 0.0 }
 0x398   : > { %v3445_v35 = vadd.f32 %v3444_v38, %v3443_v13 }
 0x39b   : > { %v3256_v40 = vpop.f32.mrf.mxu3 }
 0x39c   : > { %3296 = vst.msk [vmem:[%s6060_s22 + $0xe0] sm:$0xff] %vm2818_vm11, %v3256_v40  ;;  %v3397_v18 = vmul.f32 %v3256_v40, %v3256_v40  ;;  %v3355_v28 = vsel %vm2818_vm11, %v3256_v40, 0.0 }
 0x39e   : > { %v3456_v30 = vsel %vm2818_vm11, %v3397_v18, 0.0 }
 0x3a4   : > { %v3241_v32 = vpop.f32.mrf.mxu2 }
 0x3a5   : > { %3291 = vst.msk [vmem:[%s6060_s22 + $0xb8] sm:$0xff] %vm2818_vm11, %v3241_v32  ;;  %v3345_v8 = vsel %vm2818_vm11, %v3241_v32, 0.0  ;;  %v3392_v48 = vmul.f32 %v3241_v32, %v3241_v32 }
 0x3a6   : > { %v3346_v10 = vadd.f32 %v3345_v8, %v3344_v5 }
 0x3a7   : > { %v3446_v27 = vsel %vm2818_vm11, %v3392_v48, 0.0 }
 0x3a8   : > { %v3348_v57 = vadd.f32 %v3347_v59, %v3346_v10  ;;  %v3447_v2 = vadd.f32 %v3446_v27, %v3445_v35 }
 0x3aa   : > { %v3350_v19 = vadd.f32 %v3349_v22, %v3348_v57  ;;  %v3449_v4 = vadd.f32 %v3448_v31, %v3447_v2 }
 0x3ab   : > { %v3259_v45 = vpop.f32.mrf.mxu3 }
 0x3ac   : > { %v3352_v20 = vadd.f32 %v3351_v15, %v3350_v19  ;;  %v3451_v56 = vadd.f32 %v3450_v55, %v3449_v4  ;;  %3297 = vst.msk [vmem:[%s6060_s22 + $0xe8] sm:$0xff] %vm2818_vm11, %v3259_v45  ;;  %v3398_v33 = vmul.f32 %v3259_v45, %v3259_v45  ;;  %v3357_v39 = vsel %vm2818_vm11, %v3259_v45, 0.0 }
 0x3ae   : > { %v3453_v60 = vadd.f32 %v3452_v62, %v3451_v56  ;;  %v3354_v54 = vadd.f32 %v3353_v24, %v3352_v20  ;;  %v3458_v0 = vsel %vm2818_vm11, %v3398_v33, 0.0 }
 0x3b0   : > { %v3455_v17 = vadd.f32 %v3454_v61, %v3453_v60  ;;  %v3356_v41 = vadd.f32 %v3355_v28, %v3354_v54 }
 0x3b2   : > { %v3457_v58 = vadd.f32 %v3456_v30, %v3455_v17  ;;  %v3358_v46 = vadd.f32 %v3357_v39, %v3356_v41 }
 0x3b3   : > { %v3262_v63 = vpop.f32.mrf.mxu3 }
 0x3b4   : > { %3298 = vst.msk [vmem:[%s6060_s22 + $0xf0] sm:$0xff] %vm2818_vm11, %v3262_v63  ;;  %v3399_v12 = vmul.f32 %v3262_v63, %v3262_v63  ;;  %v3359_v49 = vsel %vm2818_vm11, %v3262_v63, 0.0  ;;  %v3459_v36 = vadd.f32 %v3458_v0, %v3457_v58 }
 0x3b5   : > { %v3360_v14 = vadd.f32 %v3359_v49, %v3358_v46 }
 0x3b6   : > { %v3460_v16 = vsel %vm2818_vm11, %v3399_v12, 0.0 }
 0x3b7   : > { %v3461_v47 = vadd.f32 %v3460_v16, %v3459_v36 }
 0x3bb   : > { %v3265_v6 = vpop.f32.mrf.mxu3 }
 0x3bc   : > { %3299 = vst.msk [vmem:[%s6060_s22 + $0xf8] sm:$0xff] %vm2818_vm11, %v3265_v6  ;;  %v3361_v11 = vsel %vm2818_vm11, %v3265_v6, 0.0  ;;  %v3400_v9 = vmul.f32 %v3265_v6, %v3265_v6 }
 0x3bd   : > { %v3362_v21 = vadd.f32 %v3361_v11, %v3360_v14 }
 0x3be   : > { %v3462_v53 = vsel %vm2818_vm11, %v3400_v9, 0.0 }
 0x3bf   : > { %v3363_v52 = vrot.slane %v3362_v21, 4  ;;  %v3463_v42 = vadd.f32 %v3462_v53, %v3461_v47 }
 0x3c1   : > { %v3364_v44 = vadd.f32 %v3363_v52, %v3362_v21  ;;  %v3464_v43 = vrot.slane %v3463_v42, 4 }
 0x3c3   : > { %v3365_v25 = vrot.slane %v3364_v44, 2  ;;  %v3465_v40 = vadd.f32 %v3464_v43, %v3463_v42 }
 0x3c5   : > { %v3366_v26 = vadd.f32 %v3365_v25, %v3364_v44  ;;  %v3466_v7 = vrot.slane %v3465_v40, 2 }
 0x3c7   : > { %v3367_v34 = vrot.slane %v3366_v26, 1  ;;  %v3467_v50 = vadd.f32 %v3466_v7, %v3465_v40 }
 0x3c9   : > { %v3468_v3 = vrot.slane %v3467_v50, 1  ;;  %v3368_v37 = vadd.f32 %v3367_v34, %v3366_v26 }
 0x3cb   : > { %v3469_v38 = vadd.f32 %v3468_v3, %v3467_v50 }
 0x3cd   : > { %v3470_v5 = vsel %vm500_vm0, %v3368_v37, %v3469_v38 }
 0x3ce   : > { %3472 = vst.msk [vmem:[%s448_s27] sm:$0x3] %vm3471_vm1, %v3470_v5 }
 0x3cf PF: > { %s18_s24 = sadd.s32 1, %s3760_s24   ;;  %s7061_s23 = smov %s3756_s1 }
 0x3d0   : > { %p15_p10 = scmp.ge.s32.totalorder %s18_s24, 4   ;;  %s7062_s1 = smov %s7064_s25 }
 0x3d2   :  { %17 = sbr.rel (!%p15_p10) target bundleno = 2 (0x2), region = 92 }

// kernel: decoder_block.4
= control target key start
LH: loop header
LB: loop body
LE: loop exit
PB: predicated region body
PF: predicated region fallthrough
CT: control target
= control target key end

     0   :  { %s3945_s24 = smov 0   ;;  %s3947_s25 = smov 0   ;;  %s6616_s0 = inlined_call_operand.vmem [shape: f32[1,8], index: 0, kind: input, shape index: {}]   ;;  %s6617_s1 = inlined_call_operand.vmem [shape: f32[1,8], index: 1, kind: input, shape index: {}]   ;;  %s6618_s2 = inlined_call_operand.vmem [shape: f32[72,8], index: 2, kind: input, shape index: {}]   ;;  %s6619_s3 = inlined_call_operand.vmem [shape: f32[512,8], index: 3, kind: input, shape index: {}, may-alias: {3,4,5}]   ;;  %s6620_s4 = inlined_call_operand.vmem [shape: f32[512,8], index: 4, kind: input, shape index: {}, may-alias: {3,4,5}]   ;;  %s6621_s5 = inlined_call_operand.vmem [shape: f32[512,8], index: 5, kind: input, shape index: {}, may-alias: {3,4,5}]   ;;  %s6622_s6 = inlined_call_operand.vmem [shape: f32[512,8], index: 6, kind: output, shape index: {0}]   ;;  %s6623_s7 = inlined_call_operand.vmem [shape: f32[2,2,8], index: 7, kind: output, shape index: {1}]  }
   0x1   :  { %s3949_s26 = smov 0  }
   0x2 LB: > { %s30_s27 = sadd.s32 1, %s3889_s25  ;;  %p3725_p0 = scmp.ge.s32.totalorder %s3893_s26, 1  ;;  %s3893_s26 = sphi %s3949_s26, %s18_s26   ;;  %s3889_s25 = sphi %s3947_s25, %s7303_s25   ;;  %s3885_s24 = sphi %s3945_s24, %s7302_s24  }
   0x3   : > { %p32_p1 = scmp.ge.s32.totalorder %s30_s27, 2  ;;  %p331_p2 = scmp.lt.s32.totalorder %s3893_s26, 3 }
   0x5   : > { %s7305_s27 = smov (%p32_p1, %s30_s27), 0  ;;  %p332_p3 = pnand %p3725_p0, %p331_p2 }
   0x7   : > { %335 = sbr.rel (%p332_p3) target bundleno = 978 (0x3d2), region = 44 }
   0xc   : > { %s3726_s28 = sshll.u32 %s3885_s24, 5  ;;  %s3728_s29 = sshll.u32 %s3885_s24, 4  ;;  %v3972_v0 = vld [vmem:[%s6616_s0] ss:$0 sm:$0xff]  ;;  %vm616_vm0 = vcmask 1040384   ;;  %vm1698_vm1 = vcmask 1046528  }
   0xd   : > { %p394_p4 = scmp.lt.s32.totalorder %s3726_s28, 63  ;;  %s3729_s9 = sadd.s32 4294967295, %s3728_s29  ;;  %v3987_v1 = vld [vmem:[%s6617_s1] ss:$0 sm:$0xff]  ;;  %vm1436_vm3 = vcmask 1041408   ;;  %vm1893_vm7 = vcmask 1045504  }
   0xe   : > { %p404_p5 = scmp.gt.s32.totalorder %s3729_s9, 0  ;;  %s3895_s21 = smov 8  }
   0xf   : > { %s7307_s28 = smov (!%p394_p4, %s3726_s28), 63  ;;  %s3898_s22 = smov 16  }
  0x10   : > { %s3727_s10 = sshll.u32 %s7307_s28, 3  ;;  %s7309_s9 = smov (!%p404_p5, %s3729_s9), 0 }
  0x11   : > { %s3982_s13 = scalar_lea.vmem %s6619_s3, %s3727_s10  ;;  %s3730_s16 = sshll.u32 %s7309_s9, 1 }
  0x12   : > { %v489_v2 = vld [vmem:[%s3982_s13 + $0x18] sm:$0xff]  ;;  %v490_v3 = vld [vmem:[%s3982_s13 + $0x20] sm:$0xff]  ;;  %v491_v4 = vld [vmem:[%s3982_s13 + $0x28] sm:$0xff]  ;;  %p407_p6 = scmp.lt.s32.totalorder %s3730_s16, 63  ;;  %s3899_s23 = smov 24  }
  0x13   : > { %v521_v5 = vmul.f32 %v3972_v0, %v489_v2  ;;  %v522_v6 = vmul.f32 %v3972_v0, %v490_v3  ;;  %v523_v7 = vmul.f32 %v3972_v0, %v491_v4  ;;  %v487_v8 = vld [vmem:[%s3982_s13 + $0x8] sm:$0xff]  ;;  %v488_v9 = vld [vmem:[%s3982_s13 + $0x10] sm:$0xff]  ;;  %v486_v10 = vld [vmem:[%s3982_s13] sm:$0xff]  ;;  %s3900_s12 = smov 32   ;;  %s3901_s18 = smov 40  }
  0x14   : > { %v519_v11 = vmul.f32 %v3972_v0, %v487_v8  ;;  %v520_v12 = vmul.f32 %v3972_v0, %v488_v9  ;;  %v518_v13 = vmul.f32 %v3972_v0, %v486_v10  ;;  %v492_v14 = vld [vmem:[%s3982_s13 + $0x30] sm:$0xff]  ;;  %v493_v15 = vld [vmem:[%s3982_s13 + $0x38] sm:$0xff]  ;;  %v494_v16 = vld [vmem:[%s3982_s13 + $0x40] sm:$0xff]  ;;  %s7311_s16 = smov (!%p407_p6, %s3730_s16), 63  ;;  %s3902_s19 = smov 56  }
  0x15   : > { %v553_v17 = vadd.f32 %v3987_v1, %v521_v5  ;;  %v554_v18 = vadd.f32 %v3987_v1, %v522_v6  ;;  %v555_v19 = vadd.f32 %v3987_v1, %v523_v7  ;;  %v524_v20 = vmul.f32 %v3972_v0, %v492_v14  ;;  %s3731_s17 = sshll.u32 %s7311_s16, 3  ;;  %v495_v62 = vld [vmem:[%s3982_s13 + $0x48] sm:$0xff]  ;;  %v496_v63 = vld [vmem:[%s3982_s13 + $0x50] sm:$0xff]  ;;  %v497_v14 = vld [vmem:[%s3982_s13 + $0x58] sm:$0xff]  ;;  %s6301_s15 = scalar_lea.vmem %s6622_s6, %s3727_s10 }
  0x16   : > { %v551_v21 = vadd.f32 %v3987_v1, %v519_v11  ;;  %v552_v22 = vadd.f32 %v3987_v1, %v520_v12  ;;  %v550_v23 = vadd.f32 %v3987_v1, %v518_v13  ;;  %v525_v24 = vmul.f32 %v3972_v0, %v493_v15  ;;  %s410_s20 = scalar_lea.vmem %s6620_s4, %s3731_s17  ;;  %v498_v15 = vld [vmem:[%s3982_s13 + $0x60] sm:$0xff]  ;;  %p445_p9 = scmp.lt.s32.totalorder %s3885_s24, 1 }
  0x17   : > { %v585_v25 = vmax.f32 %v553_v17, 0.0  ;;  %v586_v26 = vmax.f32 %v554_v18, 0.0  ;;  %v587_v27 = vmax.f32 %v555_v19, 0.0  ;;  %v526_v28 = vmul.f32 %v3972_v0, %v494_v16  ;;  %v450_v49 = vld [vmem:[%s410_s20] sm:$0xff]  ;;  %v451_v54 = vld [vmem:[%s410_s20 + $0x8] sm:$0xff]  ;;  %s3903_s20 = smov 48  }
  0x18   : > { %v583_v29 = vmax.f32 %v551_v21, 0.0  ;;  %v584_v30 = vmax.f32 %v552_v22, 0.0  ;;  %v582_v31 = vmax.f32 %v550_v23, 0.0  ;;  %v556_v32 = vadd.f32 %v3987_v1, %v524_v20  ;;  %v499_v16 = vld [vmem:[%s3982_s13 + $0x68] sm:$0xff]  ;;  %s7317_s24 = smov (!%p445_p9, %s3885_s24), 1 }
  0x19   : > { %v660_v33 = vrot.slane %v585_v25, 7  ;;  %v662_v34 = vrot.slane %v586_v26, 7  ;;  %v664_v35 = vrot.slane %v587_v27, 7  ;;  %v557_v36 = vadd.f32 %v3987_v1, %v525_v24  ;;  %s3737_s28 = sshll.u32 %s7317_s24, 1 }
  0x1a   : > { %v656_v37 = vrot.slane %v583_v29, 7  ;;  %v658_v38 = vrot.slane %v584_v30, 7  ;;  %v4018_v39 = vrot.slane %v582_v31, 7  ;;  %v558_v40 = vadd.f32 %v3987_v1, %v526_v28 }
  0x1b   : > { %v4025_v41 = vsel %vm616_vm0, %v660_v33, %v662_v34  ;;  %v4028_v42 = vsel %vm616_vm0, %v662_v34, %v664_v35  ;;  %v588_v43 = vmax.f32 %v556_v32, 0.0  ;;  %v589_v44 = vmax.f32 %v557_v36, 0.0 }
  0x1c   : > { %6804 = vst [vmem:[#allocation2_spill] sm:$0xff] %v4025_v41  ;;  %v1710_v45 = vrot.slane %v4025_v41, 1  ;;  %v1712_v46 = vrot.slane %v4028_v42, 1  ;;  %v4033_v47 = vsel %vm616_vm0, %v656_v37, %v658_v38  ;;  %v4036_v48 = vsel %vm616_vm0, %v658_v38, %v660_v33  ;;  %v500_v38 = vld [vmem:[%s3982_s13 + $0x70] sm:$0xff] }
  0x1d   : > { %6805 = vst [vmem:[#allocation3_spill] sm:$0xff] %v4028_v42  ;;  %v1706_v50 = vrot.slane %v4033_v47, 1  ;;  %v1708_v51 = vrot.slane %v4036_v48, 1  ;;  %v4042_v52 = vsel %vm616_vm0, %v4018_v39, %v656_v37  ;;  %v590_v53 = vmax.f32 %v558_v40, 0.0 }
  0x1e   : > { %6806 = vst [vmem:[#allocation4_spill] sm:$0xff] %v4033_v47  ;;  %v4045_v55 = vsel %vm1698_vm1, %v1710_v45, %v1712_v46  ;;  %v1704_v56 = vrot.slane %v4042_v52, 1  ;;  %v666_v57 = vrot.slane %v588_v43, 7  ;;  %v668_v58 = vrot.slane %v589_v44, 7 }
  0x1f   : > { %6807 = vst [vmem:[#allocation5_spill] sm:$0xff] %v4036_v48  ;;  %1776 = vrot.lane.b32.xlu0 %v4045_v55, %s3895_s21  ;;  %v4051_v59 = vsel %vm1698_vm1, %v1706_v50, %v1708_v51  ;;  %v670_v60 = vrot.slane %v590_v53, 7  ;;  %v456_v61 = vmul.f32 %v3972_v0, %v450_v49  ;;  %v457_v5 = vmul.f32 %v3972_v0, %v451_v54  ;;  %v502_v53 = vld [vmem:[%s3982_s13 + $0x80] sm:$0xff] }
  0x20   : > { %6808 = vst [vmem:[#allocation6_spill] sm:$0xff] %v4042_v52  ;;  %1772 = vrot.lane.b32.xlu2 %v4051_v59, %s3895_s21  ;;  %v4061_v2 = vsel %vm1698_vm1, %v1704_v56, %v1706_v50  ;;  %v4064_v3 = vsel %vm616_vm0, %v666_v57, %v668_v58  ;;  %v4067_v4 = vsel %vm616_vm0, %v664_v35, %v666_v57 }
  0x21   : > { %6809 = vst [vmem:[#allocation7_spill] sm:$0xff] %v4064_v3  ;;  %1770 = vrot.lane.b32.xlu1 %v4061_v2, %s3895_s21  ;;  %v4073_v6 = vsel %vm616_vm0, %v668_v58, %v670_v60  ;;  %v1716_v7 = vrot.slane %v4064_v3, 1  ;;  %v1714_v8 = vrot.slane %v4067_v4, 1  ;;  %v462_v9 = vadd.f32 %v3987_v1, %v456_v61 }
  0x22   : > { %6810 = vst [vmem:[#allocation8_spill] sm:$0xff] %v4073_v6  ;;  %v1718_v10 = vrot.slane %v4073_v6, 1  ;;  %v463_v11 = vadd.f32 %v3987_v1, %v457_v5  ;;  %v527_v12 = vmul.f32 %v3972_v0, %v495_v62  ;;  %v528_v13 = vmul.f32 %v3972_v0, %v496_v63 }
  0x23   : > { %v4086_v17 = vsel %vm1698_vm1, %v1708_v51, %v1710_v45  ;;  %v464_v18 = vmax.f32 %v462_v9, 0.0  ;;  %v529_v24 = vmul.f32 %v3972_v0, %v497_v14  ;;  %v530_v25 = vmul.f32 %v3972_v0, %v498_v15  ;;  %v505_v14 = vld [vmem:[%s3982_s13 + $0x98] sm:$0xff] }
  0x24   : > { %v4089_v19 = vsel %vm1698_vm1, %v1716_v7, %v1718_v10  ;;  %v465_v20 = vmax.f32 %v463_v11, 0.0  ;;  %v559_v21 = vadd.f32 %v3987_v1, %v527_v12  ;;  %v560_v22 = vadd.f32 %v3987_v1, %v528_v13  ;;  %v503_v12 = vld [vmem:[%s3982_s13 + $0x88] sm:$0xff]  ;;  %v504_v13 = vld [vmem:[%s3982_s13 + $0x90] sm:$0xff] }
  0x25   : > { %6811 = vst [vmem:[#allocation9_spill] sm:$0xff] %v4089_v19  ;;  %v470_v23 = vmul.f32 0.0, %v464_v18  ;;  %v531_v26 = vmul.f32 %v3972_v0, %v499_v16  ;;  %v4097_v27 = vsel %vm1698_vm1, %v1712_v46, %v1714_v8  ;;  %v561_v35 = vadd.f32 %v3987_v1, %v529_v24  ;;  %v501_v46 = vld [vmem:[%s3982_s13 + $0x78] sm:$0xff] }
  0x26   : > { %6812 = vst [vmem:[#allocation10_spill] sm:$0xff] %v4097_v27  ;;  %v471_v28 = vmul.f32 0.0, %v465_v20  ;;  %v591_v29 = vmax.f32 %v559_v21, 0.0  ;;  %v592_v30 = vmax.f32 %v560_v22, 0.0  ;;  %v562_v36 = vadd.f32 %v3987_v1, %v530_v25 }
  0x27   : > { %1782 = vrot.lane.b32.xlu0 %v4089_v19, %s3895_s21  ;;  %v617_v31 = vrot.slane %v470_v23, 7  ;;  %v563_v37 = vadd.f32 %v3987_v1, %v531_v26  ;;  %v4123_v51 = vsel %vm1698_vm1, %v1714_v8, %v1716_v7  ;;  %v532_v54 = vmul.f32 %v3972_v0, %v500_v38 }
  0x28   : > { %1774 = vrot.lane.b32.xlu2 %v4086_v17, %s3895_s21  ;;  %v618_v32 = vrot.slane %v471_v28, 7  ;;  %v672_v33 = vrot.slane %v591_v29, 7  ;;  %v674_v45 = vrot.slane %v592_v30, 7  ;;  %6816 = vst [vmem:[#allocation14_spill] sm:$0xff] %v4123_v51  ;;  %v533_v61 = vmul.f32 %v3972_v0, %v501_v46 }
  0x29   : > { %1778 = vrot.lane.b32.xlu1 %v4097_v27, %s3895_s21  ;;  %v4106_v34 = vsel %vm616_vm0, 0.0, %v617_v31  ;;  %v594_v5 = vmax.f32 %v562_v36, 0.0  ;;  %v595_v7 = vmax.f32 %v563_v37, 0.0  ;;  %v534_v8 = vmul.f32 %v3972_v0, %v502_v53  ;;  %v507_v53 = vld [vmem:[%s3982_s13 + $0xa8] sm:$0xff] }
  0x2a   : > { %6813 = vst [vmem:[#allocation11_spill] sm:$0xff] %v4106_v34  ;;  %v4113_v40 = vsel %vm616_vm0, %v617_v31, %v618_v32  ;;  %v1699_v43 = vrot.slane %v4106_v34, 1  ;;  %v4117_v44 = vsel %vm616_vm0, %v670_v60, %v672_v33  ;;  %v4130_v58 = vsel %vm616_vm0, %v618_v32, %v4018_v39 }
  0x2b   : > { %6814 = vst [vmem:[#allocation12_spill] sm:$0xff] %v4113_v40  ;;  %v1700_v49 = vrot.slane %v4113_v40, 1  ;;  %v1720_v50 = vrot.slane %v4117_v44, 1  ;;  %v593_v60 = vmax.f32 %v561_v35, 0.0  ;;  %v4137_v63 = vsel %vm616_vm0, %v672_v33, %v674_v45 }
  0x2c   : > { %6815 = vst [vmem:[#allocation13_spill] sm:$0xff] %v4117_v44  ;;  %v1702_v39 = vrot.slane %v4130_v58, 1  ;;  %v1722_v9 = vrot.slane %v4137_v63, 1  ;;  %v564_v11 = vadd.f32 %v3987_v1, %v532_v54  ;;  %v678_v15 = vrot.slane %v594_v5, 7  ;;  %v508_v54 = vld [vmem:[%s3982_s13 + $0xb0] sm:$0xff] }
  0x2d   : > { %v1701_v57 = vsel %vm1698_vm1, %v1699_v43, %v1700_v49  ;;  %6817 = vst [vmem:[#allocation15_spill] sm:$0xff] %v4130_v58  ;;  %v4134_v62 = vsel %vm1698_vm1, %v1718_v10, %v1720_v50  ;;  %v676_v10 = vrot.slane %v593_v60, 7  ;;  %v680_v16 = vrot.slane %v595_v7, 7 }
  0x2e   : > { %6818 = vst [vmem:[#allocation16_spill] sm:$0xff] %v4134_v62  ;;  %v565_v18 = vadd.f32 %v3987_v1, %v533_v61  ;;  %v566_v20 = vadd.f32 %v3987_v1, %v534_v8  ;;  %v1703_v21 = vsel %vm1698_vm1, %v1700_v49, %v1702_v39  ;;  %v535_v22 = vmul.f32 %v3972_v0, %v503_v12 }
  0x2f   : > { %6819 = vst [vmem:[#allocation17_spill] sm:$0xff] %v4137_v63  ;;  %1764 = vrot.lane.b32.xlu0 %v1701_v57, %s3895_s21  ;;  %v536_v23 = vmul.f32 %v3972_v0, %v504_v13  ;;  %v537_v24 = vmul.f32 %v3972_v0, %v505_v14  ;;  %v4158_v25 = vsel %vm1698_vm1, %v1720_v50, %v1722_v9  ;;  %v596_v29 = vmax.f32 %v564_v11, 0.0  ;;  %v506_v50 = vld [vmem:[%s3982_s13 + $0xa0] sm:$0xff] }
  0x30   : > { %1780 = vrot.lane.b32.xlu2 %v4123_v51, %s3895_s21  ;;  %6820 = vst [vmem:[#allocation18_spill] sm:$0xff] %v4158_v25  ;;  %v4163_v26 = vsel %vm1698_vm1, %v1702_v39, %v1704_v56  ;;  %v4166_v28 = vsel %vm616_vm0, %v674_v45, %v676_v10  ;;  %v4169_v30 = vsel %vm616_vm0, %v676_v10, %v678_v15  ;;  %v597_v32 = vmax.f32 %v565_v18, 0.0 }
  0x31   : > { %1784 = vrot.lane.b32.xlu1 %v4134_v62, %s3895_s21  ;;  %v4172_v31 = vsel %vm616_vm0, %v678_v15, %v680_v16  ;;  %v598_v33 = vmax.f32 %v566_v20, 0.0  ;;  %v1724_v56 = vrot.slane %v4166_v28, 1  ;;  %v567_v35 = vadd.f32 %v3987_v1, %v535_v22 }
  0x32   : > { %v568_v36 = vadd.f32 %v3987_v1, %v536_v23  ;;  %v569_v37 = vadd.f32 %v3987_v1, %v537_v24  ;;  %v1726_v38 = vrot.slane %v4169_v30, 1  ;;  %v1728_v43 = vrot.slane %v4172_v31, 1 }
  0x33   : > { %v682_v45 = vrot.slane %v596_v29, 7  ;;  %v684_v46 = vrot.slane %v597_v32, 7  ;;  %v686_v49 = vrot.slane %v598_v33, 7  ;;  %v4189_v57 = vsel %vm1698_vm1, %v1722_v9, %v1724_v56  ;;  %v509_v29 = vld [vmem:[%s3982_s13 + $0xb8] sm:$0xff]  ;;  %v510_v32 = vld [vmem:[%s3982_s13 + $0xc0] sm:$0xff]  ;;  %v511_v33 = vld [vmem:[%s3982_s13 + $0xc8] sm:$0xff] }
  0x34   : > { %6821 = vst [vmem:[#allocation19_spill] sm:$0xff] %v4189_v57  ;;  %v599_v60 = vmax.f32 %v567_v35, 0.0  ;;  %v600_v61 = vmax.f32 %v568_v36, 0.0  ;;  %v601_v5 = vmax.f32 %v569_v37, 0.0  ;;  %v4192_v7 = vsel %vm1698_vm1, %v1726_v38, %v1728_v43 }
  0x35   : > { %6822 = vst [vmem:[#allocation20_spill] sm:$0xff] %v4192_v7  ;;  %v4195_v8 = vsel %vm616_vm0, %v680_v16, %v682_v45  ;;  %v538_v39 = vmul.f32 %v3972_v0, %v506_v50  ;;  %v539_v10 = vmul.f32 %v3972_v0, %v507_v53  ;;  %v4200_v11 = vsel %vm1698_vm1, %v1724_v56, %v1726_v38 }
  0x36   : > { %6823 = vst [vmem:[#allocation21_spill] sm:$0xff] %v4200_v11  ;;  %v4203_v9 = vsel %vm616_vm0, %v682_v45, %v684_v46  ;;  %v4206_v12 = vsel %vm616_vm0, %v684_v46, %v686_v49  ;;  %v540_v13 = vmul.f32 %v3972_v0, %v508_v54  ;;  %v1730_v14 = vrot.slane %v4195_v8, 1 }
  0x37   : > { %1766 = vrot.lane.b32.xlu0 %v1703_v21, %s3895_s21  ;;  %6824 = vst [vmem:[#allocation22_spill] sm:$0xff] %v4203_v9  ;;  %v688_v15 = vrot.slane %v599_v60, 7  ;;  %v690_v16 = vrot.slane %v600_v61, 7  ;;  %v692_v18 = vrot.slane %v601_v5, 7  ;;  %v1732_v20 = vrot.slane %v4203_v9, 1 }
  0x38   : > { %1786 = vrot.lane.b32.xlu2 %v4158_v25, %s3895_s21  ;;  %v1734_v21 = vrot.slane %v4206_v12, 1  ;;  %v570_v22 = vadd.f32 %v3987_v1, %v538_v39  ;;  %v571_v23 = vadd.f32 %v3987_v1, %v539_v10  ;;  %v572_v24 = vadd.f32 %v3987_v1, %v540_v13 }
  0x39   : > { %1768 = vrot.lane.b32.xlu1 %v4163_v26, %s3895_s21  ;;  %v4225_v56 = vsel %vm1698_vm1, %v1728_v43, %v1730_v14  ;;  %v4228_v35 = vsel %vm616_vm0, %v688_v15, %v690_v16  ;;  %v4231_v36 = vsel %vm616_vm0, %v690_v16, %v692_v18  ;;  %v4234_v37 = vsel %vm616_vm0, %v686_v49, %v688_v15  ;;  %v512_v15 = vld [vmem:[%s3982_s13 + $0xd0] sm:$0xff] }
  0x3a   : > { %6825 = vst [vmem:[#allocation23_spill] sm:$0xff] %v4225_v56  ;;  %v4237_v38 = vsel %vm1698_vm1, %v1732_v20, %v1734_v21  ;;  %v602_v45 = vmax.f32 %v570_v22, 0.0  ;;  %v603_v46 = vmax.f32 %v571_v23, 0.0  ;;  %v541_v50 = vmul.f32 %v3972_v0, %v509_v29  ;;  %v513_v23 = vld [vmem:[%s3982_s13 + $0xd8] sm:$0xff]  ;;  %v514_v29 = vld [vmem:[%s3982_s13 + $0xe0] sm:$0xff] }
  0x3b   : > { %6826 = vst [vmem:[#allocation24_spill] sm:$0xff] %v4234_v37  ;;  %v4241_v43 = vsel %vm1698_vm1, %v1730_v14, %v1732_v20  ;;  %v604_v53 = vmax.f32 %v572_v24, 0.0  ;;  %v542_v54 = vmul.f32 %v3972_v0, %v510_v32  ;;  %v543_v60 = vmul.f32 %v3972_v0, %v511_v33 }
  0x3c   : > { %6827 = vst [vmem:[#allocation25_spill] sm:$0xff] %v4237_v38  ;;  %v1738_v49 = vrot.slane %v4228_v35, 1  ;;  %v1740_v61 = vrot.slane %v4231_v36, 1  ;;  %v1736_v5 = vrot.slane %v4234_v37, 1  ;;  %v763_v39 = vlaneseq }
  0x3d   : > { %6828 = vst [vmem:[#allocation26_spill] sm:$0xff] %v4241_v43  ;;  %v694_v10 = vrot.slane %v602_v45, 7  ;;  %v696_v13 = vrot.slane %v603_v46, 7  ;;  %v573_v14 = vadd.f32 %v3987_v1, %v541_v50  ;;  %v698_v16 = vrot.slane %v604_v53, 7 }
  0x3e   : > { %v574_v20 = vadd.f32 %v3987_v1, %v542_v54  ;;  %v575_v22 = vadd.f32 %v3987_v1, %v543_v60  ;;  %v4260_v24 = vsel %vm1698_vm1, %v1738_v49, %v1740_v61  ;;  %v4264_v32 = vsel %vm1698_vm1, %v1734_v21, %v1736_v5 }
  0x3f   : > { %1788 = vrot.lane.b32.xlu0 %v4189_v57, %s3895_s21  ;;  %6829 = vst [vmem:[#allocation27_spill] sm:$0xff] %v4260_v24  ;;  %v4267_v33 = vsel %vm1698_vm1, %v1736_v5, %v1738_v49  ;;  %v544_v45 = vmul.f32 %v3972_v0, %v512_v15  ;;  %v4270_v46 = vshrl.u32 %v763_v39, 7  ;;  %v4273_v50 = vsel %vm616_vm0, %v694_v10, %v696_v13 }
  0x40   : > { %1792 = vrot.lane.b32.xlu2 %v4192_v7, %s3895_s21  ;;  %6830 = vst [vmem:[#allocation28_spill] sm:$0xff] %v4264_v32  ;;  %v4276_v53 = vsel %vm616_vm0, %v692_v18, %v694_v10  ;;  %v605_v54 = vmax.f32 %v573_v14, 0.0  ;;  %v545_v60 = vmul.f32 %v3972_v0, %v513_v23  ;;  %v606_v21 = vmax.f32 %v574_v20, 0.0 }
  0x41   : > { %1790 = vrot.lane.b32.xlu1 %v4200_v11, %s3895_s21  ;;  %6831 = vst [vmem:[#allocation29_spill] sm:$0xff] %v4267_v33  ;;  %v607_v49 = vmax.f32 %v575_v22, 0.0  ;;  %v546_v5 = vmul.f32 %v3972_v0, %v514_v29  ;;  %v1744_v18 = vrot.slane %v4273_v50, 1  ;;  %v1742_v39 = vrot.slane %v4276_v53, 1 }
  0x42   : > { %6832 = vst [vmem:[#allocation30_spill] sm:$0xff] %v4276_v53  ;;  %v765_v10 = vadd.s32 8, %v4270_v46  ;;  %v700_v14 = vrot.slane %v605_v54, 7  ;;  %v576_v15 = vadd.f32 %v3987_v1, %v544_v45  ;;  %v702_v20 = vrot.slane %v606_v21, 7 }
  0x43   : > { %v704_v22 = vrot.slane %v607_v49, 7  ;;  %v577_v23 = vadd.f32 %v3987_v1, %v545_v60  ;;  %v578_v29 = vadd.f32 %v3987_v1, %v546_v5 }
  0x44   : > { %v4308_v45 = vsel %vm616_vm0, %v698_v16, %v700_v14  ;;  %v608_v54 = vmax.f32 %v576_v15, 0.0  ;;  %v4312_v21 = vsel %vm616_vm0, %v700_v14, %v702_v20 }
  0x45   : > { %6836 = vst [vmem:[#allocation34_spill] sm:$0xff] %v4308_v45  ;;  %v609_v49 = vmax.f32 %v577_v23, 0.0  ;;  %v610_v5 = vmax.f32 %v578_v29, 0.0 }
  0x46   : > { %v706_v14 = vrot.slane %v608_v54, 7 }
  0x47   : > { %1794 = vrot.lane.b32.xlu0 %v4225_v56, %s3895_s21  ;;  %v4301_v56 = vsel %vm1698_vm1, %v1742_v39, %v1744_v18 }
  0x48   : > { %1798 = vrot.lane.b32.xlu2 %v4237_v38, %s3895_s21  ;;  %v4280_v38 = vsel %vm616_vm0, %v696_v13, %v698_v16  ;;  %6834 = vst [vmem:[#allocation32_spill] sm:$0xff] %v4301_v56  ;;  %v1748_v16 = vrot.slane %v4308_v45, 1  ;;  %v4341_v54 = vsel %vm616_vm0, %v704_v22, %v706_v14 }
  0x49   : > { %1796 = vrot.lane.b32.xlu1 %v4241_v43, %s3895_s21  ;;  %v1746_v13 = vrot.slane %v4280_v38, 1  ;;  %v807_v43 = vand.u32 15, %v765_v10 }
  0x4b   : > { %v4305_v7 = vsel %vm1698_vm1, %v1744_v18, %v1746_v13  ;;  %vm1277_vm2 = vcmp.ne.s32.totalorder %v807_v43, 15  ;;  %v4332_v43 = vsel %vm1698_vm1, %v1746_v13, %v1748_v16 }
  0x4c   : > { %6835 = vst [vmem:[#allocation33_spill] sm:$0xff] %v4305_v7 }
  0x4d   : > { %6837 = vst [vmem:[#allocation35_spill] sm:$0xff] %v4332_v43 }
  0x4f   : > { %1800 = vrot.lane.b32.xlu0 %v4264_v32, %s3895_s21  ;;  %v4298_v32 = vsel %vm1698_vm1, %v1740_v61, %v1742_v39  ;;  %v4315_v61 = vsel %vm616_vm0, %v702_v20, %v704_v22  ;;  %v1750_v39 = vrot.slane %v4312_v21, 1  ;;  %v708_v20 = vrot.slane %v609_v49, 7 }
  0x50   : > { %1804 = vrot.lane.b32.xlu2 %v4260_v24, %s3895_s21  ;;  %v515_v24 = vld [vmem:[%s3982_s13 + $0xe8] sm:$0xff]  ;;  %6833 = vst [vmem:[#allocation31_spill] sm:$0xff] %v4298_v32  ;;  %v1752_v10 = vrot.slane %v4315_v61, 1  ;;  %v1754_v22 = vrot.slane %v4341_v54, 1 }
  0x51   : > { %1802 = vrot.lane.b32.xlu1 %v4267_v33, %s3895_s21  ;;  %v516_v33 = vld [vmem:[%s3982_s13 + $0xf0] sm:$0xff]  ;;  %v547_v60 = vmul.f32 %v3972_v0, %v515_v24  ;;  %v767_v24 = vadd.s32 24, %v4270_v46  ;;  %v4344_v49 = vsel %vm616_vm0, %v706_v14, %v708_v20 }
  0x52   : > { %v548_v18 = vmul.f32 %v3972_v0, %v516_v33  ;;  %v710_v0 = vrot.slane %v610_v5, 7  ;;  %v6662_v33 = vmov 0.0   ;;  %v1756_v14 = vrot.slane %v4344_v49, 1 }
  0x53   : > { %v579_v15 = vadd.f32 %v3987_v1, %v547_v60  ;;  %v3754_v23 = vsel %vm1277_vm2, 1.0, %v6662_v33 }
  0x54   : > { %v580_v29 = vadd.f32 %v3987_v1, %v548_v18  ;;  %v4347_v5 = vsel %vm616_vm0, %v708_v20, %v710_v0  ;;  %v3897_v1 = vmov 1.0   ;;  %v1438_v18 = vrot.slane %v3754_v23, 6 }
  0x55   : > { %v611_v60 = vmax.f32 %v579_v15, 0.0  ;;  %v4349_v13 = vrot.slane %v3897_v1, 6  ;;  %v1758_v15 = vrot.slane %v4347_v5, 1 }
  0x57   : > { %1806 = vrot.lane.b32.xlu0 %v4298_v32, %s3895_s21  ;;  %v4335_v32 = vsel %vm1698_vm1, %v1750_v39, %v1752_v10  ;;  %v712_v20 = vrot.slane %v611_v60, 7  ;;  %v4364_v23 = vsel %vm1436_vm3, %v4349_v13, %v1438_v18  ;;  %v1533_v57 = vmul.f32 %v4349_v13, %v4106_v34 }
  0x58   : > { %1810 = vrot.lane.b32.xlu2 %v4305_v7, %s3895_s21  ;;  %v821_v7 = vand.u32 15, %v767_v24  ;;  %6838 = vst [vmem:[#allocation36_spill] sm:$0xff] %v4335_v32  ;;  %v769_v24 = vadd.s32 40, %v4270_v46  ;;  %v1534_v60 = vmul.f32 %v4364_v23, %v4113_v40 }
  0x59   : > { %1808 = vrot.lane.b32.xlu1 %v4301_v56, %s3895_s21  ;;  %v4338_v56 = vsel %vm1698_vm1, %v1748_v16, %v1750_v39  ;;  %v612_v16 = vmax.f32 %v580_v29, 0.0  ;;  %v771_v39 = vadd.s32 56, %v4270_v46  ;;  %6840 = vst [vmem:[#allocation38_spill] sm:$0xff] %v4364_v23  ;;  %v4380_v11 = vsel %vm616_vm0, %v710_v0, %v712_v20 }
  0x5a   : > { %6839 = vst [vmem:[#allocation37_spill] sm:$0xff] %v4338_v56  ;;  %vm1279_vm4 = vcmp.ne.s32.totalorder %v821_v7, 15  ;;  %v4370_v7 = vsel %vm1698_vm1, %v1752_v10, %v1754_v22  ;;  %v773_v0 = vadd.s32 72, %v4270_v46 }
  0x5b   : > { %v4366_v29 = vrot.slane %v612_v16, 7  ;;  %v3755_v1 = vsel %vm1279_vm4, 1.0, %v6662_v33  ;;  %6841 = vst [vmem:[#allocation39_spill] sm:$0xff] %v4370_v7  ;;  %v4383_v16 = vsel %vm1698_vm1, %v1754_v22, %v1756_v14  ;;  %v1894_v22 = vrot.slane %v1533_v57, 2 }
  0x5c   : > { %6843 = vst [vmem:[#allocation41_spill] sm:$0xff] %v4380_v11 }
  0x5d   : > { %6844 = vst [vmem:[#allocation42_spill] sm:$0xff] %v4383_v16  ;;  %v4389_v10 = vsel %vm616_vm0, %v712_v20, %v4366_v29 }
  0x5e   : > { %6845 = vst [vmem:[#allocation43_spill] sm:$0xff] %v4389_v10 }
  0x5f   : > { %1812 = vrot.lane.b32.xlu0 %v4332_v43, %s3895_s21  ;;  %v849_v43 = vand.u32 15, %v771_v39  ;;  %v1760_v39 = vrot.slane %v4380_v11, 1 }
  0x60   : > { %1816 = vrot.lane.b32.xlu2 %v4335_v32, %s3895_s21  ;;  %v835_v32 = vand.u32 15, %v769_v24  ;;  %v1442_v24 = vrot.slane %v3755_v1, 6  ;;  %v4399_v1 = vsel %vm1436_vm3, %v1438_v18, %v4349_v13 }
  0x61   : > { %1814 = vrot.lane.b32.xlu1 %v4338_v56, %s3895_s21  ;;  %v4373_v56 = vsel %vm1698_vm1, %v1756_v14, %v1758_v15  ;;  %vm1283_vm6 = vcmp.ne.s32.totalorder %v849_v43, 15  ;;  %v1895_v14 = vrot.slane %v1534_v60, 2  ;;  %6846 = vst [vmem:[#allocation44_spill] sm:$0xff] %v4399_v1  ;;  %v4413_v57 = vsel %vm1698_vm1, %v1758_v15, %v1760_v39 }
  0x62   : > { %6842 = vst [vmem:[#allocation40_spill] sm:$0xff] %v4373_v56  ;;  %vm1281_vm5 = vcmp.ne.s32.totalorder %v835_v32, 15  ;;  %v4404_v20 = vsel %vm1436_vm3, %v4349_v13, %v1442_v24  ;;  %v4408_v43 = vsel %vm1436_vm3, %v1442_v24, %v4349_v13  ;;  %v3757_v34 = vsel %vm1283_vm6, 1.0, %v6662_v33 }
  0x63   : > { %6847 = vst [vmem:[#allocation45_spill] sm:$0xff] %v4404_v20  ;;  %v3756_v40 = vsel %vm1281_vm5, 1.0, %v6662_v33  ;;  %v1535_v18 = vmul.f32 %v4399_v1, %v4130_v58  ;;  %v863_v60 = vand.u32 15, %v773_v0  ;;  %v1896_v32 = vsel %vm1893_vm7, %v1894_v22, %v1895_v14 }
  0x64   : > { %6848 = vst [vmem:[#allocation46_spill] sm:$0xff] %v4408_v43  ;;  %v1537_v24 = vmul.f32 %v4408_v43, %v4033_v47  ;;  %v1446_v23 = vrot.slane %v3756_v40, 6  ;;  %v1450_v15 = vrot.slane %v3757_v34, 6  ;;  %v775_v0 = vadd.s32 88, %v4270_v46 }
  0x65   : > { %6849 = vst [vmem:[#allocation47_spill] sm:$0xff] %v4413_v57  ;;  %v1897_v22 = vrot.slane %v1535_v18, 2  ;;  %vm1285_vm8 = vcmp.ne.s32.totalorder %v863_v60, 15 }
  0x66   : > { %v1901_v43 = vrot.slane %v1537_v24, 2  ;;  %v4436_v34 = vsel %vm1436_vm3, %v4349_v13, %v1446_v23  ;;  %v877_v60 = vand.u32 15, %v775_v0 }
  0x67   : > { %1818 = vrot.lane.b32.xlu0 %v4370_v7, %s3895_s21  ;;  %v6850_v7 = vrot.slane %v4389_v10, 1  ;;  %6852 = vst [vmem:[#allocation49_spill] sm:$0xff] %v4436_v34  ;;  %v1898_v1 = vsel %vm1893_vm7, %v1895_v14, %v1897_v22 }
  0x68   : > { %1822 = vrot.lane.b32.xlu2 %v4373_v56, %s3895_s21  ;;  %v1536_v56 = vmul.f32 %v4404_v20, %v4042_v52  ;;  %v777_v20 = vadd.s32 104, %v4270_v46  ;;  %vm1287_vm9 = vcmp.ne.s32.totalorder %v877_v60, 15 }
  0x69   : > { %1820 = vrot.lane.b32.xlu1 %v4383_v16, %s3895_s21  ;;  %v4425_v33 = vsel %vm1698_vm1, %v1760_v39, %v6850_v7  ;;  %v4440_v7 = vsel %vm1436_vm3, %v1446_v23, %v4349_v13  ;;  %v4444_v39 = vsel %vm1436_vm3, %v4349_v13, %v1450_v15 }
  0x6a   : > { %6851 = vst [vmem:[#allocation48_spill] sm:$0xff] %v4425_v33  ;;  %v1899_v40 = vrot.slane %v1536_v56, 2  ;;  %v1538_v56 = vmul.f32 %v4436_v34, %v4036_v48  ;;  %v891_v24 = vand.u32 15, %v777_v20  ;;  %v1540_v23 = vmul.f32 %v4444_v39, %v4028_v42 }
  0x6b   : > { %6853 = vst [vmem:[#allocation50_spill] sm:$0xff] %v4440_v7  ;;  %v779_v20 = vadd.s32 120, %v4270_v46 }
  0x6c   : > { %6854 = vst [vmem:[#allocation51_spill] sm:$0xff] %v4444_v39  ;;  %v1900_v16 = vsel %vm1893_vm7, %v1897_v22, %v1899_v40  ;;  %v1903_v14 = vrot.slane %v1538_v56, 2  ;;  %vm1289_vm10 = vcmp.ne.s32.totalorder %v891_v24, 15  ;;  %v1907_v34 = vrot.slane %v1540_v23, 2 }
  0x6f   : > { %1824 = vrot.lane.b32.xlu0 %v4413_v57, %s3895_s21  ;;  %v1902_v57 = vsel %vm1893_vm7, %v1899_v40, %v1901_v43  ;;  %v905_v40 = vand.u32 15, %v779_v20  ;;  %v783_v20 = vadd.s32 152, %v4270_v46 }
  0x70   : > { %1959 = vrot.lane.b32.xlu2 %v1896_v32, %s3898_s22  ;;  %v6855_v32 = vmov 0.0  }
  0x71   : > { %1826 = vrot.lane.b32.xlu1 %v4425_v33, %s3895_s21  ;;  %v3758_v18 = vsel %vm1285_vm8, 1.0, %v6855_v32  ;;  %v1539_v33 = vmul.f32 %v4440_v7, %v4025_v41  ;;  %v4462_v7 = vsel %vm1436_vm3, %v1450_v15, %v4349_v13  ;;  %v3759_v22 = vsel %vm1287_vm9, 1.0, %v6855_v32  ;;  %s3904_s21 = smov 64  }
  0x72   : > { %v1454_v25 = vrot.slane %v3758_v18, 6  ;;  %6856 = vst [vmem:[#allocation52_spill] sm:$0xff] %v4462_v7  ;;  %v1541_v15 = vmul.f32 %v4462_v7, %v4067_v4  ;;  %vm1291_vm11 = vcmp.ne.s32.totalorder %v905_v40, 15 }
  0x73   : > { %v1905_v0 = vrot.slane %v1539_v33, 2  ;;  %v1904_v33 = vsel %vm1893_vm7, %v1901_v43, %v1903_v14  ;;  %v781_v43 = vadd.s32 136, %v4270_v46 }
  0x75   : > { %v1908_v18 = vsel %vm1893_vm7, %v1905_v0, %v1907_v34  ;;  %v1906_v24 = vsel %vm1893_vm7, %v1903_v14, %v1905_v0 }
  0x77   : > { %1961 = vrot.lane.b32.xlu0 %v1898_v1, %s3898_s22  ;;  %v4468_v1 = vsel %vm1436_vm3, %v4349_v13, %v1454_v25 }
  0x78   : > { %1965 = vrot.lane.b32.xlu2 %v1902_v57, %s3898_s22  ;;  %6858 = vst [vmem:[#allocation54_spill] sm:$0xff] %v4468_v1  ;;  %v4472_v57 = vsel %vm1436_vm3, %v1454_v25, %v4349_v13  ;;  %v1542_v60 = vmul.f32 %v4468_v1, %v4064_v3  ;;  %v1458_v25 = vrot.slane %v3759_v22, 6 }
  0x79   : > { %1963 = vrot.lane.b32.xlu1 %v1900_v16, %s3898_s22  ;;  %6859 = vst [vmem:[#allocation55_spill] sm:$0xff] %v4472_v57  ;;  %v3760_v16 = vsel %vm1289_vm10, 1.0, %v6855_v32  ;;  %v1543_v56 = vmul.f32 %v4472_v57, %v4073_v6 }
  0x7a   : > { %v4464_v39 = vpop.permute.xlu2 %1772  ;;  %v1462_v23 = vrot.slane %v3760_v16, 6  ;;  %v1911_v1 = vrot.slane %v1542_v60, 2  ;;  %v4492_v22 = vsel %vm1436_vm3, %v4349_v13, %v1458_v25  ;;  %v4498_v0 = vsel %vm1436_vm3, %v1458_v25, %v4349_v13 }
  0x7b   : > { %6857 = vst [vmem:[#allocation53_spill] sm:$0xff] %v4464_v39  ;;  %v1909_v39 = vrot.slane %v1541_v15, 2  ;;  %v1913_v7 = vrot.slane %v1543_v56, 2  ;;  %v919_v15 = vand.u32 15, %v781_v43  ;;  %v933_v60 = vand.u32 15, %v783_v20 }
  0x7c   : > { %6860 = vst [vmem:[#allocation56_spill] sm:$0xff] %v4492_v22  ;;  %v4502_v16 = vsel %vm1436_vm3, %v4349_v13, %v1462_v23  ;;  %v785_v43 = vadd.s32 168, %v4270_v46 }
  0x7d   : > { %6862 = vst [vmem:[#allocation58_spill] sm:$0xff] %v4498_v0  ;;  %v1910_v40 = vsel %vm1893_vm7, %v1907_v34, %v1909_v39  ;;  %v1914_v56 = vsel %vm1893_vm7, %v1911_v1, %v1913_v7  ;;  %v1546_v25 = vmul.f32 %v4502_v16, %v4166_v28  ;;  %vm1293_vm12 = vcmp.ne.s32.totalorder %v919_v15, 15 }
  0x7e   : > { %6863 = vst [vmem:[#allocation59_spill] sm:$0xff] %v4502_v16  ;;  %vm1295_vm13 = vcmp.ne.s32.totalorder %v933_v60, 15 }
  0x7f   : > { %1967 = vrot.lane.b32.xlu0 %v1904_v33, %s3898_s22  ;;  %v3761_v33 = vsel %vm1291_vm11, 1.0, %v6855_v32 }
  0x80   : > { %1971 = vrot.lane.b32.xlu2 %v1908_v18, %s3898_s22  ;;  %v1544_v18 = vmul.f32 %v4492_v22, %v4117_v44  ;;  %v1466_v57 = vrot.slane %v3761_v33, 6  ;;  %v1919_v22 = vrot.slane %v1546_v25, 2  ;;  %v3762_v33 = vsel %vm1293_vm12, 1.0, %v6855_v32 }
  0x81   : > { %1969 = vrot.lane.b32.xlu1 %v1906_v24, %s3898_s22  ;;  %v1545_v24 = vmul.f32 %v4498_v0, %v4137_v63  ;;  %v4520_v0 = vsel %vm1436_vm3, %v1462_v23, %v4349_v13 }
  0x82   : > { %v4494_v14 = vpop.permute.xlu2 %1774  ;;  %v1915_v34 = vrot.slane %v1544_v18, 2  ;;  %6864 = vst [vmem:[#allocation60_spill] sm:$0xff] %v4520_v0  ;;  %v1547_v23 = vmul.f32 %v4520_v0, %v4169_v30 }
  0x83   : > { %6861 = vst [vmem:[#allocation57_spill] sm:$0xff] %v4494_v14  ;;  %v1912_v14 = vsel %vm1893_vm7, %v1909_v39, %v1911_v1  ;;  %v1917_v20 = vrot.slane %v1545_v24, 2  ;;  %v4526_v39 = vsel %vm1436_vm3, %v4349_v13, %v1466_v57  ;;  %v4530_v1 = vsel %vm1436_vm3, %v1466_v57, %v4349_v13 }
  0x84   : > { %6866 = vst [vmem:[#allocation62_spill] sm:$0xff] %v4526_v39  ;;  %v1916_v15 = vsel %vm1893_vm7, %v1913_v7, %v1915_v34  ;;  %v1548_v60 = vmul.f32 %v4526_v39, %v4172_v31  ;;  %v1470_v57 = vrot.slane %v3762_v33, 6  ;;  %v787_v7 = vadd.s32 184, %v4270_v46 }
  0x85   : > { %6867 = vst [vmem:[#allocation63_spill] sm:$0xff] %v4530_v1  ;;  %v1920_v18 = vsel %vm1893_vm7, %v1917_v20, %v1919_v22  ;;  %v1918_v24 = vsel %vm1893_vm7, %v1915_v34, %v1917_v20 }
  0x86   : > { %v1923_v0 = vrot.slane %v1548_v60, 2  ;;  %v4552_v34 = vsel %vm1436_vm3, %v4349_v13, %v1470_v57  ;;  %v4558_v33 = vsel %vm1436_vm3, %v1470_v57, %v4349_v13 }
  0x87   : > { %1973 = vrot.lane.b32.xlu0 %v1910_v40, %s3898_s22  ;;  %v947_v40 = vand.u32 15, %v785_v43  ;;  %v789_v43 = vadd.s32 200, %v4270_v46  ;;  %6869 = vst [vmem:[#allocation65_spill] sm:$0xff] %v4552_v34  ;;  %v1550_v60 = vmul.f32 %v4552_v34, %v4203_v9  ;;  %v1551_v57 = vmul.f32 %v4558_v33, %v4206_v12 }
  0x88   : > { %1977 = vrot.lane.b32.xlu2 %v1914_v56, %s3898_s22  ;;  %v1549_v56 = vmul.f32 %v4530_v1, %v4195_v8  ;;  %6871 = vst [vmem:[#allocation67_spill] sm:$0xff] %v4558_v33 }
  0x89   : > { %1975 = vrot.lane.b32.xlu1 %v1912_v14, %s3898_s22  ;;  %v3763_v14 = vsel %vm1295_vm13, 1.0, %v6855_v32  ;;  %vm1297_vm14 = vcmp.ne.s32.totalorder %v947_v40, 15  ;;  %v961_v40 = vand.u32 15, %v787_v7  ;;  %v791_v7 = vadd.s32 216, %v4270_v46 }
  0x8a   : > { %v4522_v16 = vpop.permute.xlu2 %1780  ;;  %v1474_v25 = vrot.slane %v3763_v14, 6  ;;  %v1925_v1 = vrot.slane %v1549_v56, 2  ;;  %v975_v56 = vand.u32 15, %v789_v43  ;;  %v1929_v33 = vrot.slane %v1551_v57, 2 }
  0x8b   : > { %6865 = vst [vmem:[#allocation61_spill] sm:$0xff] %v4522_v16  ;;  %v1921_v16 = vrot.slane %v1547_v23, 2  ;;  %v3764_v23 = vsel %vm1297_vm14, 1.0, %v6855_v32  ;;  %vm1299_vm15 = vcmp.ne.s32.totalorder %v961_v40, 15 }
  0x8c   : > { %v4562_v14 = vsel %vm1436_vm3, %v4349_v13, %v1474_v25  ;;  %vm1301_vm2 = vcmp.ne.s32.totalorder %v975_v56, 15 }
  0x8d   : > { %6872 = vst [vmem:[#allocation68_spill] sm:$0xff] %v4562_v14 }
  0x8f   : > { %1979 = vrot.lane.b32.xlu0 %v1916_v15, %s3898_s22 }
  0x90   : > { %1983 = vrot.lane.b32.xlu2 %v1920_v18, %s3898_s22  ;;  %v1922_v18 = vsel %vm1893_vm7, %v1919_v22, %v1921_v16  ;;  %v1927_v22 = vrot.slane %v1550_v60, 2  ;;  %v989_v60 = vand.u32 15, %v791_v7  ;;  %v795_v7 = vadd.s32 248, %v4270_v46 }
  0x91   : > { %1981 = vrot.lane.b32.xlu1 %v1918_v24, %s3898_s22  ;;  %v4548_v39 = vpop.permute.xlu0 %1776  ;;  %v1926_v24 = vsel %vm1893_vm7, %v1923_v0, %v1925_v1 }
  0x92   : > { %6868 = vst [vmem:[#allocation64_spill] sm:$0xff] %v4548_v39  ;;  %v4554_v20 = vpop.permute.xlu2 %1786  ;;  %v1552_v39 = vmul.f32 %v4562_v14, %v4234_v37  ;;  %v4584_v14 = vsel %vm1436_vm3, %v1474_v25, %v4349_v13  ;;  %vm1303_vm4 = vcmp.ne.s32.totalorder %v989_v60, 15 }
  0x93   : > { %6870 = vst [vmem:[#allocation66_spill] sm:$0xff] %v4554_v20  ;;  %v4564_v15 = vpop.permute.xlu1 %1770  ;;  %v1924_v20 = vsel %vm1893_vm7, %v1921_v16, %v1923_v0  ;;  %v1553_v25 = vmul.f32 %v4584_v14, %v4228_v35 }
  0x94   : > { %6873 = vst [vmem:[#allocation69_spill] sm:$0xff] %v4564_v15  ;;  %v1478_v15 = vrot.slane %v3764_v23, 6  ;;  %v1931_v34 = vrot.slane %v1552_v39, 2  ;;  %v3766_v39 = vsel %vm1301_vm2, 1.0, %v6855_v32 }
  0x95   : > { %6875 = vst [vmem:[#allocation71_spill] sm:$0xff] %v4584_v14 }
  0x96   : > { %v4590_v16 = vsel %vm1436_vm3, %v4349_v13, %v1478_v15  ;;  %v4594_v23 = vsel %vm1436_vm3, %v1478_v15, %v4349_v13  ;;  %v1932_v56 = vsel %vm1893_vm7, %v1929_v33, %v1931_v34 }
  0x97   : > { %1985 = vrot.lane.b32.xlu0 %v1922_v18, %s3898_s22  ;;  %6877 = vst [vmem:[#allocation73_spill] sm:$0xff] %v4590_v16  ;;  %v1928_v18 = vsel %vm1893_vm7, %v1925_v1, %v1927_v22  ;;  %v1555_v15 = vmul.f32 %v4594_v23, %v4276_v53  ;;  %v793_v1 = vadd.s32 232, %v4270_v46 }
  0x98   : > { %1989 = vrot.lane.b32.xlu2 %v1926_v24, %s3898_s22  ;;  %6878 = vst [vmem:[#allocation74_spill] sm:$0xff] %v4594_v23  ;;  %v1554_v24 = vmul.f32 %v4590_v16, %v4231_v36 }
  0x99   : > { %1987 = vrot.lane.b32.xlu1 %v1924_v20, %s3898_s22  ;;  %v4580_v43 = vpop.permute.xlu0 %1782  ;;  %v3765_v20 = vsel %vm1299_vm15, 1.0, %v6855_v32  ;;  %v1937_v23 = vrot.slane %v1555_v15, 2 }
  0x9a   : > { %6874 = vst [vmem:[#allocation70_spill] sm:$0xff] %v4580_v43  ;;  %v4586_v0 = vpop.permute.xlu2 %1792  ;;  %v1482_v57 = vrot.slane %v3765_v20, 6  ;;  %v1930_v43 = vsel %vm1893_vm7, %v1927_v22, %v1929_v33  ;;  %v1935_v14 = vrot.slane %v1554_v24, 2  ;;  %v1017_v24 = vand.u32 15, %v795_v7 }
  0x9b   : > { %6876 = vst [vmem:[#allocation72_spill] sm:$0xff] %v4586_v0  ;;  %v4597_v40 = vpop.permute.xlu1 %1778  ;;  %v1933_v0 = vrot.slane %v1553_v25, 2  ;;  %v1003_v25 = vand.u32 15, %v793_v1 }
  0x9c   : > { %6879 = vst [vmem:[#allocation75_spill] sm:$0xff] %v4597_v40  ;;  %v1486_v40 = vrot.slane %v3766_v39, 6  ;;  %v4618_v33 = vsel %vm1436_vm3, %v4349_v13, %v1482_v57  ;;  %v4624_v20 = vsel %vm1436_vm3, %v1482_v57, %v4349_v13  ;;  %v1938_v15 = vsel %vm1893_vm7, %v1935_v14, %v1937_v23 }
  0x9d   : > { %6881 = vst [vmem:[#allocation77_spill] sm:$0xff] %v4618_v33  ;;  %v1934_v60 = vsel %vm1893_vm7, %v1931_v34, %v1933_v0  ;;  %v1557_v57 = vmul.f32 %v4624_v20, %v4280_v38  ;;  %vm1305_vm5 = vcmp.ne.s32.totalorder %v1003_v25, 15  ;;  %vm1307_vm6 = vcmp.ne.s32.totalorder %v1017_v24, 15 }
  0x9e   : > { %6883 = vst [vmem:[#allocation79_spill] sm:$0xff] %v4624_v20  ;;  %v4628_v39 = vsel %vm1436_vm3, %v4349_v13, %v1486_v40  ;;  %v4649_v20 = vsel %vm1436_vm3, %v1486_v40, %v4349_v13 }
  0x9f   : > { %1991 = vrot.lane.b32.xlu0 %v1928_v18, %s3898_s22  ;;  %6884 = vst [vmem:[#allocation80_spill] sm:$0xff] %v4628_v39  ;;  %v1941_v7 = vrot.slane %v1557_v57, 2  ;;  %v1559_v40 = vmul.f32 %v4649_v20, %v4312_v21 }
  0xa0   : > { %1995 = vrot.lane.b32.xlu2 %v1932_v56, %s3898_s22  ;;  %v1556_v56 = vmul.f32 %v4618_v33, %v4273_v50  ;;  %6887 = vst [vmem:[#allocation83_spill] sm:$0xff] %v4649_v20 }
  0xa1   : > { %1993 = vrot.lane.b32.xlu1 %v1930_v43, %s3898_s22  ;;  %v4614_v16 = vpop.permute.xlu0 %1764  ;;  %v3767_v43 = vsel %vm1303_vm4, 1.0, %v6855_v32 }
  0xa2   : > { %6880 = vst [vmem:[#allocation76_spill] sm:$0xff] %v4614_v16  ;;  %v4620_v22 = vpop.permute.xlu2 %1798  ;;  %v1558_v16 = vmul.f32 %v4628_v39, %v4308_v45  ;;  %v1939_v34 = vrot.slane %v1556_v56, 2 }
  0xa3   : > { %6882 = vst [vmem:[#allocation78_spill] sm:$0xff] %v4620_v22  ;;  %v4630_v18 = vpop.permute.xlu1 %1784  ;;  %v1936_v22 = vsel %vm1893_vm7, %v1933_v0, %v1935_v14 }
  0xa4   : > { %6885 = vst [vmem:[#allocation81_spill] sm:$0xff] %v4630_v18  ;;  %v1490_v18 = vrot.slane %v3767_v43, 6  ;;  %v1943_v33 = vrot.slane %v1558_v16, 2  ;;  %v3769_v16 = vsel %vm1307_vm6, 1.0, %v6855_v32  ;;  %v1940_v25 = vsel %vm1893_vm7, %v1937_v23, %v1939_v34 }
  0xa5   : > { %v4674_v57 = vrot.slane %v3769_v16, 6  ;;  %v1945_v23 = vrot.slane %v1559_v40, 2 }
  0xa6   : > { %v4655_v14 = vsel %vm1436_vm3, %v4349_v13, %v1490_v18  ;;  %v4659_v0 = vsel %vm1436_vm3, %v1490_v18, %v4349_v13 }
  0xa7   : > { %1997 = vrot.lane.b32.xlu0 %v1934_v60, %s3898_s22  ;;  %6889 = vst [vmem:[#allocation85_spill] sm:$0xff] %v4655_v14  ;;  %v1944_v60 = vsel %vm1893_vm7, %v1941_v7, %v1943_v33  ;;  %v1560_v56 = vmul.f32 %v4655_v14, %v4315_v61  ;;  %v1561_v18 = vmul.f32 %v4659_v0, %v4341_v54 }
  0xa8   : > { %2001 = vrot.lane.b32.xlu2 %v1938_v15, %s3898_s22  ;;  %6890 = vst [vmem:[#allocation86_spill] sm:$0xff] %v4659_v0  ;;  %v1942_v15 = vsel %vm1893_vm7, %v1939_v34, %v1941_v7  ;;  %v4694_v7 = vsel %vm1436_vm3, %v4349_v13, %v4674_v57 }
  0xa9   : > { %1999 = vrot.lane.b32.xlu1 %v1936_v22, %s3898_s22  ;;  %v4645_v1 = vpop.permute.xlu0 %1766  ;;  %v3768_v22 = vsel %vm1305_vm5, 1.0, %v6855_v32  ;;  %6892 = vst [vmem:[#allocation88_spill] sm:$0xff] %v4674_v57 }
  0xaa   : > { %6886 = vst [vmem:[#allocation82_spill] sm:$0xff] %v4645_v1  ;;  %v4651_v39 = vpop.permute.xlu2 %1804  ;;  %v1494_v24 = vrot.slane %v3768_v22, 6  ;;  %v1947_v1 = vrot.slane %v1560_v56, 2 }
  0xab   : > { %6888 = vst [vmem:[#allocation84_spill] sm:$0xff] %v4651_v39  ;;  %v4662_v43 = vpop.permute.xlu1 %1768  ;;  %v1949_v39 = vrot.slane %v1561_v18, 2  ;;  %v1564_v18 = vmul.f32 %v4694_v7, %v4380_v11 }
  0xac   : > { %6891 = vst [vmem:[#allocation87_spill] sm:$0xff] %v4662_v43  ;;  %v4683_v14 = vsel %vm1436_vm3, %v4349_v13, %v1494_v24  ;;  %v4689_v34 = vsel %vm1436_vm3, %v1494_v24, %v4349_v13  ;;  %v1948_v24 = vsel %vm1893_vm7, %v1945_v23, %v1947_v1 }
  0xad   : > { %6894 = vst [vmem:[#allocation90_spill] sm:$0xff] %v4683_v14  ;;  %v1562_v40 = vmul.f32 %v4683_v14, %v4344_v49  ;;  %v1563_v56 = vmul.f32 %v4689_v34, %v4347_v5 }
  0xae   : > { %6896 = vst [vmem:[#allocation92_spill] sm:$0xff] %v4689_v34 }
  0xaf   : > { %2003 = vrot.lane.b32.xlu0 %v1940_v25, %s3898_s22  ;;  %6897 = vst [vmem:[#allocation93_spill] sm:$0xff] %v4694_v7  ;;  %v1946_v25 = vsel %vm1893_vm7, %v1943_v33, %v1945_v23  ;;  %v800_v23 = vand.u32 15, %v4270_v46 }
  0xb0   : > { %2007 = vrot.lane.b32.xlu2 %v1944_v60, %s3898_s22  ;;  %v1950_v60 = vsel %vm1893_vm7, %v1947_v1, %v1949_v39  ;;  %v1565_v1 = vmul.f32 %v4674_v57, %v4389_v10 }
  0xb1   : > { %2005 = vrot.lane.b32.xlu1 %v1942_v15, %s3898_s22  ;;  %v4679_v43 = vpop.permute.xlu0 %1788  ;;  %v1951_v15 = vrot.slane %v1562_v40, 2  ;;  %vm1180_vm3 = vcmp.ne.s32.totalorder %v800_v23, 0 }
  0xb2   : > { %6893 = vst [vmem:[#allocation89_spill] sm:$0xff] %v4679_v43  ;;  %v4685_v22 = vpop.permute.xlu2 %1810  ;;  %v1953_v43 = vrot.slane %v1563_v56, 2  ;;  %v768_v56 = vadd.s32 32, %v4270_v46 }
  0xb3   : > { %6895 = vst [vmem:[#allocation91_spill] sm:$0xff] %v4685_v22  ;;  %v4696_v16 = vpop.permute.xlu1 %1790  ;;  %v1955_v22 = vrot.slane %v1564_v18, 2  ;;  %v1952_v34 = vsel %vm1893_vm7, %v1949_v39, %v1951_v15  ;;  %v1957_v18 = vrot.slane %v1565_v1, 2  ;;  %v770_v1 = vadd.s32 48, %v4270_v46 }
  0xb4   : > { %6898 = vst [vmem:[#allocation94_spill] sm:$0xff] %v4696_v16  ;;  %v1954_v40 = vsel %vm1893_vm7, %v1951_v15, %v1953_v43  ;;  %v4734_v15 = vsel %vm1180_vm3, 1.0, %v6855_v32 }
  0xb7   : > { %2009 = vrot.lane.b32.xlu0 %v1946_v25, %s3898_s22  ;;  %v1956_v25 = vsel %vm1893_vm7, %v1953_v43, %v1955_v22  ;;  %v828_v43 = vand.u32 15, %v768_v56 }
  0xb8   : > { %2013 = vrot.lane.b32.xlu2 %v1950_v60, %s3898_s22  ;;  %v766_v60 = vadd.s32 16, %v4270_v46 }
  0xb9   : > { %2011 = vrot.lane.b32.xlu1 %v1948_v24, %s3898_s22  ;;  %v4710_v33 = vpop.permute.xlu0 %1794  ;;  %vm1184_vm9 = vcmp.ne.s32.totalorder %v828_v43, 0  ;;  %v842_v43 = vand.u32 15, %v770_v1 }
  0xba   : > { %6899 = vst [vmem:[#allocation95_spill] sm:$0xff] %v4710_v33  ;;  %v4712_v16 = vpop.permute.xlu2 %1816 }
  0xbb   : > { %6900 = vst [vmem:[#allocation96_spill] sm:$0xff] %v4712_v16  ;;  %v4714_v14 = vpop.permute.xlu1 %1796  ;;  %v814_v16 = vand.u32 15, %v766_v60  ;;  %vm1186_vm10 = vcmp.ne.s32.totalorder %v842_v43, 0 }
  0xbc   : > { %6901 = vst [vmem:[#allocation97_spill] sm:$0xff] %v4714_v14  ;;  %v4773_v1 = vsel %vm1186_vm10, 1.0, %v6855_v32  ;;  %vm2901_vm10 = vcmask 64512  }
  0xbd   : > { %vm1182_vm8 = vcmp.ne.s32.totalorder %v814_v16, 0  ;;  %v4752_v16 = vsel %vm1184_vm9, 1.0, %v6855_v32  ;;  %6912 = vst [vmem:[#allocation108_spill] sm:$0xff] %v4773_v1 }
  0xbe   : > { %6907 = vst [vmem:[#allocation103_spill] sm:$0xff] %v4752_v16 }
  0xbf   : > { %2015 = vrot.lane.b32.xlu0 %v1952_v34, %s3898_s22  ;;  %v1958_v34 = vsel %vm1893_vm7, %v1955_v22, %v1957_v18  ;;  %v1570_v18 = vmul.f32 %v4752_v16, %v4025_v41 }
  0xc0   : > { %2019 = vrot.lane.b32.xlu2 %v1956_v25, %s3898_s22  ;;  %v1566_v25 = vmul.f32 %v4734_v15, %v4130_v58 }
  0xc1   : > { %2017 = vrot.lane.b32.xlu1 %v1954_v40, %s3898_s22  ;;  %v4727_v39 = vpop.permute.xlu0 %1800  ;;  %v4747_v40 = vsel %vm1182_vm8, 1.0, %v6855_v32 }
  0xc2   : > { %6902 = vst [vmem:[#allocation98_spill] sm:$0xff] %v4727_v39  ;;  %v4729_v24 = vpop.permute.xlu2 %1822  ;;  %v1568_v56 = vmul.f32 %v4747_v40, %v4033_v47 }
  0xc3   : > { %6903 = vst [vmem:[#allocation99_spill] sm:$0xff] %v4729_v24  ;;  %v4731_v14 = vpop.permute.xlu1 %1802 }
  0xc4   : > { %6904 = vst [vmem:[#allocation100_spill] sm:$0xff] %v4731_v14 }
  0xc7   : > { %2021 = vrot.lane.b32.xlu0 %v1958_v34, %s3898_s22  ;;  %v772_v34 = vadd.s32 64, %v4270_v46 }
  0xc8   : > { %2089 = vrot.lane.b32.xlu2 %v4042_v52, %s3899_s23 }
  0xc9   : > { %2087 = vrot.lane.b32.xlu1 %v1566_v25, %s3899_s23  ;;  %v4744_v23 = vpop.permute.xlu0 %1806  ;;  %v774_v25 = vadd.s32 80, %v4270_v46 }
  0xca   : > { %6905 = vst [vmem:[#allocation101_spill] sm:$0xff] %v4744_v23  ;;  %v4749_v22 = vpop.permute.xlu2 %1959 }
  0xcb   : > { %6906 = vst [vmem:[#allocation102_spill] sm:$0xff] %v4749_v22  ;;  %v4754_v60 = vpop.permute.xlu1 %1808  ;;  %v870_v23 = vand.u32 15, %v774_v25 }
  0xcc   : > { %6908 = vst [vmem:[#allocation104_spill] sm:$0xff] %v4754_v60  ;;  %v856_v60 = vand.u32 15, %v772_v34 }
  0xcd   : > { %vm1190_vm12 = vcmp.ne.s32.totalorder %v870_v23, 0 }
  0xce   : > { %vm1188_vm11 = vcmp.ne.s32.totalorder %v856_v60, 0  ;;  %v4791_v60 = vsel %vm1190_vm12, 1.0, %v6855_v32  ;;  %vm2967_vm12 = vcmask 195584  }
  0xcf   : > { %2091 = vrot.lane.b32.xlu0 %v1568_v56, %s3899_s23  ;;  %v1572_v56 = vmul.f32 %v4773_v1, %v4067_v4  ;;  %v4786_v34 = vsel %vm1188_vm11, 1.0, %v6855_v32  ;;  %6915 = vst [vmem:[#allocation111_spill] sm:$0xff] %v4791_v60  ;;  %v1576_v1 = vmul.f32 %v4791_v60, %v4137_v63  ;;  %vm2934_vm11 = vcmask 130048  }
  0xd0   : > { %2095 = vrot.lane.b32.xlu2 %v1570_v18, %s3899_s23  ;;  %v776_v18 = vadd.s32 96, %v4270_v46  ;;  %v1574_v23 = vmul.f32 %v4786_v34, %v4073_v6 }
  0xd1   : > { %2093 = vrot.lane.b32.xlu1 %v4036_v48, %s3899_s23  ;;  %v4766_v22 = vpop.permute.xlu0 %1812 }
  0xd2   : > { %6909 = vst [vmem:[#allocation105_spill] sm:$0xff] %v4766_v22  ;;  %v4768_v24 = vpop.permute.xlu2 %1965 }
  0xd3   : > { %6910 = vst [vmem:[#allocation106_spill] sm:$0xff] %v4768_v24  ;;  %v4770_v14 = vpop.permute.xlu1 %1814 }
  0xd4   : > { %6911 = vst [vmem:[#allocation107_spill] sm:$0xff] %v4770_v14  ;;  %v884_v14 = vand.u32 15, %v776_v18 }
  0xd6   : > { %vm1192_vm13 = vcmp.ne.s32.totalorder %v884_v14, 0  ;;  %v782_v14 = vadd.s32 144, %v4270_v46 }
  0xd7   : > { %2097 = vrot.lane.b32.xlu0 %v4028_v42, %s3899_s23  ;;  %v4812_v18 = vsel %vm1192_vm13, 1.0, %v6855_v32  ;;  %vm3000_vm13 = vcmask 261120  }
  0xd8   : > { %2101 = vrot.lane.b32.xlu2 %v4064_v3, %s3899_s23  ;;  %6920 = vst [vmem:[#allocation116_spill] sm:$0xff] %v4812_v18 }
  0xd9   : > { %2099 = vrot.lane.b32.xlu1 %v1572_v56, %s3899_s23  ;;  %v4783_v43 = vpop.permute.xlu0 %1818  ;;  %v778_v56 = vadd.s32 112, %v4270_v46 }
  0xda   : > { %6913 = vst [vmem:[#allocation109_spill] sm:$0xff] %v4783_v43  ;;  %v4788_v25 = vpop.permute.xlu2 %1971  ;;  %v780_v43 = vadd.s32 128, %v4270_v46 }
  0xdb   : > { %6914 = vst [vmem:[#allocation110_spill] sm:$0xff] %v4788_v25  ;;  %v4793_v24 = vpop.permute.xlu1 %1820  ;;  %v898_v22 = vand.u32 15, %v778_v56 }
  0xdc   : > { %6916 = vst [vmem:[#allocation112_spill] sm:$0xff] %v4793_v24  ;;  %v912_v60 = vand.u32 15, %v780_v43 }
  0xdd   : > { %vm1194_vm14 = vcmp.ne.s32.totalorder %v898_v22, 0 }
  0xde   : > { %vm1196_vm15 = vcmp.ne.s32.totalorder %v912_v60, 0  ;;  %v4825_v56 = vsel %vm1194_vm14, 1.0, %v6855_v32  ;;  %vm3033_vm14 = vcmask 326656  }
  0xdf   : > { %2103 = vrot.lane.b32.xlu0 %v1574_v23, %s3899_s23  ;;  %v1578_v23 = vmul.f32 %v4812_v18, %v4169_v30  ;;  %6922 = vst [vmem:[#allocation118_spill] sm:$0xff] %v4825_v56  ;;  %v4830_v22 = vsel %vm1196_vm15, 1.0, %v6855_v32  ;;  %v1580_v60 = vmul.f32 %v4825_v56, %v4195_v8  ;;  %v926_v18 = vand.u32 15, %v782_v14 }
  0xe0   : > { %2107 = vrot.lane.b32.xlu2 %v1576_v1, %s3899_s23  ;;  %vm3066_vm15 = vcmask 392192  }
  0xe1   : > { %2105 = vrot.lane.b32.xlu1 %v4117_v44, %s3899_s23  ;;  %v4805_v25 = vpop.permute.xlu0 %1824  ;;  %vm1198_vm2 = vcmp.ne.s32.totalorder %v926_v18, 0 }
  0xe2   : > { %6917 = vst [vmem:[#allocation113_spill] sm:$0xff] %v4805_v25  ;;  %v4807_v24 = vpop.permute.xlu2 %1977  ;;  %v4851_v14 = vsel %vm1198_vm2, 1.0, %v6855_v32  ;;  %vm3099_vm2 = vcmask 457728  }
  0xe3   : > { %6918 = vst [vmem:[#allocation114_spill] sm:$0xff] %v4807_v24  ;;  %v4809_v16 = vpop.permute.xlu1 %1826 }
  0xe4   : > { %6919 = vst [vmem:[#allocation115_spill] sm:$0xff] %v4809_v16  ;;  %v1582_v16 = vmul.f32 %v4830_v22, %v4206_v12 }
  0xe5   : > { %6928 = vst [vmem:[#allocation124_spill] sm:$0xff] %v4851_v14 }
  0xe7   : > { %2109 = vrot.lane.b32.xlu0 %v4166_v28, %s3899_s23 }
  0xe8   : > { %2113 = vrot.lane.b32.xlu2 %v4172_v31, %s3899_s23 }
  0xe9   : > { %2111 = vrot.lane.b32.xlu1 %v1578_v23, %s3899_s23  ;;  %v4822_v1 = vpop.permute.xlu0 %1961  ;;  %v784_v23 = vadd.s32 160, %v4270_v46 }
  0xea   : > { %6921 = vst [vmem:[#allocation117_spill] sm:$0xff] %v4822_v1  ;;  %v4827_v43 = vpop.permute.xlu2 %1983  ;;  %v786_v1 = vadd.s32 176, %v4270_v46 }
  0xeb   : > { %6923 = vst [vmem:[#allocation119_spill] sm:$0xff] %v4827_v43  ;;  %v4832_v24 = vpop.permute.xlu1 %1963  ;;  %v940_v25 = vand.u32 15, %v784_v23 }
  0xec   : > { %6924 = vst [vmem:[#allocation120_spill] sm:$0xff] %v4832_v24  ;;  %v954_v39 = vand.u32 15, %v786_v1 }
  0xed   : > { %vm1200_vm4 = vcmp.ne.s32.totalorder %v940_v25, 0 }
  0xee   : > { %vm1202_vm5 = vcmp.ne.s32.totalorder %v954_v39, 0  ;;  %v4864_v1 = vsel %vm1200_vm4, 1.0, %v6855_v32  ;;  %vm3132_vm4 = vcmask 523264  }
  0xef   : > { %2115 = vrot.lane.b32.xlu0 %v1580_v60, %s3899_s23  ;;  %v1584_v60 = vmul.f32 %v4851_v14, %v4228_v35  ;;  %6930 = vst [vmem:[#allocation126_spill] sm:$0xff] %v4864_v1  ;;  %v4869_v25 = vsel %vm1202_vm5, 1.0, %v6855_v32  ;;  %v1586_v39 = vmul.f32 %v4864_v1, %v4276_v53  ;;  %v792_v14 = vadd.s32 224, %v4270_v46  ;;  %v517_v1 = vld [vmem:[%s3982_s13 + $0xf8] sm:$0xff]  ;;  %s421_s13 = sadd.s32 16, %s3728_s29 }
  0xf0   : > { %2119 = vrot.lane.b32.xlu2 %v1582_v16, %s3899_s23  ;;  %v788_v16 = vadd.s32 192, %v4270_v46  ;;  %6932 = vst [vmem:[#allocation128_spill] sm:$0xff] %v4869_v25  ;;  %p422_p7 = scmp.lt.s32.totalorder %s421_s13, 31  ;;  %vm3174_vm5 = vcmask 588800  }
  0xf1   : > { %2117 = vrot.lane.b32.xlu1 %v4203_v9, %s3899_s23  ;;  %v4844_v43 = vpop.permute.xlu0 %1967 }
  0xf2   : > { %6925 = vst [vmem:[#allocation121_spill] sm:$0xff] %v4844_v43  ;;  %v4846_v24 = vpop.permute.xlu2 %1989  ;;  %v1588_v43 = vmul.f32 %v4869_v25, %v4280_v38  ;;  %s7313_s13 = smov (!%p422_p7, %s421_s13), 31 }
  0xf3   : > { %6926 = vst [vmem:[#allocation122_spill] sm:$0xff] %v4846_v24  ;;  %v4848_v56 = vpop.permute.xlu1 %1969  ;;  %s3733_s29 = sshll.u32 %s7313_s13, 1 }
  0xf4   : > { %6927 = vst [vmem:[#allocation123_spill] sm:$0xff] %v4848_v56  ;;  %p425_p8 = scmp.lt.s32.totalorder %s3733_s29, 63 }
  0xf6   : > { %s7315_s29 = smov (!%p425_p8, %s3733_s29), 63 }
  0xf7   : > { %2121 = vrot.lane.b32.xlu0 %v4234_v37, %s3899_s23  ;;  %s3734_s14 = sshll.u32 %s7315_s29, 3 }
  0xf8   : > { %2125 = vrot.lane.b32.xlu2 %v4231_v36, %s3899_s23  ;;  %s5039_s17 = scalar_lea.vmem %s6621_s5, %s3734_s14 }
  0xf9   : > { %2123 = vrot.lane.b32.xlu1 %v1584_v60, %s3899_s23  ;;  %v4861_v18 = vpop.permute.xlu0 %1973  ;;  %v968_v60 = vand.u32 15, %v788_v16 }
  0xfa   : > { %6929 = vst [vmem:[#allocation125_spill] sm:$0xff] %v4861_v18  ;;  %v4866_v23 = vpop.permute.xlu2 %1995  ;;  %v790_v18 = vadd.s32 208, %v4270_v46 }
  0xfb   : > { %6931 = vst [vmem:[#allocation127_spill] sm:$0xff] %v4866_v23  ;;  %v4871_v56 = vpop.permute.xlu1 %1975  ;;  %vm1204_vm6 = vcmp.ne.s32.totalorder %v968_v60, 0 }
  0xfc   : > { %6933 = vst [vmem:[#allocation129_spill] sm:$0xff] %v4871_v56  ;;  %v982_v24 = vand.u32 15, %v790_v18  ;;  %v4891_v16 = vsel %vm1204_vm6, 1.0, %v6855_v32 }
  0xfd   : > { %6937 = vst [vmem:[#allocation133_spill] sm:$0xff] %v4891_v16  ;;  %v1590_v33 = vmul.f32 %v4891_v16, %v4312_v21 }
  0xfe   : > { %vm1206_vm3 = vcmp.ne.s32.totalorder %v982_v24, 0 }
  0xff   : > { %2127 = vrot.lane.b32.xlu0 %v1586_v39, %s3899_s23  ;;  %v996_v39 = vand.u32 15, %v792_v14  ;;  %v794_v14 = vadd.s32 240, %v4270_v46 }
 0x100   : > { %2131 = vrot.lane.b32.xlu2 %v1588_v43, %s3899_s23  ;;  %v4898_v43 = vld [vmem:[%s6616_s0] ss:$0 sm:$0xff] }
 0x101   : > { %2129 = vrot.lane.b32.xlu1 %v4273_v50, %s3899_s23  ;;  %v4883_v56 = vpop.permute.xlu0 %1979  ;;  %v549_v60 = vmul.f32 %v4898_v43, %v517_v1  ;;  %vm1208_vm8 = vcmp.ne.s32.totalorder %v996_v39, 0  ;;  %v4916_v1 = vsel %vm1206_vm3, 1.0, %v6855_v32  ;;  %v1010_v16 = vand.u32 15, %v794_v14 }
 0x102   : > { %6934 = vst [vmem:[#allocation130_spill] sm:$0xff] %v4883_v56  ;;  %v4885_v23 = vpop.permute.xlu2 %2001  ;;  %v4921_v56 = vsel %vm1208_vm8, 1.0, %v6855_v32 }
 0x103   : > { %6935 = vst [vmem:[#allocation131_spill] sm:$0xff] %v4885_v23  ;;  %v4888_v25 = vpop.permute.xlu1 %1981  ;;  %vm1210_vm9 = vcmp.ne.s32.totalorder %v1010_v16, 0 }
 0x104   : > { %6936 = vst [vmem:[#allocation132_spill] sm:$0xff] %v4888_v25  ;;  %v4912_v25 = vld [vmem:[%s6617_s1] ss:$0 sm:$0xff] }
 0x105   : > { %v581_v24 = vadd.f32 %v4912_v25, %v549_v60  ;;  %6939 = vst [vmem:[#allocation135_spill] sm:$0xff] %v4916_v1 }
 0x106   : > { %6941 = vst [vmem:[#allocation137_spill] sm:$0xff] %v4921_v56 }
 0x107   : > { %2133 = vrot.lane.b32.xlu0 %v4308_v45, %s3899_s23  ;;  %v613_v23 = vmax.f32 %v581_v24, 0.0 }
 0x108   : > { %2137 = vrot.lane.b32.xlu2 %v4315_v61, %s3899_s23 }
 0x109   : > { %2135 = vrot.lane.b32.xlu1 %v1590_v33, %s3899_s23  ;;  %v4907_v18 = vpop.permute.xlu0 %1985  ;;  %v1592_v33 = vmul.f32 %v4916_v1, %v4341_v54 }
 0x10a   : > { %6938 = vst [vmem:[#allocation134_spill] sm:$0xff] %v4907_v18  ;;  %v4918_v39 = vpop.permute.xlu2 %2007  ;;  %v1594_v18 = vmul.f32 %v4921_v56, %v4347_v5  ;;  %v4942_v56 = vsel %vm1210_vm9, 1.0, %v6855_v32 }
 0x10b   : > { %6940 = vst [vmem:[#allocation136_spill] sm:$0xff] %v4918_v39  ;;  %v4923_v46 = vpop.permute.xlu1 %1987  ;;  %v4935_v39 = vrot.slane %v613_v23, 7  ;;  %v1596_v16 = vmul.f32 %v4942_v56, %v4389_v10 }
 0x10c   : > { %6942 = vst [vmem:[#allocation138_spill] sm:$0xff] %v4923_v46 }
 0x10d   : > { %6946 = vst [vmem:[#allocation142_spill] sm:$0xff] %v4942_v56  ;;  %v4947_v14 = vsel %vm616_vm0, %v4366_v29, %v4935_v39 }
 0x10e   : > { %6947 = vst [vmem:[#allocation143_spill] sm:$0xff] %v4947_v14 }
 0x10f   : > { %2139 = vrot.lane.b32.xlu0 %v1592_v33, %s3899_s23 }
 0x110   : > { %2143 = vrot.lane.b32.xlu2 %v1594_v18, %s3899_s23 }
 0x111   : > { %2141 = vrot.lane.b32.xlu1 %v4344_v49, %s3899_s23  ;;  %v4933_v60 = vpop.permute.xlu0 %1991 }
 0x112   : > { %6943 = vst [vmem:[#allocation139_spill] sm:$0xff] %v4933_v60  ;;  %v4937_v46 = vpop.permute.xlu2 %2013  ;;  %v6985_v60 = vld [vmem:[#allocation37_spill] sm:$0xff] }
 0x113   : > { %6944 = vst [vmem:[#allocation140_spill] sm:$0xff] %v4937_v46  ;;  %v4939_v1 = vpop.permute.xlu1 %1993 }
 0x114   : > { %6945 = vst [vmem:[#allocation141_spill] sm:$0xff] %v4939_v1 }
 0x117   : > { %2145 = vrot.lane.b32.xlu0 %v4380_v11, %s3899_s23 }
 0x118   : > { %2149 = vrot.lane.b32.xlu2 %v4947_v14, %s3899_s23 }
 0x119   : > { %2147 = vrot.lane.b32.xlu1 %v1596_v16, %s3899_s23  ;;  %v4956_v23 = vpop.permute.xlu0 %1997 }
 0x11a   : > { %6948 = vst [vmem:[#allocation144_spill] sm:$0xff] %v4956_v23  ;;  %v4958_v32 = vpop.permute.xlu2 %2019  ;;  %v6974_v23 = vld [vmem:[#allocation28_spill] sm:$0xff] }
 0x11b   : > { %6949 = vst [vmem:[#allocation145_spill] sm:$0xff] %v4958_v32  ;;  %v4960_v18 = vpop.permute.xlu1 %1999 }
 0x11c   : > { %6950 = vst [vmem:[#allocation146_spill] sm:$0xff] %v4960_v18 }
 0x11f   : > { %2188 = vrot.lane.b32.xlu0 %v4163_v26, %s3900_s12 }
 0x120   : > { %2192 = vrot.lane.b32.xlu2 %v4051_v59, %s3900_s12 }
 0x121   : > { %2190 = vrot.lane.b32.xlu1 %v4061_v2, %s3900_s12  ;;  %v4968_v29 = vpop.permute.xlu0 %2003 }
 0x122   : > { %6951 = vst [vmem:[#allocation147_spill] sm:$0xff] %v4968_v29  ;;  %v4970_v24 = vpop.permute.xlu2 %2089 }
 0x123   : > { %6952 = vst [vmem:[#allocation148_spill] sm:$0xff] %v4970_v24  ;;  %v4972_v33 = vpop.permute.xlu1 %2005 }
 0x124   : > { %6953 = vst [vmem:[#allocation149_spill] sm:$0xff] %v4972_v33 }
 0x127   : > { %2194 = vrot.lane.b32.xlu0 %v4086_v17, %s3900_s12 }
 0x128   : > { %2198 = vrot.lane.b32.xlu2 %v4097_v27, %s3900_s12 }
 0x129   : > { %2196 = vrot.lane.b32.xlu1 %v4045_v55, %s3900_s12  ;;  %v4980_v26 = vpop.permute.xlu0 %2009 }
 0x12a   : > { %6954 = vst [vmem:[#allocation150_spill] sm:$0xff] %v4980_v26  ;;  %v4982_v16 = vpop.permute.xlu2 %2095 }
 0x12b   : > { %6955 = vst [vmem:[#allocation151_spill] sm:$0xff] %v4982_v16  ;;  %v4984_v2 = vpop.permute.xlu1 %2011  ;;  %v6960_v16 = vld [vmem:[#allocation18_spill] sm:$0xff] }
 0x12c   : > { %6956 = vst [vmem:[#allocation152_spill] sm:$0xff] %v4984_v2  ;;  %v6961_v2 = vld [vmem:[#allocation21_spill] sm:$0xff] }
 0x12f   : > { %2200 = vrot.lane.b32.xlu0 %v4123_v51, %s3900_s12 }
 0x130   : > { %2204 = vrot.lane.b32.xlu2 %v4134_v62, %s3900_s12  ;;  %v6962_v62 = vld [vmem:[#allocation19_spill] sm:$0xff] }
 0x131   : > { %2202 = vrot.lane.b32.xlu1 %v4089_v19, %s3900_s12  ;;  %v4992_v24 = vpop.permute.xlu0 %2015 }
 0x132   : > { %6957 = vst [vmem:[#allocation153_spill] sm:$0xff] %v4992_v24  ;;  %v4994_v33 = vpop.permute.xlu2 %2101  ;;  %v6967_v24 = vld [vmem:[#allocation26_spill] sm:$0xff] }
 0x133   : > { %6958 = vst [vmem:[#allocation154_spill] sm:$0xff] %v4994_v33  ;;  %v4996_v29 = vpop.permute.xlu1 %2017 }
 0x134   : > { %6959 = vst [vmem:[#allocation155_spill] sm:$0xff] %v4996_v29  ;;  %v6966_v29 = vld [vmem:[#allocation20_spill] sm:$0xff] }
 0x137   : > { %2206 = vrot.lane.b32.xlu0 %v6960_v16, %s3900_s12  ;;  %v6968_v16 = vld [vmem:[#allocation23_spill] sm:$0xff] }
 0x138   : > { %2210 = vrot.lane.b32.xlu2 %v6961_v2, %s3900_s12 }
 0x139   : > { %2208 = vrot.lane.b32.xlu1 %v6962_v62, %s3900_s12  ;;  %v5006_v26 = vpop.permute.xlu0 %2021 }
 0x13a   : > { %6963 = vst [vmem:[#allocation19_spill] sm:$0xff] %v5006_v26  ;;  %v5008_v19 = vpop.permute.xlu2 %2107 }
 0x13b   : > { %6964 = vst [vmem:[#allocation156_spill] sm:$0xff] %v5008_v19  ;;  %v5010_v33 = vpop.permute.xlu1 %2087  ;;  %v6972_v19 = vld [vmem:[#allocation25_spill] sm:$0xff] }
 0x13c   : > { %6965 = vst [vmem:[#allocation157_spill] sm:$0xff] %v5010_v33  ;;  %v6973_v33 = vld [vmem:[#allocation29_spill] sm:$0xff] }
 0x13f   : > { %2212 = vrot.lane.b32.xlu0 %v6966_v29, %s3900_s12 }
 0x140   : > { %2216 = vrot.lane.b32.xlu2 %v6967_v24, %s3900_s12 }
 0x141   : > { %2214 = vrot.lane.b32.xlu1 %v6968_v16, %s3900_s12  ;;  %v5018_v18 = vpop.permute.xlu0 %2091 }
 0x142   : > { %6969 = vst [vmem:[#allocation158_spill] sm:$0xff] %v5018_v18  ;;  %v5020_v32 = vpop.permute.xlu2 %2113 }
 0x143   : > { %6970 = vst [vmem:[#allocation159_spill] sm:$0xff] %v5020_v32  ;;  %v5022_v26 = vpop.permute.xlu1 %2093 }
 0x144   : > { %6971 = vst [vmem:[#allocation160_spill] sm:$0xff] %v5022_v26  ;;  %v6978_v26 = vld [vmem:[#allocation27_spill] sm:$0xff] }
 0x147   : > { %2218 = vrot.lane.b32.xlu0 %v6972_v19, %s3900_s12 }
 0x148   : > { %2222 = vrot.lane.b32.xlu2 %v6973_v33, %s3900_s12  ;;  %v6979_v33 = vld [vmem:[#allocation32_spill] sm:$0xff] }
 0x149   : > { %2220 = vrot.lane.b32.xlu1 %v6974_v23, %s3900_s12  ;;  %v5030_v24 = vpop.permute.xlu0 %2097  ;;  %v472_v23 = vld [vmem:[%s5039_s17] sm:$0xff] }
 0x14a   : > { %6975 = vst [vmem:[#allocation161_spill] sm:$0xff] %v5030_v24  ;;  %v5032_v16 = vpop.permute.xlu2 %2119  ;;  %v6980_v24 = vld [vmem:[#allocation31_spill] sm:$0xff]  ;;  %v474_v1 = vmul.f32 %v4898_v43, %v472_v23  ;;  %v6990_v43 = vld [vmem:[#allocation36_spill] sm:$0xff] }
 0x14b   : > { %6976 = vst [vmem:[#allocation162_spill] sm:$0xff] %v5032_v16  ;;  %v5034_v18 = vpop.permute.xlu1 %2099  ;;  %v6984_v16 = vld [vmem:[#allocation33_spill] sm:$0xff] }
 0x14c   : > { %6977 = vst [vmem:[#allocation163_spill] sm:$0xff] %v5034_v18  ;;  %v476_v46 = vadd.f32 %v4912_v25, %v474_v1  ;;  %v6992_v25 = vld [vmem:[#allocation42_spill] sm:$0xff]  ;;  %v6993_v1 = vld [vmem:[#allocation39_spill] sm:$0xff] }
 0x14f   : > { %2224 = vrot.lane.b32.xlu0 %v6978_v26, %s3900_s12 }
 0x150   : > { %2228 = vrot.lane.b32.xlu2 %v6979_v33, %s3900_s12  ;;  %v6986_v33 = vld [vmem:[#allocation35_spill] sm:$0xff] }
 0x151   : > { %2226 = vrot.lane.b32.xlu1 %v6980_v24, %s3900_s12  ;;  %v5048_v19 = vpop.permute.xlu0 %2103 }
 0x152   : > { %6981 = vst [vmem:[#allocation164_spill] sm:$0xff] %v5048_v19  ;;  %v5050_v56 = vpop.permute.xlu2 %2125 }
 0x153   : > { %6982 = vst [vmem:[#allocation165_spill] sm:$0xff] %v5050_v56  ;;  %v5052_v18 = vpop.permute.xlu1 %2105 }
 0x154   : > { %6983 = vst [vmem:[#allocation166_spill] sm:$0xff] %v5052_v18  ;;  %v478_v18 = vmax.f32 %v476_v46, 0.0  ;;  %v1598_v46 = vmul.f32 %v4349_v13, %v4130_v58 }
 0x156   : > { %v5070_v23 = vmul.f32 0.0, %v478_v18  ;;  %v6997_v18 = vld [vmem:[#allocation38_spill] sm:$0xff] }
 0x157   : > { %2230 = vrot.lane.b32.xlu0 %v6984_v16, %s3900_s12  ;;  %v6998_v16 = vld [vmem:[#allocation40_spill] sm:$0xff] }
 0x158   : > { %2234 = vrot.lane.b32.xlu2 %v6985_v60, %s3900_s12  ;;  %6991 = vst [vmem:[#allocation170_spill] sm:$0xff] %v5070_v23 }
 0x159   : > { %2232 = vrot.lane.b32.xlu1 %v6986_v33, %s3900_s12  ;;  %v5062_v24 = vpop.permute.xlu0 %2109 }
 0x15a   : > { %6987 = vst [vmem:[#allocation167_spill] sm:$0xff] %v5062_v24  ;;  %v5064_v19 = vpop.permute.xlu2 %2131 }
 0x15b   : > { %6988 = vst [vmem:[#allocation168_spill] sm:$0xff] %v5064_v19  ;;  %v5066_v56 = vpop.permute.xlu1 %2111  ;;  %v7001_v19 = vld [vmem:[#allocation47_spill] sm:$0xff] }
 0x15c   : > { %6989 = vst [vmem:[#allocation169_spill] sm:$0xff] %v5066_v56  ;;  %v6755_v56 = vrot.slane %v5070_v23, 7 }
 0x15f   : > { %2236 = vrot.lane.b32.xlu0 %v6990_v43, %s3900_s12  ;;  %v1599_v43 = vmul.f32 %v6997_v18, %v4042_v52  ;;  %v2317_v52 = vrot.slane %v1598_v46, 2 }
 0x160   : > { %2240 = vrot.lane.b32.xlu2 %v6992_v25, %s3900_s12  ;;  %v7000_v25 = vld [vmem:[#allocation48_spill] sm:$0xff] }
 0x161   : > { %2238 = vrot.lane.b32.xlu1 %v6993_v1, %s3900_s12  ;;  %v5076_v60 = vpop.permute.xlu0 %2115  ;;  %v5093_v1 = vsel %vm616_vm0, %v4935_v39, %v6755_v56  ;;  %v7005_v39 = vrot.slane %v4389_v10, 1 }
 0x162   : > { %6994 = vst [vmem:[#allocation171_spill] sm:$0xff] %v5076_v60  ;;  %v5078_v33 = vpop.permute.xlu2 %2137  ;;  %v2318_v60 = vrot.slane %v1599_v43, 2  ;;  %v6757_v23 = vrot.slane %v5093_v1, 1  ;;  %v7009_v43 = vld [vmem:[#allocation46_spill] sm:$0xff] }
 0x163   : > { %6995 = vst [vmem:[#allocation172_spill] sm:$0xff] %v5078_v33  ;;  %v5080_v24 = vpop.permute.xlu1 %2117  ;;  %v2184_v33 = vrot.slane %v4947_v14, 1 }
 0x164   : > { %6996 = vst [vmem:[#allocation173_spill] sm:$0xff] %v5080_v24 }
 0x165   : > { %6999 = vst [vmem:[#allocation38_spill] sm:$0xff] %v5093_v1  ;;  %v5110_v56 = vsel %vm1698_vm1, %v7005_v39, %v2184_v33  ;;  %v5122_v51 = vsel %vm1698_vm1, %v2184_v33, %v6757_v23  ;;  %v7014_v23 = vld [vmem:[#allocation49_spill] sm:$0xff] }
 0x166   : > { %7006 = vst [vmem:[#allocation177_spill] sm:$0xff] %v5110_v56 }
 0x167   : > { %2242 = vrot.lane.b32.xlu0 %v6998_v16, %s3900_s12 }
 0x168   : > { %2246 = vrot.lane.b32.xlu2 %v7000_v25, %s3900_s12  ;;  %v7007_v25 = vld [vmem:[#allocation44_spill] sm:$0xff] }
 0x169   : > { %2244 = vrot.lane.b32.xlu1 %v7001_v19, %s3900_s12  ;;  %v5100_v58 = vpop.permute.xlu0 %2121  ;;  %v1600_v32 = vmul.f32 %v7007_v25, %v4033_v47  ;;  %v2319_v19 = vsel %vm1893_vm7, %v2317_v52, %v2318_v60  ;;  %7010 = vst [vmem:[#allocation44_spill] sm:$0xff] %v5122_v51 }
 0x16a   : > { %7002 = vst [vmem:[#allocation174_spill] sm:$0xff] %v5100_v58  ;;  %v5102_v29 = vpop.permute.xlu2 %2143  ;;  %v7008_v58 = vld [vmem:[#allocation45_spill] sm:$0xff] }
 0x16b   : > { %7003 = vst [vmem:[#allocation175_spill] sm:$0xff] %v5102_v29  ;;  %v5105_v16 = vpop.permute.xlu1 %2123  ;;  %v1601_v46 = vmul.f32 %v7008_v58, %v4036_v48  ;;  %v1602_v29 = vmul.f32 %v7009_v43, %v4025_v41  ;;  %v2320_v39 = vrot.slane %v1600_v32, 2 }
 0x16c   : > { %7004 = vst [vmem:[#allocation176_spill] sm:$0xff] %v5105_v16 }
 0x16d   : > { %v2322_v16 = vrot.slane %v1601_v46, 2  ;;  %v2324_v26 = vrot.slane %v1602_v29, 2  ;;  %v2321_v33 = vsel %vm1893_vm7, %v2318_v60, %v2320_v39 }
 0x16f   : > { %2248 = vrot.lane.b32.xlu0 %v5110_v56, %s3900_s12  ;;  %v1603_v56 = vmul.f32 %v7014_v23, %v4028_v42  ;;  %v2325_v27 = vsel %vm1893_vm7, %v2322_v16, %v2324_v26  ;;  %v2323_v46 = vsel %vm1893_vm7, %v2320_v39, %v2322_v16 }
 0x170   : > { %2382 = vrot.lane.b32.xlu2 %v2319_v19, %s3901_s18  ;;  %v7015_v19 = vld [vmem:[#allocation50_spill] sm:$0xff] }
 0x171   : > { %2250 = vrot.lane.b32.xlu1 %v5122_v51, %s3900_s12  ;;  %v5129_v52 = vpop.permute.xlu0 %2127  ;;  %v1604_v32 = vmul.f32 %v7015_v19, %v4067_v4  ;;  %v7016_v51 = vld [vmem:[#allocation51_spill] sm:$0xff]  ;;  %v2326_v29 = vrot.slane %v1603_v56, 2 }
 0x172   : > { %7011 = vst [vmem:[#allocation45_spill] sm:$0xff] %v5129_v52  ;;  %v5131_v2 = vpop.permute.xlu2 %2149  ;;  %v1605_v43 = vmul.f32 %v7016_v51, %v4064_v3  ;;  %v7020_v51 = vld [vmem:[#allocation52_spill] sm:$0xff] }
 0x173   : > { %7012 = vst [vmem:[#allocation178_spill] sm:$0xff] %v5131_v2  ;;  %v5133_v24 = vpop.permute.xlu1 %2129  ;;  %v2328_v2 = vrot.slane %v1604_v32, 2  ;;  %v2327_v19 = vsel %vm1893_vm7, %v2324_v26, %v2326_v29  ;;  %v1606_v16 = vmul.f32 %v7020_v51, %v4073_v6  ;;  %v7026_v3 = vld [vmem:[#allocation56_spill] sm:$0xff] }
 0x174   : > { %7013 = vst [vmem:[#allocation179_spill] sm:$0xff] %v5133_v24  ;;  %v2330_v52 = vrot.slane %v1605_v43, 2 }
 0x175   : > { %v2329_v32 = vsel %vm1893_vm7, %v2326_v29, %v2328_v2  ;;  %v2332_v43 = vrot.slane %v1606_v16, 2  ;;  %v7027_v29 = vld [vmem:[#allocation58_spill] sm:$0xff] }
 0x176   : > { %v2331_v39 = vsel %vm1893_vm7, %v2328_v2, %v2330_v52  ;;  %v1609_v2 = vmul.f32 %v7026_v3, %v4166_v28  ;;  %v1610_v16 = vmul.f32 %v7027_v29, %v4169_v30 }
 0x177   : > { %2384 = vrot.lane.b32.xlu0 %v2321_v33, %s3901_s18  ;;  %v7022_v33 = vld [vmem:[#allocation55_spill] sm:$0xff] }
 0x178   : > { %2388 = vrot.lane.b32.xlu2 %v2325_v27, %s3901_s18  ;;  %v7021_v27 = vld [vmem:[#allocation54_spill] sm:$0xff] }
 0x179   : > { %2386 = vrot.lane.b32.xlu1 %v2323_v46, %s3901_s18  ;;  %v5147_v60 = vpop.permute.xlu0 %2133  ;;  %v1607_v56 = vmul.f32 %v7021_v27, %v4117_v44  ;;  %v1608_v46 = vmul.f32 %v7022_v33, %v4137_v63  ;;  %v2333_v44 = vsel %vm1893_vm7, %v2330_v52, %v2332_v43 }
 0x17a   : > { %7017 = vst [vmem:[#allocation180_spill] sm:$0xff] %v5147_v60  ;;  %v5149_v23 = vpop.permute.xlu2 %2192 }
 0x17b   : > { %7018 = vst [vmem:[#allocation181_spill] sm:$0xff] %v5149_v23  ;;  %v5151_v24 = vpop.permute.xlu1 %2135  ;;  %v2334_v23 = vrot.slane %v1607_v56, 2  ;;  %v2336_v60 = vrot.slane %v1608_v46, 2  ;;  %v2338_v46 = vrot.slane %v1609_v2, 2 }
 0x17c   : > { %7019 = vst [vmem:[#allocation182_spill] sm:$0xff] %v5151_v24 }
 0x17d   : > { %v2335_v56 = vsel %vm1893_vm7, %v2332_v43, %v2334_v23  ;;  %v2339_v29 = vsel %vm1893_vm7, %v2336_v60, %v2338_v46  ;;  %v7033_v43 = vld [vmem:[#allocation62_spill] sm:$0xff] }
 0x17e   : > { %v1613_v2 = vmul.f32 %v7033_v43, %v4203_v9  ;;  %v7038_v9 = vld [vmem:[#allocation65_spill] sm:$0xff] }
 0x17f   : > { %2390 = vrot.lane.b32.xlu0 %v2327_v19, %s3901_s18  ;;  %v2337_v19 = vsel %vm1893_vm7, %v2334_v23, %v2336_v60 }
 0x180   : > { %2394 = vrot.lane.b32.xlu2 %v2331_v39, %s3901_s18  ;;  %v7028_v39 = vld [vmem:[#allocation59_spill] sm:$0xff] }
 0x181   : > { %2392 = vrot.lane.b32.xlu1 %v2329_v32, %s3901_s18  ;;  %v5165_v26 = vpop.permute.xlu0 %2139  ;;  %v1611_v32 = vmul.f32 %v7028_v39, %v4172_v31  ;;  %v7032_v39 = vld [vmem:[#allocation60_spill] sm:$0xff] }
 0x182   : > { %7023 = vst [vmem:[#allocation52_spill] sm:$0xff] %v5165_v26  ;;  %v5167_v6 = vpop.permute.xlu2 %2198  ;;  %v1612_v23 = vmul.f32 %v7032_v39, %v4195_v8  ;;  %v2346_v39 = vrot.slane %v1613_v2, 2 }
 0x183   : > { %7024 = vst [vmem:[#allocation54_spill] sm:$0xff] %v5167_v6  ;;  %v5169_v24 = vpop.permute.xlu1 %2141  ;;  %v2340_v6 = vrot.slane %v1610_v16, 2  ;;  %v2342_v26 = vrot.slane %v1611_v32, 2 }
 0x184   : > { %7025 = vst [vmem:[#allocation55_spill] sm:$0xff] %v5169_v24  ;;  %v2344_v32 = vrot.slane %v1612_v23, 2 }
 0x185   : > { %v2341_v16 = vsel %vm1893_vm7, %v2338_v46, %v2340_v6  ;;  %v7039_v46 = vld [vmem:[#allocation67_spill] sm:$0xff] }
 0x186   : > { %v2345_v43 = vsel %vm1893_vm7, %v2342_v26, %v2344_v32  ;;  %v1616_v23 = vmul.f32 %v7039_v46, %v4228_v35  ;;  %v2347_v2 = vsel %vm1893_vm7, %v2344_v32, %v2346_v39  ;;  %v7044_v32 = vld [vmem:[#allocation73_spill] sm:$0xff] }
 0x187   : > { %2396 = vrot.lane.b32.xlu0 %v2333_v44, %s3901_s18  ;;  %v2343_v44 = vsel %vm1893_vm7, %v2340_v6, %v2342_v26  ;;  %v1615_v6 = vmul.f32 %v7038_v9, %v4234_v37 }
 0x188   : > { %2400 = vrot.lane.b32.xlu2 %v2337_v19, %s3901_s18  ;;  %v7034_v19 = vld [vmem:[#allocation63_spill] sm:$0xff] }
 0x189   : > { %2398 = vrot.lane.b32.xlu1 %v2335_v56, %s3901_s18  ;;  %v5183_v52 = vpop.permute.xlu0 %2145  ;;  %v1614_v56 = vmul.f32 %v7034_v19, %v4206_v12 }
 0x18a   : > { %7029 = vst [vmem:[#allocation183_spill] sm:$0xff] %v5183_v52  ;;  %v5185_v24 = vpop.permute.xlu2 %2204 }
 0x18b   : > { %7030 = vst [vmem:[#allocation184_spill] sm:$0xff] %v5185_v24  ;;  %v5187_v3 = vpop.permute.xlu1 %2147  ;;  %v2348_v24 = vrot.slane %v1614_v56, 2  ;;  %v2350_v56 = vrot.slane %v1615_v6, 2  ;;  %v1619_v6 = vmul.f32 %v7044_v32, %v4273_v50 }
 0x18c   : > { %7031 = vst [vmem:[#allocation185_spill] sm:$0xff] %v5187_v3 }
 0x18d   : > { %v2351_v46 = vsel %vm1893_vm7, %v2348_v24, %v2350_v56 }
 0x18f   : > { %2402 = vrot.lane.b32.xlu0 %v2339_v29, %s3901_s18  ;;  %v2349_v29 = vsel %vm1893_vm7, %v2346_v39, %v2348_v24 }
 0x190   : > { %2406 = vrot.lane.b32.xlu2 %v2343_v44, %s3901_s18  ;;  %v7040_v44 = vld [vmem:[#allocation68_spill] sm:$0xff] }
 0x191   : > { %2404 = vrot.lane.b32.xlu1 %v2341_v16, %s3901_s18  ;;  %v5201_v60 = vpop.permute.xlu0 %2188  ;;  %v1617_v16 = vmul.f32 %v7040_v44, %v4231_v36  ;;  %v7043_v44 = vld [vmem:[#allocation71_spill] sm:$0xff] }
 0x192   : > { %7035 = vst [vmem:[#allocation63_spill] sm:$0xff] %v5201_v60  ;;  %v5203_v52 = vpop.permute.xlu2 %2210  ;;  %v1618_v39 = vmul.f32 %v7043_v44, %v4276_v53 }
 0x193   : > { %7036 = vst [vmem:[#allocation186_spill] sm:$0xff] %v5203_v52  ;;  %v5205_v3 = vpop.permute.xlu1 %2190  ;;  %v2352_v52 = vrot.slane %v1616_v23, 2 }
 0x194   : > { %7037 = vst [vmem:[#allocation187_spill] sm:$0xff] %v5205_v3  ;;  %v2354_v3 = vrot.slane %v1617_v16, 2  ;;  %v2356_v16 = vrot.slane %v1618_v39, 2 }
 0x195   : > { %v2353_v23 = vsel %vm1893_vm7, %v2350_v56, %v2352_v52  ;;  %v7049_v56 = vld [vmem:[#allocation79_spill] sm:$0xff] }
 0x196   : > { %v2357_v32 = vsel %vm1893_vm7, %v2354_v3, %v2356_v16  ;;  %v1622_v39 = vmul.f32 %v7049_v56, %v4312_v21 }
 0x197   : > { %2408 = vrot.lane.b32.xlu0 %v2345_v43, %s3901_s18  ;;  %v2355_v43 = vsel %vm1893_vm7, %v2352_v52, %v2354_v3 }
 0x198   : > { %2412 = vrot.lane.b32.xlu2 %v2349_v29, %s3901_s18  ;;  %v7045_v29 = vld [vmem:[#allocation74_spill] sm:$0xff] }
 0x199   : > { %2410 = vrot.lane.b32.xlu1 %v2347_v2, %s3901_s18  ;;  %v5219_v26 = vpop.permute.xlu0 %2194  ;;  %v1620_v2 = vmul.f32 %v7045_v29, %v4280_v38  ;;  %v7048_v29 = vld [vmem:[#allocation77_spill] sm:$0xff] }
 0x19a   : > { %7041 = vst [vmem:[#allocation65_spill] sm:$0xff] %v5219_v26  ;;  %v5221_v60 = vpop.permute.xlu2 %2216  ;;  %v1621_v52 = vmul.f32 %v7048_v29, %v4308_v45 }
 0x19b   : > { %v5223_v37 = vpop.permute.xlu1 %2196  ;;  %v2360_v26 = vrot.slane %v1620_v2, 2 }
 0x19c   : > { %7042 = vst [vmem:[#allocation188_spill] sm:$0xff] %v5223_v37  ;;  %v2358_v37 = vrot.slane %v1619_v6, 2  ;;  %v2362_v2 = vrot.slane %v1621_v52, 2 }
 0x19e   : > { %v2359_v6 = vsel %vm1893_vm7, %v2356_v16, %v2358_v37  ;;  %v2363_v56 = vsel %vm1893_vm7, %v2360_v26, %v2362_v2  ;;  %v7053_v16 = vld [vmem:[#allocation85_spill] sm:$0xff] }
 0x19f   : > { %2414 = vrot.lane.b32.xlu0 %v2351_v46, %s3901_s18  ;;  %v2361_v46 = vsel %vm1893_vm7, %v2358_v37, %v2360_v26  ;;  %v1624_v37 = vmul.f32 %v4649_v20, %v4341_v54  ;;  %v1625_v52 = vmul.f32 %v7053_v16, %v4344_v49 }
 0x1a0   : > { %2418 = vrot.lane.b32.xlu2 %v2355_v43, %s3901_s18  ;;  %v7050_v43 = vld [vmem:[#allocation80_spill] sm:$0xff] }
 0x1a1   : > { %2416 = vrot.lane.b32.xlu1 %v2353_v23, %s3901_s18  ;;  %v5237_v24 = vpop.permute.xlu0 %2200  ;;  %v1623_v23 = vmul.f32 %v7050_v43, %v4315_v61 }
 0x1a2   : > { %7046 = vst [vmem:[#allocation189_spill] sm:$0xff] %v5237_v24  ;;  %v5239_v44 = vpop.permute.xlu2 %2222 }
 0x1a3   : > { %v5241_v53 = vpop.permute.xlu1 %2202  ;;  %v2366_v24 = vrot.slane %v1623_v23, 2  ;;  %v2368_v23 = vrot.slane %v1624_v37, 2 }
 0x1a4   : > { %7047 = vst [vmem:[#allocation190_spill] sm:$0xff] %v5241_v53  ;;  %v2364_v53 = vrot.slane %v1622_v39, 2 }
 0x1a5   : > { %v2369_v16 = vsel %vm1893_vm7, %v2366_v24, %v2368_v23 }
 0x1a6   : > { %v2365_v39 = vsel %vm1893_vm7, %v2362_v2, %v2364_v53  ;;  %v7056_v2 = vld [vmem:[#allocation92_spill] sm:$0xff] }
 0x1a7   : > { %2420 = vrot.lane.b32.xlu0 %v2357_v32, %s3901_s18  ;;  %v2367_v32 = vsel %vm1893_vm7, %v2364_v53, %v2366_v24  ;;  %v1628_v37 = vmul.f32 %v7056_v2, %v4389_v10  ;;  %v5431_v10 = vmul.f32 %v7034_v19, %v4228_v35 }
 0x1a8   : > { %2424 = vrot.lane.b32.xlu2 %v2361_v46, %s3901_s18  ;;  %v1626_v46 = vmul.f32 %v4659_v0, %v4347_v5  ;;  %v7055_v0 = vld [vmem:[#allocation90_spill] sm:$0xff] }
 0x1a9   : > { %2422 = vrot.lane.b32.xlu1 %v2359_v6, %s3901_s18  ;;  %v5255_v3 = vpop.permute.xlu0 %2206  ;;  %v2370_v6 = vrot.slane %v1625_v52, 2  ;;  %v1627_v53 = vmul.f32 %v7055_v0, %v4380_v11  ;;  %v6793_v19 = vrot.slane %v5431_v10, 2 }
 0x1aa   : > { %7051 = vst [vmem:[#allocation80_spill] sm:$0xff] %v5255_v3  ;;  %v5257_v29 = vpop.permute.xlu2 %2228 }
 0x1ab   : > { %v5259_v45 = vpop.permute.xlu1 %2208  ;;  %v2371_v52 = vsel %vm1893_vm7, %v2368_v23, %v2370_v6  ;;  %v1630_v23 = vmul.f32 %v4674_v57, %v5093_v1  ;;  %v5360_v57 = vmul.f32 %v7020_v51, %v4137_v63 }
 0x1ac   : > { %7052 = vst [vmem:[#allocation191_spill] sm:$0xff] %v5259_v45  ;;  %v2372_v45 = vrot.slane %v1626_v46, 2  ;;  %v2374_v46 = vrot.slane %v1627_v53, 2 }
 0x1ad   : > { %v2380_v53 = vrot.slane %v1630_v23, 2 }
 0x1ae   : > { %v2375_v2 = vsel %vm1893_vm7, %v2372_v45, %v2374_v46 }
 0x1af   : > { %2426 = vrot.lane.b32.xlu0 %v2363_v56, %s3901_s18  ;;  %v2373_v56 = vsel %vm1893_vm7, %v2370_v6, %v2372_v45 }
 0x1b0   : > { %2430 = vrot.lane.b32.xlu2 %v2367_v32, %s3901_s18  ;;  %v1629_v32 = vmul.f32 %v4694_v7, %v4947_v14  ;;  %v7060_v7 = vld [vmem:[#allocation95_spill] sm:$0xff]  ;;  %v7064_v14 = vld [vmem:[#allocation21_spill] sm:$0xff] }
 0x1b1   : > { %2428 = vrot.lane.b32.xlu1 %v2365_v39, %s3901_s18  ;;  %v5273_v26 = vpop.permute.xlu0 %2212  ;;  %v2376_v39 = vrot.slane %v1628_v37, 2 }
 0x1b2   : > { %7054 = vst [vmem:[#allocation192_spill] sm:$0xff] %v5273_v26  ;;  %v5275_v3 = vpop.permute.xlu2 %2234  ;;  %v2378_v26 = vrot.slane %v1629_v32, 2 }
 0x1b3   : > { %v5277_v20 = vpop.permute.xlu1 %2214  ;;  %v2377_v6 = vsel %vm1893_vm7, %v2374_v46, %v2376_v39  ;;  %v1664_v46 = vmul.f32 %v6997_v18, %v4036_v48 }
 0x1b4   : > { %v2381_v45 = vsel %vm1893_vm7, %v2378_v26, %v2380_v53 }
 0x1b5   : > { %v2741_v23 = vrot.slane %v1664_v46, 2 }
 0x1b7   : > { %2432 = vrot.lane.b32.xlu0 %v2369_v16, %s3901_s18  ;;  %v2379_v16 = vsel %vm1893_vm7, %v2376_v39, %v2378_v26 }
 0x1b8   : > { %2436 = vrot.lane.b32.xlu2 %v2373_v56, %s3901_s18 }
 0x1b9   : > { %2434 = vrot.lane.b32.xlu1 %v2371_v52, %s3901_s18  ;;  %v5291_v24 = vpop.permute.xlu0 %2218  ;;  %v1663_v52 = vmul.f32 %v4349_v13, %v4033_v47 }
 0x1ba   : > { %v5293_v0 = vpop.permute.xlu2 %2240 }
 0x1bb   : > { %v5295_v11 = vpop.permute.xlu1 %2220  ;;  %v2740_v39 = vrot.slane %v1663_v52, 2 }
 0x1bd   : > { %v2742_v18 = vsel %vm1893_vm7, %v2740_v39, %v2741_v23 }
 0x1bf   : > { %2438 = vrot.lane.b32.xlu0 %v2375_v2, %s3901_s18  ;;  %v1631_v2 = vmul.f32 %v4734_v15, %v4033_v47  ;;  %v7095_v47 = vld [vmem:[#allocation136_spill] sm:$0xff] }
 0x1c0   : > { %2442 = vrot.lane.b32.xlu2 %v2379_v16, %s3901_s18 }
 0x1c1   : > { %2440 = vrot.lane.b32.xlu1 %v2377_v6, %s3901_s18  ;;  %v5305_v56 = vpop.permute.xlu0 %2224  ;;  %v1665_v6 = vmul.f32 %v7007_v25, %v4025_v41  ;;  %v1639_v25 = vmul.f32 %v4786_v34, %v4137_v63  ;;  %v7063_v63 = vld [vmem:[#allocation173_spill] sm:$0xff] }
 0x1c2   : > { %v5307_v37 = vpop.permute.xlu2 %2246 }
 0x1c3   : > { %v5309_v32 = vpop.permute.xlu1 %2226 }
 0x1c7   : > { %2444 = vrot.lane.b32.xlu0 %v2381_v45, %s3901_s18 }
 0x1c8   : > { %2611 = vrot.lane.b32.xlu2 %v4051_v59, %s3902_s19  ;;  %v2743_v59 = vrot.slane %v1665_v6, 2 }
 0x1c9   : > { %2510 = vrot.lane.b32.xlu1 %v1631_v2, %s3903_s20  ;;  %v5322_v26 = vpop.permute.xlu0 %2230  ;;  %v1633_v2 = vmul.f32 %v4747_v40, %v4025_v41  ;;  %v7062_v41 = vld [vmem:[#allocation122_spill] sm:$0xff] }
 0x1ca   : > { %v5324_v13 = vpop.permute.xlu2 %2382  ;;  %v2744_v46 = vsel %vm1893_vm7, %v2741_v23, %v2743_v59  ;;  %7070 = vst [vmem:[#allocation122_spill] sm:$0xff] %v5431_v10 }
 0x1cb   : > { %v5326_v16 = vpop.permute.xlu1 %2232 }
 0x1cf   : > { %2805 = vrot.lane.b32.xlu0 %v2742_v18, %s3904_s21 }
 0x1d0   : > { %2613 = vrot.lane.b32.xlu2 %v4086_v17, %s3902_s19  ;;  %v1666_v17 = vmul.f32 %v7008_v58, %v4028_v42  ;;  %v1672_v58 = vmul.f32 %v7021_v27, %v4166_v28 }
 0x1d1   : > { %2512 = vrot.lane.b32.xlu1 %v4036_v48, %s3903_s20  ;;  %v5336_v53 = vpop.permute.xlu0 %2236 }
 0x1d2   : > { %v5338_v45 = vpop.permute.xlu2 %2388  ;;  %v2745_v18 = vrot.slane %v1666_v17, 2 }
 0x1d3   : > { %v5340_v52 = vpop.permute.xlu1 %2238 }
 0x1d7   : > { %2807 = vrot.lane.b32.xlu0 %v2744_v46, %s3904_s21  ;;  %v2746_v46 = vsel %vm1893_vm7, %v2743_v59, %v2745_v18 }
 0x1d8   : > { %2526 = vrot.lane.b32.xlu2 %v1639_v25, %s3903_s20  ;;  %v6780_v25 = vrot.slane %v5360_v57, 2 }
 0x1d9   : > { %2514 = vrot.lane.b32.xlu1 %v1633_v2, %s3903_s20  ;;  %v5352_v39 = vpop.permute.xlu0 %2242  ;;  %v2757_v2 = vrot.slane %v1672_v58, 2  ;;  %v1647_v58 = vmul.f32 %v4830_v22, %v4228_v35 }
 0x1da   : > { %v5354_v6 = vpop.permute.xlu2 %2394 }
 0x1db   : > { %7057 = vst [vmem:[#allocation193_spill] sm:$0xff] %v5354_v6  ;;  %v5356_v23 = vpop.permute.xlu1 %2244  ;;  %v2758_v27 = vsel %vm1893_vm7, %v6780_v25, %v2757_v2 }
 0x1df   : > { %2615 = vrot.lane.b32.xlu0 %v4045_v55, %s3902_s19 }
 0x1e0   : > { %2809 = vrot.lane.b32.xlu2 %v2746_v46, %s3904_s21  ;;  %v7059_v46 = vld [vmem:[#allocation46_spill] sm:$0xff] }
 0x1e1   : > { %2627 = vrot.lane.b32.xlu1 %v6962_v62, %s3902_s19  ;;  %v5371_v17 = vpop.permute.xlu0 %2248  ;;  %v5395_v25 = vmul.f32 %v7059_v46, %v4067_v4 }
 0x1e2   : > { %v5373_v51 = vpop.permute.xlu2 %2400 }
 0x1e3   : > { %v5375_v6 = vpop.permute.xlu1 %2250 }
 0x1e7   : > { %2821 = vrot.lane.b32.xlu0 %v2758_v27, %s3904_s21  ;;  %v5399_v27 = vmul.f32 %v7022_v33, %v4169_v30 }
 0x1e8   : > { %2528 = vrot.lane.b32.xlu2 %v4166_v28, %s3903_s20 }
 0x1e9   : > { %2516 = vrot.lane.b32.xlu1 %v4028_v42, %s3903_s20  ;;  %v5385_v55 = vpop.permute.xlu0 %2384  ;;  %v2917_v42 = vsel %vm2901_vm10, %v4172_v31, %v7060_v7 }
 0x1ea   : > { %v5387_v62 = vpop.permute.xlu2 %2406  ;;  %v2950_v1 = vsel %vm2934_vm11, %v2917_v42, %v7062_v41  ;;  %v6792_v41 = vrot.slane %v5399_v27, 2  ;;  %v7066_v42 = vld [vmem:[#allocation124_spill] sm:$0xff] }
 0x1eb   : > { %7058 = vst [vmem:[#allocation194_spill] sm:$0xff] %v5387_v62  ;;  %v5389_v59 = vpop.permute.xlu1 %2386  ;;  %v7061_v62 = vld [vmem:[#allocation10_spill] sm:$0xff]  ;;  %v2983_v33 = vsel %vm2967_vm12, %v2950_v1, %v7063_v63  ;;  %v7069_v1 = vrot.slane %v5395_v25, 2 }
 0x1ef   : > { %2617 = vrot.lane.b32.xlu0 %v7061_v62, %s3902_s19  ;;  %v3016_v62 = vsel %vm3000_vm13, %v2983_v33, %v5291_v24  ;;  %v5435_v24 = vmul.f32 %v7038_v9, %v4231_v36  ;;  %v2760_v33 = vsel %vm1893_vm7, %v2757_v2, %v6792_v41  ;;  %v7079_v41 = vld [vmem:[#allocation101_spill] sm:$0xff] }
 0x1f0   : > { %2542 = vrot.lane.b32.xlu2 %v1647_v58, %s3903_s20  ;;  %v1390_v58 = vmul.f32 %v7066_v42, %v4206_v12 }
 0x1f1   : > { %2629 = vrot.lane.b32.xlu1 %v7064_v14, %s3902_s19  ;;  %v5414_v7 = vpop.permute.xlu0 %2390  ;;  %v2748_v14 = vsel %vm1893_vm7, %v2745_v18, %v7069_v1  ;;  %v7073_v1 = vld [vmem:[#allocation27_spill] sm:$0xff]  ;;  %v6794_v9 = vrot.slane %v5435_v24, 2 }
 0x1f2   : > { %7065 = vst [vmem:[#allocation46_spill] sm:$0xff] %v5414_v7  ;;  %v2413_v48 = vpop.permute.xlu2 %2412 }
 0x1f3   : > { %v5422_v46 = vsel %vm3033_vm14, %v3016_v62, %v2413_v48  ;;  %v5424_v63 = vpop.permute.xlu1 %2392  ;;  %v7071_v48 = vld [vmem:[#allocation98_spill] sm:$0xff] }
 0x1f4   : > { %7067 = vst [vmem:[#allocation95_spill] sm:$0xff] %v5422_v46  ;;  %v2920_v62 = vsel %vm2901_vm10, %v1390_v58, %v7071_v48  ;;  %v7072_v46 = vld [vmem:[#allocation127_spill] sm:$0xff] }
 0x1f5   : > { %7068 = vst [vmem:[#allocation10_spill] sm:$0xff] %v5424_v63  ;;  %v2953_v18 = vsel %vm2934_vm11, %v2920_v62, %v7072_v46  ;;  %v7074_v63 = vld [vmem:[#allocation176_spill] sm:$0xff]  ;;  %v2774_v62 = vsel %vm1893_vm7, %v6793_v19, %v6794_v9 }
 0x1f6   : > { %v2986_v7 = vsel %vm2967_vm12, %v2953_v18, %v7074_v63  ;;  %v7077_v63 = vld [vmem:[#allocation111_spill] sm:$0xff] }
 0x1f7   : > { %2811 = vrot.lane.b32.xlu0 %v2748_v14, %s3904_s21  ;;  %v3019_v58 = vsel %vm3000_vm13, %v2986_v7, %v5305_v56  ;;  %v7078_v18 = vld [vmem:[#allocation103_spill] sm:$0xff]  ;;  %v2923_v56 = vsel %vm2901_vm10, %v4231_v36, %v7079_v41  ;;  %v7083_v41 = vld [vmem:[#allocation133_spill] sm:$0xff] }
 0x1f8   : > { %2643 = vrot.lane.b32.xlu2 %v7073_v1, %s3902_s19  ;;  %v1635_v1 = vmul.f32 %v7078_v18, %v4067_v4  ;;  %v7080_v7 = vld [vmem:[#allocation131_spill] sm:$0xff]  ;;  %v1396_v10 = vmul.f32 %v7083_v41, %v4280_v38  ;;  %v7091_v18 = vld [vmem:[#allocation105_spill] sm:$0xff] }
 0x1f9   : > { %2823 = vrot.lane.b32.xlu1 %v2760_v33, %s3904_s21  ;;  %v5452_v2 = vpop.permute.xlu0 %2396  ;;  %v1641_v33 = vmul.f32 %v7077_v63, %v4169_v30 }
 0x1fa   : > { %7075 = vst [vmem:[#allocation173_spill] sm:$0xff] %v5452_v2  ;;  %v2419_v14 = vpop.permute.xlu2 %2418 }
 0x1fb   : > { %v5457_v46 = vsel %vm3033_vm14, %v3019_v58, %v2419_v14  ;;  %v5459_v48 = vpop.permute.xlu1 %2398  ;;  %v2956_v58 = vsel %vm2934_vm11, %v2923_v56, %v7080_v7  ;;  %v7081_v14 = vld [vmem:[#allocation179_spill] sm:$0xff] }
 0x1fc   : > { %7076 = vst [vmem:[#allocation21_spill] sm:$0xff] %v5457_v46  ;;  %v2989_v19 = vsel %vm2967_vm12, %v2956_v58, %v7081_v14  ;;  %v7087_v58 = vld [vmem:[#allocation7_spill] sm:$0xff]  ;;  %v7088_v14 = vld [vmem:[#allocation49_spill] sm:$0xff] }
 0x1fd   : > { %v3022_v2 = vsel %vm3000_vm13, %v2989_v19, %v5322_v26  ;;  %v7090_v19 = vld [vmem:[#allocation56_spill] sm:$0xff] }
 0x1fe   : > { %v5502_v63 = vmul.f32 %v7090_v19, %v4172_v31 }
 0x1ff   : > { %2837 = vrot.lane.b32.xlu0 %v2774_v62, %s3904_s21 }
 0x200   : > { %2530 = vrot.lane.b32.xlu2 %v1641_v33, %s3903_s20  ;;  %v7086_v33 = vld [vmem:[#allocation118_spill] sm:$0xff] }
 0x201   : > { %2518 = vrot.lane.b32.xlu1 %v1635_v1, %s3903_s20  ;;  %v5480_v9 = vpop.permute.xlu0 %2402  ;;  %v1386_v7 = vmul.f32 %v7086_v33, %v4169_v30  ;;  %v5495_v1 = vmul.f32 %v7088_v14, %v7087_v58  ;;  %v7093_v30 = vld [vmem:[#allocation14_spill] sm:$0xff] }
 0x202   : > { %7082 = vst [vmem:[#allocation124_spill] sm:$0xff] %v5480_v9  ;;  %v2425_v46 = vpop.permute.xlu2 %2424  ;;  %v7089_v9 = vld [vmem:[#allocation94_spill] sm:$0xff] }
 0x203   : > { %v5487_v62 = vsel %vm3033_vm14, %v3022_v2, %v2425_v46  ;;  %v5489_v56 = vpop.permute.xlu1 %2404  ;;  %v2915_v26 = vsel %vm2901_vm10, %v4166_v28, %v7089_v9  ;;  %v2926_v2 = vsel %vm2901_vm10, %v1396_v10, %v7091_v18  ;;  %v7092_v46 = vld [vmem:[#allocation134_spill] sm:$0xff]  ;;  %v7096_v28 = vld [vmem:[#allocation159_spill] sm:$0xff]  ;;  %v6797_v10 = vrot.slane %v5495_v1, 2 }
 0x204   : > { %7084 = vst [vmem:[#allocation98_spill] sm:$0xff] %v5487_v62  ;;  %v2948_v62 = vsel %vm2934_vm11, %v2915_v26, %v7092_v46  ;;  %v2959_v33 = vsel %vm2934_vm11, %v2926_v2, %v7095_v47  ;;  %v1388_v18 = vmul.f32 %v4830_v22, %v4195_v8  ;;  %v7097_v26 = vld [vmem:[#allocation138_spill] sm:$0xff]  ;;  %v7100_v2 = vld [vmem:[#allocation171_spill] sm:$0xff] }
 0x205   : > { %7085 = vst [vmem:[#allocation127_spill] sm:$0xff] %v5489_v56  ;;  %v7094_v56 = vld [vmem:[#allocation72_spill] sm:$0xff]  ;;  %v2981_v9 = vsel %vm2967_vm12, %v2948_v62, %v7096_v28  ;;  %v7098_v46 = vld [vmem:[#allocation182_spill] sm:$0xff]  ;;  %v6798_v28 = vrot.slane %v5502_v63, 2 }
 0x206   : > { %v2916_v14 = vsel %vm2901_vm10, %v1386_v7, %v7094_v56  ;;  %v2992_v56 = vsel %vm2967_vm12, %v2959_v33, %v7098_v46  ;;  %v3014_v47 = vsel %vm3000_vm13, %v2981_v9, %v5277_v20  ;;  %v7099_v7 = vld [vmem:[#allocation20_spill] sm:$0xff]  ;;  %v7104_v46 = vld [vmem:[#allocation30_spill] sm:$0xff] }
 0x207   : > { %2619 = vrot.lane.b32.xlu0 %v7093_v30, %s3902_s19  ;;  %v2949_v19 = vsel %vm2934_vm11, %v2916_v14, %v7097_v26  ;;  %v3025_v30 = vsel %vm3000_vm13, %v2992_v56, %v5336_v53  ;;  %v7103_v53 = vrot.slane %v5395_v25, 2  ;;  %v7105_v56 = vld [vmem:[#allocation67_spill] sm:$0xff] }
 0x208   : > { %2544 = vrot.lane.b32.xlu2 %v4231_v36, %s3903_s20  ;;  %v2982_v36 = vsel %vm2967_vm12, %v2949_v19, %v7100_v2  ;;  %v7109_v25 = vld [vmem:[#allocation139_spill] sm:$0xff] }
 0x209   : > { %2631 = vrot.lane.b32.xlu1 %v7099_v7, %s3902_s19  ;;  %v2409_v62 = vpop.permute.xlu0 %2408  ;;  %v3015_v33 = vsel %vm3000_vm13, %v2982_v36, %v5221_v60  ;;  %v2750_v19 = vsel %vm1893_vm7, %v7103_v53, %v6797_v10  ;;  %v7106_v7 = vld [vmem:[#allocation97_spill] sm:$0xff] }
 0x20a   : > { %v5534_v22 = vsel %vm3033_vm14, %v3014_v47, %v2409_v62  ;;  %v2431_v14 = vpop.permute.xlu2 %2430  ;;  %v5552_v47 = vmul.f32 %v7105_v56, %v7104_v46  ;;  %v2918_v60 = vsel %vm2901_vm10, %v1388_v18, %v7106_v7  ;;  %v7107_v62 = vrot.slane %v5399_v27, 2  ;;  %v7108_v36 = vld [vmem:[#allocation109_spill] sm:$0xff]  ;;  %v7112_v18 = vld [vmem:[#allocation140_spill] sm:$0xff]  ;;  %v7113_v7 = vld [vmem:[#allocation162_spill] sm:$0xff] }
 0x20b   : > { %7101 = vst [vmem:[#allocation27_spill] sm:$0xff] %v5534_v22  ;;  %v5540_v20 = vsel %vm3033_vm14, %v3025_v30, %v2431_v14  ;;  %v2411_v9 = vpop.permute.xlu1 %2410  ;;  %v2929_v30 = vsel %vm2901_vm10, %v4315_v61, %v7108_v36  ;;  %v2951_v14 = vsel %vm2934_vm11, %v2918_v60, %v7109_v25  ;;  %v7115_v10 = vld [vmem:[#allocation141_spill] sm:$0xff]  ;;  %v7116_v25 = vld [vmem:[#allocation55_spill] sm:$0xff] }
 0x20c   : > { %v5543_v26 = vsel %vm3033_vm14, %v3015_v33, %v2411_v9  ;;  %v2762_v2 = vsel %vm1893_vm7, %v7107_v62, %v6798_v28  ;;  %v7110_v33 = vld [vmem:[#allocation78_spill] sm:$0xff]  ;;  %v2962_v56 = vsel %vm2934_vm11, %v2929_v30, %v7112_v18  ;;  %v2984_v27 = vsel %vm2967_vm12, %v2951_v14, %v7113_v7  ;;  %v7114_v62 = vld [vmem:[#allocation31_spill] sm:$0xff] }
 0x20d   : > { %7102 = vst [vmem:[#allocation176_spill] sm:$0xff] %v5543_v26  ;;  %v7111_v9 = vld [vmem:[#allocation22_spill] sm:$0xff]  ;;  %v6799_v36 = vrot.slane %v5552_v47, 2  ;;  %v7129_v26 = vld [vmem:[#allocation165_spill] sm:$0xff] }
 0x20e   : > { %v2919_v53 = vsel %vm2901_vm10, %v7111_v9, %v7110_v33  ;;  %v3017_v33 = vsel %vm3000_vm13, %v2984_v27, %v5295_v11  ;;  %v7117_v18 = vld [vmem:[#allocation174_spill] sm:$0xff] }
 0x20f   : > { %2813 = vrot.lane.b32.xlu0 %v2750_v19, %s3904_s21  ;;  %v2952_v60 = vsel %vm2934_vm11, %v2919_v53, %v7115_v10  ;;  %v2995_v19 = vsel %vm2967_vm12, %v2962_v56, %v7116_v25  ;;  %v7118_v10 = vld [vmem:[#allocation126_spill] sm:$0xff] }
 0x210   : > { %2645 = vrot.lane.b32.xlu2 %v7114_v62, %s3902_s19  ;;  %v2985_v14 = vsel %vm2967_vm12, %v2952_v60, %v7117_v18  ;;  %v3028_v7 = vsel %vm3000_vm13, %v2995_v19, %v5352_v39  ;;  %v1392_v53 = vmul.f32 %v7118_v10, %v4228_v35  ;;  %v7119_v56 = vld [vmem:[#allocation142_spill] sm:$0xff]  ;;  %v7121_v35 = vrot.slane %v5435_v24, 2  ;;  %v7124_v24 = vld [vmem:[#allocation84_spill] sm:$0xff] }
 0x211   : > { %2825 = vrot.lane.b32.xlu1 %v2762_v2, %s3904_s21  ;;  %v2415_v30 = vpop.permute.xlu0 %2414  ;;  %v1402_v25 = vmul.f32 %v7119_v56, %v4347_v5  ;;  %v3018_v11 = vsel %vm3000_vm13, %v2985_v14, %v5239_v44  ;;  %v3173_v39 = vld [vmem:[%s6618_s2 + $0x40] sm:$0xff]  ;;  %v3172_v44 = vld [vmem:[%s6618_s2 + $0x38] sm:$0xff] }
 0x212   : > { %v5589_v62 = vsel %vm3033_vm14, %v3017_v33, %v2415_v30  ;;  %v2437_v28 = vpop.permute.xlu2 %2436  ;;  %v2776_v19 = vsel %vm1893_vm7, %v7121_v35, %v6799_v36  ;;  %3278 = vmatpush.msra.mxu0 %v3173_v39  ;;  %3804 = vmatpush.msra.mxu1 %v3173_v39  ;;  %v7122_v33 = vld [vmem:[#allocation100_spill] sm:$0xff]  ;;  %v2922_v14 = vsel %vm2901_vm10, %v1392_v53, %v7124_v24  ;;  %v7130_v53 = vld [vmem:[#allocation146_spill] sm:$0xff] }
 0x213   : > { %v5598_v2 = vsel %vm3033_vm14, %v3028_v7, %v2437_v28  ;;  %v2417_v27 = vpop.permute.xlu1 %2416  ;;  %v3171_v28 = vld [vmem:[%s6618_s2 + $0x30] sm:$0xff]  ;;  %3805 = vmatpush.msra.mxu2 %v3173_v39  ;;  %3806 = vmatpush.msra.mxu3 %v3173_v39  ;;  %v7125_v7 = vld [vmem:[#allocation113_spill] sm:$0xff] }
 0x214   : > { %7120 = vst [vmem:[#allocation101_spill] sm:$0xff] %v5598_v2  ;;  %v5604_v60 = vsel %vm3033_vm14, %v3018_v11, %v2417_v27  ;;  %v7123_v30 = vld [vmem:[#allocation24_spill] sm:$0xff]  ;;  %3279 = vmatpush.msra.mxu0 %v3172_v44  ;;  %3807 = vmatpush.msra.mxu1 %v3172_v44  ;;  %v2932_v11 = vsel %vm2901_vm10, %v1402_v25, %v7125_v7  ;;  %v7128_v2 = vld [vmem:[#allocation145_spill] sm:$0xff] }
 0x215   : > { %v2921_v18 = vsel %vm2901_vm10, %v7123_v30, %v7122_v33  ;;  %v7126_v27 = vld [vmem:[#allocation144_spill] sm:$0xff]  ;;  %3808 = vmatpush.msra.mxu2 %v3172_v44  ;;  %v2965_v33 = vsel %vm2934_vm11, %v2932_v11, %v7128_v2  ;;  %v2955_v25 = vsel %vm2934_vm11, %v2922_v14, %v7130_v53  ;;  %3809 = vmatpush.msra.mxu3 %v3172_v44 }
 0x216   : > { %v2954_v35 = vsel %vm2934_vm11, %v2921_v18, %v7126_v27  ;;  %v7127_v39 = vld [vmem:[#allocation128_spill] sm:$0xff]  ;;  %3280 = vmatpush.msra.mxu0 %v3171_v28  ;;  %v7131_v18 = vld [vmem:[#allocation185_spill] sm:$0xff]  ;;  %3810 = vmatpush.msra.mxu1 %v3171_v28  ;;  %v1649_v53 = vmul.f32 %v7066_v42, %v7104_v46 }
 0x217   : > { %2839 = vrot.lane.b32.xlu0 %v2776_v19, %s3904_s21  ;;  %v1394_v36 = vmul.f32 %v7127_v39, %v7104_v46  ;;  %v2987_v22 = vsel %vm2967_vm12, %v2954_v35, %v7129_v26  ;;  %v2998_v19 = vsel %vm2967_vm12, %v2965_v33, %v7131_v18  ;;  %v3170_v26 = vld [vmem:[%s6618_s2 + $0x28] sm:$0xff]  ;;  %3811 = vmatpush.msra.mxu2 %v3171_v28  ;;  %v3169_v33 = vld [vmem:[%s6618_s2 + $0x20] sm:$0xff]  ;;  %v3167_v44 = vld [vmem:[%s6618_s2 + $0x10] sm:$0xff] }
 0x218   : > { %2532 = vrot.lane.b32.xlu2 %v4172_v31, %s3903_s20  ;;  %v3020_v24 = vsel %vm3000_vm13, %v2987_v22, %v5309_v32  ;;  %v7132_v31 = vld [vmem:[#allocation45_spill] sm:$0xff]  ;;  %v3031_v14 = vsel %vm3000_vm13, %v2998_v19, %v5371_v17  ;;  %3281 = vmatpush.msra.mxu0 %v3170_v26  ;;  %v7135_v19 = vld [vmem:[#allocation104_spill] sm:$0xff]  ;;  %v7137_v46 = vld [vmem:[#allocation50_spill] sm:$0xff] }
 0x219   : > { %2520 = vrot.lane.b32.xlu1 %v7087_v58, %s3903_s20  ;;  %v2421_v2 = vpop.permute.xlu0 %2420  ;;  %v2988_v7 = vsel %vm2967_vm12, %v2955_v25, %v7132_v31  ;;  %3813 = vmatpush.msra.mxu1 %v3170_v26  ;;  %v7134_v25 = vld [vmem:[#allocation58_spill] sm:$0xff]  ;;  %v7136_v42 = vld [vmem:[#allocation8_spill] sm:$0xff]  ;;  %v7138_v31 = vld [vmem:[#allocation147_spill] sm:$0xff] }
 0x21a   : > { %v5651_v11 = vsel %vm3033_vm14, %v3020_v24, %v2421_v2  ;;  %v2443_v27 = vpop.permute.xlu2 %2442  ;;  %v3021_v32 = vsel %vm3000_vm13, %v2988_v7, %v5257_v29  ;;  %3282 = vmatpush.msra.mxu0 %v3169_v33  ;;  %v3168_v29 = vld [vmem:[%s6618_s2 + $0x18] sm:$0xff]  ;;  %3814 = vmatpush.msra.mxu2 %v3170_v26  ;;  %v5671_v18 = vmul.f32 %v7134_v25, %v4195_v8 }
 0x21b   : > { %v5656_v22 = vsel %vm3033_vm14, %v3031_v14, %v2443_v27  ;;  %v2423_v35 = vpop.permute.xlu1 %2422  ;;  %3816 = vmatpush.msra.mxu1 %v3169_v33  ;;  %3812 = vmatpush.msra.mxu3 %v3171_v28  ;;  %v2924_v24 = vsel %vm2901_vm10, %v1394_v36, %v7135_v19  ;;  %v5680_v2 = vmul.f32 %v7137_v46, %v7136_v42  ;;  %v7139_v14 = vld [vmem:[#allocation9_spill] sm:$0xff]  ;;  %v7140_v27 = vld [vmem:[#allocation91_spill] sm:$0xff] }
 0x21c   : > { %7133 = vst [vmem:[#allocation131_spill] sm:$0xff] %v5656_v22  ;;  %v5662_v17 = vsel %vm3033_vm14, %v3021_v32, %v2423_v35  ;;  %3283 = vmatpush.msra.mxu0 %v3168_v29  ;;  %3817 = vmatpush.msra.mxu2 %v3169_v33  ;;  %v2957_v7 = vsel %vm2934_vm11, %v2924_v24, %v7138_v31  ;;  %v7141_v32 = vld [vmem:[#allocation168_spill] sm:$0xff]  ;;  %v7142_v35 = vld [vmem:[#allocation149_spill] sm:$0xff]  ;;  %v7143_v24 = vld [vmem:[#allocation23_spill] sm:$0xff]  ;;  %v6800_v31 = vrot.slane %v5671_v18, 2 }
 0x21d   : > { %3819 = vmatpush.msra.mxu1 %v3168_v29  ;;  %v2925_v28 = vsel %vm2901_vm10, %v4273_v50, %v7140_v27  ;;  %v2990_v36 = vsel %vm2967_vm12, %v2957_v7, %v7141_v32  ;;  %v7144_v7 = vld [vmem:[#allocation180_spill] sm:$0xff]  ;;  %3815 = vmatpush.msra.mxu3 %v3170_v26  ;;  %v7150_v26 = vld [vmem:[#allocation107_spill] sm:$0xff] }
 0x21e   : > { %3284 = vmatpush.msra.mxu0 %v3167_v44  ;;  %v2958_v25 = vsel %vm2934_vm11, %v2925_v28, %v7142_v35  ;;  %v3023_v19 = vsel %vm3000_vm13, %v2990_v36, %v5326_v16  ;;  %3820 = vmatpush.msra.mxu2 %v3168_v29  ;;  %v1655_v35 = vmul.f32 %v7083_v41, %v4341_v54  ;;  %v7151_v16 = vld [vmem:[#allocation34_spill] sm:$0xff] }
 0x21f   : > { %2621 = vrot.lane.b32.xlu0 %v7139_v14, %s3902_s19  ;;  %v3166_v14 = vld [vmem:[%s6618_s2 + $0x8] sm:$0xff]  ;;  %3822 = vmatpush.msra.mxu1 %v3167_v44  ;;  %v2927_v22 = vsel %vm2901_vm10, %v7151_v16, %v7150_v26  ;;  %v7157_v26 = vld [vmem:[#allocation152_spill] sm:$0xff] }
 0x220   : > { %2546 = vrot.lane.b32.xlu2 %v1649_v53, %s3903_s20  ;;  %v2991_v53 = vsel %vm2967_vm12, %v2958_v25, %v7144_v7  ;;  %3285 = vmatpush.msra.mxu0 %v3166_v14  ;;  %v3165_v25 = vld [vmem:[%s6618_s2] sm:$0xff]  ;;  %v7149_v7 = vld [vmem:[#allocation68_spill] sm:$0xff] }
 0x221   : > { %2633 = vrot.lane.b32.xlu1 %v7143_v24, %s3902_s19  ;;  %v2427_v46 = vpop.permute.xlu0 %2426  ;;  %v3024_v32 = vsel %vm3000_vm13, %v2991_v53, %v5275_v3  ;;  %3825 = vmatpush.msra.mxu1 %v3166_v14  ;;  %v7148_v3 = vrot.slane %v5502_v63, 2  ;;  %v5729_v53 = vmul.f32 %v7149_v7, %v4273_v50  ;;  %v7154_v63 = vld [vmem:[#allocation150_spill] sm:$0xff]  ;;  %v7155_v7 = vld [vmem:[#allocation96_spill] sm:$0xff] }
 0x222   : > { %v5705_v27 = vsel %vm3033_vm14, %v3023_v19, %v2427_v46  ;;  %v5707_v28 = vpop.permute.xlu2 %2611  ;;  %v7146_v19 = vld [vmem:[#allocation135_spill] sm:$0xff]  ;;  %3286 = vmatpush.msra.mxu0 %v3165_v25  ;;  %3823 = vmatpush.msra.mxu2 %v3167_v44 }
 0x223   : > { %7145 = vst [vmem:[#allocation179_spill] sm:$0xff] %v5705_v27  ;;  %v2429_v36 = vpop.permute.xlu1 %2428  ;;  %v1398_v24 = vmul.f32 %v7146_v19, %v4312_v21  ;;  %v2764_v41 = vsel %vm1893_vm7, %v7148_v3, %v6800_v31  ;;  %3828 = vmatpush.msra.mxu1 %v3165_v25  ;;  %3818 = vmatpush.msra.mxu3 %v3169_v33  ;;  %v7156_v31 = vld [vmem:[#allocation172_spill] sm:$0xff] }
 0x224   : > { %v5720_v46 = vsel %vm3033_vm14, %v3024_v32, %v2429_v36  ;;  %v7152_v32 = vrot.slane %v5680_v2, 2  ;;  %v7153_v36 = vrot.slane %v5495_v1, 2  ;;  %3826 = vmatpush.msra.mxu2 %v3166_v14  ;;  %v2960_v3 = vsel %vm2934_vm11, %v2927_v22, %v7154_v63 }
 0x225   : > { %7147 = vst [vmem:[#allocation133_spill] sm:$0xff] %v5720_v46  ;;  %3821 = vmatpush.msra.mxu3 %v3168_v29  ;;  %v2928_v33 = vsel %vm2901_vm10, %v1398_v24, %v7155_v7  ;;  %v2993_v27 = vsel %vm2967_vm12, %v2960_v3, %v7156_v31  ;;  %v6803_v29 = vrot.slane %v5729_v53, 2  ;;  %v5773_v7 = vmul.f32 %v7050_v43, %v4344_v49 }
 0x226   : > { %v2752_v46 = vsel %vm1893_vm7, %v7153_v36, %v7152_v32  ;;  %3829 = vmatpush.msra.mxu2 %v3165_v25  ;;  %v2961_v1 = vsel %vm2934_vm11, %v2928_v33, %v7157_v26  ;;  %v3026_v32 = vsel %vm3000_vm13, %v2993_v27, %v5340_v52  ;;  %v7159_v36 = vld [vmem:[#allocation52_spill] sm:$0xff]  ;;  %v7161_v33 = vrot.slane %v5552_v47, 2 }
 0x227   : > { %2558 = vrot.lane.b32.xlu0 %v1655_v35, %s3903_s20  ;;  %3824 = vmatpush.msra.mxu3 %v3167_v44  ;;  %v7158_v35 = vld [vmem:[#allocation137_spill] sm:$0xff]  ;;  %v2994_v31 = vsel %vm2967_vm12, %v2961_v1, %v7159_v36  ;;  %v7160_v44 = vld [vmem:[#allocation79_spill] sm:$0xff] }
 0x228   : > { %2827 = vrot.lane.b32.xlu2 %v2764_v41, %s3904_s21  ;;  %v1400_v24 = vmul.f32 %v7158_v35, %v4341_v54  ;;  %v3027_v52 = vsel %vm3000_vm13, %v2994_v31, %v5293_v0  ;;  %v5769_v3 = vmul.f32 %v7160_v44, %v4341_v54  ;;  %v2778_v26 = vsel %vm1893_vm7, %v7161_v33, %v6803_v29  ;;  %v7162_v0 = vld [vmem:[#allocation112_spill] sm:$0xff]  ;;  %v7163_v1 = vld [vmem:[#allocation153_spill] sm:$0xff]  ;;  %v7166_v36 = vld [vmem:[#allocation175_spill] sm:$0xff] }
 0x229   : > { %2815 = vrot.lane.b32.xlu1 %v2752_v46, %s3904_s21  ;;  %v2433_v22 = vpop.permute.xlu0 %2432  ;;  %3827 = vmatpush.msra.mxu3 %v3166_v14  ;;  %v7164_v54 = vld [vmem:[#allocation32_spill] sm:$0xff]  ;;  %v7168_v44 = vld [vmem:[#allocation42_spill] sm:$0xff] }
 0x22a   : > { %v5758_v41 = vsel %vm3033_vm14, %v3026_v32, %v2433_v22  ;;  %v5760_v63 = vpop.permute.xlu2 %2613  ;;  %v2930_v14 = vsel %vm2901_vm10, %v1400_v24, %v7162_v0  ;;  %v7165_v22 = vld [vmem:[#allocation99_spill] sm:$0xff]  ;;  %v6801_v47 = vrot.slane %v5769_v3, 2  ;;  %v7189_v29 = vld [vmem:[#allocation148_spill] sm:$0xff] }
 0x22b   : > { %v2435_v27 = vpop.permute.xlu1 %2434  ;;  %3830 = vmatpush.msra.mxu3 %v3165_v25  ;;  %v2963_v32 = vsel %vm2934_vm11, %v2930_v14, %v7163_v1  ;;  %v2931_v43 = vsel %vm2901_vm10, %v4344_v49, %v7165_v22  ;;  %v6802_v25 = vrot.slane %v5773_v7, 2  ;;  %v7167_v24 = vld [vmem:[#allocation155_spill] sm:$0xff] }
 0x22c   : > { %v5765_v46 = vsel %vm3033_vm14, %v3027_v52, %v2435_v27  ;;  %v2996_v31 = vsel %vm2967_vm12, %v2963_v32, %v7166_v36  ;;  %v2964_v52 = vsel %vm2934_vm11, %v2931_v43, %v7167_v24  ;;  %v7169_v0 = vld [vmem:[#allocation183_spill] sm:$0xff]  ;;  %v7170_v43 = vld [vmem:[#allocation116_spill] sm:$0xff] }
 0x22d   : > { %v3029_v27 = vsel %vm3000_vm13, %v2996_v31, %v5356_v23  ;;  %v2997_v14 = vsel %vm2967_vm12, %v2964_v52, %v7169_v0  ;;  %v2790_v23 = vsel %vm1893_vm7, %v6801_v47, %v6802_v25  ;;  %v1643_v36 = vmul.f32 %v7170_v43, %v4195_v8  ;;  %v7171_v31 = vld [vmem:[#allocation11_spill] sm:$0xff]  ;;  %v7172_v52 = vld [vmem:[#allocation108_spill] sm:$0xff] }
 0x22e   : > { %v3030_v32 = vsel %vm3000_vm13, %v2997_v14, %v5307_v37  ;;  %v1372_v24 = vmul.f32 %v4734_v15, %v7171_v31  ;;  %v7173_v37 = vld [vmem:[#allocation115_spill] sm:$0xff]  ;;  %v7177_v8 = vld [vmem:[#allocation76_spill] sm:$0xff] }
 0x22f   : > { %2647 = vrot.lane.b32.xlu0 %v7164_v54, %s3902_s19  ;;  %v7175_v0 = vld [vmem:[#allocation19_spill] sm:$0xff] }
 0x230   : > { %2841 = vrot.lane.b32.xlu2 %v2778_v26, %s3904_s21  ;;  %v2902_v15 = vsel %vm2901_vm10, %v1372_v24, %v7177_v8 }
 0x231   : > { %2659 = vrot.lane.b32.xlu1 %v7168_v44, %s3902_s19  ;;  %v2439_v33 = vpop.permute.xlu0 %2438  ;;  %v7174_v44 = vld [vmem:[#allocation41_spill] sm:$0xff] }
 0x232   : > { %v5803_v1 = vsel %vm3033_vm14, %v3029_v27, %v2439_v33  ;;  %v5805_v26 = vpop.permute.xlu2 %2526  ;;  %v1637_v27 = vmul.f32 %v7172_v52, %v7136_v42  ;;  %v2933_v33 = vsel %vm2901_vm10, %v7174_v44, %v7173_v37  ;;  %v7178_v37 = vld [vmem:[#allocation102_spill] sm:$0xff] }
 0x233   : > { %v2441_v54 = vpop.permute.xlu1 %2440  ;;  %v2966_v14 = vsel %vm2934_vm11, %v2933_v33, %v7175_v0  ;;  %v2935_v25 = vsel %vm2934_vm11, %v2902_v15, %v7178_v37  ;;  %v7179_v0 = vld [vmem:[#allocation157_spill] sm:$0xff]  ;;  %v7183_v15 = vld [vmem:[#allocation51_spill] sm:$0xff]  ;;  %v7186_v37 = vld [vmem:[#allocation12_spill] sm:$0xff] }
 0x234   : > { %v5810_v22 = vsel %vm3033_vm14, %v3030_v32, %v2441_v54  ;;  %v7176_v32 = vld [vmem:[#allocation178_spill] sm:$0xff] }
 0x235   : > { %v2999_v54 = vsel %vm2967_vm12, %v2966_v14, %v7176_v32  ;;  %v2968_v14 = vsel %vm2967_vm12, %v2935_v25, %v7179_v0  ;;  %v7180_v32 = vld [vmem:[#allocation63_spill] sm:$0xff]  ;;  %v7184_v25 = vld [vmem:[#allocation16_spill] sm:$0xff] }
 0x236   : > { %v3032_v31 = vsel %vm3000_vm13, %v2999_v54, %v5375_v6  ;;  %v3001_v24 = vsel %vm3000_vm13, %v2968_v14, %v7180_v32  ;;  %v7187_v14 = vld [vmem:[#allocation26_spill] sm:$0xff] }
 0x237   : > { %2853 = vrot.lane.b32.xlu0 %v2790_v23, %s3904_s21  ;;  %v3034_v6 = vsel %vm3033_vm14, %v3001_v24, %v5324_v13  ;;  %v7185_v13 = vld [vmem:[#allocation82_spill] sm:$0xff] }
 0x238   : > { %2534 = vrot.lane.b32.xlu2 %v1643_v36, %s3903_s20  ;;  %v2903_v0 = vsel %vm2901_vm10, %v7186_v37, %v7185_v13 }
 0x239   : > { %2522 = vrot.lane.b32.xlu1 %v1637_v27, %s3903_s20  ;;  %v2445_v47 = vpop.permute.xlu0 %2444  ;;  %v7181_v27 = vld [vmem:[#allocation59_spill] sm:$0xff] }
 0x23a   : > { %v5840_v33 = vsel %vm3033_vm14, %v3032_v31, %v2445_v47  ;;  %v2810_v23 = vpop.permute.xlu2 %2809  ;;  %v5850_v54 = vmul.f32 %v7181_v27, %v7111_v9  ;;  %v7182_v47 = vld [vmem:[#allocation13_spill] sm:$0xff] }
 0x23b   : > { %v2511_v36 = vpop.permute.xlu1 %2510  ;;  %v5855_v31 = vmul.f32 %v7183_v15, %v7182_v47 }
 0x23c   : > { %v3067_v8 = vsel %vm3066_vm15, %v3034_v6, %v2511_v36  ;;  %v2765_v24 = vrot.slane %v5850_v54, 2  ;;  %v7188_v6 = vld [vmem:[#allocation117_spill] sm:$0xff] }
 0x23d   : > { %v3100_v32 = vsel %vm3099_vm2, %v3067_v8, %v5707_v28  ;;  %v2936_v27 = vsel %vm2934_vm11, %v2903_v0, %v7188_v6  ;;  %v7191_v0 = vrot.slane %v5671_v18, 2 }
 0x23e   : > { %v2969_v13 = vsel %vm2967_vm12, %v2936_v27, %v7189_v29  ;;  %v7193_v27 = vrot.slane %v5680_v2, 2 }
 0x23f   : > { %2623 = vrot.lane.b32.xlu0 %v7184_v25, %s3902_s19  ;;  %v2753_v25 = vrot.slane %v5855_v31, 2 }
 0x240   : > { %2548 = vrot.lane.b32.xlu2 %v4273_v50, %s3903_s20 }
 0x241   : > { %2635 = vrot.lane.b32.xlu1 %v7187_v14, %s3902_s19  ;;  %v2806_v36 = vpop.permute.xlu0 %2805  ;;  %v7190_v14 = vld [vmem:[#allocation187_spill] sm:$0xff] }
 0x242   : > { %v5871_v15 = vpop.permute.xlu2 %2528  ;;  %v3133_v50 = vsel %vm3132_vm4, %v3100_v32, %v2806_v36  ;;  %v3002_v28 = vsel %vm3000_vm13, %v2969_v13, %v7190_v14  ;;  %v2766_v36 = vsel %vm1893_vm7, %v7191_v0, %v2765_v24  ;;  %v7192_v32 = vld [vmem:[#allocation71_spill] sm:$0xff] }
 0x243   : > { %v2513_v37 = vpop.permute.xlu1 %2512  ;;  %3770 = vmatmul.msk.f32.vlgmr.msra.gmra.mxu0 %vm3174_vm5, %v3133_v50  ;;  %v3035_v8 = vsel %vm3033_vm14, %v3002_v28, %v5385_v55  ;;  %v5889_v6 = vmul.f32 %v7192_v32, %v4280_v38  ;;  %v2754_v50 = vsel %vm1893_vm7, %v7193_v27, %v2753_v25  ;;  %v7194_v55 = vld [vmem:[#allocation15_spill] sm:$0xff]  ;;  %v7197_v32 = vld [vmem:[#allocation120_spill] sm:$0xff] }
 0x244   : > { %v3068_v29 = vsel %vm3066_vm15, %v3035_v8, %v2513_v37  ;;  %v1374_v18 = vmul.f32 %v4747_v40, %v7194_v55  ;;  %v7196_v0 = vld [vmem:[#allocation83_spill] sm:$0xff] }
 0x245   : > { %v3101_v37 = vsel %vm3099_vm2, %v3068_v29, %v5760_v63  ;;  %v2779_v14 = vrot.slane %v5889_v6, 2  ;;  %v7198_v63 = vrot.slane %v5729_v53, 2 }
 0x247   : > { %2560 = vrot.lane.b32.xlu0 %v4344_v49, %s3903_s20  ;;  %v7195_v49 = vld [vmem:[#allocation87_spill] sm:$0xff]  ;;  %v2780_v29 = vsel %vm1893_vm7, %v7198_v63, %v2779_v14 }
 0x248   : > { %2829 = vrot.lane.b32.xlu2 %v2766_v36, %s3904_s21  ;;  %v2904_v40 = vsel %vm2901_vm10, %v1374_v18, %v7195_v49  ;;  %v5914_v36 = vmul.f32 %v7196_v0, %v4347_v5  ;;  %v7200_v18 = vld [vmem:[#allocation181_spill] sm:$0xff]  ;;  %v7202_v0 = vld [vmem:[#allocation40_spill] sm:$0xff] }
 0x249   : > { %2817 = vrot.lane.b32.xlu1 %v2754_v50, %s3904_s21  ;;  %v2808_v13 = vpop.permute.xlu0 %2807  ;;  %v2937_v27 = vsel %vm2934_vm11, %v2904_v40, %v7197_v32  ;;  %v7199_v50 = vld [vmem:[#allocation158_spill] sm:$0xff] }
 0x24a   : > { %v5906_v28 = vpop.permute.xlu2 %2542  ;;  %v3134_v2 = vsel %vm3132_vm4, %v3101_v37, %v2808_v13  ;;  %v2970_v55 = vsel %vm2967_vm12, %v2937_v27, %v7199_v50  ;;  %v1380_v13 = vmul.f32 %v4786_v34, %v4067_v4  ;;  %v2791_v53 = vrot.slane %v5914_v36, 2  ;;  %v7203_v27 = vld [vmem:[#allocation61_spill] sm:$0xff] }
 0x24b   : > { %v2515_v8 = vpop.permute.xlu1 %2514  ;;  %3771 = vmatmul.msk.f32.gmra.mxu0 %vm3174_vm5, %v3134_v2  ;;  %v3003_v37 = vsel %vm3000_vm13, %v2970_v55, %v7200_v18  ;;  %v7201_v2 = vld [vmem:[#allocation33_spill] sm:$0xff] }
 0x24c   : > { %v3036_v49 = vsel %vm3033_vm14, %v3003_v37, %v5389_v59  ;;  %v2910_v63 = vsel %vm2901_vm10, %v1380_v13, %v7203_v27  ;;  %v7204_v55 = vld [vmem:[#allocation129_spill] sm:$0xff]  ;;  %v7206_v37 = vld [vmem:[#allocation164_spill] sm:$0xff] }
 0x24d   : > { %v3069_v40 = vsel %vm3066_vm15, %v3036_v49, %v2515_v8  ;;  %v7205_v8 = vrot.slane %v5773_v7, 2  ;;  %v7207_v49 = vld [vmem:[#allocation184_spill] sm:$0xff] }
 0x24f   : > { %2649 = vrot.lane.b32.xlu0 %v7201_v2, %s3902_s19  ;;  %v2792_v18 = vsel %vm1893_vm7, %v7205_v8, %v2791_v53  ;;  %v7211_v8 = vld [vmem:[#allocation69_spill] sm:$0xff] }
 0x250   : > { %2843 = vrot.lane.b32.xlu2 %v2780_v29, %s3904_s21  ;;  %v2943_v29 = vsel %vm2934_vm11, %v2910_v63, %v7204_v55 }
 0x251   : > { %2661 = vrot.lane.b32.xlu1 %v7202_v0, %s3902_s19  ;;  %v2616_v32 = vpop.permute.xlu0 %2615  ;;  %v2976_v2 = vsel %vm2967_vm12, %v2943_v29, %v7206_v37  ;;  %v1657_v37 = vmul.f32 %v7146_v19, %v4347_v5  ;;  %v7218_v19 = vld [vmem:[#allocation65_spill] sm:$0xff] }
 0x252   : > { %v3102_v4 = vsel %vm3099_vm2, %v3069_v40, %v2616_v32  ;;  %v5939_v34 = vpop.permute.xlu2 %2643  ;;  %v3009_v13 = vsel %vm3000_vm13, %v2976_v2, %v7207_v49  ;;  %v7213_v2 = vld [vmem:[#allocation106_spill] sm:$0xff] }
 0x253   : > { %v2628_v50 = vpop.permute.xlu1 %2627  ;;  %v3135_v59 = vsel %vm3132_vm4, %v3102_v4, %v2810_v23  ;;  %v3042_v23 = vsel %vm3033_vm14, %v3009_v13, %v5459_v48  ;;  %v1651_v48 = vmul.f32 %v7118_v10, %v4280_v38  ;;  %v7214_v13 = vld [vmem:[#allocation70_spill] sm:$0xff] }
 0x254   : > { %3772 = vmatmul.msk.f32.gmra.mxu0 %vm3174_vm5, %v3135_v59  ;;  %v3075_v40 = vsel %vm3066_vm15, %v3042_v23, %v5805_v26  ;;  %v7208_v26 = vld [vmem:[#allocation60_spill] sm:$0xff]  ;;  %v2911_v23 = vsel %vm2901_vm10, %v7087_v58, %v7214_v13 }
 0x255   : > { %v3108_v7 = vsel %vm3099_vm2, %v3075_v40, %v2628_v50  ;;  %v5974_v63 = vmul.f32 %v7208_v26, %v4206_v12  ;;  %v7210_v50 = vld [vmem:[#allocation25_spill] sm:$0xff]  ;;  %v7215_v40 = vld [vmem:[#allocation160_spill] sm:$0xff]  ;;  %v7217_v26 = vld [vmem:[#allocation114_spill] sm:$0xff] }
 0x256   : > { %v2944_v5 = vsel %vm2934_vm11, %v2911_v23, %v7217_v26 }
 0x257   : > { %2855 = vrot.lane.b32.xlu0 %v2792_v18, %s3904_s21  ;;  %v2767_v55 = vrot.slane %v5974_v63, 2  ;;  %v7212_v18 = vld [vmem:[#allocation6_spill] sm:$0xff] }
 0x258   : > { %2536 = vrot.lane.b32.xlu2 %v7111_v9, %s3903_s20  ;;  %v7209_v9 = vld [vmem:[#allocation18_spill] sm:$0xff]  ;;  %v2905_v38 = vsel %vm2901_vm10, %v7212_v18, %v7211_v8  ;;  %v7221_v8 = vld [vmem:[#allocation80_spill] sm:$0xff] }
 0x259   : > { %2524 = vrot.lane.b32.xlu1 %v7182_v47, %s3903_s20  ;;  %v2822_v0 = vpop.permute.xlu0 %2821  ;;  %v2938_v49 = vsel %vm2934_vm11, %v2905_v38, %v7213_v2 }
 0x25a   : > { %v5966_v32 = vpop.permute.xlu2 %2530  ;;  %v3141_v4 = vsel %vm3132_vm4, %v3108_v7, %v2822_v0  ;;  %v2971_v7 = vsel %vm2967_vm12, %v2938_v49, %v7215_v40  ;;  %v2768_v0 = vsel %vm1893_vm7, %v2765_v24, %v2767_v55  ;;  %v7223_v40 = vld [vmem:[#allocation35_spill] sm:$0xff] }
 0x25b   : > { %v2517_v27 = vpop.permute.xlu1 %2516  ;;  %3778 = vmatmul.msk.f32.vlgmr.msra.gmra.mxu1 %vm3174_vm5, %v3141_v4  ;;  %v7216_v4 = vld [vmem:[#allocation73_spill] sm:$0xff]  ;;  %v3004_v63 = vsel %vm3000_vm13, %v2971_v7, %v7218_v19 }
 0x25c   : > { %v3037_v24 = vsel %vm3033_vm14, %v3004_v63, %v5338_v45 }
 0x25d   : > { %v3070_v38 = vsel %vm3066_vm15, %v3037_v24, %v2517_v27  ;;  %v7230_v24 = vld [vmem:[#allocation111_spill] sm:$0xff] }
 0x25e   : > { %v1382_v36 = vmul.f32 %v7230_v24, %v7136_v42 }
 0x25f   : > { %2625 = vrot.lane.b32.xlu0 %v7209_v9, %s3902_s19  ;;  %v7219_v9 = vrot.slane %v5360_v57, 2 }
 0x260   : > { %2550 = vrot.lane.b32.xlu2 %v1651_v48, %s3903_s20  ;;  %v6001_v48 = vmul.f32 %v7216_v4, %v7151_v16  ;;  %v7224_v4 = vld [vmem:[#allocation47_spill] sm:$0xff] }
 0x261   : > { %2637 = vrot.lane.b32.xlu1 %v7210_v50, %s3902_s19  ;;  %v2618_v59 = vpop.permute.xlu0 %2617  ;;  %v2756_v58 = vsel %vm1893_vm7, %v2753_v25, %v7219_v9  ;;  %v7220_v50 = vld [vmem:[#allocation166_spill] sm:$0xff]  ;;  %v7227_v9 = vld [vmem:[#allocation4_spill] sm:$0xff] }
 0x262   : > { %v5982_v29 = vpop.permute.xlu2 %2544  ;;  %v2977_v54 = vsel %vm2967_vm12, %v2944_v5, %v7220_v50  ;;  %v3103_v31 = vsel %vm3099_vm2, %v3070_v38, %v2618_v59  ;;  %v2781_v2 = vrot.slane %v6001_v48, 2  ;;  %v7222_v59 = vld [vmem:[#allocation85_spill] sm:$0xff] }
 0x263   : > { %v2630_v10 = vpop.permute.xlu1 %2629  ;;  %v3010_v18 = vsel %vm3000_vm13, %v2977_v54, %v7221_v8  ;;  %v6036_v23 = vmul.f32 %v7222_v59, %v7174_v44  ;;  %v7229_v54 = vld [vmem:[#allocation28_spill] sm:$0xff] }
 0x264   : > { %v3043_v57 = vsel %vm3033_vm14, %v3010_v18, %v5373_v51  ;;  %v7231_v18 = vld [vmem:[#allocation53_spill] sm:$0xff] }
 0x265   : > { %v3076_v45 = vsel %vm3066_vm15, %v3043_v57, %v5871_v15  ;;  %v2782_v15 = vsel %vm1893_vm7, %v2779_v14, %v2781_v2  ;;  %v2793_v7 = vrot.slane %v6036_v23, 2  ;;  %v7236_v23 = vld [vmem:[#allocation130_spill] sm:$0xff] }
 0x266   : > { %v3109_v27 = vsel %vm3099_vm2, %v3076_v45, %v2630_v10  ;;  %v3083_v10 = vsel %vm3066_vm15, %v5589_v62, %v5906_v28  ;;  %v7225_v28 = vld [vmem:[#allocation118_spill] sm:$0xff]  ;;  %v7233_v45 = vld [vmem:[#allocation81_spill] sm:$0xff] }
 0x267   : > { %2562 = vrot.lane.b32.xlu0 %v1657_v37, %s3903_s20  ;;  %v2794_v62 = vsel %vm1893_vm7, %v2791_v53, %v2793_v7  ;;  %v1645_v19 = vmul.f32 %v7225_v28, %v4206_v12 }
 0x268   : > { %2831 = vrot.lane.b32.xlu2 %v2768_v0, %s3904_s21  ;;  %v3116_v0 = vsel %vm3099_vm2, %v3083_v10, %v5939_v34  ;;  %v7226_v34 = vld [vmem:[#allocation62_spill] sm:$0xff] }
 0x269   : > { %2819 = vrot.lane.b32.xlu1 %v2756_v58, %s3904_s21  ;;  %v2812_v25 = vpop.permute.xlu0 %2811  ;;  %v6066_v63 = vmul.f32 %v7226_v34, %v7123_v30  ;;  %v7228_v58 = vld [vmem:[#allocation103_spill] sm:$0xff] }
 0x26a   : > { %v6028_v37 = vpop.permute.xlu2 %2645  ;;  %v3136_v49 = vsel %vm3132_vm4, %v3103_v31, %v2812_v25  ;;  %v1376_v50 = vmul.f32 %v7228_v58, %v7227_v9  ;;  %v7232_v31 = vld [vmem:[#allocation121_spill] sm:$0xff] }
 0x26b   : > { %v2824_v13 = vpop.permute.xlu1 %2823  ;;  %3773 = vmatmul.msk.f32.gmra.mxu0 %vm3174_vm5, %v3136_v49  ;;  %v2769_v12 = vrot.slane %v6066_v63, 2  ;;  %v2912_v49 = vsel %vm2901_vm10, %v1382_v36, %v7233_v45  ;;  %v7245_v45 = vld [vmem:[#allocation48_spill] sm:$0xff] }
 0x26c   : > { %v3142_v51 = vsel %vm3132_vm4, %v3109_v27, %v2824_v13  ;;  %v2906_v38 = vsel %vm2901_vm10, %v1376_v50, %v7231_v18  ;;  %v7234_v27 = vld [vmem:[#allocation151_spill] sm:$0xff]  ;;  %v7243_v18 = vld [vmem:[#allocation86_spill] sm:$0xff] }
 0x26d   : > { %3779 = vmatmul.msk.f32.gmra.mxu1 %vm3174_vm5, %v3142_v51  ;;  %v2939_v25 = vsel %vm2934_vm11, %v2906_v38, %v7232_v31  ;;  %v2770_v13 = vsel %vm1893_vm7, %v2767_v55, %v2769_v12  ;;  %v7235_v51 = vld [vmem:[#allocation74_spill] sm:$0xff]  ;;  %v7240_v55 = vld [vmem:[#allocation191_spill] sm:$0xff] }
 0x26e   : > { %v2972_v42 = vsel %vm2967_vm12, %v2939_v25, %v7234_v27  ;;  %v6090_v59 = vmul.f32 %v7235_v51, %v4312_v21  ;;  %v7248_v51 = vld [vmem:[#allocation167_spill] sm:$0xff] }
 0x26f   : > { %2651 = vrot.lane.b32.xlu0 %v7223_v40, %s3902_s19  ;;  %v7237_v40 = vld [vmem:[#allocation188_spill] sm:$0xff] }
 0x270   : > { %2845 = vrot.lane.b32.xlu2 %v2782_v15, %s3904_s21  ;;  %v2945_v15 = vsel %vm2934_vm11, %v2912_v49, %v7236_v23  ;;  %v3005_v10 = vsel %vm3000_vm13, %v2972_v42, %v7237_v40  ;;  %v2783_v58 = vrot.slane %v6090_v59, 2  ;;  %v7250_v40 = vld [vmem:[#allocation186_spill] sm:$0xff] }
 0x271   : > { %2663 = vrot.lane.b32.xlu1 %v7224_v4, %s3902_s19  ;;  %v2838_v6 = vpop.permute.xlu0 %2837 }
 0x272   : > { %v6055_v26 = vpop.permute.xlu2 %2532  ;;  %v3149_v14 = vsel %vm3132_vm4, %v3116_v0, %v2838_v6  ;;  %v7238_v0 = vld [vmem:[#allocation156_spill] sm:$0xff]  ;;  %v7239_v6 = vld [vmem:[#allocation46_spill] sm:$0xff] }
 0x273   : > { %v2519_v5 = vpop.permute.xlu1 %2518  ;;  %3786 = vmatmul.msk.f32.vlgmr.msra.gmra.mxu2 %vm3174_vm5, %v3149_v14  ;;  %v2978_v4 = vsel %vm2967_vm12, %v2945_v15, %v7238_v0  ;;  %v3038_v14 = vsel %vm3033_vm14, %v3005_v10, %v7239_v6  ;;  %v7249_v15 = vld [vmem:[#allocation29_spill] sm:$0xff]  ;;  %v7251_v0 = vld [vmem:[#allocation127_spill] sm:$0xff] }
 0x274   : > { %v3071_v28 = vsel %vm3066_vm15, %v3038_v14, %v2519_v5 }
 0x277   : > { %2857 = vrot.lane.b32.xlu0 %v2794_v62, %s3904_s21  ;;  %v3011_v62 = vsel %vm3000_vm13, %v2978_v4, %v7240_v55  ;;  %v1653_v55 = vmul.f32 %v7127_v39, %v4312_v21  ;;  %v7257_v21 = vld [vmem:[#allocation123_spill] sm:$0xff] }
 0x278   : > { %2639 = vrot.lane.b32.xlu2 %v7229_v54, %s3902_s19 }
 0x279   : > { %2538 = vrot.lane.b32.xlu1 %v1645_v19, %s3903_s20  ;;  %v2620_v53 = vpop.permute.xlu0 %2619  ;;  %v7241_v19 = vld [vmem:[#allocation124_spill] sm:$0xff] }
 0x27a   : > { %v6077_v8 = vpop.permute.xlu2 %2546  ;;  %v3044_v34 = vsel %vm3033_vm14, %v3011_v62, %v7241_v19  ;;  %v3104_v63 = vsel %vm3099_vm2, %v3071_v28, %v2620_v53  ;;  %v7242_v53 = vld [vmem:[#allocation43_spill] sm:$0xff]  ;;  %v7252_v62 = vld [vmem:[#allocation57_spill] sm:$0xff] }
 0x27b   : > { %v2632_v57 = vpop.permute.xlu1 %2631  ;;  %v6120_v38 = vmul.f32 %v7243_v18, %v7242_v53  ;;  %v7253_v28 = vld [vmem:[#allocation5_spill] sm:$0xff] }
 0x27c   : > { %v2907_v19 = vsel %vm2901_vm10, %v7253_v28, %v7252_v62 }
 0x27d   : > { %v2795_v31 = vrot.slane %v6120_v38, 2  ;;  %v2940_v39 = vsel %vm2934_vm11, %v2907_v19, %v7257_v21 }
 0x27f   : > { %2552 = vrot.lane.b32.xlu0 %v7151_v16, %s3903_s20  ;;  %v3077_v16 = vsel %vm3066_vm15, %v3044_v34, %v5966_v32  ;;  %v7244_v32 = vld [vmem:[#allocation37_spill] sm:$0xff] }
 0x280   : > { %2833 = vrot.lane.b32.xlu2 %v2770_v13, %s3904_s21  ;;  %v3110_v5 = vsel %vm3099_vm2, %v3077_v16, %v2632_v57  ;;  %v3084_v57 = vsel %vm3066_vm15, %v5604_v60, %v5982_v29  ;;  %v2796_v60 = vsel %vm1893_vm7, %v2793_v7, %v2795_v31  ;;  %v7246_v29 = vld [vmem:[#allocation66_spill] sm:$0xff]  ;;  %v7247_v13 = vld [vmem:[#allocation132_spill] sm:$0xff] }
 0x281   : > { %2564 = vrot.lane.b32.xlu1 %v7174_v44, %s3903_s20  ;;  %v2814_v9 = vpop.permute.xlu0 %2813  ;;  %v2784_v44 = vsel %vm1893_vm7, %v2781_v2, %v2783_v58  ;;  %v3117_v25 = vsel %vm3099_vm2, %v3084_v57, %v6028_v37  ;;  %v2913_v42 = vsel %vm2901_vm10, %v7182_v47, %v7246_v29  ;;  %v7262_v29 = vld [vmem:[#allocation90_spill] sm:$0xff] }
 0x282   : > { %v2828_v50 = vpop.permute.xlu2 %2827  ;;  %v3137_v54 = vsel %vm3132_vm4, %v3104_v63, %v2814_v9  ;;  %v2946_v37 = vsel %vm2934_vm11, %v2913_v42, %v7247_v13  ;;  %v7254_v63 = vld [vmem:[#allocation122_spill] sm:$0xff] }
 0x283   : > { %v2826_v24 = vpop.permute.xlu1 %2825  ;;  %3774 = vmatmul.msk.f32.gmra.mxu0 %vm3174_vm5, %v3137_v54  ;;  %v2979_v23 = vsel %vm2967_vm12, %v2946_v37, %v7248_v51  ;;  %v7255_v9 = vrot.slane %v7254_v63, 2  ;;  %v7256_v54 = vld [vmem:[#allocation77_spill] sm:$0xff]  ;;  %v3869_v13 = vld [vmem:[%s6616_s0] ss:$0 sm:$0xff]  ;;  %v7263_v51 = vld [vmem:[#allocation36_spill] sm:$0xff] }
 0x284   : > { %v3143_v36 = vsel %vm3132_vm4, %v3110_v5, %v2826_v24  ;;  %v3012_v10 = vsel %vm3000_vm13, %v2979_v23, %v7250_v40  ;;  %v1686_v5 = vmul.f32 %v7256_v54, %v4315_v61  ;;  %v7258_v24 = vld [vmem:[#allocation161_spill] sm:$0xff]  ;;  %v7269_v54 = vrot.slane %v5769_v3, 2  ;;  %v7276_v3 = vld [vmem:[#allocation2_spill] sm:$0xff] }
 0x285   : > { %3780 = vmatmul.msk.f32.gmra.mxu1 %vm3174_vm5, %v3143_v36  ;;  %v3045_v47 = vsel %vm3033_vm14, %v3012_v10, %v7251_v0  ;;  %v2772_v16 = vsel %vm1893_vm7, %v2769_v12, %v7255_v9  ;;  %v2973_v36 = vsel %vm2967_vm12, %v2940_v39, %v7258_v24  ;;  %v7260_v12 = vld [vmem:[#allocation10_spill] sm:$0xff]  ;;  %v7264_v10 = vld [vmem:[#allocation21_spill] sm:$0xff]  ;;  %v7268_v9 = vld [vmem:[#allocation92_spill] sm:$0xff] }
 0x286   : > { %v3078_v6 = vsel %vm3066_vm15, %v3045_v47, %v6055_v26  ;;  %v1659_v26 = vmul.f32 %v7158_v35, %v7242_v53  ;;  %v7265_v0 = vld [vmem:[#allocation177_spill] sm:$0xff]  ;;  %v7271_v39 = vld [vmem:[#allocation119_spill] sm:$0xff] }
 0x287   : > { %2653 = vrot.lane.b32.xlu0 %v7244_v32, %s3902_s19  ;;  %v473_v32 = vld [vmem:[%s5039_s17 + $0x8] sm:$0xff] }
 0x288   : > { %2847 = vrot.lane.b32.xlu2 %v2784_v44, %s3904_s21  ;;  %v2785_v44 = vrot.slane %v1686_v5, 2  ;;  %v475_v37 = vmul.f32 %v3869_v13, %v473_v32  ;;  %v7272_v24 = vld [vmem:[#allocation39_spill] sm:$0xff]  ;;  %v7277_v32 = vld [vmem:[#allocation192_spill] sm:$0xff] }
 0x289   : > { %2665 = vrot.lane.b32.xlu1 %v7245_v45, %s3902_s19  ;;  %v2840_v48 = vpop.permute.xlu0 %2839 }
 0x28a   : > { %v2842_v49 = vpop.permute.xlu2 %2841  ;;  %v3150_v2 = vsel %vm3132_vm4, %v3117_v25, %v2840_v48  ;;  %v2788_v5 = vsel %vm1893_vm7, %v2785_v44, %v7269_v54 }
 0x28b   : > { %v2521_v27 = vpop.permute.xlu1 %2520  ;;  %3787 = vmatmul.msk.f32.gmra.mxu2 %vm3174_vm5, %v3150_v2 }
 0x28f   : > { %2859 = vrot.lane.b32.xlu0 %v2796_v60, %s3904_s21  ;;  %v7261_v60 = vld [vmem:[#allocation143_spill] sm:$0xff] }
 0x290   : > { %2641 = vrot.lane.b32.xlu2 %v7249_v15, %s3902_s19  ;;  %v1692_v42 = vmul.f32 %v7262_v29, %v7261_v60  ;;  %v3870_v15 = vld [vmem:[%s6617_s1] ss:$0 sm:$0xff] }
 0x291   : > { %2540 = vrot.lane.b32.xlu1 %v7123_v30, %s3903_s20  ;;  %v2622_v7 = vpop.permute.xlu0 %2621  ;;  %v477_v40 = vadd.f32 %v3870_v15, %v475_v37 }
 0x292   : > { %v6160_v4 = vpop.permute.xlu2 %2534  ;;  %v2797_v23 = vrot.slane %v1692_v42, 2 }
 0x293   : > { %v2634_v14 = vpop.permute.xlu1 %2633  ;;  %v479_v62 = vmax.f32 %v477_v40, 0.0  ;;  %v7281_v40 = vld [vmem:[#allocation64_spill] sm:$0xff] }
 0x294   : > { %v3111_v30 = vsel %vm3099_vm2, %v3078_v6, %v2634_v14 }
 0x295   : > { %v3144_v34 = vsel %vm3132_vm4, %v3111_v30, %v2828_v50  ;;  %v7259_v50 = vld [vmem:[#allocation54_spill] sm:$0xff]  ;;  %v485_v28 = vmul.f32 0.0, %v479_v62  ;;  %v7266_v30 = vld [vmem:[#allocation17_spill] sm:$0xff] }
 0x296   : > { %3781 = vmatmul.msk.f32.gmra.mxu1 %vm3174_vm5, %v3144_v34  ;;  %v3006_v18 = vsel %vm3000_vm13, %v2973_v36, %v7259_v50  ;;  %v1384_v38 = vmul.f32 %v7170_v43, %v7266_v30  ;;  %v7273_v36 = vld [vmem:[#allocation169_spill] sm:$0xff] }
 0x297   : > { %2554 = vrot.lane.b32.xlu0 %v1653_v55, %s3903_s20  ;;  %v3039_v35 = vsel %vm3033_vm14, %v3006_v18, %v7260_v12  ;;  %v2798_v55 = vsel %vm1893_vm7, %v2795_v31, %v2797_v23  ;;  %v7274_v12 = vld [vmem:[#allocation170_spill] sm:$0xff] }
 0x298   : > { %2835 = vrot.lane.b32.xlu2 %v2772_v16, %s3904_s21  ;;  %v3072_v57 = vsel %vm3066_vm15, %v3039_v35, %v2521_v27  ;;  %v2786_v27 = vsel %vm1893_vm7, %v2783_v58, %v2785_v44  ;;  %v7275_v35 = vrot.slane %v7274_v12, 7  ;;  %v1378_v44 = vmul.f32 %v7172_v52, %v7276_v3 }
 0x299   : > { %2566 = vrot.lane.b32.xlu1 %v1659_v26, %s3903_s20  ;;  %v2559_v53 = vpop.permute.xlu0 %2558  ;;  %v3105_v45 = vsel %vm3099_vm2, %v3072_v57, %v2622_v7  ;;  %v3085_v7 = vsel %vm3066_vm15, %v7264_v10, %v6077_v8  ;;  %v754_v26 = vrot.slane %v485_v28, 7 }
 0x29a   : > { %v6192_v25 = vpop.permute.xlu2 %2548  ;;  %v3091_v8 = vsel %vm3066_vm15, %v5540_v20, %v2559_v53  ;;  %v7267_v20 = vld [vmem:[#allocation38_spill] sm:$0xff]  ;;  %v2908_v10 = vsel %vm2901_vm10, %v1378_v44, %v7281_v40 }
 0x29b   : > { %v2816_v48 = vpop.permute.xlu1 %2815  ;;  %v1693_v16 = vmul.f32 %v7268_v9, %v7267_v20  ;;  %v755_v53 = vsel %vm616_vm0, %v7275_v35, %v754_v26 }
 0x29c   : > { %v3138_v2 = vsel %vm3132_vm4, %v3105_v45, %v2816_v48  ;;  %v7278_v45 = vld [vmem:[#allocation44_spill] sm:$0xff] }
 0x29d   : > { %3775 = vmatmul.msk.f32.gmra.mxu0 %vm3174_vm5, %v3138_v2  ;;  %v2799_v18 = vrot.slane %v1693_v16, 2  ;;  %v2607_v2 = vrot.slane %v755_v53, 1  ;;  %v7287_v16 = vld [vmem:[#allocation88_spill] sm:$0xff] }
 0x29f   : > { %2655 = vrot.lane.b32.xlu0 %v7263_v51, %s3902_s19  ;;  %v2800_v52 = vsel %vm1893_vm7, %v2797_v23, %v2799_v18  ;;  %v7280_v51 = vld [vmem:[#allocation93_spill] sm:$0xff]  ;;  %v7284_v23 = vld [vmem:[#allocation163_spill] sm:$0xff] }
 0x2a0   : > { %2849 = vrot.lane.b32.xlu2 %v2786_v27, %s3904_s21  ;;  %v1694_v15 = vmul.f32 %v7280_v51, %v755_v53 }
 0x2a1   : > { %2667 = vrot.lane.b32.xlu1 %v7265_v0, %s3902_s19  ;;  %v2648_v59 = vpop.permute.xlu0 %2647  ;;  %v1661_v0 = vmul.f32 %v7119_v56, %v7267_v20  ;;  %v762_v56 = vsel %vm616_vm0, %v754_v26, 0.0 }
 0x2a2   : > { %v3118_v58 = vsel %vm3099_vm2, %v3085_v7, %v2648_v59  ;;  %v2830_v47 = vpop.permute.xlu2 %2829  ;;  %v7282_v59 = vrot.slane %v7267_v20, 1  ;;  %v2801_v62 = vrot.slane %v1694_v15, 2  ;;  %v1695_v26 = vmul.f32 %v7287_v16, %v762_v56 }
 0x2a3   : > { %v2660_v6 = vpop.permute.xlu1 %2659  ;;  %v3151_v14 = vsel %vm3132_vm4, %v3118_v58, %v2842_v49  ;;  %v7283_v58 = vld [vmem:[#allocation110_spill] sm:$0xff] }
 0x2a4   : > { %3788 = vmatmul.msk.f32.gmra.mxu2 %vm3174_vm5, %v3151_v14  ;;  %v3124_v19 = vsel %vm3099_vm2, %v3091_v8, %v2660_v6  ;;  %v2941_v6 = vsel %vm2934_vm11, %v2908_v10, %v7283_v58  ;;  %v7286_v8 = vld [vmem:[#allocation193_spill] sm:$0xff]  ;;  %v2802_v9 = vsel %vm1893_vm7, %v2799_v18, %v2801_v62 }
 0x2a5   : > { %v2974_v14 = vsel %vm2967_vm12, %v2941_v6, %v7284_v23  ;;  %v7291_v23 = vld [vmem:[#allocation125_spill] sm:$0xff] }
 0x2a7   : > { %2861 = vrot.lane.b32.xlu0 %v2798_v55, %s3904_s21  ;;  %v7285_v55 = vld [vmem:[#allocation189_spill] sm:$0xff] }
 0x2a8   : > { %2568 = vrot.lane.b32.xlu2 %v7261_v60, %s3903_s20  ;;  %v7279_v60 = vld [vmem:[#allocation194_spill] sm:$0xff] }
 0x2a9   : > { %2556 = vrot.lane.b32.xlu1 %v4315_v61, %s3903_s20  ;;  %v2854_v49 = vpop.permute.xlu0 %2853  ;;  %v7270_v61 = vld [vmem:[#allocation89_spill] sm:$0xff] }
 0x2aa   : > { %v6232_v31 = vpop.permute.xlu2 %2843  ;;  %v3157_v34 = vsel %vm3132_vm4, %v3124_v19, %v2854_v49  ;;  %v2914_v21 = vsel %vm2901_vm10, %v1384_v38, %v7270_v61  ;;  %v2609_v49 = vrot.slane %v762_v56, 1  ;;  %v2803_v61 = vrot.slane %v1695_v26, 2 }
 0x2ab   : > { %v2523_v63 = vpop.permute.xlu1 %2522  ;;  %3794 = vmatmul.msk.f32.vlgmr.msra.gmra.mxu3 %vm3174_vm5, %v3157_v34  ;;  %v2947_v43 = vsel %vm2934_vm11, %v2914_v21, %v7271_v39  ;;  %v3086_v21 = vsel %vm3066_vm15, %v5651_v11, %v6192_v25 }
 0x2ac   : > { %v2980_v50 = vsel %vm2967_vm12, %v2947_v43, %v7273_v36  ;;  %v2610_v54 = vsel %vm1698_vm1, %v2607_v2, %v2609_v49 }
 0x2ad   : > { %v3013_v57 = vsel %vm3000_vm13, %v2980_v50, %v7277_v32  ;;  %v2804_v50 = vsel %vm1893_vm7, %v2801_v62, %v2803_v61 }
 0x2ae   : > { %v3046_v29 = vsel %vm3033_vm14, %v3013_v57, %v7279_v60 }
 0x2af   : > { %2657 = vrot.lane.b32.xlu0 %v7272_v24, %s3902_s19  ;;  %v3079_v42 = vsel %vm3066_vm15, %v3046_v29, %v6160_v4  ;;  %v2608_v4 = vsel %vm1698_vm1, %v7282_v59, %v2607_v2  ;;  %v7290_v59 = vld [vmem:[#allocation3_spill] sm:$0xff]  ;;  %vm3587_vm1 = vcmask 58368  }
 0x2b0   : > { %2851 = vrot.lane.b32.xlu2 %v2788_v5, %s3904_s21 }
 0x2b1   : > { %2669 = vrot.lane.b32.xlu1 %v7278_v45, %s3902_s19  ;;  %v2624_v48 = vpop.permute.xlu0 %2623 }
 0x2b2   : > { %v6263_v37 = vpop.permute.xlu2 %2536 }
 0x2b3   : > { %v2636_v13 = vpop.permute.xlu1 %2635 }
 0x2b4   : > { %v3112_v27 = vsel %vm3099_vm2, %v3079_v42, %v2636_v13 }
 0x2b5   : > { %v3145_v7 = vsel %vm3132_vm4, %v3112_v27, %v2830_v47  ;;  %v3007_v47 = vsel %vm3000_vm13, %v2974_v14, %v7285_v55  ;;  %v7292_v55 = vld [vmem:[#allocation154_spill] sm:$0xff] }
 0x2b6   : > { %3782 = vmatmul.msk.f32.gmra.mxu1 %vm3174_vm5, %v3145_v7  ;;  %v3040_v28 = vsel %vm3033_vm14, %v3007_v47, %v7286_v8  ;;  %v7293_v47 = vld [vmem:[#allocation190_spill] sm:$0xff]  ;;  %v7294_v8 = vld [vmem:[#allocation173_spill] sm:$0xff] }
 0x2b7   : > { %2863 = vrot.lane.b32.xlu0 %v2800_v52, %s3904_s21  ;;  %v3073_v30 = vsel %vm3066_vm15, %v3040_v28, %v2523_v63  ;;  %v7288_v52 = vld [vmem:[#allocation27_spill] sm:$0xff] }
 0x2b8   : > { %2671 = vrot.lane.b32.xlu2 %v2608_v4, %s3902_s19  ;;  %v3106_v38 = vsel %vm3099_vm2, %v3073_v30, %v2624_v48  ;;  %v3080_v51 = vsel %vm3066_vm15, %v7288_v52, %v6263_v37 }
 0x2b9   : > { %2570 = vrot.lane.b32.xlu1 %v1661_v0, %s3903_s20  ;;  %v2561_v19 = vpop.permute.xlu0 %2560  ;;  %v7289_v0 = vld [vmem:[#allocation75_spill] sm:$0xff] }
 0x2ba   : > { %v2551_v5 = vpop.permute.xlu2 %2550  ;;  %v3092_v11 = vsel %vm3066_vm15, %v5758_v41, %v2561_v19  ;;  %v2909_v4 = vsel %vm2901_vm10, %v7290_v59, %v7289_v0 }
 0x2bb   : > { %v2818_v34 = vpop.permute.xlu1 %2817  ;;  %v2942_v14 = vsel %vm2934_vm11, %v2909_v4, %v7291_v23 }
 0x2bc   : > { %v3139_v20 = vsel %vm3132_vm4, %v3106_v38, %v2818_v34  ;;  %v2975_v37 = vsel %vm2967_vm12, %v2942_v14, %v7292_v55  ;;  %v7298_v14 = vld [vmem:[#allocation95_spill] sm:$0xff] }
 0x2bd   : > { %3776 = vmatmul.msk.f32.gmra.mxu0 %vm3174_vm5, %v3139_v20  ;;  %v3008_v62 = vsel %vm3000_vm13, %v2975_v37, %v7293_v47 }
 0x2be   : > { %v3041_v28 = vsel %vm3033_vm14, %v3008_v62, %v7294_v8 }
 0x2bf   : > { %2865 = vrot.lane.b32.xlu0 %v2802_v9, %s3904_s21  ;;  %v3087_v9 = vsel %vm3066_vm15, %v5662_v17, %v2551_v5 }
 0x2c0   : > { %v3288_v63 = vpop.f32.mrf.mxu0  ;;  %2673 = vrot.lane.b32.xlu2 %v2610_v54, %s3902_s19 }
 0x2c1   : > { %2572 = vrot.lane.b32.xlu1 %v755_v53, %s3903_s20  ;;  %3384 = vst.msk [vmem:[%s6301_s15] sm:$0xff] %vm2901_vm10, %v3288_v63  ;;  %v2650_v39 = vpop.permute.xlu0 %2649  ;;  %v3485_v18 = vmul.f32 %v3288_v63, %v3288_v63  ;;  %v3416_v35 = vsel %vm2901_vm10, %v3288_v63, 0.0  ;;  %s448_s20 = scalar_lea.vmem %s6623_s7, %s3737_s28 }
 0x2c2   : > { %v3119_v43 = vsel %vm3099_vm2, %v3086_v21, %v2650_v39  ;;  %v2832_v25 = vpop.permute.xlu2 %2831 }
 0x2c3   : > { %v2662_v24 = vpop.permute.xlu1 %2661  ;;  %v3152_v36 = vsel %vm3132_vm4, %v3119_v43, %v6232_v31  ;;  %v3517_v45 = vsel %vm2901_vm10, %v3485_v18, 0.0 }
 0x2c4   : > { %3789 = vmatmul.msk.f32.gmra.mxu2 %vm3174_vm5, %v3152_v36  ;;  %v3125_v53 = vsel %vm3099_vm2, %v3092_v11, %v2662_v24 }
 0x2c7   : > { %2867 = vrot.lane.b32.xlu0 %v2804_v50, %s3904_s21 }
 0x2c8   : > { %v3291_v12 = vpop.f32.mrf.mxu0 }
 0x2c9   : > { %3385 = vst.msk [vmem:[%s6301_s15 + $0x8] sm:$0xff] %vm2901_vm10, %v3291_v12  ;;  %v3417_v31 = vsel %vm2901_vm10, %v3291_v12, 0.0  ;;  %v3486_v3 = vmul.f32 %v3291_v12, %v3291_v12  ;;  %v2856_v44 = vpop.permute.xlu0 %2855  ;;  %v7295_v12 = vld [vmem:[#allocation176_spill] sm:$0xff] }
 0x2ca   : > { %v3418_v32 = vadd.f32 %v3417_v31, %v3416_v35  ;;  %v3158_v57 = vsel %vm3132_vm4, %v3125_v53, %v2856_v44  ;;  %v2846_v42 = vpop.permute.xlu2 %2845 }
 0x2cb   : > { %v3518_v41 = vsel %vm2901_vm10, %v3486_v3, 0.0  ;;  %v2525_v48 = vpop.permute.xlu1 %2524  ;;  %3795 = vmatmul.msk.f32.gmra.mxu3 %vm3174_vm5, %v3158_v57 }
 0x2cc   : > { %v3519_v2 = vadd.f32 %v3518_v41, %v3517_v45  ;;  %v3074_v49 = vsel %vm3066_vm15, %v3041_v28, %v2525_v48  ;;  %v7296_v45 = vld [vmem:[#allocation98_spill] sm:$0xff] }
 0x2d1   : > { %v2626_v60 = vpop.permute.xlu0 %2625  ;;  %v3294_v29 = vpop.f32.mrf.mxu0 }
 0x2d2   : > { %3386 = vst.msk [vmem:[%s6301_s15 + $0x10] sm:$0xff] %vm2901_vm10, %v3294_v29  ;;  %v3419_v13 = vsel %vm2901_vm10, %v3294_v29, 0.0  ;;  %v3487_v27 = vmul.f32 %v3294_v29, %v3294_v29  ;;  %v3107_v30 = vsel %vm3099_vm2, %v3074_v49, %v2626_v60  ;;  %v2640_v34 = vpop.permute.xlu2 %2639  ;;  %v7299_v49 = vld [vmem:[#allocation179_spill] sm:$0xff] }
 0x2d3   : > { %v3420_v15 = vadd.f32 %v3419_v13, %v3418_v32  ;;  %v2638_v40 = vpop.permute.xlu1 %2637  ;;  %v7297_v13 = vld [vmem:[#allocation101_spill] sm:$0xff] }
 0x2d4   : > { %v3520_v10 = vsel %vm2901_vm10, %v3487_v27, 0.0  ;;  %v3113_v7 = vsel %vm3099_vm2, %v3080_v51, %v2638_v40 }
 0x2d5   : > { %v3521_v58 = vadd.f32 %v3520_v10, %v3519_v2  ;;  %v3146_v6 = vsel %vm3132_vm4, %v3113_v7, %v2832_v25 }
 0x2d6   : > { %3783 = vmatmul.msk.f32.gmra.mxu1 %vm3174_vm5, %v3146_v6 }
 0x2d8   : > { %v6347_v56 = vpop.f32.mrf.mxu1 }
 0x2d9   : > { %3392 = vst.msk [vmem:[%s6301_s15 + $0x40] sm:$0xff] %vm2901_vm10, %v6347_v56  ;;  %v2563_v19 = vpop.permute.xlu0 %2562 }
 0x2da   : > { %v2834_v61 = vpop.permute.xlu2 %2833  ;;  %v3093_v21 = vsel %vm3066_vm15, %v5765_v46, %v2563_v19 }
 0x2db   : > { %v2820_v38 = vpop.permute.xlu1 %2819 }
 0x2dc   : > { %v3140_v20 = vsel %vm3132_vm4, %v3107_v30, %v2820_v38 }
 0x2dd   : > { %3777 = vmatmul.msk.f32.gmra.mxu0 %vm3174_vm5, %v3140_v20 }
 0x2e1   : > { %v2652_v16 = vpop.permute.xlu0 %2651 }
 0x2e2   : > { %v3120_v26 = vsel %vm3099_vm2, %v3087_v9, %v2652_v16  ;;  %v2848_v3 = vpop.permute.xlu2 %2847 }
 0x2e3   : > { %v2664_v54 = vpop.permute.xlu1 %2663  ;;  %v3153_v63 = vsel %vm3132_vm4, %v3120_v26, %v2846_v42 }
 0x2e4   : > { %3790 = vmatmul.msk.f32.gmra.mxu2 %vm3174_vm5, %v3153_v63  ;;  %v3126_v43 = vsel %vm3099_vm2, %v3093_v21, %v2664_v54 }
 0x2e8   : > { %v3297_v39 = vpop.f32.mrf.mxu0 }
 0x2e9   : > { %3387 = vst.msk [vmem:[%s6301_s15 + $0x18] sm:$0xff] %vm2901_vm10, %v3297_v39  ;;  %v3421_v17 = vsel %vm2901_vm10, %v3297_v39, 0.0  ;;  %v3488_v5 = vmul.f32 %v3297_v39, %v3297_v39  ;;  %v2858_v24 = vpop.permute.xlu0 %2857 }
 0x2ea   : > { %v3422_v36 = vadd.f32 %v3421_v17, %v3420_v15  ;;  %v6369_v50 = vpop.f32.mrf.mxu1  ;;  %v3159_v18 = vsel %vm3132_vm4, %v3126_v43, %v2858_v24  ;;  %v2642_v2 = vpop.permute.xlu2 %2641 }
 0x2eb   : > { %v3522_v11 = vsel %vm2901_vm10, %v3488_v5, 0.0  ;;  %3393 = vst.msk [vmem:[%s6301_s15 + $0x48] sm:$0xff] %vm2901_vm10, %v6369_v50  ;;  %v2539_v46 = vpop.permute.xlu1 %2538  ;;  %3796 = vmatmul.msk.f32.gmra.mxu3 %vm3174_vm5, %v3159_v18 }
 0x2ec   : > { %v3523_v25 = vadd.f32 %v3522_v11, %v3521_v58  ;;  %v3081_v35 = vsel %vm3066_vm15, %v7295_v12, %v2539_v46  ;;  %v7300_v11 = vld [vmem:[#allocation133_spill] sm:$0xff] }
 0x2ed   : > { %v3114_v53 = vsel %vm3099_vm2, %v3081_v35, %v2640_v34 }
 0x2ee   : > { %v3147_v31 = vsel %vm3132_vm4, %v3114_v53, %v2834_v61 }
 0x2ef   : > { %3784 = vmatmul.msk.f32.gmra.mxu1 %vm3174_vm5, %v3147_v31 }
 0x2f1   : > { %v2553_v44 = vpop.permute.xlu0 %2552 }
 0x2f2   : > { %v3088_v41 = vsel %vm3066_vm15, %v7296_v45, %v2553_v44  ;;  %v2836_v6 = vpop.permute.xlu2 %2835 }
 0x2f3   : > { %v2565_v32 = vpop.permute.xlu1 %2564 }
 0x2f4   : > { %v3094_v27 = vsel %vm3066_vm15, %v7297_v13, %v2565_v32 }
 0x2f6   : > { %v6382_v57 = vpop.f32.mrf.mxu2 }
 0x2f7   : > { %3400 = vst.msk [vmem:[%s6301_s15 + $0x80] sm:$0xff] %vm2901_vm10, %v6382_v57 }
 0x2f9   : > { %v2654_v48 = vpop.permute.xlu0 %2653 }
 0x2fa   : > { %v3121_v60 = vsel %vm3099_vm2, %v3088_v41, %v2654_v48  ;;  %v2850_v28 = vpop.permute.xlu2 %2849 }
 0x2fb   : > { %v2666_v29 = vpop.permute.xlu1 %2665  ;;  %v3154_v42 = vsel %vm3132_vm4, %v3121_v60, %v2848_v3 }
 0x2fc   : > { %3791 = vmatmul.msk.f32.gmra.mxu2 %vm3174_vm5, %v3154_v42  ;;  %v3127_v51 = vsel %vm3099_vm2, %v3094_v27, %v2666_v29 }
 0x300   : > { %v3300_v52 = vpop.f32.mrf.mxu0 }
 0x301   : > { %3388 = vst.msk [vmem:[%s6301_s15 + $0x20] sm:$0xff] %vm2901_vm10, %v3300_v52  ;;  %v3423_v15 = vsel %vm2901_vm10, %v3300_v52, 0.0  ;;  %v3489_v40 = vmul.f32 %v3300_v52, %v3300_v52  ;;  %v2860_v10 = vpop.permute.xlu0 %2859 }
 0x302   : > { %v3424_v7 = vadd.f32 %v3423_v15, %v3422_v36  ;;  %v6398_v0 = vpop.f32.mrf.mxu1  ;;  %v3160_v59 = vsel %vm3132_vm4, %v3127_v51, %v2860_v10  ;;  %v2569_v26 = vpop.permute.xlu2 %2568 }
 0x303   : > { %v3524_v4 = vsel %vm2901_vm10, %v3489_v40, 0.0  ;;  %3394 = vst.msk [vmem:[%s6301_s15 + $0x50] sm:$0xff] %vm2901_vm10, %v6398_v0  ;;  %v2541_v58 = vpop.permute.xlu1 %2540  ;;  %3797 = vmatmul.msk.f32.gmra.mxu3 %vm3174_vm5, %v3160_v59  ;;  %v3096_v3 = vsel %vm3066_vm15, %v5810_v22, %v2569_v26 }
 0x304   : > { %v3525_v23 = vadd.f32 %v3524_v4, %v3523_v25  ;;  %v3082_v55 = vsel %vm3066_vm15, %v7298_v14, %v2541_v58 }
 0x305   : > { %v3115_v37 = vsel %vm3099_vm2, %v3082_v55, %v2642_v2  ;;  %v7301_v2 = vld [vmem:[#allocation131_spill] sm:$0xff] }
 0x306   : > { %v3148_v47 = vsel %vm3132_vm4, %v3115_v37, %v2836_v6 }
 0x307   : > { %3785 = vmatmul.msk.f32.gmra.mxu1 %vm3174_vm5, %v3148_v47 }
 0x309   : > { %v2555_v62 = vpop.permute.xlu0 %2554 }
 0x30a   : > { %v3089_v30 = vsel %vm3066_vm15, %v7299_v49, %v2555_v62  ;;  %v3493_v62 = vmul.f32 %v6347_v56, %v6347_v56 }
 0x30b   : > { %v2567_v8 = vpop.permute.xlu1 %2566 }
 0x30c   : > { %v3095_v54 = vsel %vm3066_vm15, %v5803_v1, %v2567_v8  ;;  %v2852_v1 = vpop.permute.xlu2 %2851  ;;  %v3532_v26 = vsel %vm2901_vm10, %v3493_v62, 0.0 }
 0x30e   : > { %v6411_v19 = vpop.f32.mrf.mxu2 }
 0x30f   : > { %3401 = vst.msk [vmem:[%s6301_s15 + $0x88] sm:$0xff] %vm2901_vm10, %v6411_v19 }
 0x311   : > { %v2656_v38 = vpop.permute.xlu0 %2655 }
 0x312   : > { %v3122_v34 = vsel %vm3099_vm2, %v3089_v30, %v2656_v38  ;;  %v3431_v30 = vsel %vm2901_vm10, %v6347_v56, 0.0  ;;  %v3494_v38 = vmul.f32 %v6369_v50, %v6369_v50  ;;  %v3435_v56 = vsel %vm2901_vm10, %v6398_v0, 0.0 }
 0x313   : > { %v6419_v20 = vpop.f32.mrf.mxu1  ;;  %v2668_v9 = vpop.permute.xlu1 %2667  ;;  %v3155_v16 = vsel %vm3132_vm4, %v3122_v34, %v2850_v28 }
 0x314   : > { %3395 = vst.msk [vmem:[%s6301_s15 + $0x58] sm:$0xff] %vm2901_vm10, %v6419_v20  ;;  %3792 = vmatmul.msk.f32.gmra.mxu2 %vm3174_vm5, %v3155_v16  ;;  %v3128_v63 = vsel %vm3099_vm2, %v3095_v54, %v2668_v9  ;;  %v2672_v48 = vpop.permute.xlu2 %2671  ;;  %v3433_v54 = vsel %vm2901_vm10, %v6369_v50, 0.0  ;;  %v3437_v50 = vsel %vm2901_vm10, %v6419_v20, 0.0 }
 0x319   : > { %v2862_v61 = vpop.permute.xlu0 %2861 }
 0x31a   : > { %v3303_v21 = vpop.f32.mrf.mxu0  ;;  %v3161_v39 = vsel %vm3132_vm4, %v3128_v63, %v2862_v61  ;;  %v3495_v63 = vmul.f32 %v6398_v0, %v6398_v0 }
 0x31b   : > { %3389 = vst.msk [vmem:[%s6301_s15 + $0x28] sm:$0xff] %vm2901_vm10, %v3303_v21  ;;  %v3425_v43 = vsel %vm2901_vm10, %v3303_v21, 0.0  ;;  %v3490_v17 = vmul.f32 %v3303_v21, %v3303_v21  ;;  %v2557_v5 = vpop.permute.xlu1 %2556  ;;  %3798 = vmatmul.msk.f32.gmra.mxu3 %vm3174_vm5, %v3161_v39  ;;  %v3534_v39 = vsel %vm2901_vm10, %v3494_v38, 0.0 }
 0x31c   : > { %v3426_v24 = vadd.f32 %v3425_v43, %v3424_v7  ;;  %v3090_v46 = vsel %vm3066_vm15, %v7300_v11, %v2557_v5  ;;  %v2674_v15 = vpop.permute.xlu2 %2673  ;;  %v3496_v43 = vmul.f32 %v6419_v20, %v6419_v20 }
 0x31d   : > { %v3526_v36 = vsel %vm2901_vm10, %v3490_v17, 0.0 }
 0x31e   : > { %v3527_v18 = vadd.f32 %v3526_v36, %v3525_v23  ;;  %v3538_v11 = vsel %vm2901_vm10, %v3496_v43, 0.0 }
 0x321   : > { %v2658_v25 = vpop.permute.xlu0 %2657 }
 0x322   : > { %v3123_v12 = vsel %vm3099_vm2, %v3090_v46, %v2658_v25 }
 0x323   : > { %v2670_v35 = vpop.permute.xlu1 %2669  ;;  %v3156_v53 = vsel %vm3132_vm4, %v3123_v12, %v2852_v1 }
 0x324   : > { %3793 = vmatmul.msk.f32.gmra.mxu2 %vm3174_vm5, %v3156_v53  ;;  %v3129_v44 = vsel %vm3099_vm2, %v3096_v3, %v2670_v35 }
 0x327   : > { %v6440_v31 = vpop.f32.mrf.mxu2 }
 0x328   : > { %3402 = vst.msk [vmem:[%s6301_s15 + $0x90] sm:$0xff] %vm2901_vm10, %v6440_v31 }
 0x329   : > { %v2864_v32 = vpop.permute.xlu0 %2863 }
 0x32a   : > { %v3162_v45 = vsel %vm3132_vm4, %v3129_v44, %v2864_v32 }
 0x32b   : > { %v2571_v41 = vpop.permute.xlu1 %2570  ;;  %3799 = vmatmul.msk.f32.gmra.mxu3 %vm3174_vm5, %v3162_v45 }
 0x32c   : > { %v3097_v60 = vsel %vm3066_vm15, %v7301_v2, %v2571_v41 }
 0x32d   : > { %v3130_v22 = vsel %vm3099_vm2, %v3097_v60, %v2672_v48 }
 0x32e   : > { %v6452_v29 = vpop.f32.mrf.mxu3 }
 0x32f   : > { %3408 = vst.msk [vmem:[%s6301_s15 + $0xc0] sm:$0xff] %vm2901_vm10, %v6452_v29 }
 0x331   : > { %v2866_v42 = vpop.permute.xlu0 %2865 }
 0x332   : > { %v3163_v13 = vsel %vm3132_vm4, %v3130_v22, %v2866_v42 }
 0x333   : > { %v3324_v27 = vpop.f32.mrf.mxu1  ;;  %v2573_v52 = vpop.permute.xlu1 %2572  ;;  %3800 = vmatmul.msk.f32.gmra.mxu3 %vm3174_vm5, %v3163_v13 }
 0x334   : > { %3396 = vst.msk [vmem:[%s6301_s15 + $0x60] sm:$0xff] %vm2901_vm10, %v3324_v27  ;;  %v3098_v51 = vsel %vm3066_vm15, %v5840_v33, %v2573_v52  ;;  %v3497_v36 = vmul.f32 %v3324_v27, %v3324_v27  ;;  %v3439_v0 = vsel %vm2901_vm10, %v3324_v27, 0.0  ;;  %v3501_v52 = vmul.f32 %v6382_v57, %v6382_v57 }
 0x335   : > { %v3131_v40 = vsel %vm3099_vm2, %v3098_v51, %v2674_v15 }
 0x336   : > { %v3540_v35 = vsel %vm2901_vm10, %v3497_v36, 0.0 }
 0x339   : > { %v2868_v10 = vpop.permute.xlu0 %2867 }
 0x33a   : > { %v3306_v7 = vpop.f32.mrf.mxu0  ;;  %v3164_v59 = vsel %vm3132_vm4, %v3131_v40, %v2868_v10 }
 0x33b   : > { %3390 = vst.msk [vmem:[%s6301_s15 + $0x30] sm:$0xff] %vm2901_vm10, %v3306_v7  ;;  %v3427_v4 = vsel %vm2901_vm10, %v3306_v7, 0.0  ;;  %v3491_v58 = vmul.f32 %v3306_v7, %v3306_v7  ;;  %3801 = vmatmul.msk.f32.gmra.mxu3 %vm3174_vm5, %v3164_v59  ;;  %v3447_v59 = vsel %vm2901_vm10, %v6382_v57, 0.0 }
 0x33c   : > { %v3428_v6 = vadd.f32 %v3427_v4, %v3426_v24  ;;  %v3536_v24 = vsel %vm2901_vm10, %v3495_v63, 0.0  ;;  %v3502_v4 = vmul.f32 %v6411_v19, %v6411_v19 }
 0x33d   : > { %v3528_v33 = vsel %vm2901_vm10, %v3491_v58, 0.0 }
 0x33e   : > { %v3529_v23 = vadd.f32 %v3528_v33, %v3527_v18 }
 0x347   : > { %v6471_v14 = vpop.f32.mrf.mxu2 }
 0x348   : > { %3403 = vst.msk [vmem:[%s6301_s15 + $0x98] sm:$0xff] %vm2901_vm10, %v6471_v14 }
 0x34e   : > { %v6476_v55 = vpop.f32.mrf.mxu3 }
 0x34f   : > { %3409 = vst.msk [vmem:[%s6301_s15 + $0xc8] sm:$0xff] %vm2901_vm10, %v6476_v55 }
 0x353   : > { %v3327_v37 = vpop.f32.mrf.mxu1 }
 0x354   : > { %3397 = vst.msk [vmem:[%s6301_s15 + $0x68] sm:$0xff] %vm2901_vm10, %v3327_v37  ;;  %v3498_v46 = vmul.f32 %v3327_v37, %v3327_v37  ;;  %v3441_v53 = vsel %vm2901_vm10, %v3327_v37, 0.0  ;;  %v3449_v37 = vsel %vm2901_vm10, %v6411_v19, 0.0  ;;  %v3453_v19 = vsel %vm2901_vm10, %v6471_v14, 0.0 }
 0x356   : > { %v3542_v32 = vsel %vm2901_vm10, %v3498_v46, 0.0  ;;  %v3509_v46 = vmul.f32 %v6452_v29, %v6452_v29 }
 0x35a   : > { %v3309_v47 = vpop.f32.mrf.mxu0 }
 0x35b   : > { %3391 = vst.msk [vmem:[%s6301_s15 + $0x38] sm:$0xff] %vm2901_vm10, %v3309_v47  ;;  %v3429_v8 = vsel %vm2901_vm10, %v3309_v47, 0.0  ;;  %v3492_v28 = vmul.f32 %v3309_v47, %v3309_v47  ;;  %v3503_v47 = vmul.f32 %v6440_v31, %v6440_v31 }
 0x35c   : > { %v3430_v49 = vadd.f32 %v3429_v8, %v3428_v6  ;;  %v3550_v8 = vsel %vm2901_vm10, %v3502_v4, 0.0 }
 0x35d   : > { %v3530_v34 = vsel %vm2901_vm10, %v3492_v28, 0.0  ;;  %v3451_v28 = vsel %vm2901_vm10, %v6440_v31, 0.0 }
 0x35e   : > { %v3432_v9 = vadd.f32 %v3431_v30, %v3430_v49  ;;  %v3531_v16 = vadd.f32 %v3530_v34, %v3529_v23  ;;  %v3548_v23 = vsel %vm2901_vm10, %v3501_v52, 0.0  ;;  %v3504_v49 = vmul.f32 %v6471_v14, %v6471_v14 }
 0x35f   : > { %v3552_v34 = vsel %vm2901_vm10, %v3503_v47, 0.0 }
 0x360   : > { %v3434_v61 = vadd.f32 %v3433_v54, %v3432_v9  ;;  %v3533_v21 = vadd.f32 %v3532_v26, %v3531_v16  ;;  %v3554_v54 = vsel %vm2901_vm10, %v3504_v49, 0.0 }
 0x362   : > { %v3436_v17 = vadd.f32 %v3435_v56, %v3434_v61  ;;  %v3535_v5 = vadd.f32 %v3534_v39, %v3533_v21 }
 0x364   : > { %v3537_v18 = vadd.f32 %v3536_v24, %v3535_v5  ;;  %v3438_v1 = vadd.f32 %v3437_v50, %v3436_v17 }
 0x366   : > { %v3440_v25 = vadd.f32 %v3439_v0, %v3438_v1  ;;  %v3539_v12 = vadd.f32 %v3538_v11, %v3537_v18 }
 0x367   : > { %v3348_v3 = vpop.f32.mrf.mxu2 }
 0x368   : > { %3404 = vst.msk [vmem:[%s6301_s15 + $0xa0] sm:$0xff] %vm2901_vm10, %v3348_v3  ;;  %v3442_v20 = vadd.f32 %v3441_v53, %v3440_v25  ;;  %v3541_v44 = vadd.f32 %v3540_v35, %v3539_v12  ;;  %v3505_v9 = vmul.f32 %v3348_v3, %v3348_v3  ;;  %v3455_v63 = vsel %vm2901_vm10, %v3348_v3, 0.0 }
 0x369   : > { %v3463_v3 = vsel %vm2901_vm10, %v6452_v29, 0.0 }
 0x36a   : > { %v3543_v45 = vadd.f32 %v3542_v32, %v3541_v44  ;;  %v3556_v21 = vsel %vm2901_vm10, %v3505_v9, 0.0 }
 0x36c   : > { %v3330_v41 = vpop.f32.mrf.mxu1 }
 0x36d   : > { %3398 = vst.msk [vmem:[%s6301_s15 + $0x70] sm:$0xff] %vm2901_vm10, %v3330_v41  ;;  %v3499_v2 = vmul.f32 %v3330_v41, %v3330_v41  ;;  %v3443_v22 = vsel %vm2901_vm10, %v3330_v41, 0.0  ;;  %v3564_v41 = vsel %vm2901_vm10, %v3509_v46, 0.0 }
 0x36e   : > { %v6515_v48 = vpop.f32.mrf.mxu3  ;;  %v3444_v13 = vadd.f32 %v3443_v22, %v3442_v20  ;;  %v3510_v20 = vmul.f32 %v6476_v55, %v6476_v55 }
 0x36f   : > { %3410 = vst.msk [vmem:[%s6301_s15 + $0xd0] sm:$0xff] %vm2901_vm10, %v6515_v48  ;;  %v3544_v42 = vsel %vm2901_vm10, %v3499_v2, 0.0  ;;  %v3465_v2 = vsel %vm2901_vm10, %v6476_v55, 0.0 }
 0x370   : > { %v3545_v40 = vadd.f32 %v3544_v42, %v3543_v45  ;;  %v3566_v29 = vsel %vm2901_vm10, %v3510_v20, 0.0 }
 0x37f   : > { %v3351_v60 = vpop.f32.mrf.mxu2 }
 0x380   : > { %3405 = vst.msk [vmem:[%s6301_s15 + $0xa8] sm:$0xff] %vm2901_vm10, %v3351_v60  ;;  %v3506_v14 = vmul.f32 %v3351_v60, %v3351_v60  ;;  %v3457_v5 = vsel %vm2901_vm10, %v3351_v60, 0.0  ;;  %v3511_v60 = vmul.f32 %v6515_v48, %v6515_v48 }
 0x382   : > { %v3558_v36 = vsel %vm2901_vm10, %v3506_v14, 0.0  ;;  %v3568_v55 = vsel %vm2901_vm10, %v3511_v60, 0.0 }
 0x384   : > { %v3333_v27 = vpop.f32.mrf.mxu1 }
 0x385   : > { %3399 = vst.msk [vmem:[%s6301_s15 + $0x78] sm:$0xff] %vm2901_vm10, %v3333_v27  ;;  %v3445_v51 = vsel %vm2901_vm10, %v3333_v27, 0.0  ;;  %v3500_v15 = vmul.f32 %v3333_v27, %v3333_v27 }
 0x386   : > { %v3446_v10 = vadd.f32 %v3445_v51, %v3444_v13  ;;  %v6529_v7 = vpop.f32.mrf.mxu3  ;;  %v3467_v13 = vsel %vm2901_vm10, %v6515_v48, 0.0 }
 0x387   : > { %v3546_v58 = vsel %vm2901_vm10, %v3500_v15, 0.0  ;;  %3411 = vst.msk [vmem:[%s6301_s15 + $0xd8] sm:$0xff] %vm2901_vm10, %v6529_v7  ;;  %v3512_v52 = vmul.f32 %v6529_v7, %v6529_v7 }
 0x388   : > { %v3448_v6 = vadd.f32 %v3447_v59, %v3446_v10  ;;  %v3547_v33 = vadd.f32 %v3546_v58, %v3545_v40  ;;  %v3469_v40 = vsel %vm2901_vm10, %v6529_v7, 0.0 }
 0x389   : > { %v3570_v4 = vsel %vm2901_vm10, %v3512_v52, 0.0 }
 0x38a   : > { %v3450_v62 = vadd.f32 %v3449_v37, %v3448_v6  ;;  %v3549_v57 = vadd.f32 %v3548_v23, %v3547_v33 }
 0x38c   : > { %v3452_v30 = vadd.f32 %v3451_v28, %v3450_v62  ;;  %v3551_v38 = vadd.f32 %v3550_v8, %v3549_v57 }
 0x38e   : > { %v3553_v16 = vadd.f32 %v3552_v34, %v3551_v38  ;;  %v3454_v26 = vadd.f32 %v3453_v19, %v3452_v30 }
 0x390   : > { %v3456_v31 = vadd.f32 %v3455_v63, %v3454_v26  ;;  %v3555_v61 = vadd.f32 %v3554_v54, %v3553_v16 }
 0x392   : > { %v3557_v39 = vadd.f32 %v3556_v21, %v3555_v61  ;;  %v3458_v50 = vadd.f32 %v3457_v5, %v3456_v31 }
 0x394   : > { %v3559_v11 = vadd.f32 %v3558_v36, %v3557_v39 }
 0x397   : > { %v3354_v56 = vpop.f32.mrf.mxu2 }
 0x398   : > { %3406 = vst.msk [vmem:[%s6301_s15 + $0xb0] sm:$0xff] %vm2901_vm10, %v3354_v56  ;;  %v3507_v17 = vmul.f32 %v3354_v56, %v3354_v56  ;;  %v3459_v24 = vsel %vm2901_vm10, %v3354_v56, 0.0 }
 0x399   : > { %v3460_v1 = vadd.f32 %v3459_v24, %v3458_v50 }
 0x39a   : > { %v3560_v18 = vsel %vm2901_vm10, %v3507_v17, 0.0 }
 0x39b   : > { %v3561_v35 = vadd.f32 %v3560_v18, %v3559_v11 }
 0x39e   : > { %v3372_v43 = vpop.f32.mrf.mxu3 }
 0x39f   : > { %3412 = vst.msk [vmem:[%s6301_s15 + $0xe0] sm:$0xff] %vm2901_vm10, %v3372_v43  ;;  %v3513_v58 = vmul.f32 %v3372_v43, %v3372_v43  ;;  %v3471_v6 = vsel %vm2901_vm10, %v3372_v43, 0.0 }
 0x3a1   : > { %v3572_v37 = vsel %vm2901_vm10, %v3513_v58, 0.0 }
 0x3a7   : > { %v3357_v0 = vpop.f32.mrf.mxu2 }
 0x3a8   : > { %3407 = vst.msk [vmem:[%s6301_s15 + $0xb8] sm:$0xff] %vm2901_vm10, %v3357_v0  ;;  %v3461_v25 = vsel %vm2901_vm10, %v3357_v0, 0.0  ;;  %v3508_v12 = vmul.f32 %v3357_v0, %v3357_v0 }
 0x3a9   : > { %v3462_v53 = vadd.f32 %v3461_v25, %v3460_v1 }
 0x3aa   : > { %v3562_v44 = vsel %vm2901_vm10, %v3508_v12, 0.0 }
 0x3ab   : > { %v3464_v32 = vadd.f32 %v3463_v3, %v3462_v53  ;;  %v3563_v45 = vadd.f32 %v3562_v44, %v3561_v35 }
 0x3ad   : > { %v3466_v22 = vadd.f32 %v3465_v2, %v3464_v32  ;;  %v3565_v42 = vadd.f32 %v3564_v41, %v3563_v45 }
 0x3ae   : > { %v3375_v27 = vpop.f32.mrf.mxu3 }
 0x3af   : > { %v3468_v51 = vadd.f32 %v3467_v13, %v3466_v22  ;;  %v3567_v15 = vadd.f32 %v3566_v29, %v3565_v42  ;;  %3413 = vst.msk [vmem:[%s6301_s15 + $0xe8] sm:$0xff] %vm2901_vm10, %v3375_v27  ;;  %v3514_v47 = vmul.f32 %v3375_v27, %v3375_v27  ;;  %v3473_v57 = vsel %vm2901_vm10, %v3375_v27, 0.0 }
 0x3b1   : > { %v3569_v10 = vadd.f32 %v3568_v55, %v3567_v15  ;;  %v3470_v59 = vadd.f32 %v3469_v40, %v3468_v51  ;;  %v3574_v28 = vsel %vm2901_vm10, %v3514_v47, 0.0 }
 0x3b3   : > { %v3571_v48 = vadd.f32 %v3570_v4, %v3569_v10  ;;  %v3472_v33 = vadd.f32 %v3471_v6, %v3470_v59 }
 0x3b5   : > { %v3573_v62 = vadd.f32 %v3572_v37, %v3571_v48  ;;  %v3474_v8 = vadd.f32 %v3473_v57, %v3472_v33 }
 0x3b6   : > { %v3378_v23 = vpop.f32.mrf.mxu3 }
 0x3b7   : > { %3414 = vst.msk [vmem:[%s6301_s15 + $0xf0] sm:$0xff] %vm2901_vm10, %v3378_v23  ;;  %v3515_v7 = vmul.f32 %v3378_v23, %v3378_v23  ;;  %v3475_v49 = vsel %vm2901_vm10, %v3378_v23, 0.0  ;;  %v3575_v30 = vadd.f32 %v3574_v28, %v3573_v62 }
 0x3b8   : > { %v3476_v34 = vadd.f32 %v3475_v49, %v3474_v8 }
 0x3b9   : > { %v3576_v38 = vsel %vm2901_vm10, %v3515_v7, 0.0 }
 0x3ba   : > { %v3577_v26 = vadd.f32 %v3576_v38, %v3575_v30 }
 0x3be   : > { %v3381_v19 = vpop.f32.mrf.mxu3 }
 0x3bf   : > { %3415 = vst.msk [vmem:[%s6301_s15 + $0xf8] sm:$0xff] %vm2901_vm10, %v3381_v19  ;;  %v3477_v9 = vsel %vm2901_vm10, %v3381_v19, 0.0  ;;  %v3516_v16 = vmul.f32 %v3381_v19, %v3381_v19 }
 0x3c0   : > { %v3478_v54 = vadd.f32 %v3477_v9, %v3476_v34 }
 0x3c1   : > { %v3578_v63 = vsel %vm2901_vm10, %v3516_v16, 0.0 }
 0x3c2   : > { %v3479_v31 = vrot.slane %v3478_v54, 4  ;;  %v3579_v61 = vadd.f32 %v3578_v63, %v3577_v26 }
 0x3c4   : > { %v3480_v21 = vadd.f32 %v3479_v31, %v3478_v54  ;;  %v3580_v39 = vrot.slane %v3579_v61, 4 }
 0x3c6   : > { %v3481_v56 = vrot.slane %v3480_v21, 2  ;;  %v3581_v43 = vadd.f32 %v3580_v39, %v3579_v61 }
 0x3c8   : > { %v3482_v14 = vadd.f32 %v3481_v56, %v3480_v21  ;;  %v3582_v17 = vrot.slane %v3581_v43, 2 }
 0x3ca   : > { %v3483_v5 = vrot.slane %v3482_v14, 1  ;;  %v3583_v24 = vadd.f32 %v3582_v17, %v3581_v43 }
 0x3cc   : > { %v3584_v50 = vrot.slane %v3583_v24, 1  ;;  %v3484_v36 = vadd.f32 %v3483_v5, %v3482_v14 }
 0x3ce   : > { %v3585_v18 = vadd.f32 %v3584_v50, %v3583_v24 }
 0x3d0   : > { %v3586_v1 = vsel %vm616_vm0, %v3484_v36, %v3585_v18 }
 0x3d1   : > { %3588 = vst.msk [vmem:[%s448_s20] sm:$0x3] %vm3587_vm1, %v3586_v1 }
 0x3d2 PF: > { %s18_s26 = sadd.s32 1, %s3893_s26   ;;  %s7302_s24 = smov %s3889_s25 }
 0x3d3   : > { %p15_p10 = scmp.ge.s32.totalorder %s18_s26, 4   ;;  %s7303_s25 = smov %s7305_s27 }
 0x3d5   :  { %17 = sbr.rel (!%p15_p10) target bundleno = 2 (0x2), region = 92 }

</bundles_post_ra>
